<compile_context>
chip_gen: v7x
topology: tpu7x:2x2x1
jax: 0.10.0
libtpu: 0.0.40
codegen_flags: <defaults>
</compile_context>

<pallas_src>
import jax
import jax.numpy as jnp
from jax import lax
from jax.experimental import pallas as pl
from jax.experimental.pallas import tpu as pltpu

# ----- small synthetic wav2vec2-style config -----
B = 2                      # batch
T_RAW = 2048               # raw audio samples per example
C1, K1 = 16, 8             # conv1: kernel = stride = 8,  1 -> 16 channels
C2, K2 = 32, 2             # conv2: kernel = stride = 2, 16 -> 32 channels
FRAME = K1 * K2            # 16 raw samples per encoder frame
S = T_RAW // FRAME         # 128 encoder frames per example
BS = B * S                 # 256 batch-stacked frames
D = 32                     # hidden size
H = 2                      # attention heads
DH = D // H                # head dim
F = 64                     # FFN inner dim
V = 32                     # CTC vocab size (same as wav2vec2-base-960h)
VPAD = 128                 # LM head padded to one full lane group (lane-dense)


# --------------------------------------------------------------------------
# Packed-parameter slab layout
# --------------------------------------------------------------------------
def _align16(n):           # bf16 sublane packing: keep row offsets 16-aligned
    return (n + 15) // 16 * 16

# bf16 matmul-weight slab: [W_ROWS, 128]
OFF_WC1   = 0                               # [K1,   C1]
OFF_WC2   = OFF_WC1   + _align16(K1)        # [2*C1, C2]
OFF_WPROJ = OFF_WC2   + _align16(2 * C1)    # [C2,   D]
OFF_WQ    = OFF_WPROJ + _align16(C2)        # [D,    D]
OFF_WK    = OFF_WQ    + _align16(D)
OFF_WV    = OFF_WK    + _align16(D)
OFF_WO    = OFF_WV    + _align16(D)
OFF_W1    = OFF_WO    + _align16(D)         # [D,    F]
OFF_W2    = OFF_W1    + _align16(D)         # [F,    D]
OFF_WLM   = OFF_W2    + _align16(F)         # [D,    VPAD]
W_ROWS    = OFF_WLM   + _align16(D)         # = 336

# f32 bias / LayerNorm slab: one vector per row, [V_ROWS, 128]
ROW_BC1, ROW_BC2 = 0, 1
ROW_LN0G, ROW_LN0B, ROW_BPROJ = 2, 3, 4
ROW_BQ, ROW_BK, ROW_BV, ROW_BO = 5, 6, 7, 8
ROW_LN1G, ROW_LN1B = 9, 10
ROW_B1, ROW_B2 = 11, 12
ROW_LN2G, ROW_LN2B = 13, 14
ROW_BLM = 15
V_ROWS = 16


# --------------------------------------------------------------------------
# In-kernel helpers
# --------------------------------------------------------------------------
def _mm(a, b):
    """MXU matmul: bf16 operands (weights are pre-cast), f32 accumulation."""
    return jnp.dot(a.astype(jnp.bfloat16), b.astype(jnp.bfloat16),
                   preferred_element_type=jnp.float32)


def _mm_nt(a, b):
    """a @ b.T without materializing a transpose (contract last dims)."""
    return lax.dot_general(a.astype(jnp.bfloat16), b.astype(jnp.bfloat16),
                           dimension_numbers=(((1,), (1,)), ((), ())),
                           preferred_element_type=jnp.float32)


def _layernorm(x, g, b, eps=1e-5):
    """Single-pass LN: var = E[x^2] - E[x]^2 (halves the XLU reduction passes)."""
    m1 = jnp.mean(x, axis=-1, keepdims=True)
    m2 = jnp.mean(x * x, axis=-1, keepdims=True)
    return (x - m1) * lax.rsqrt(m2 - m1 * m1 + eps) * g + b


# --------------------------------------------------------------------------
# Single fused kernel: one invocation, whole pipeline VMEM-resident.
# --------------------------------------------------------------------------
def _fused_stt_kernel(x_ref, w_ref, v_ref, logits_ref, ids_ref):
    # static slices of the packed-weight / packed-bias refs are free
    def wslice(off, rows, c0, c1):
        return w_ref[off:off + rows, c0:c1]

    def vec(row, width):
        return v_ref[row:row + 1, 0:width]

    # --- Wav2Vec2Processor: per-utterance zero-mean / unit-variance ---------
    x = x_ref[...]                                          # [BS, FRAME] f32
    xn_parts = []
    for b in range(B):                                      # static unroll
        xb = x[b * S:(b + 1) * S]                           # sublane slice
        m1 = jnp.mean(jnp.mean(xb, axis=-1, keepdims=True), axis=0, keepdims=True)
        m2 = jnp.mean(jnp.mean(xb * xb, axis=-1, keepdims=True), axis=0, keepdims=True)
        isig = lax.rsqrt(m2 - m1 * m1 + 1e-7)
        xn_parts.append((xb - m1) * isig)
    xn = jnp.concatenate(xn_parts, axis=0)                  # [BS, FRAME]

    # --- conv feature extractor (kernel == stride => frame-view matmuls) ----
    # TODO(synk): exact-erf GELU of HF wav2vec2 approximated with tanh GELU.
    wc1 = wslice(OFF_WC1, K1, 0, C1)
    bc1 = vec(ROW_BC1, C1)
    h1a = jax.nn.gelu(_mm(xn[:, 0:K1], wc1) + bc1, approximate=True)      # [BS, C1]
    h1b = jax.nn.gelu(_mm(xn[:, K1:FRAME], wc1) + bc1, approximate=True)
    # patch concat [h1a | h1b] @ wc2 folded into two partial matmuls
    h2 = jax.nn.gelu(_mm(h1a, wslice(OFF_WC2, C1, 0, C2))
                     + _mm(h1b, wslice(OFF_WC2 + C1, C1, 0, C2))
                     + vec(ROW_BC2, C2), approximate=True)                 # [BS, C2]

    # --- feature projection: LayerNorm + Linear ------------------------------
    feats = _layernorm(h2, vec(ROW_LN0G, C2), vec(ROW_LN0B, C2))
    h = _mm(feats, wslice(OFF_WPROJ, C2, 0, D)) + vec(ROW_BPROJ, D)        # [BS, D]

    # --- self-attention: per-example, per-head (weight-sliced projections) --
    scale = 1.0 / (DH ** 0.5)
    ctx_parts = []
    for b in range(B):                                       # static unroll
        hb = h[b * S:(b + 1) * S]                            # [S, D] sublane slice
        acc = jnp.zeros((S, D), jnp.float32)
        for hh in range(H):
            c0, c1 = hh * DH, (hh + 1) * DH
            qh = _mm(hb, wslice(OFF_WQ, D, c0, c1)) + v_ref[ROW_BQ:ROW_BQ + 1, c0:c1]
            kh = _mm(hb, wslice(OFF_WK, D, c0, c1)) + v_ref[ROW_BK:ROW_BK + 1, c0:c1]
            vh = _mm(hb, wslice(OFF_WV, D, c0, c1)) + v_ref[ROW_BV:ROW_BV + 1, c0:c1]
            s = _mm_nt(qh, kh) * scale                       # [S, S]
            m = jnp.max(s, axis=-1, keepdims=True)
            p = jnp.exp(s - m)
            p = p * pl.reciprocal(jnp.sum(p, axis=-1, keepdims=True), approx=True)
            # head output fused directly with its slice of the out-projection
            acc = acc + _mm(_mm(p, vh), wslice(OFF_WO + c0, DH, 0, D))     # [S, D]
        ctx_parts.append(acc)
    attn = jnp.concatenate(ctx_parts, axis=0) + vec(ROW_BO, D)             # [BS, D]
    h = _layernorm(h + attn, vec(ROW_LN1G, D), vec(ROW_LN1B, D))

    # --- FFN -----------------------------------------------------------------
    ffn_h = jax.nn.gelu(_mm(h, wslice(OFF_W1, D, 0, F)) + vec(ROW_B1, F),
                        approximate=True)                                   # [BS, F]
    ffn = _mm(ffn_h, wslice(OFF_W2, F, 0, D)) + vec(ROW_B2, D)
    h = _layernorm(h + ffn, vec(ROW_LN2G, D), vec(ROW_LN2B, D))

    # --- CTC LM head (V padded to 128 lanes -> lane-dense logits store) -----
    logits = _mm(h, wslice(OFF_WLM, D, 0, VPAD)) + vec(ROW_BLM, VPAD)      # [BS, 128]
    logits_ref[...] = logits

    # --- greedy argmax, first-occurrence (== torch.argmax semantics) --------
    # one-hot of the first max per row, then ids via a [1,128]x[128,128] MXU
    # contraction per example -> the (B, S) id output is stored lane-dense.
    rmax = jnp.max(logits, axis=-1, keepdims=True)
    iota = lax.broadcasted_iota(jnp.int32, logits.shape, 1)
    masked = jnp.where(logits == rmax, iota, jnp.int32(2 * VPAD))
    onehot = (masked == jnp.min(masked, axis=-1, keepdims=True)).astype(jnp.float32)
    iota_row = lax.broadcasted_iota(jnp.int32, (1, VPAD), 1).astype(jnp.float32)
    id_rows = [_mm_nt(iota_row, onehot[b * S:(b + 1) * S]) for b in range(B)]
    ids_ref[...] = jnp.concatenate(id_rows, axis=0).astype(jnp.int32)      # [B, S]


# --------------------------------------------------------------------------
# Parameters (deterministic synthetic init -- no checkpoint loading)
# --------------------------------------------------------------------------
def init_params(key):
    # TODO(synk): pretrained facebook/wav2vec2-base-960h weights cannot be
    # loaded in-script; synthetic deterministic init with the same structure.
    ks = jax.random.split(key, 10)
    sd = 0.02
    n = lambda k, shape: jax.random.normal(k, shape, jnp.float32) * sd
    z = lambda shape: jnp.zeros(shape, jnp.float32)
    o = lambda shape: jnp.ones(shape, jnp.float32)
    return {
        "wc1": n(ks[0], (K1, C1)), "bc1": z((C1,)),
        "wc2": n(ks[1], (2 * C1, C2)), "bc2": z((C2,)),
        "ln0_g": o((C2,)), "ln0_b": z((C2,)),
        "wproj": n(ks[2], (C2, D)), "bproj": z((D,)),
        "wq": n(ks[3], (D, D)), "bq": z((D,)),
        "wk": n(ks[4], (D, D)), "bk": z((D,)),
        "wv": n(ks[5], (D, D)), "bv": z((D,)),
        "wo": n(ks[6], (D, D)), "bo": z((D,)),
        "ln1_g": o((D,)), "ln1_b": z((D,)),
        "w1": n(ks[7], (D, F)), "b1": z((F,)),
        "w2": n(ks[8], (F, D)), "b2": z((D,)),
        "ln2_g": o((D,)), "ln2_b": z((D,)),
        "wlm": n(ks[9], (D, V)), "blm": z((V,)),
    }


def pack_params(p):
    """Pack 22 tensors into two lane-dense slabs (one DMA each):
       bf16 [W_ROWS,128] matmul weights (pre-cast once) + f32 [V_ROWS,128] bias/LN."""
    w = jnp.zeros((W_ROWS, 128), jnp.float32)

    def put(slab, off, mat):
        r, c = mat.shape
        return slab.at[off:off + r, 0:c].set(mat)

    w = put(w, OFF_WC1, p["wc1"])
    w = put(w, OFF_WC2, p["wc2"])
    w = put(w, OFF_WPROJ, p["wproj"])
    w = put(w, OFF_WQ, p["wq"])
    w = put(w, OFF_WK, p["wk"])
    w = put(w, OFF_WV, p["wv"])
    w = put(w, OFF_WO, p["wo"])
    w = put(w, OFF_W1, p["w1"])
    w = put(w, OFF_W2, p["w2"])
    w = put(w, OFF_WLM, p["wlm"])          # vocab cols V..127 stay zero
    wslab = w.astype(jnp.bfloat16)         # pre-cast once on the host

    v = jnp.zeros((V_ROWS, 128), jnp.float32)

    def putv(slab, row, x):
        return slab.at[row, 0:x.shape[0]].set(x)

    v = putv(v, ROW_BC1, p["bc1"]); v = putv(v, ROW_BC2, p["bc2"])
    v = putv(v, ROW_LN0G, p["ln0_g"]); v = putv(v, ROW_LN0B, p["ln0_b"])
    v = putv(v, ROW_BPROJ, p["bproj"])
    v = putv(v, ROW_BQ, p["bq"]); v = putv(v, ROW_BK, p["bk"]); v = putv(v, ROW_BV, p["bv"])
    v = putv(v, ROW_BO, p["bo"])
    v = putv(v, ROW_LN1G, p["ln1_g"]); v = putv(v, ROW_LN1B, p["ln1_b"])
    v = putv(v, ROW_B1, p["b1"]); v = putv(v, ROW_B2, p["b2"])
    v = putv(v, ROW_LN2G, p["ln2_g"]); v = putv(v, ROW_LN2B, p["ln2_b"])
    v = putv(v, ROW_BLM, p["blm"])
    v = v.at[ROW_BLM, V:].set(-1e30)       # padded vocab lanes can never win argmax
    return wslab, v


# --------------------------------------------------------------------------
# Forward pass: exactly one pallas_call, no grid (single dense invocation).
# --------------------------------------------------------------------------
@jax.jit
def forward(wslab, vslab, audio):
    # TODO(synk): Wav2Vec2Processor resampling / attention-mask padding has no
    # kernel equivalent here (inputs are fixed-length and already at 16 kHz).
    frames = audio.reshape(BS, FRAME)      # contiguous HBM view (batch-stacked)
    logits_pad, ids = pl.pallas_call(
        _fused_stt_kernel,
        out_shape=(jax.ShapeDtypeStruct((BS, VPAD), jnp.float32),   # lane-dense
                   jax.ShapeDtypeStruct((B, S), jnp.int32)),        # lane-dense
        in_specs=[pl.BlockSpec(memory_space=pltpu.MemorySpace.VMEM)] * 3,
        out_specs=(pl.BlockSpec(memory_space=pltpu.MemorySpace.VMEM),
                   pl.BlockSpec(memory_space=pltpu.MemorySpace.VMEM)),
    )(frames, wslab, vslab)
    logits = logits_pad.reshape(B, S, VPAD)[:, :, :V]
    return logits, ids


# --------------------------------------------------------------------------
# Greedy CTC decode (Python glue, mirrors processor.batch_decode)
# --------------------------------------------------------------------------
VOCAB = (["<pad>", "<s>", "</s>", "<unk>", "|"]
         + list("ABCDEFGHIJKLMNOPQRSTUVWXYZ") + ["'"])
assert len(VOCAB) == V


def ctc_greedy_decode(id_row):
    out, prev = [], -1
    for i in id_row:
        i = int(i)
        if i != prev and i >= 4:
            out.append(" " if VOCAB[i] == "|" else VOCAB[i])
        prev = i
    return "".join(out).strip()


class SpeechToTextModulePallas:
    """Mirrors SpeechToTextModule.forward: returns features (None) + transcriptions."""

    def __init__(self, key):
        self.params = init_params(key)
        self.wslab, self.vslab = pack_params(self.params)   # packed once, host-side

    def forward(self, audio, gaps=None):
        logits, ids = forward(self.wslab, self.vslab, audio)
        jax.block_until_ready(ids)
        transcriptions = [ctc_greedy_decode(row) for row in jax.device_get(ids)]
        return {
            "features": None,           # matches torch path (features list stays empty)
            "transcription": transcriptions,
            "predicted_ids": ids,
            "logits": logits,
        }

    def process_audio(self, audio, gaps=None):
        return self.forward(audio, gaps)


if __name__ == "__main__":
    key = jax.random.PRNGKey(0)
    k_param, k_audio = jax.random.split(key)
    audio = jax.random.normal(k_audio, (B, T_RAW), jnp.float32)  # synthetic 16 kHz audio

    module = SpeechToTextModulePallas(k_param)
    out = module.forward(audio)
    jax.block_until_ready(out["logits"])
    jax.block_until_ready(out["predicted_ids"])
    assert out["logits"].shape == (B, S, V)
    assert out["predicted_ids"].shape == (B, S)
    assert len(out["transcription"]) == B
    print("KERNEL_OK")
</pallas_src>

<mosaic_0001>
module attributes {stable_mosaic.version = 11 : i64} {
  func.func @_fused_stt_kernel(%arg0: memref<256x16xf32, #tpu.memory_space<vmem>>, %arg1: memref<336x128xbf16, #tpu.memory_space<vmem>>, %arg2: memref<16x128xf32, #tpu.memory_space<vmem>>, %arg3: memref<256x128xf32, #tpu.memory_space<vmem>>, %arg4: memref<2x128xi32, #tpu.memory_space<vmem>>) attributes {dimension_semantics = [], scalar_prefetch = 0 : i64, scratch_operands = 0 : i64, tpu.core_type = #tpu.core_type<tc>} {
    %c0 = arith.constant 0 : index
    %c0_0 = arith.constant 0 : index
    %0 = vector.load %arg0[%c0, %c0_0] : memref<256x16xf32, #tpu.memory_space<vmem>>, vector<256x16xf32>
    %1 = vector.extract_strided_slice %0 {offsets = [0, 0], sizes = [128, 16], strides = [1, 1]} : vector<256x16xf32> to vector<128x16xf32>
    %cst = arith.constant dense<0.000000e+00> : vector<128xf32>
    %2 = vector.multi_reduction <add>, %1, %cst [1] : vector<128x16xf32> to vector<128xf32>
    %3 = vector.shape_cast %2 : vector<128xf32> to vector<128x1xf32>
    %cst_1 = arith.constant 1.600000e+01 : f32
    %4 = vector.broadcast %cst_1 : f32 to vector<128x1xf32>
    %5 = arith.divf %3, %4 : vector<128x1xf32>
    %cst_2 = arith.constant dense<0.000000e+00> : vector<1xf32>
    %6 = vector.multi_reduction <add>, %5, %cst_2 [0] : vector<128x1xf32> to vector<1xf32>
    %7 = vector.shape_cast %6 : vector<1xf32> to vector<1x1xf32>
    %cst_3 = arith.constant 1.280000e+02 : f32
    %8 = vector.broadcast %cst_3 : f32 to vector<1x1xf32>
    %9 = arith.divf %7, %8 : vector<1x1xf32>
    %10 = arith.mulf %1, %1 : vector<128x16xf32>
    %cst_4 = arith.constant dense<0.000000e+00> : vector<128xf32>
    %11 = vector.multi_reduction <add>, %10, %cst_4 [1] : vector<128x16xf32> to vector<128xf32>
    %12 = vector.shape_cast %11 : vector<128xf32> to vector<128x1xf32>
    %cst_5 = arith.constant 1.600000e+01 : f32
    %13 = vector.broadcast %cst_5 : f32 to vector<128x1xf32>
    %14 = arith.divf %12, %13 : vector<128x1xf32>
    %cst_6 = arith.constant dense<0.000000e+00> : vector<1xf32>
    %15 = vector.multi_reduction <add>, %14, %cst_6 [0] : vector<128x1xf32> to vector<1xf32>
    %16 = vector.shape_cast %15 : vector<1xf32> to vector<1x1xf32>
    %cst_7 = arith.constant 1.280000e+02 : f32
    %17 = vector.broadcast %cst_7 : f32 to vector<1x1xf32>
    %18 = arith.divf %16, %17 : vector<1x1xf32>
    %19 = arith.mulf %9, %9 : vector<1x1xf32>
    %20 = arith.subf %18, %19 : vector<1x1xf32>
    %cst_8 = arith.constant 1.000000e-07 : f32
    %21 = vector.broadcast %cst_8 : f32 to vector<1x1xf32>
    %22 = arith.addf %20, %21 : vector<1x1xf32>
    %23 = math.rsqrt %22 : vector<1x1xf32>
    %24 = vector.broadcast %9 : vector<1x1xf32> to vector<128x16xf32>
    %25 = arith.subf %1, %24 : vector<128x16xf32>
    %26 = vector.broadcast %23 : vector<1x1xf32> to vector<128x16xf32>
    %27 = arith.mulf %25, %26 : vector<128x16xf32>
    %28 = vector.extract_strided_slice %0 {offsets = [128, 0], sizes = [128, 16], strides = [1, 1]} : vector<256x16xf32> to vector<128x16xf32>
    %cst_9 = arith.constant dense<0.000000e+00> : vector<128xf32>
    %29 = vector.multi_reduction <add>, %28, %cst_9 [1] : vector<128x16xf32> to vector<128xf32>
    %30 = vector.shape_cast %29 : vector<128xf32> to vector<128x1xf32>
    %cst_10 = arith.constant 1.600000e+01 : f32
    %31 = vector.broadcast %cst_10 : f32 to vector<128x1xf32>
    %32 = arith.divf %30, %31 : vector<128x1xf32>
    %cst_11 = arith.constant dense<0.000000e+00> : vector<1xf32>
    %33 = vector.multi_reduction <add>, %32, %cst_11 [0] : vector<128x1xf32> to vector<1xf32>
    %34 = vector.shape_cast %33 : vector<1xf32> to vector<1x1xf32>
    %cst_12 = arith.constant 1.280000e+02 : f32
    %35 = vector.broadcast %cst_12 : f32 to vector<1x1xf32>
    %36 = arith.divf %34, %35 : vector<1x1xf32>
    %37 = arith.mulf %28, %28 : vector<128x16xf32>
    %cst_13 = arith.constant dense<0.000000e+00> : vector<128xf32>
    %38 = vector.multi_reduction <add>, %37, %cst_13 [1] : vector<128x16xf32> to vector<128xf32>
    %39 = vector.shape_cast %38 : vector<128xf32> to vector<128x1xf32>
    %cst_14 = arith.constant 1.600000e+01 : f32
    %40 = vector.broadcast %cst_14 : f32 to vector<128x1xf32>
    %41 = arith.divf %39, %40 : vector<128x1xf32>
    %cst_15 = arith.constant dense<0.000000e+00> : vector<1xf32>
    %42 = vector.multi_reduction <add>, %41, %cst_15 [0] : vector<128x1xf32> to vector<1xf32>
    %43 = vector.shape_cast %42 : vector<1xf32> to vector<1x1xf32>
    %cst_16 = arith.constant 1.280000e+02 : f32
    %44 = vector.broadcast %cst_16 : f32 to vector<1x1xf32>
    %45 = arith.divf %43, %44 : vector<1x1xf32>
    %46 = arith.mulf %36, %36 : vector<1x1xf32>
    %47 = arith.subf %45, %46 : vector<1x1xf32>
    %cst_17 = arith.constant 1.000000e-07 : f32
    %48 = vector.broadcast %cst_17 : f32 to vector<1x1xf32>
    %49 = arith.addf %47, %48 : vector<1x1xf32>
    %50 = math.rsqrt %49 : vector<1x1xf32>
    %51 = vector.broadcast %36 : vector<1x1xf32> to vector<128x16xf32>
    %52 = arith.subf %28, %51 : vector<128x16xf32>
    %53 = vector.broadcast %50 : vector<1x1xf32> to vector<128x16xf32>
    %54 = arith.mulf %52, %53 : vector<128x16xf32>
    %55 = tpu.concatenate %27, %54 in 0 : vector<128x16xf32>, vector<128x16xf32> -> vector<256x16xf32>
    %c0_18 = arith.constant 0 : index
    %c0_19 = arith.constant 0 : index
    %56 = vector.load %arg1[%c0_18, %c0_19] : memref<336x128xbf16, #tpu.memory_space<vmem>>, vector<8x16xbf16>
    %c0_20 = arith.constant 0 : index
    %c0_21 = arith.constant 0 : index
    %57 = vector.load %arg2[%c0_20, %c0_21] : memref<16x128xf32, #tpu.memory_space<vmem>>, vector<1x16xf32>
    %58 = vector.extract_strided_slice %55 {offsets = [0, 0], sizes = [256, 8], strides = [1, 1]} : vector<256x16xf32> to vector<256x8xf32>
    %59 = arith.truncf %58 : vector<256x8xf32> to vector<256x8xbf16>
    %cst_22 = arith.constant dense<0.000000e+00> : vector<256x16xf32>
    %60 = tpu.matmul %59, %56, %cst_22 {dimension_numbers = #tpu.dot_dimension_numbers<[1], [0], [0], [1], [0, 0, 1, 1], [], []>} : vector<256x8xbf16>, vector<8x16xbf16>, vector<256x16xf32> -> vector<256x16xf32>
    %61 = vector.broadcast %57 : vector<1x16xf32> to vector<256x16xf32>
    %62 = arith.addf %60, %61 : vector<256x16xf32>
    %63 = arith.mulf %62, %62 : vector<256x16xf32>
    %64 = arith.mulf %62, %63 : vector<256x16xf32>
    %cst_23 = arith.constant 4.471500e-02 : f32
    %65 = vector.broadcast %cst_23 : f32 to vector<256x16xf32>
    %66 = arith.mulf %65, %64 : vector<256x16xf32>
    %67 = arith.addf %62, %66 : vector<256x16xf32>
    %cst_24 = arith.constant 0.797884583 : f32
    %68 = vector.broadcast %cst_24 : f32 to vector<256x16xf32>
    %69 = arith.mulf %68, %67 : vector<256x16xf32>
    %70 = math.tanh %69 : vector<256x16xf32>
    %cst_25 = arith.constant 1.000000e+00 : f32
    %71 = vector.broadcast %cst_25 : f32 to vector<256x16xf32>
    %72 = arith.addf %71, %70 : vector<256x16xf32>
    %cst_26 = arith.constant 5.000000e-01 : f32
    %73 = vector.broadcast %cst_26 : f32 to vector<256x16xf32>
    %74 = arith.mulf %73, %72 : vector<256x16xf32>
    %75 = arith.mulf %62, %74 : vector<256x16xf32>
    %76 = vector.extract_strided_slice %55 {offsets = [0, 8], sizes = [256, 8], strides = [1, 1]} : vector<256x16xf32> to vector<256x8xf32>
    %77 = arith.truncf %76 : vector<256x8xf32> to vector<256x8xbf16>
    %cst_27 = arith.constant dense<0.000000e+00> : vector<256x16xf32>
    %78 = tpu.matmul %77, %56, %cst_27 {dimension_numbers = #tpu.dot_dimension_numbers<[1], [0], [0], [1], [0, 0, 1, 1], [], []>} : vector<256x8xbf16>, vector<8x16xbf16>, vector<256x16xf32> -> vector<256x16xf32>
    %79 = vector.broadcast %57 : vector<1x16xf32> to vector<256x16xf32>
    %80 = arith.addf %78, %79 : vector<256x16xf32>
    %81 = arith.mulf %80, %80 : vector<256x16xf32>
    %82 = arith.mulf %80, %81 : vector<256x16xf32>
    %cst_28 = arith.constant 4.471500e-02 : f32
    %83 = vector.broadcast %cst_28 : f32 to vector<256x16xf32>
    %84 = arith.mulf %83, %82 : vector<256x16xf32>
    %85 = arith.addf %80, %84 : vector<256x16xf32>
    %cst_29 = arith.constant 0.797884583 : f32
    %86 = vector.broadcast %cst_29 : f32 to vector<256x16xf32>
    %87 = arith.mulf %86, %85 : vector<256x16xf32>
    %88 = math.tanh %87 : vector<256x16xf32>
    %cst_30 = arith.constant 1.000000e+00 : f32
    %89 = vector.broadcast %cst_30 : f32 to vector<256x16xf32>
    %90 = arith.addf %89, %88 : vector<256x16xf32>
    %cst_31 = arith.constant 5.000000e-01 : f32
    %91 = vector.broadcast %cst_31 : f32 to vector<256x16xf32>
    %92 = arith.mulf %91, %90 : vector<256x16xf32>
    %93 = arith.mulf %80, %92 : vector<256x16xf32>
    %c16 = arith.constant 16 : index
    %c0_32 = arith.constant 0 : index
    %94 = vector.load %arg1[%c16, %c0_32] : memref<336x128xbf16, #tpu.memory_space<vmem>>, vector<16x32xbf16>
    %95 = arith.truncf %75 : vector<256x16xf32> to vector<256x16xbf16>
    %cst_33 = arith.constant dense<0.000000e+00> : vector<256x32xf32>
    %96 = tpu.matmul %95, %94, %cst_33 {dimension_numbers = #tpu.dot_dimension_numbers<[1], [0], [0], [1], [0, 0, 1, 1], [], []>} : vector<256x16xbf16>, vector<16x32xbf16>, vector<256x32xf32> -> vector<256x32xf32>
    %c32 = arith.constant 32 : index
    %c0_34 = arith.constant 0 : index
    %97 = vector.load %arg1[%c32, %c0_34] : memref<336x128xbf16, #tpu.memory_space<vmem>>, vector<16x32xbf16>
    %98 = arith.truncf %93 : vector<256x16xf32> to vector<256x16xbf16>
    %cst_35 = arith.constant dense<0.000000e+00> : vector<256x32xf32>
    %99 = tpu.matmul %98, %97, %cst_35 {dimension_numbers = #tpu.dot_dimension_numbers<[1], [0], [0], [1], [0, 0, 1, 1], [], []>} : vector<256x16xbf16>, vector<16x32xbf16>, vector<256x32xf32> -> vector<256x32xf32>
    %100 = arith.addf %96, %99 : vector<256x32xf32>
    %c1 = arith.constant 1 : index
    %c0_36 = arith.constant 0 : index
    %101 = vector.load %arg2[%c1, %c0_36] : memref<16x128xf32, #tpu.memory_space<vmem>>, vector<1x32xf32>
    %102 = vector.broadcast %101 : vector<1x32xf32> to vector<256x32xf32>
    %103 = arith.addf %100, %102 : vector<256x32xf32>
    %104 = arith.mulf %103, %103 : vector<256x32xf32>
    %105 = arith.mulf %103, %104 : vector<256x32xf32>
    %cst_37 = arith.constant 4.471500e-02 : f32
    %106 = vector.broadcast %cst_37 : f32 to vector<256x32xf32>
    %107 = arith.mulf %106, %105 : vector<256x32xf32>
    %108 = arith.addf %103, %107 : vector<256x32xf32>
    %cst_38 = arith.constant 0.797884583 : f32
    %109 = vector.broadcast %cst_38 : f32 to vector<256x32xf32>
    %110 = arith.mulf %109, %108 : vector<256x32xf32>
    %111 = math.tanh %110 : vector<256x32xf32>
    %cst_39 = arith.constant 1.000000e+00 : f32
    %112 = vector.broadcast %cst_39 : f32 to vector<256x32xf32>
    %113 = arith.addf %112, %111 : vector<256x32xf32>
    %cst_40 = arith.constant 5.000000e-01 : f32
    %114 = vector.broadcast %cst_40 : f32 to vector<256x32xf32>
    %115 = arith.mulf %114, %113 : vector<256x32xf32>
    %116 = arith.mulf %103, %115 : vector<256x32xf32>
    %c2 = arith.constant 2 : index
    %c0_41 = arith.constant 0 : index
    %117 = vector.load %arg2[%c2, %c0_41] : memref<16x128xf32, #tpu.memory_space<vmem>>, vector<1x32xf32>
    %c3 = arith.constant 3 : index
    %c0_42 = arith.constant 0 : index
    %118 = vector.load %arg2[%c3, %c0_42] : memref<16x128xf32, #tpu.memory_space<vmem>>, vector<1x32xf32>
    %cst_43 = arith.constant dense<0.000000e+00> : vector<256xf32>
    %119 = vector.multi_reduction <add>, %116, %cst_43 [1] : vector<256x32xf32> to vector<256xf32>
    %120 = vector.shape_cast %119 : vector<256xf32> to vector<256x1xf32>
    %cst_44 = arith.constant 3.200000e+01 : f32
    %121 = vector.broadcast %cst_44 : f32 to vector<256x1xf32>
    %122 = arith.divf %120, %121 : vector<256x1xf32>
    %123 = arith.mulf %116, %116 : vector<256x32xf32>
    %cst_45 = arith.constant dense<0.000000e+00> : vector<256xf32>
    %124 = vector.multi_reduction <add>, %123, %cst_45 [1] : vector<256x32xf32> to vector<256xf32>
    %125 = vector.shape_cast %124 : vector<256xf32> to vector<256x1xf32>
    %cst_46 = arith.constant 3.200000e+01 : f32
    %126 = vector.broadcast %cst_46 : f32 to vector<256x1xf32>
    %127 = arith.divf %125, %126 : vector<256x1xf32>
    %128 = vector.broadcast %122 : vector<256x1xf32> to vector<256x32xf32>
    %129 = arith.subf %116, %128 : vector<256x32xf32>
    %130 = arith.mulf %122, %122 : vector<256x1xf32>
    %131 = arith.subf %127, %130 : vector<256x1xf32>
    %cst_47 = arith.constant 9.99999974E-6 : f32
    %132 = vector.broadcast %cst_47 : f32 to vector<256x1xf32>
    %133 = arith.addf %131, %132 : vector<256x1xf32>
    %134 = math.rsqrt %133 : vector<256x1xf32>
    %135 = vector.broadcast %134 : vector<256x1xf32> to vector<256x32xf32>
    %136 = arith.mulf %129, %135 : vector<256x32xf32>
    %137 = vector.broadcast %117 : vector<1x32xf32> to vector<256x32xf32>
    %138 = arith.mulf %136, %137 : vector<256x32xf32>
    %139 = vector.broadcast %118 : vector<1x32xf32> to vector<256x32xf32>
    %140 = arith.addf %138, %139 : vector<256x32xf32>
    %c48 = arith.constant 48 : index
    %c0_48 = arith.constant 0 : index
    %141 = vector.load %arg1[%c48, %c0_48] : memref<336x128xbf16, #tpu.memory_space<vmem>>, vector<32x32xbf16>
    %142 = arith.truncf %140 : vector<256x32xf32> to vector<256x32xbf16>
    %cst_49 = arith.constant dense<0.000000e+00> : vector<256x32xf32>
    %143 = tpu.matmul %142, %141, %cst_49 {dimension_numbers = #tpu.dot_dimension_numbers<[1], [0], [0], [1], [0, 0, 1, 1], [], []>} : vector<256x32xbf16>, vector<32x32xbf16>, vector<256x32xf32> -> vector<256x32xf32>
    %c4 = arith.constant 4 : index
    %c0_50 = arith.constant 0 : index
    %144 = vector.load %arg2[%c4, %c0_50] : memref<16x128xf32, #tpu.memory_space<vmem>>, vector<1x32xf32>
    %145 = vector.broadcast %144 : vector<1x32xf32> to vector<256x32xf32>
    %146 = arith.addf %143, %145 : vector<256x32xf32>
    %147 = vector.extract_strided_slice %146 {offsets = [0, 0], sizes = [128, 32], strides = [1, 1]} : vector<256x32xf32> to vector<128x32xf32>
    %cst_51 = arith.constant 0.000000e+00 : f32
    %148 = vector.broadcast %cst_51 : f32 to vector<128x32xf32>
    %c80 = arith.constant 80 : index
    %c0_52 = arith.constant 0 : index
    %149 = vector.load %arg1[%c80, %c0_52] : memref<336x128xbf16, #tpu.memory_space<vmem>>, vector<32x16xbf16>
    %150 = arith.truncf %147 : vector<128x32xf32> to vector<128x32xbf16>
    %cst_53 = arith.constant dense<0.000000e+00> : vector<128x16xf32>
    %151 = tpu.matmul %150, %149, %cst_53 {dimension_numbers = #tpu.dot_dimension_numbers<[1], [0], [0], [1], [0, 0, 1, 1], [], []>} : vector<128x32xbf16>, vector<32x16xbf16>, vector<128x16xf32> -> vector<128x16xf32>
    %c5 = arith.constant 5 : index
    %c0_54 = arith.constant 0 : index
    %152 = vector.load %arg2[%c5, %c0_54] : memref<16x128xf32, #tpu.memory_space<vmem>>, vector<1x16xf32>
    %153 = vector.broadcast %152 : vector<1x16xf32> to vector<128x16xf32>
    %154 = arith.addf %151, %153 : vector<128x16xf32>
    %c112 = arith.constant 112 : index
    %c0_55 = arith.constant 0 : index
    %155 = vector.load %arg1[%c112, %c0_55] : memref<336x128xbf16, #tpu.memory_space<vmem>>, vector<32x16xbf16>
    %156 = arith.truncf %147 : vector<128x32xf32> to vector<128x32xbf16>
    %cst_56 = arith.constant dense<0.000000e+00> : vector<128x16xf32>
    %157 = tpu.matmul %156, %155, %cst_56 {dimension_numbers = #tpu.dot_dimension_numbers<[1], [0], [0], [1], [0, 0, 1, 1], [], []>} : vector<128x32xbf16>, vector<32x16xbf16>, vector<128x16xf32> -> vector<128x16xf32>
    %c6 = arith.constant 6 : index
    %c0_57 = arith.constant 0 : index
    %158 = vector.load %arg2[%c6, %c0_57] : memref<16x128xf32, #tpu.memory_space<vmem>>, vector<1x16xf32>
    %159 = vector.broadcast %158 : vector<1x16xf32> to vector<128x16xf32>
    %160 = arith.addf %157, %159 : vector<128x16xf32>
    %c144 = arith.constant 144 : index
    %c0_58 = arith.constant 0 : index
    %161 = vector.load %arg1[%c144, %c0_58] : memref<336x128xbf16, #tpu.memory_space<vmem>>, vector<32x16xbf16>
    %162 = arith.truncf %147 : vector<128x32xf32> to vector<128x32xbf16>
    %cst_59 = arith.constant dense<0.000000e+00> : vector<128x16xf32>
    %163 = tpu.matmul %162, %161, %cst_59 {dimension_numbers = #tpu.dot_dimension_numbers<[1], [0], [0], [1], [0, 0, 1, 1], [], []>} : vector<128x32xbf16>, vector<32x16xbf16>, vector<128x16xf32> -> vector<128x16xf32>
    %c7 = arith.constant 7 : index
    %c0_60 = arith.constant 0 : index
    %164 = vector.load %arg2[%c7, %c0_60] : memref<16x128xf32, #tpu.memory_space<vmem>>, vector<1x16xf32>
    %165 = vector.broadcast %164 : vector<1x16xf32> to vector<128x16xf32>
    %166 = arith.addf %163, %165 : vector<128x16xf32>
    %167 = arith.truncf %154 : vector<128x16xf32> to vector<128x16xbf16>
    %168 = arith.truncf %160 : vector<128x16xf32> to vector<128x16xbf16>
    %cst_61 = arith.constant dense<0.000000e+00> : vector<128x128xf32>
    %169 = tpu.matmul %167, %168, %cst_61 {dimension_numbers = #tpu.dot_dimension_numbers<[1], [1], [0], [0], [0, 0, 1, 0], [], []>} : vector<128x16xbf16>, vector<128x16xbf16>, vector<128x128xf32> -> vector<128x128xf32>
    %cst_62 = arith.constant 2.500000e-01 : f32
    %170 = vector.broadcast %cst_62 : f32 to vector<128x128xf32>
    %171 = arith.mulf %169, %170 : vector<128x128xf32>
    %cst_63 = arith.constant dense<0xFF800000> : vector<128xf32>
    %172 = vector.multi_reduction <maximumf>, %171, %cst_63 [1] : vector<128x128xf32> to vector<128xf32>
    %173 = vector.shape_cast %172 : vector<128xf32> to vector<128x1xf32>
    %174 = vector.broadcast %173 : vector<128x1xf32> to vector<128x128xf32>
    %175 = arith.subf %171, %174 : vector<128x128xf32>
    %176 = math.exp %175 : vector<128x128xf32>
    %cst_64 = arith.constant dense<0.000000e+00> : vector<128xf32>
    %177 = vector.multi_reduction <add>, %176, %cst_64 [1] : vector<128x128xf32> to vector<128xf32>
    %178 = vector.shape_cast %177 : vector<128xf32> to vector<128x1xf32>
    %179 = tpu.reciprocal %178 {approx = true} : vector<128x1xf32> -> vector<128x1xf32>
    %180 = vector.broadcast %179 : vector<128x1xf32> to vector<128x128xf32>
    %181 = arith.mulf %176, %180 : vector<128x128xf32>
    %182 = arith.truncf %181 : vector<128x128xf32> to vector<128x128xbf16>
    %183 = arith.truncf %166 : vector<128x16xf32> to vector<128x16xbf16>
    %cst_65 = arith.constant dense<0.000000e+00> : vector<128x16xf32>
    %184 = tpu.matmul %182, %183, %cst_65 {dimension_numbers = #tpu.dot_dimension_numbers<[1], [0], [0], [1], [0, 0, 1, 1], [], []>} : vector<128x128xbf16>, vector<128x16xbf16>, vector<128x16xf32> -> vector<128x16xf32>
    %c176 = arith.constant 176 : index
    %c0_66 = arith.constant 0 : index
    %185 = vector.load %arg1[%c176, %c0_66] : memref<336x128xbf16, #tpu.memory_space<vmem>>, vector<16x32xbf16>
    %186 = arith.truncf %184 : vector<128x16xf32> to vector<128x16xbf16>
    %cst_67 = arith.constant dense<0.000000e+00> : vector<128x32xf32>
    %187 = tpu.matmul %186, %185, %cst_67 {dimension_numbers = #tpu.dot_dimension_numbers<[1], [0], [0], [1], [0, 0, 1, 1], [], []>} : vector<128x16xbf16>, vector<16x32xbf16>, vector<128x32xf32> -> vector<128x32xf32>
    %188 = arith.addf %148, %187 : vector<128x32xf32>
    %c80_68 = arith.constant 80 : index
    %c16_69 = arith.constant 16 : index
    %189 = vector.load %arg1[%c80_68, %c16_69] : memref<336x128xbf16, #tpu.memory_space<vmem>>, vector<32x16xbf16>
    %190 = arith.truncf %147 : vector<128x32xf32> to vector<128x32xbf16>
    %cst_70 = arith.constant dense<0.000000e+00> : vector<128x16xf32>
    %191 = tpu.matmul %190, %189, %cst_70 {dimension_numbers = #tpu.dot_dimension_numbers<[1], [0], [0], [1], [0, 0, 1, 1], [], []>} : vector<128x32xbf16>, vector<32x16xbf16>, vector<128x16xf32> -> vector<128x16xf32>
    %c5_71 = arith.constant 5 : index
    %c16_72 = arith.constant 16 : index
    %192 = vector.load %arg2[%c5_71, %c16_72] : memref<16x128xf32, #tpu.memory_space<vmem>>, vector<1x16xf32>
    %193 = vector.broadcast %192 : vector<1x16xf32> to vector<128x16xf32>
    %194 = arith.addf %191, %193 : vector<128x16xf32>
    %c112_73 = arith.constant 112 : index
    %c16_74 = arith.constant 16 : index
    %195 = vector.load %arg1[%c112_73, %c16_74] : memref<336x128xbf16, #tpu.memory_space<vmem>>, vector<32x16xbf16>
    %196 = arith.truncf %147 : vector<128x32xf32> to vector<128x32xbf16>
    %cst_75 = arith.constant dense<0.000000e+00> : vector<128x16xf32>
    %197 = tpu.matmul %196, %195, %cst_75 {dimension_numbers = #tpu.dot_dimension_numbers<[1], [0], [0], [1], [0, 0, 1, 1], [], []>} : vector<128x32xbf16>, vector<32x16xbf16>, vector<128x16xf32> -> vector<128x16xf32>
    %c6_76 = arith.constant 6 : index
    %c16_77 = arith.constant 16 : index
    %198 = vector.load %arg2[%c6_76, %c16_77] : memref<16x128xf32, #tpu.memory_space<vmem>>, vector<1x16xf32>
    %199 = vector.broadcast %198 : vector<1x16xf32> to vector<128x16xf32>
    %200 = arith.addf %197, %199 : vector<128x16xf32>
    %c144_78 = arith.constant 144 : index
    %c16_79 = arith.constant 16 : index
    %201 = vector.load %arg1[%c144_78, %c16_79] : memref<336x128xbf16, #tpu.memory_space<vmem>>, vector<32x16xbf16>
    %202 = arith.truncf %147 : vector<128x32xf32> to vector<128x32xbf16>
    %cst_80 = arith.constant dense<0.000000e+00> : vector<128x16xf32>
    %203 = tpu.matmul %202, %201, %cst_80 {dimension_numbers = #tpu.dot_dimension_numbers<[1], [0], [0], [1], [0, 0, 1, 1], [], []>} : vector<128x32xbf16>, vector<32x16xbf16>, vector<128x16xf32> -> vector<128x16xf32>
    %c7_81 = arith.constant 7 : index
    %c16_82 = arith.constant 16 : index
    %204 = vector.load %arg2[%c7_81, %c16_82] : memref<16x128xf32, #tpu.memory_space<vmem>>, vector<1x16xf32>
    %205 = vector.broadcast %204 : vector<1x16xf32> to vector<128x16xf32>
    %206 = arith.addf %203, %205 : vector<128x16xf32>
    %207 = arith.truncf %194 : vector<128x16xf32> to vector<128x16xbf16>
    %208 = arith.truncf %200 : vector<128x16xf32> to vector<128x16xbf16>
    %cst_83 = arith.constant dense<0.000000e+00> : vector<128x128xf32>
    %209 = tpu.matmul %207, %208, %cst_83 {dimension_numbers = #tpu.dot_dimension_numbers<[1], [1], [0], [0], [0, 0, 1, 0], [], []>} : vector<128x16xbf16>, vector<128x16xbf16>, vector<128x128xf32> -> vector<128x128xf32>
    %cst_84 = arith.constant 2.500000e-01 : f32
    %210 = vector.broadcast %cst_84 : f32 to vector<128x128xf32>
    %211 = arith.mulf %209, %210 : vector<128x128xf32>
    %cst_85 = arith.constant dense<0xFF800000> : vector<128xf32>
    %212 = vector.multi_reduction <maximumf>, %211, %cst_85 [1] : vector<128x128xf32> to vector<128xf32>
    %213 = vector.shape_cast %212 : vector<128xf32> to vector<128x1xf32>
    %214 = vector.broadcast %213 : vector<128x1xf32> to vector<128x128xf32>
    %215 = arith.subf %211, %214 : vector<128x128xf32>
    %216 = math.exp %215 : vector<128x128xf32>
    %cst_86 = arith.constant dense<0.000000e+00> : vector<128xf32>
    %217 = vector.multi_reduction <add>, %216, %cst_86 [1] : vector<128x128xf32> to vector<128xf32>
    %218 = vector.shape_cast %217 : vector<128xf32> to vector<128x1xf32>
    %219 = tpu.reciprocal %218 {approx = true} : vector<128x1xf32> -> vector<128x1xf32>
    %220 = vector.broadcast %219 : vector<128x1xf32> to vector<128x128xf32>
    %221 = arith.mulf %216, %220 : vector<128x128xf32>
    %222 = arith.truncf %221 : vector<128x128xf32> to vector<128x128xbf16>
    %223 = arith.truncf %206 : vector<128x16xf32> to vector<128x16xbf16>
    %cst_87 = arith.constant dense<0.000000e+00> : vector<128x16xf32>
    %224 = tpu.matmul %222, %223, %cst_87 {dimension_numbers = #tpu.dot_dimension_numbers<[1], [0], [0], [1], [0, 0, 1, 1], [], []>} : vector<128x128xbf16>, vector<128x16xbf16>, vector<128x16xf32> -> vector<128x16xf32>
    %c192 = arith.constant 192 : index
    %c0_88 = arith.constant 0 : index
    %225 = vector.load %arg1[%c192, %c0_88] : memref<336x128xbf16, #tpu.memory_space<vmem>>, vector<16x32xbf16>
    %226 = arith.truncf %224 : vector<128x16xf32> to vector<128x16xbf16>
    %cst_89 = arith.constant dense<0.000000e+00> : vector<128x32xf32>
    %227 = tpu.matmul %226, %225, %cst_89 {dimension_numbers = #tpu.dot_dimension_numbers<[1], [0], [0], [1], [0, 0, 1, 1], [], []>} : vector<128x16xbf16>, vector<16x32xbf16>, vector<128x32xf32> -> vector<128x32xf32>
    %228 = arith.addf %188, %227 : vector<128x32xf32>
    %229 = vector.extract_strided_slice %146 {offsets = [128, 0], sizes = [128, 32], strides = [1, 1]} : vector<256x32xf32> to vector<128x32xf32>
    %cst_90 = arith.constant 0.000000e+00 : f32
    %230 = vector.broadcast %cst_90 : f32 to vector<128x32xf32>
    %c80_91 = arith.constant 80 : index
    %c0_92 = arith.constant 0 : index
    %231 = vector.load %arg1[%c80_91, %c0_92] : memref<336x128xbf16, #tpu.memory_space<vmem>>, vector<32x16xbf16>
    %232 = arith.truncf %229 : vector<128x32xf32> to vector<128x32xbf16>
    %cst_93 = arith.constant dense<0.000000e+00> : vector<128x16xf32>
    %233 = tpu.matmul %232, %231, %cst_93 {dimension_numbers = #tpu.dot_dimension_numbers<[1], [0], [0], [1], [0, 0, 1, 1], [], []>} : vector<128x32xbf16>, vector<32x16xbf16>, vector<128x16xf32> -> vector<128x16xf32>
    %c5_94 = arith.constant 5 : index
    %c0_95 = arith.constant 0 : index
    %234 = vector.load %arg2[%c5_94, %c0_95] : memref<16x128xf32, #tpu.memory_space<vmem>>, vector<1x16xf32>
    %235 = vector.broadcast %234 : vector<1x16xf32> to vector<128x16xf32>
    %236 = arith.addf %233, %235 : vector<128x16xf32>
    %c112_96 = arith.constant 112 : index
    %c0_97 = arith.constant 0 : index
    %237 = vector.load %arg1[%c112_96, %c0_97] : memref<336x128xbf16, #tpu.memory_space<vmem>>, vector<32x16xbf16>
    %238 = arith.truncf %229 : vector<128x32xf32> to vector<128x32xbf16>
    %cst_98 = arith.constant dense<0.000000e+00> : vector<128x16xf32>
    %239 = tpu.matmul %238, %237, %cst_98 {dimension_numbers = #tpu.dot_dimension_numbers<[1], [0], [0], [1], [0, 0, 1, 1], [], []>} : vector<128x32xbf16>, vector<32x16xbf16>, vector<128x16xf32> -> vector<128x16xf32>
    %c6_99 = arith.constant 6 : index
    %c0_100 = arith.constant 0 : index
    %240 = vector.load %arg2[%c6_99, %c0_100] : memref<16x128xf32, #tpu.memory_space<vmem>>, vector<1x16xf32>
    %241 = vector.broadcast %240 : vector<1x16xf32> to vector<128x16xf32>
    %242 = arith.addf %239, %241 : vector<128x16xf32>
    %c144_101 = arith.constant 144 : index
    %c0_102 = arith.constant 0 : index
    %243 = vector.load %arg1[%c144_101, %c0_102] : memref<336x128xbf16, #tpu.memory_space<vmem>>, vector<32x16xbf16>
    %244 = arith.truncf %229 : vector<128x32xf32> to vector<128x32xbf16>
    %cst_103 = arith.constant dense<0.000000e+00> : vector<128x16xf32>
    %245 = tpu.matmul %244, %243, %cst_103 {dimension_numbers = #tpu.dot_dimension_numbers<[1], [0], [0], [1], [0, 0, 1, 1], [], []>} : vector<128x32xbf16>, vector<32x16xbf16>, vector<128x16xf32> -> vector<128x16xf32>
    %c7_104 = arith.constant 7 : index
    %c0_105 = arith.constant 0 : index
    %246 = vector.load %arg2[%c7_104, %c0_105] : memref<16x128xf32, #tpu.memory_space<vmem>>, vector<1x16xf32>
    %247 = vector.broadcast %246 : vector<1x16xf32> to vector<128x16xf32>
    %248 = arith.addf %245, %247 : vector<128x16xf32>
    %249 = arith.truncf %236 : vector<128x16xf32> to vector<128x16xbf16>
    %250 = arith.truncf %242 : vector<128x16xf32> to vector<128x16xbf16>
    %cst_106 = arith.constant dense<0.000000e+00> : vector<128x128xf32>
    %251 = tpu.matmul %249, %250, %cst_106 {dimension_numbers = #tpu.dot_dimension_numbers<[1], [1], [0], [0], [0, 0, 1, 0], [], []>} : vector<128x16xbf16>, vector<128x16xbf16>, vector<128x128xf32> -> vector<128x128xf32>
    %cst_107 = arith.constant 2.500000e-01 : f32
    %252 = vector.broadcast %cst_107 : f32 to vector<128x128xf32>
    %253 = arith.mulf %251, %252 : vector<128x128xf32>
    %cst_108 = arith.constant dense<0xFF800000> : vector<128xf32>
    %254 = vector.multi_reduction <maximumf>, %253, %cst_108 [1] : vector<128x128xf32> to vector<128xf32>
    %255 = vector.shape_cast %254 : vector<128xf32> to vector<128x1xf32>
    %256 = vector.broadcast %255 : vector<128x1xf32> to vector<128x128xf32>
    %257 = arith.subf %253, %256 : vector<128x128xf32>
    %258 = math.exp %257 : vector<128x128xf32>
    %cst_109 = arith.constant dense<0.000000e+00> : vector<128xf32>
    %259 = vector.multi_reduction <add>, %258, %cst_109 [1] : vector<128x128xf32> to vector<128xf32>
    %260 = vector.shape_cast %259 : vector<128xf32> to vector<128x1xf32>
    %261 = tpu.reciprocal %260 {approx = true} : vector<128x1xf32> -> vector<128x1xf32>
    %262 = vector.broadcast %261 : vector<128x1xf32> to vector<128x128xf32>
    %263 = arith.mulf %258, %262 : vector<128x128xf32>
    %264 = arith.truncf %263 : vector<128x128xf32> to vector<128x128xbf16>
    %265 = arith.truncf %248 : vector<128x16xf32> to vector<128x16xbf16>
    %cst_110 = arith.constant dense<0.000000e+00> : vector<128x16xf32>
    %266 = tpu.matmul %264, %265, %cst_110 {dimension_numbers = #tpu.dot_dimension_numbers<[1], [0], [0], [1], [0, 0, 1, 1], [], []>} : vector<128x128xbf16>, vector<128x16xbf16>, vector<128x16xf32> -> vector<128x16xf32>
    %c176_111 = arith.constant 176 : index
    %c0_112 = arith.constant 0 : index
    %267 = vector.load %arg1[%c176_111, %c0_112] : memref<336x128xbf16, #tpu.memory_space<vmem>>, vector<16x32xbf16>
    %268 = arith.truncf %266 : vector<128x16xf32> to vector<128x16xbf16>
    %cst_113 = arith.constant dense<0.000000e+00> : vector<128x32xf32>
    %269 = tpu.matmul %268, %267, %cst_113 {dimension_numbers = #tpu.dot_dimension_numbers<[1], [0], [0], [1], [0, 0, 1, 1], [], []>} : vector<128x16xbf16>, vector<16x32xbf16>, vector<128x32xf32> -> vector<128x32xf32>
    %270 = arith.addf %230, %269 : vector<128x32xf32>
    %c80_114 = arith.constant 80 : index
    %c16_115 = arith.constant 16 : index
    %271 = vector.load %arg1[%c80_114, %c16_115] : memref<336x128xbf16, #tpu.memory_space<vmem>>, vector<32x16xbf16>
    %272 = arith.truncf %229 : vector<128x32xf32> to vector<128x32xbf16>
    %cst_116 = arith.constant dense<0.000000e+00> : vector<128x16xf32>
    %273 = tpu.matmul %272, %271, %cst_116 {dimension_numbers = #tpu.dot_dimension_numbers<[1], [0], [0], [1], [0, 0, 1, 1], [], []>} : vector<128x32xbf16>, vector<32x16xbf16>, vector<128x16xf32> -> vector<128x16xf32>
    %c5_117 = arith.constant 5 : index
    %c16_118 = arith.constant 16 : index
    %274 = vector.load %arg2[%c5_117, %c16_118] : memref<16x128xf32, #tpu.memory_space<vmem>>, vector<1x16xf32>
    %275 = vector.broadcast %274 : vector<1x16xf32> to vector<128x16xf32>
    %276 = arith.addf %273, %275 : vector<128x16xf32>
    %c112_119 = arith.constant 112 : index
    %c16_120 = arith.constant 16 : index
    %277 = vector.load %arg1[%c112_119, %c16_120] : memref<336x128xbf16, #tpu.memory_space<vmem>>, vector<32x16xbf16>
    %278 = arith.truncf %229 : vector<128x32xf32> to vector<128x32xbf16>
    %cst_121 = arith.constant dense<0.000000e+00> : vector<128x16xf32>
    %279 = tpu.matmul %278, %277, %cst_121 {dimension_numbers = #tpu.dot_dimension_numbers<[1], [0], [0], [1], [0, 0, 1, 1], [], []>} : vector<128x32xbf16>, vector<32x16xbf16>, vector<128x16xf32> -> vector<128x16xf32>
    %c6_122 = arith.constant 6 : index
    %c16_123 = arith.constant 16 : index
    %280 = vector.load %arg2[%c6_122, %c16_123] : memref<16x128xf32, #tpu.memory_space<vmem>>, vector<1x16xf32>
    %281 = vector.broadcast %280 : vector<1x16xf32> to vector<128x16xf32>
    %282 = arith.addf %279, %281 : vector<128x16xf32>
    %c144_124 = arith.constant 144 : index
    %c16_125 = arith.constant 16 : index
    %283 = vector.load %arg1[%c144_124, %c16_125] : memref<336x128xbf16, #tpu.memory_space<vmem>>, vector<32x16xbf16>
    %284 = arith.truncf %229 : vector<128x32xf32> to vector<128x32xbf16>
    %cst_126 = arith.constant dense<0.000000e+00> : vector<128x16xf32>
    %285 = tpu.matmul %284, %283, %cst_126 {dimension_numbers = #tpu.dot_dimension_numbers<[1], [0], [0], [1], [0, 0, 1, 1], [], []>} : vector<128x32xbf16>, vector<32x16xbf16>, vector<128x16xf32> -> vector<128x16xf32>
    %c7_127 = arith.constant 7 : index
    %c16_128 = arith.constant 16 : index
    %286 = vector.load %arg2[%c7_127, %c16_128] : memref<16x128xf32, #tpu.memory_space<vmem>>, vector<1x16xf32>
    %287 = vector.broadcast %286 : vector<1x16xf32> to vector<128x16xf32>
    %288 = arith.addf %285, %287 : vector<128x16xf32>
    %289 = arith.truncf %276 : vector<128x16xf32> to vector<128x16xbf16>
    %290 = arith.truncf %282 : vector<128x16xf32> to vector<128x16xbf16>
    %cst_129 = arith.constant dense<0.000000e+00> : vector<128x128xf32>
    %291 = tpu.matmul %289, %290, %cst_129 {dimension_numbers = #tpu.dot_dimension_numbers<[1], [1], [0], [0], [0, 0, 1, 0], [], []>} : vector<128x16xbf16>, vector<128x16xbf16>, vector<128x128xf32> -> vector<128x128xf32>
    %cst_130 = arith.constant 2.500000e-01 : f32
    %292 = vector.broadcast %cst_130 : f32 to vector<128x128xf32>
    %293 = arith.mulf %291, %292 : vector<128x128xf32>
    %cst_131 = arith.constant dense<0xFF800000> : vector<128xf32>
    %294 = vector.multi_reduction <maximumf>, %293, %cst_131 [1] : vector<128x128xf32> to vector<128xf32>
    %295 = vector.shape_cast %294 : vector<128xf32> to vector<128x1xf32>
    %296 = vector.broadcast %295 : vector<128x1xf32> to vector<128x128xf32>
    %297 = arith.subf %293, %296 : vector<128x128xf32>
    %298 = math.exp %297 : vector<128x128xf32>
    %cst_132 = arith.constant dense<0.000000e+00> : vector<128xf32>
    %299 = vector.multi_reduction <add>, %298, %cst_132 [1] : vector<128x128xf32> to vector<128xf32>
    %300 = vector.shape_cast %299 : vector<128xf32> to vector<128x1xf32>
    %301 = tpu.reciprocal %300 {approx = true} : vector<128x1xf32> -> vector<128x1xf32>
    %302 = vector.broadcast %301 : vector<128x1xf32> to vector<128x128xf32>
    %303 = arith.mulf %298, %302 : vector<128x128xf32>
    %304 = arith.truncf %303 : vector<128x128xf32> to vector<128x128xbf16>
    %305 = arith.truncf %288 : vector<128x16xf32> to vector<128x16xbf16>
    %cst_133 = arith.constant dense<0.000000e+00> : vector<128x16xf32>
    %306 = tpu.matmul %304, %305, %cst_133 {dimension_numbers = #tpu.dot_dimension_numbers<[1], [0], [0], [1], [0, 0, 1, 1], [], []>} : vector<128x128xbf16>, vector<128x16xbf16>, vector<128x16xf32> -> vector<128x16xf32>
    %c192_134 = arith.constant 192 : index
    %c0_135 = arith.constant 0 : index
    %307 = vector.load %arg1[%c192_134, %c0_135] : memref<336x128xbf16, #tpu.memory_space<vmem>>, vector<16x32xbf16>
    %308 = arith.truncf %306 : vector<128x16xf32> to vector<128x16xbf16>
    %cst_136 = arith.constant dense<0.000000e+00> : vector<128x32xf32>
    %309 = tpu.matmul %308, %307, %cst_136 {dimension_numbers = #tpu.dot_dimension_numbers<[1], [0], [0], [1], [0, 0, 1, 1], [], []>} : vector<128x16xbf16>, vector<16x32xbf16>, vector<128x32xf32> -> vector<128x32xf32>
    %310 = arith.addf %270, %309 : vector<128x32xf32>
    %311 = tpu.concatenate %228, %310 in 0 : vector<128x32xf32>, vector<128x32xf32> -> vector<256x32xf32>
    %c8 = arith.constant 8 : index
    %c0_137 = arith.constant 0 : index
    %312 = vector.load %arg2[%c8, %c0_137] : memref<16x128xf32, #tpu.memory_space<vmem>>, vector<1x32xf32>
    %313 = vector.broadcast %312 : vector<1x32xf32> to vector<256x32xf32>
    %314 = arith.addf %311, %313 : vector<256x32xf32>
    %315 = arith.addf %146, %314 : vector<256x32xf32>
    %c9 = arith.constant 9 : index
    %c0_138 = arith.constant 0 : index
    %316 = vector.load %arg2[%c9, %c0_138] : memref<16x128xf32, #tpu.memory_space<vmem>>, vector<1x32xf32>
    %c10 = arith.constant 10 : index
    %c0_139 = arith.constant 0 : index
    %317 = vector.load %arg2[%c10, %c0_139] : memref<16x128xf32, #tpu.memory_space<vmem>>, vector<1x32xf32>
    %cst_140 = arith.constant dense<0.000000e+00> : vector<256xf32>
    %318 = vector.multi_reduction <add>, %315, %cst_140 [1] : vector<256x32xf32> to vector<256xf32>
    %319 = vector.shape_cast %318 : vector<256xf32> to vector<256x1xf32>
    %cst_141 = arith.constant 3.200000e+01 : f32
    %320 = vector.broadcast %cst_141 : f32 to vector<256x1xf32>
    %321 = arith.divf %319, %320 : vector<256x1xf32>
    %322 = arith.mulf %315, %315 : vector<256x32xf32>
    %cst_142 = arith.constant dense<0.000000e+00> : vector<256xf32>
    %323 = vector.multi_reduction <add>, %322, %cst_142 [1] : vector<256x32xf32> to vector<256xf32>
    %324 = vector.shape_cast %323 : vector<256xf32> to vector<256x1xf32>
    %cst_143 = arith.constant 3.200000e+01 : f32
    %325 = vector.broadcast %cst_143 : f32 to vector<256x1xf32>
    %326 = arith.divf %324, %325 : vector<256x1xf32>
    %327 = vector.broadcast %321 : vector<256x1xf32> to vector<256x32xf32>
    %328 = arith.subf %315, %327 : vector<256x32xf32>
    %329 = arith.mulf %321, %321 : vector<256x1xf32>
    %330 = arith.subf %326, %329 : vector<256x1xf32>
    %cst_144 = arith.constant 9.99999974E-6 : f32
    %331 = vector.broadcast %cst_144 : f32 to vector<256x1xf32>
    %332 = arith.addf %330, %331 : vector<256x1xf32>
    %333 = math.rsqrt %332 : vector<256x1xf32>
    %334 = vector.broadcast %333 : vector<256x1xf32> to vector<256x32xf32>
    %335 = arith.mulf %328, %334 : vector<256x32xf32>
    %336 = vector.broadcast %316 : vector<1x32xf32> to vector<256x32xf32>
    %337 = arith.mulf %335, %336 : vector<256x32xf32>
    %338 = vector.broadcast %317 : vector<1x32xf32> to vector<256x32xf32>
    %339 = arith.addf %337, %338 : vector<256x32xf32>
    %c208 = arith.constant 208 : index
    %c0_145 = arith.constant 0 : index
    %340 = vector.load %arg1[%c208, %c0_145] : memref<336x128xbf16, #tpu.memory_space<vmem>>, vector<32x64xbf16>
    %341 = arith.truncf %339 : vector<256x32xf32> to vector<256x32xbf16>
    %cst_146 = arith.constant dense<0.000000e+00> : vector<256x64xf32>
    %342 = tpu.matmul %341, %340, %cst_146 {dimension_numbers = #tpu.dot_dimension_numbers<[1], [0], [0], [1], [0, 0, 1, 1], [], []>} : vector<256x32xbf16>, vector<32x64xbf16>, vector<256x64xf32> -> vector<256x64xf32>
    %c11 = arith.constant 11 : index
    %c0_147 = arith.constant 0 : index
    %343 = vector.load %arg2[%c11, %c0_147] : memref<16x128xf32, #tpu.memory_space<vmem>>, vector<1x64xf32>
    %344 = vector.broadcast %343 : vector<1x64xf32> to vector<256x64xf32>
    %345 = arith.addf %342, %344 : vector<256x64xf32>
    %346 = arith.mulf %345, %345 : vector<256x64xf32>
    %347 = arith.mulf %345, %346 : vector<256x64xf32>
    %cst_148 = arith.constant 4.471500e-02 : f32
    %348 = vector.broadcast %cst_148 : f32 to vector<256x64xf32>
    %349 = arith.mulf %348, %347 : vector<256x64xf32>
    %350 = arith.addf %345, %349 : vector<256x64xf32>
    %cst_149 = arith.constant 0.797884583 : f32
    %351 = vector.broadcast %cst_149 : f32 to vector<256x64xf32>
    %352 = arith.mulf %351, %350 : vector<256x64xf32>
    %353 = math.tanh %352 : vector<256x64xf32>
    %cst_150 = arith.constant 1.000000e+00 : f32
    %354 = vector.broadcast %cst_150 : f32 to vector<256x64xf32>
    %355 = arith.addf %354, %353 : vector<256x64xf32>
    %cst_151 = arith.constant 5.000000e-01 : f32
    %356 = vector.broadcast %cst_151 : f32 to vector<256x64xf32>
    %357 = arith.mulf %356, %355 : vector<256x64xf32>
    %358 = arith.mulf %345, %357 : vector<256x64xf32>
    %c240 = arith.constant 240 : index
    %c0_152 = arith.constant 0 : index
    %359 = vector.load %arg1[%c240, %c0_152] : memref<336x128xbf16, #tpu.memory_space<vmem>>, vector<64x32xbf16>
    %360 = arith.truncf %358 : vector<256x64xf32> to vector<256x64xbf16>
    %cst_153 = arith.constant dense<0.000000e+00> : vector<256x32xf32>
    %361 = tpu.matmul %360, %359, %cst_153 {dimension_numbers = #tpu.dot_dimension_numbers<[1], [0], [0], [1], [0, 0, 1, 1], [], []>} : vector<256x64xbf16>, vector<64x32xbf16>, vector<256x32xf32> -> vector<256x32xf32>
    %c12 = arith.constant 12 : index
    %c0_154 = arith.constant 0 : index
    %362 = vector.load %arg2[%c12, %c0_154] : memref<16x128xf32, #tpu.memory_space<vmem>>, vector<1x32xf32>
    %363 = vector.broadcast %362 : vector<1x32xf32> to vector<256x32xf32>
    %364 = arith.addf %361, %363 : vector<256x32xf32>
    %365 = arith.addf %339, %364 : vector<256x32xf32>
    %c13 = arith.constant 13 : index
    %c0_155 = arith.constant 0 : index
    %366 = vector.load %arg2[%c13, %c0_155] : memref<16x128xf32, #tpu.memory_space<vmem>>, vector<1x32xf32>
    %c14 = arith.constant 14 : index
    %c0_156 = arith.constant 0 : index
    %367 = vector.load %arg2[%c14, %c0_156] : memref<16x128xf32, #tpu.memory_space<vmem>>, vector<1x32xf32>
    %cst_157 = arith.constant dense<0.000000e+00> : vector<256xf32>
    %368 = vector.multi_reduction <add>, %365, %cst_157 [1] : vector<256x32xf32> to vector<256xf32>
    %369 = vector.shape_cast %368 : vector<256xf32> to vector<256x1xf32>
    %cst_158 = arith.constant 3.200000e+01 : f32
    %370 = vector.broadcast %cst_158 : f32 to vector<256x1xf32>
    %371 = arith.divf %369, %370 : vector<256x1xf32>
    %372 = arith.mulf %365, %365 : vector<256x32xf32>
    %cst_159 = arith.constant dense<0.000000e+00> : vector<256xf32>
    %373 = vector.multi_reduction <add>, %372, %cst_159 [1] : vector<256x32xf32> to vector<256xf32>
    %374 = vector.shape_cast %373 : vector<256xf32> to vector<256x1xf32>
    %cst_160 = arith.constant 3.200000e+01 : f32
    %375 = vector.broadcast %cst_160 : f32 to vector<256x1xf32>
    %376 = arith.divf %374, %375 : vector<256x1xf32>
    %377 = vector.broadcast %371 : vector<256x1xf32> to vector<256x32xf32>
    %378 = arith.subf %365, %377 : vector<256x32xf32>
    %379 = arith.mulf %371, %371 : vector<256x1xf32>
    %380 = arith.subf %376, %379 : vector<256x1xf32>
    %cst_161 = arith.constant 9.99999974E-6 : f32
    %381 = vector.broadcast %cst_161 : f32 to vector<256x1xf32>
    %382 = arith.addf %380, %381 : vector<256x1xf32>
    %383 = math.rsqrt %382 : vector<256x1xf32>
    %384 = vector.broadcast %383 : vector<256x1xf32> to vector<256x32xf32>
    %385 = arith.mulf %378, %384 : vector<256x32xf32>
    %386 = vector.broadcast %366 : vector<1x32xf32> to vector<256x32xf32>
    %387 = arith.mulf %385, %386 : vector<256x32xf32>
    %388 = vector.broadcast %367 : vector<1x32xf32> to vector<256x32xf32>
    %389 = arith.addf %387, %388 : vector<256x32xf32>
    %c304 = arith.constant 304 : index
    %c0_162 = arith.constant 0 : index
    %390 = vector.load %arg1[%c304, %c0_162] : memref<336x128xbf16, #tpu.memory_space<vmem>>, vector<32x128xbf16>
    %391 = arith.truncf %389 : vector<256x32xf32> to vector<256x32xbf16>
    %cst_163 = arith.constant dense<0.000000e+00> : vector<256x128xf32>
    %392 = tpu.matmul %391, %390, %cst_163 {dimension_numbers = #tpu.dot_dimension_numbers<[1], [0], [0], [1], [0, 0, 1, 1], [], []>} : vector<256x32xbf16>, vector<32x128xbf16>, vector<256x128xf32> -> vector<256x128xf32>
    %c15 = arith.constant 15 : index
    %c0_164 = arith.constant 0 : index
    %393 = vector.load %arg2[%c15, %c0_164] : memref<16x128xf32, #tpu.memory_space<vmem>>, vector<1x128xf32>
    %394 = vector.broadcast %393 : vector<1x128xf32> to vector<256x128xf32>
    %395 = arith.addf %392, %394 : vector<256x128xf32>
    %c0_165 = arith.constant 0 : index
    %c0_166 = arith.constant 0 : index
    %396 = vector.load %arg3[%c0_165, %c0_166] : memref<256x128xf32, #tpu.memory_space<vmem>>, vector<256x128xf32>
    tpu.vector_store %arg3[%c0_165, %c0_166], %395 {strides = array<i32>} : memref<256x128xf32, #tpu.memory_space<vmem>>, vector<256x128xf32>,
    %cst_167 = arith.constant dense<0xFF800000> : vector<256xf32>
    %397 = vector.multi_reduction <maximumf>, %395, %cst_167 [1] : vector<256x128xf32> to vector<256xf32>
    %398 = vector.shape_cast %397 : vector<256xf32> to vector<256x1xf32>
    %399 = tpu.iota {dimensions = array<i32: 1>} : vector<256x128xi32>
    %400 = vector.broadcast %398 : vector<256x1xf32> to vector<256x128xf32>
    %401 = arith.cmpf oeq, %395, %400 : vector<256x128xf32>
    %c256_i32 = arith.constant 256 : i32
    %402 = vector.broadcast %c256_i32 : i32 to vector<256x128xi32>
    %403 = arith.select %401, %399, %402 : vector<256x128xi1>, vector<256x128xi32>
    %cst_168 = arith.constant dense<2147483647> : vector<256xi32>
    %404 = vector.multi_reduction <minsi>, %403, %cst_168 [1] : vector<256x128xi32> to vector<256xi32>
    %405 = vector.shape_cast %404 : vector<256xi32> to vector<256x1xi32>
    %406 = vector.broadcast %405 : vector<256x1xi32> to vector<256x128xi32>
    %407 = arith.cmpi eq, %403, %406 : vector<256x128xi32>
    %408 = arith.extui %407 : vector<256x128xi1> to vector<256x128xi32>
    %409 = arith.sitofp %408 : vector<256x128xi32> to vector<256x128xf32>
    %410 = tpu.iota {dimensions = array<i32: 1>} : vector<1x128xi32>
    %411 = arith.sitofp %410 : vector<1x128xi32> to vector<1x128xf32>
    %412 = vector.extract_strided_slice %409 {offsets = [0, 0], sizes = [128, 128], strides = [1, 1]} : vector<256x128xf32> to vector<128x128xf32>
    %413 = arith.truncf %411 : vector<1x128xf32> to vector<1x128xbf16>
    %414 = arith.truncf %412 : vector<128x128xf32> to vector<128x128xbf16>
    %cst_169 = arith.constant dense<0.000000e+00> : vector<1x128xf32>
    %415 = tpu.matmul %413, %414, %cst_169 {dimension_numbers = #tpu.dot_dimension_numbers<[1], [1], [0], [0], [0, 0, 1, 0], [], []>} : vector<1x128xbf16>, vector<128x128xbf16>, vector<1x128xf32> -> vector<1x128xf32>
    %416 = vector.extract_strided_slice %409 {offsets = [128, 0], sizes = [128, 128], strides = [1, 1]} : vector<256x128xf32> to vector<128x128xf32>
    %417 = arith.truncf %411 : vector<1x128xf32> to vector<1x128xbf16>
    %418 = arith.truncf %416 : vector<128x128xf32> to vector<128x128xbf16>
    %cst_170 = arith.constant dense<0.000000e+00> : vector<1x128xf32>
    %419 = tpu.matmul %417, %418, %cst_170 {dimension_numbers = #tpu.dot_dimension_numbers<[1], [1], [0], [0], [0, 0, 1, 0], [], []>} : vector<1x128xbf16>, vector<128x128xbf16>, vector<1x128xf32> -> vector<1x128xf32>
    %420 = tpu.concatenate %415, %419 in 0 : vector<1x128xf32>, vector<1x128xf32> -> vector<2x128xf32>
    %421 = arith.fptosi %420 : vector<2x128xf32> to vector<2x128xi32>
    %c0_171 = arith.constant 0 : index
    %c0_172 = arith.constant 0 : index
    %422 = vector.load %arg4[%c0_171, %c0_172] : memref<2x128xi32, #tpu.memory_space<vmem>>, vector<2x128xi32>
    tpu.vector_store %arg4[%c0_171, %c0_172], %421 {strides = array<i32>} : memref<2x128xi32, #tpu.memory_space<vmem>>, vector<2x128xi32>,
    return
  }
}

</mosaic_0001>

<bundles_post_ra>
// kernel: forward.1
= control target key start
LH: loop header
LB: loop body
LE: loop exit
PB: predicated region body
PF: predicated region fallthrough
CT: control target
= control target key end

     0   :  { %vm50_vm0 = vcmask 130048   ;;  %s18392_s0 = inlined_call_operand.vmem [shape: f32[256,16], index: 0, kind: input, shape index: {}]   ;;  %s18393_s1 = inlined_call_operand.vmem [shape: bf16[336,128], index: 1, kind: input, shape index: {}]   ;;  %s18394_s2 = inlined_call_operand.vmem [shape: f32[16,128], index: 2, kind: input, shape index: {}]   ;;  %s18395_s3 = inlined_call_operand.vmem [shape: f32[256,128], index: 3, kind: output, shape index: {0}]   ;;  %s18396_s4 = inlined_call_operand.hbm [shape: s32[2,128], index: 4, kind: output, shape index: {1}]  }
   0x1   :  { %v12484_v0 = vld [vmem:[%s18392_s0 + $0x10] sm:$0xff]  ;;  %v12489_v1 = vld [vmem:[%s18392_s0] sm:$0xff]  ;;  %v12494_v2 = vld [vmem:[%s18392_s0 + $0x8] sm:$0xff] }
   0x2   :  { %v57_v3 = vsel %vm50_vm0, %v12484_v0, 0.0  ;;  %v51_v4 = vsel %vm50_vm0, %v12489_v1, 0.0  ;;  %v139_v5 = vmul.f32 %v12489_v1, %v12489_v1  ;;  %v54_v7 = vsel %vm50_vm0, %v12494_v2, 0.0  ;;  %v12510_v9 = vld [vmem:[%s18392_s0 + $0x18] sm:$0xff]  ;;  %v12520_v13 = vld [vmem:[%s18392_s0 + $0x20] sm:$0xff]  ;;  %v12530_v17 = vld [vmem:[%s18392_s0 + $0x28] sm:$0xff] }
   0x3   :  { %58 = vadd.xlane.f32.xlu1 %v57_v3  ;;  %52 = vadd.xlane.f32.xlu0 %v51_v4  ;;  %v140_v8 = vmul.f32 %v12494_v2, %v12494_v2  ;;  %v60_v10 = vsel %vm50_vm0, %v12510_v9, 0.0  ;;  %v141_v12 = vmul.f32 %v12484_v0, %v12484_v0  ;;  %v63_v14 = vsel %vm50_vm0, %v12520_v13, 0.0  ;;  %v12540_v21 = vld [vmem:[%s18392_s0 + $0x30] sm:$0xff]  ;;  %v12550_v25 = vld [vmem:[%s18392_s0 + $0x38] sm:$0xff]  ;;  %v12559_v28 = vld [vmem:[%s18392_s0 + $0x40] sm:$0xff] }
   0x4   :  { %v155_v6 = vsel %vm50_vm0, %v139_v5, 0.0  ;;  %v142_v16 = vmul.f32 %v12510_v9, %v12510_v9  ;;  %v66_v18 = vsel %vm50_vm0, %v12530_v17, 0.0  ;;  %v143_v20 = vmul.f32 %v12520_v13, %v12520_v13  ;;  %v12564_v29 = vld [vmem:[%s18392_s0 + $0x48] sm:$0xff]  ;;  %v12580_v37 = vld [vmem:[%s18392_s0 + $0x50] sm:$0xff] }
   0x5   :  { %v158_v11 = vsel %vm50_vm0, %v140_v8, 0.0  ;;  %v161_v15 = vsel %vm50_vm0, %v141_v12, 0.0  ;;  %v69_v22 = vsel %vm50_vm0, %v12540_v21, 0.0  ;;  %v144_v24 = vmul.f32 %v12530_v17, %v12530_v17 }
   0x6   :  { %v164_v19 = vsel %vm50_vm0, %v142_v16, 0.0  ;;  %v167_v23 = vsel %vm50_vm0, %v143_v20, 0.0  ;;  %v145_v26 = vmul.f32 %v12540_v21, %v12540_v21  ;;  %v146_v27 = vmul.f32 %v12550_v25, %v12550_v25 }
   0x7   :  { %156 = vadd.xlane.f32.xlu1 %v155_v6  ;;  %55 = vadd.xlane.f32.xlu0 %v54_v7  ;;  %v72_v30 = vsel %vm50_vm0, %v12550_v25, 0.0  ;;  %v170_v31 = vsel %vm50_vm0, %v144_v24, 0.0  ;;  %v75_v32 = vsel %vm50_vm0, %v12559_v28, 0.0  ;;  %v78_v34 = vsel %vm50_vm0, %v12564_v29, 0.0 }
   0x8   :  { %v173_v33 = vsel %vm50_vm0, %v145_v26, 0.0  ;;  %v176_v35 = vsel %vm50_vm0, %v146_v27, 0.0  ;;  %v147_v36 = vmul.f32 %v12559_v28, %v12559_v28 }
   0xb   :  { %61 = vadd.xlane.f32.xlu1 %v60_v10  ;;  %159 = vadd.xlane.f32.xlu0 %v158_v11 }
   0xf   :  { %64 = vadd.xlane.f32.xlu1 %v63_v14  ;;  %162 = vadd.xlane.f32.xlu0 %v161_v15 }
  0x13   :  { %67 = vadd.xlane.f32.xlu1 %v66_v18  ;;  %165 = vadd.xlane.f32.xlu0 %v164_v19 }
  0x17   :  { %70 = vadd.xlane.f32.xlu1 %v69_v22  ;;  %168 = vadd.xlane.f32.xlu0 %v167_v23 }
  0x1b   :  { %73 = vadd.xlane.f32.xlu1 %v72_v30  ;;  %171 = vadd.xlane.f32.xlu0 %v170_v31 }
  0x1f   :  { %76 = vadd.xlane.f32.xlu1 %v75_v32  ;;  %174 = vadd.xlane.f32.xlu0 %v173_v33 }
  0x20   :  { %10 = vsyncpa [#allocation3], 0  ;;  %v81_v38 = vsel %vm50_vm0, %v12580_v37, 0.0  ;;  %v179_v39 = vsel %vm50_vm0, %v147_v36, 0.0  ;;  %v148_v40 = vmul.f32 %v12564_v29, %v12564_v29  ;;  %v12590_v41 = vld [vmem:[%s18392_s0 + $0x58] sm:$0xff]  ;;  %v149_v44 = vmul.f32 %v12580_v37, %v12580_v37  ;;  %v12600_v45 = vld [vmem:[%s18392_s0 + $0x60] sm:$0xff] }
  0x21   :  { %v84_v42 = vsel %vm50_vm0, %v12590_v41, 0.0  ;;  %v87_v46 = vsel %vm50_vm0, %v12600_v45, 0.0  ;;  %v150_v48 = vmul.f32 %v12590_v41, %v12590_v41  ;;  %v12610_v49 = vld [vmem:[%s18392_s0 + $0x68] sm:$0xff]  ;;  %v151_v52 = vmul.f32 %v12600_v45, %v12600_v45  ;;  %v12620_v53 = vld [vmem:[%s18392_s0 + $0x70] sm:$0xff]  ;;  %v12630_v57 = vld [vmem:[%s18392_s0 + $0x78] sm:$0xff]  ;;  %s12451_s14 = smov 112  }
  0x22   :  { %v182_v43 = vsel %vm50_vm0, %v148_v40, 0.0  ;;  %v185_v47 = vsel %vm50_vm0, %v149_v44, 0.0  ;;  %v90_v50 = vsel %vm50_vm0, %v12610_v49, 0.0  ;;  %v93_v54 = vsel %vm50_vm0, %v12620_v53, 0.0  ;;  %v12644_v3 = vld [vmem:[%s18392_s0 + $0x88] sm:$0xff]  ;;  %v12649_v4 = vld [vmem:[%s18392_s0 + $0x80] sm:$0xff] }
  0x23   :  { %79 = vadd.xlane.f32.xlu1 %v78_v34  ;;  %177 = vadd.xlane.f32.xlu0 %v176_v35  ;;  %v188_v51 = vsel %vm50_vm0, %v150_v48, 0.0  ;;  %v191_v55 = vsel %vm50_vm0, %v151_v52, 0.0  ;;  %v152_v56 = vmul.f32 %v12610_v49, %v12610_v49  ;;  %v96_v58 = vsel %vm50_vm0, %v12630_v57, 0.0  ;;  %v12660_v8 = vld [vmem:[%s18392_s0 + $0x90] sm:$0xff]  ;;  %v12670_v14 = vld [vmem:[%s18392_s0 + $0x98] sm:$0xff]  ;;  %v12680_v19 = vld [vmem:[%s18392_s0 + $0xa0] sm:$0xff] }
  0x24   :  { %v154_v60 = vmul.f32 %v12630_v57, %v12630_v57  ;;  %v153_v61 = vmul.f32 %v12620_v53, %v12620_v53  ;;  %v280_v5 = vsel %vm50_vm0, %v12644_v3, 0.0  ;;  %v277_v6 = vsel %vm50_vm0, %v12649_v4, 0.0  ;;  %v12690_v24 = vld [vmem:[%s18392_s0 + $0xa8] sm:$0xff]  ;;  %v12700_v31 = vld [vmem:[%s18392_s0 + $0xb0] sm:$0xff]  ;;  %v12710_v35 = vld [vmem:[%s18392_s0 + $0xb8] sm:$0xff] }
  0x25   :  { %v194_v59 = vsel %vm50_vm0, %v152_v56, 0.0  ;;  %v363_v7 = vmul.f32 %v12649_v4, %v12649_v4  ;;  %v283_v11 = vsel %vm50_vm0, %v12660_v8, 0.0  ;;  %v364_v12 = vmul.f32 %v12644_v3, %v12644_v3  ;;  %v12720_v40 = vld [vmem:[%s18392_s0 + $0xc0] sm:$0xff]  ;;  %v12750_v56 = vld [vmem:[%s18392_s0 + $0xd8] sm:$0xff] }
  0x26   :  { %v200_v62 = vsel %vm50_vm0, %v154_v60, 0.0  ;;  %v197_v63 = vsel %vm50_vm0, %v153_v61, 0.0  ;;  %v286_v15 = vsel %vm50_vm0, %v12670_v14, 0.0  ;;  %v365_v18 = vmul.f32 %v12660_v8, %v12660_v8  ;;  %v12760_v61 = vld [vmem:[%s18392_s0 + $0xe0] sm:$0xff] }
  0x27   :  { %82 = vadd.xlane.f32.xlu1 %v81_v38  ;;  %180 = vadd.xlane.f32.xlu0 %v179_v39  ;;  %v379_v10 = vsel %vm50_vm0, %v363_v7, 0.0  ;;  %v382_v16 = vsel %vm50_vm0, %v364_v12, 0.0  ;;  %v289_v20 = vsel %vm50_vm0, %v12680_v19, 0.0  ;;  %v366_v23 = vmul.f32 %v12670_v14, %v12670_v14  ;;  %18512 = vst [vmem:[#allocation6_spill] sm:$0xff] %v12760_v61  ;;  %v501_v12 = vld [vmem:[%s18393_s1] sm:$0xf] }
  0x28   :  { %v385_v22 = vsel %vm50_vm0, %v365_v18, 0.0  ;;  %v292_v26 = vsel %vm50_vm0, %v12690_v24, 0.0  ;;  %v367_v30 = vmul.f32 %v12680_v19, %v12680_v19  ;;  %v295_v32 = vsel %vm50_vm0, %v12700_v31, 0.0 }
  0x29   :  { %v388_v27 = vsel %vm50_vm0, %v366_v23, 0.0  ;;  %v368_v34 = vmul.f32 %v12690_v24, %v12690_v24  ;;  %v298_v36 = vsel %vm50_vm0, %v12710_v35, 0.0  ;;  %v369_v39 = vmul.f32 %v12700_v31, %v12700_v31  ;;  %v12793_v23 = vld [vmem:[%s18392_s0 + $0xf8] sm:$0xff] }
  0x2a   :  { %v391_v33 = vsel %vm50_vm0, %v367_v30, 0.0  ;;  %v370_v44 = vmul.f32 %v12710_v35, %v12710_v35  ;;  %vm572_vm1 = vcmask 1043456   ;;  %18515 = vst [vmem:[#allocation9_spill] sm:$0xff] %v12793_v23  ;;  %vm523_vm2 = vcmask 64512  }
  0x2b   :  { %85 = vadd.xlane.f32.xlu1 %v84_v42  ;;  %183 = vadd.xlane.f32.xlu0 %v182_v43  ;;  %v394_v38 = vsel %vm50_vm0, %v368_v34, 0.0  ;;  %v301_v42 = vsel %vm50_vm0, %v12720_v40, 0.0  ;;  %v397_v43 = vsel %vm50_vm0, %v369_v39, 0.0  ;;  %vm2363_vm3 = vcmask 261120  }
  0x2c   :  { %v400_v48 = vsel %vm50_vm0, %v370_v44, 0.0  ;;  %11621 = vmatprep.subr.msk.bf16.mxu0 %vm572_vm1, %v501_v12  ;;  %11622 = vmatprep.subr.msk.bf16.mxu1 %vm572_vm1, %v501_v12  ;;  %vm7962_vm4 = vcmask 523264  }
  0x2f   :  { %88 = vadd.xlane.f32.xlu1 %v87_v46  ;;  %186 = vadd.xlane.f32.xlu0 %v185_v47  ;;  %v12730_v46 = vld [vmem:[%s18392_s0 + $0xc8] sm:$0xff] }
  0x30   :  { %18511 = vst [vmem:[#allocation5_spill] sm:$0xff] %v12730_v46  ;;  %v304_v47 = vsel %vm50_vm0, %v12730_v46, 0.0 }
  0x33   :  { %91 = vadd.xlane.f32.xlu1 %v90_v50  ;;  %189 = vadd.xlane.f32.xlu0 %v188_v51  ;;  %v371_v50 = vmul.f32 %v12720_v40, %v12720_v40  ;;  %v12740_v51 = vld [vmem:[%s18392_s0 + $0xd0] sm:$0xff] }
  0x34   :  { %v307_v52 = vsel %vm50_vm0, %v12740_v51, 0.0  ;;  %v373_v60 = vmul.f32 %v12740_v51, %v12740_v51 }
  0x37   :  { %94 = vadd.xlane.f32.xlu1 %v93_v54  ;;  %192 = vadd.xlane.f32.xlu0 %v191_v55  ;;  %v403_v54 = vsel %vm50_vm0, %v371_v50, 0.0  ;;  %v372_v55 = vmul.f32 %v12730_v46, %v12730_v46 }
  0x3b   :  { %97 = vadd.xlane.f32.xlu1 %v96_v58  ;;  %195 = vadd.xlane.f32.xlu0 %v194_v59  ;;  %v310_v58 = vsel %vm50_vm0, %v12750_v56, 0.0  ;;  %v406_v59 = vsel %vm50_vm0, %v372_v55, 0.0 }
  0x3f   :  { %201 = vadd.xlane.f32.xlu1 %v200_v62  ;;  %198 = vadd.xlane.f32.xlu0 %v197_v63  ;;  %v313_v62 = vsel %vm50_vm0, %v12760_v61, 0.0  ;;  %v409_v63 = vsel %vm50_vm0, %v373_v60, 0.0 }
  0x43   :  { %281 = vadd.xlane.f32.xlu1 %v280_v5  ;;  %278 = vadd.xlane.f32.xlu0 %v277_v6  ;;  %v374_v5 = vmul.f32 %v12750_v56, %v12750_v56  ;;  %v12770_v6 = vld [vmem:[%s18392_s0 + $0xe8] sm:$0xff] }
  0x44   :  { %18513 = vst [vmem:[#allocation7_spill] sm:$0xff] %v12770_v6  ;;  %v316_v7 = vsel %vm50_vm0, %v12770_v6, 0.0 }
  0x47   :  { %380 = vadd.xlane.f32.xlu1 %v379_v10  ;;  %284 = vadd.xlane.f32.xlu0 %v283_v11  ;;  %v412_v10 = vsel %vm50_vm0, %v374_v5, 0.0  ;;  %v375_v11 = vmul.f32 %v12760_v61, %v12760_v61 }
  0x4b   :  { %287 = vadd.xlane.f32.xlu1 %v286_v15  ;;  %383 = vadd.xlane.f32.xlu0 %v382_v16  ;;  %v12783_v15 = vld [vmem:[%s18392_s0 + $0xf0] sm:$0xff]  ;;  %v574_v16 = vsel %vm572_vm1, %v501_v12, 0  ;;  %s12450_s0 = smov 120  }
  0x4c   :  { %18514 = vst [vmem:[#allocation8_spill] sm:$0xff] %v12783_v15  ;;  %10666 = vmatpush3.bf16.msra.mxu0 %v574_v16  ;;  %10700 = vmatpush3.bf16.msra.mxu1 %v574_v16  ;;  %v319_v18 = vsel %vm50_vm0, %v12783_v15, 0.0  ;;  %v377_v30 = vmul.f32 %v12783_v15, %v12783_v15 }
  0x4f   :  { %290 = vadd.xlane.f32.xlu1 %v289_v20  ;;  %386 = vadd.xlane.f32.xlu0 %v385_v22  ;;  %v415_v20 = vsel %vm50_vm0, %v375_v11, 0.0  ;;  %v376_v22 = vmul.f32 %v12770_v6, %v12770_v6 }
  0x53   :  { %293 = vadd.xlane.f32.xlu1 %v292_v26  ;;  %389 = vadd.xlane.f32.xlu0 %v388_v27  ;;  %v322_v26 = vsel %vm50_vm0, %v12793_v23, 0.0  ;;  %v418_v27 = vsel %vm50_vm0, %v376_v22, 0.0 }
  0x57   :  { %296 = vadd.xlane.f32.xlu1 %v295_v32  ;;  %392 = vadd.xlane.f32.xlu0 %v391_v33  ;;  %v378_v32 = vmul.f32 %v12793_v23, %v12793_v23  ;;  %v421_v33 = vsel %vm50_vm0, %v377_v30, 0.0 }
  0x59   :  { %v424_v34 = vsel %vm50_vm0, %v378_v32, 0.0 }
  0x5b   :  { %299 = vadd.xlane.f32.xlu1 %v298_v36  ;;  %395 = vadd.xlane.f32.xlu0 %v394_v38 }
  0x5f   :  { %302 = vadd.xlane.f32.xlu1 %v301_v42  ;;  %398 = vadd.xlane.f32.xlu0 %v397_v43 }
  0x63   :  { %305 = vadd.xlane.f32.xlu1 %v304_v47  ;;  %401 = vadd.xlane.f32.xlu0 %v400_v48 }
  0x67   :  { %308 = vadd.xlane.f32.xlu1 %v307_v52  ;;  %404 = vadd.xlane.f32.xlu0 %v403_v54 }
  0x6b   :  { %311 = vadd.xlane.f32.xlu1 %v310_v58  ;;  %407 = vadd.xlane.f32.xlu0 %v406_v59 }
  0x6f   :  { %314 = vadd.xlane.f32.xlu1 %v313_v62  ;;  %410 = vadd.xlane.f32.xlu0 %v409_v63 }
  0x73   :  { %317 = vadd.xlane.f32.xlu1 %v316_v7  ;;  %413 = vadd.xlane.f32.xlu0 %v412_v10 }
  0x77   :  { %320 = vadd.xlane.f32.xlu1 %v319_v18  ;;  %416 = vadd.xlane.f32.xlu0 %v415_v20 }
  0x7b   :  { %323 = vadd.xlane.f32.xlu1 %v322_v26  ;;  %419 = vadd.xlane.f32.xlu0 %v418_v27 }
  0x7f   :  { %422 = vadd.xlane.f32.xlu0 %v421_v33  ;;  %425 = vadd.xlane.f32.xlu1 %v424_v34 }
  0x90   :  { %v59_v36 = vpop.xlane.xlu1 %58  ;;  %v53_v38 = vpop.xlane.xlu0 %52 }
  0x91   :  { %v100_v62 = vmul.f32 0.0625, %v53_v38  ;;  %v102_v10 = vmul.f32 0.0625, %v59_v36 }
  0x94   :  { %v157_v39 = vpop.xlane.xlu1 %156  ;;  %v56_v42 = vpop.xlane.xlu0 %55 }
  0x95   :  { %v101_v58 = vmul.f32 0.0625, %v56_v42  ;;  %v203_v26 = vmul.f32 0.0625, %v157_v39 }
  0x97   :  { %v116_v63 = vadd.f32 %v101_v58, %v100_v62 }
  0x98   :  { %v62_v43 = vpop.xlane.xlu1 %61  ;;  %v160_v44 = vpop.xlane.xlu0 %159 }
  0x99   :  { %v103_v11 = vmul.f32 0.0625, %v62_v43  ;;  %v117_v12 = vadd.f32 %v116_v63, %v102_v10  ;;  %v204_v20 = vmul.f32 0.0625, %v160_v44 }
  0x9b   :  { %v118_v27 = vadd.f32 %v117_v12, %v103_v11  ;;  %v219_v42 = vadd.f32 %v204_v20, %v203_v26 }
  0x9c   :  { %v65_v47 = vpop.xlane.xlu1 %64  ;;  %v163_v48 = vpop.xlane.xlu0 %162 }
  0x9d   :  { %v104_v22 = vmul.f32 0.0625, %v65_v47  ;;  %v205_v30 = vmul.f32 0.0625, %v163_v48 }
  0x9f   :  { %v119_v6 = vadd.f32 %v118_v27, %v104_v22  ;;  %v220_v58 = vadd.f32 %v219_v42, %v205_v30 }
  0xa0   :  { %v68_v50 = vpop.xlane.xlu1 %67  ;;  %v166_v52 = vpop.xlane.xlu0 %165 }
  0xa1   :  { %v105_v32 = vmul.f32 0.0625, %v68_v50  ;;  %v206_v61 = vmul.f32 0.0625, %v166_v52 }
  0xa3   :  { %v120_v62 = vadd.f32 %v119_v6, %v105_v32  ;;  %v221_v10 = vadd.f32 %v220_v58, %v206_v61 }
  0xa4   :  { %v71_v54 = vpop.xlane.xlu1 %70  ;;  %v169_v55 = vpop.xlane.xlu0 %168 }
  0xa5   :  { %v106_v38 = vmul.f32 0.0625, %v71_v54  ;;  %v207_v23 = vmul.f32 0.0625, %v169_v55 }
  0xa7   :  { %v121_v15 = vadd.f32 %v120_v62, %v106_v38  ;;  %v222_v39 = vadd.f32 %v221_v10, %v207_v23 }
  0xa8   :  { %v74_v59 = vpop.xlane.xlu1 %73  ;;  %v172_v60 = vpop.xlane.xlu0 %171 }
  0xa9   :  { %v107_v36 = vmul.f32 0.0625, %v74_v59  ;;  %v208_v44 = vmul.f32 0.0625, %v172_v60 }
  0xab   :  { %v122_v11 = vadd.f32 %v121_v15, %v107_v36  ;;  %v223_v20 = vadd.f32 %v222_v39, %v208_v44 }
  0xac   :  { %v77_v5 = vpop.xlane.xlu1 %76  ;;  %v175_v7 = vpop.xlane.xlu0 %174 }
  0xad   :  { %v108_v47 = vmul.f32 0.0625, %v77_v5  ;;  %v209_v48 = vmul.f32 0.0625, %v175_v7 }
  0xaf   :  { %v123_v22 = vadd.f32 %v122_v11, %v108_v47  ;;  %v224_v26 = vadd.f32 %v223_v20, %v209_v48 }
  0xb0   :  { %v80_v16 = vpop.xlane.xlu1 %79  ;;  %v178_v18 = vpop.xlane.xlu0 %177 }
  0xb1   :  { %v109_v50 = vmul.f32 0.0625, %v80_v16  ;;  %v210_v52 = vmul.f32 0.0625, %v178_v18 }
  0xb3   :  { %v124_v6 = vadd.f32 %v123_v22, %v109_v50  ;;  %v225_v61 = vadd.f32 %v224_v26, %v210_v52 }
  0xb4   :  { %v83_v33 = vpop.xlane.xlu1 %82  ;;  %v181_v34 = vpop.xlane.xlu0 %180 }
  0xb5   :  { %v110_v54 = vmul.f32 0.0625, %v83_v33  ;;  %v211_v55 = vmul.f32 0.0625, %v181_v34 }
  0xb7   :  { %v125_v32 = vadd.f32 %v124_v6, %v110_v54  ;;  %v226_v23 = vadd.f32 %v225_v61, %v211_v55 }
  0xb8   :  { %v86_v43 = vpop.xlane.xlu1 %85  ;;  %v184_v63 = vpop.xlane.xlu0 %183 }
  0xb9   :  { %v111_v59 = vmul.f32 0.0625, %v86_v43  ;;  %v212_v60 = vmul.f32 0.0625, %v184_v63 }
  0xbb   :  { %v126_v15 = vadd.f32 %v125_v32, %v111_v59  ;;  %v227_v58 = vadd.f32 %v226_v23, %v212_v60 }
  0xbc   :  { %v89_v12 = vpop.xlane.xlu1 %88  ;;  %v187_v46 = vpop.xlane.xlu0 %186 }
  0xbd   :  { %v112_v5 = vmul.f32 0.0625, %v89_v12  ;;  %v213_v7 = vmul.f32 0.0625, %v187_v46 }
  0xbf   :  { %v127_v62 = vadd.f32 %v126_v15, %v112_v5  ;;  %v228_v36 = vadd.f32 %v227_v58, %v213_v7 }
  0xc0   :  { %v92_v27 = vpop.xlane.xlu1 %91  ;;  %v190_v30 = vpop.xlane.xlu0 %189 }
  0xc1   :  { %v113_v16 = vmul.f32 0.0625, %v92_v27  ;;  %v214_v18 = vmul.f32 0.0625, %v190_v30 }
  0xc3   :  { %v128_v10 = vadd.f32 %v127_v62, %v113_v16  ;;  %v229_v47 = vadd.f32 %v228_v36, %v214_v18 }
  0xc4   :  { %v95_v42 = vpop.xlane.xlu1 %94  ;;  %v193_v38 = vpop.xlane.xlu0 %192 }
  0xc5   :  { %v114_v33 = vmul.f32 0.0625, %v95_v42  ;;  %v215_v34 = vmul.f32 0.0625, %v193_v38 }
  0xc7   :  { %v129_v39 = vadd.f32 %v128_v10, %v114_v33  ;;  %v230_v48 = vadd.f32 %v229_v47, %v215_v34 }
  0xc8   :  { %v98_v43 = vpop.xlane.xlu1 %97  ;;  %v196_v44 = vpop.xlane.xlu0 %195 }
  0xc9   :  { %v115_v11 = vmul.f32 0.0625, %v98_v43  ;;  %v216_v63 = vmul.f32 0.0625, %v196_v44 }
  0xcb   :  { %v130_v50 = vadd.f32 %v129_v39, %v115_v11  ;;  %v231_v22 = vadd.f32 %v230_v48, %v216_v63 }
  0xcc   :  { %v202_v12 = vpop.xlane.xlu1 %201  ;;  %v199_v46 = vpop.xlane.xlu0 %198 }
  0xcd   :  { %v131_v20 = vrot.slane %v130_v50, 4  ;;  %v218_v52 = vmul.f32 0.0625, %v202_v12  ;;  %v217_v54 = vmul.f32 0.0625, %v199_v46 }
  0xcf   :  { %v132_v26 = vadd.f32 %v131_v20, %v130_v50  ;;  %v232_v6 = vadd.f32 %v231_v22, %v217_v54 }
  0xd0   :  { %v282_v55 = vpop.xlane.xlu1 %281  ;;  %v279_v59 = vpop.xlane.xlu0 %278 }
  0xd1   :  { %v133_v27 = vrot.slane %v132_v26, 2  ;;  %v233_v30 = vadd.f32 %v232_v6, %v218_v52  ;;  %v326_v50 = vmul.f32 0.0625, %v282_v55  ;;  %v325_v12 = vmul.f32 0.0625, %v279_v59 }
  0xd3   :  { %v134_v61 = vadd.f32 %v133_v27, %v132_v26  ;;  %v234_v32 = vrot.slane %v233_v30, 4  ;;  %v341_v52 = vadd.f32 %v326_v50, %v325_v12 }
  0xd4   :  { %v381_v60 = vpop.xlane.xlu1 %380  ;;  %v285_v5 = vpop.xlane.xlu0 %284 }
  0xd5   :  { %v135_v23 = vrot.slane %v134_v61, 1  ;;  %v235_v15 = vadd.f32 %v234_v32, %v233_v30  ;;  %v327_v22 = vmul.f32 0.0625, %v285_v5  ;;  %v427_v54 = vmul.f32 0.0625, %v381_v60 }
  0xd7   :  { %v136_v7 = vadd.f32 %v135_v23, %v134_v61  ;;  %v236_v16 = vrot.slane %v235_v15, 2  ;;  %v342_v27 = vadd.f32 %v341_v52, %v327_v22 }
  0xd8   :  { %v288_v42 = vpop.xlane.xlu1 %287  ;;  %v384_v38 = vpop.xlane.xlu0 %383 }
  0xd9   :  { %v237_v58 = vadd.f32 %v236_v16, %v235_v15  ;;  %v12804_v62 = vmul.f32 0.0078125, %v136_v7  ;;  %v328_v30 = vmul.f32 0.0625, %v288_v42  ;;  %v428_v61 = vmul.f32 0.0625, %v384_v38 }
  0xdb   :  { %v238_v18 = vrot.slane %v237_v58, 1  ;;  %v241_v34 = vmul.f32 %v12804_v62, %v12804_v62  ;;  %v247_v32 = vsub.f32 %v12484_v0, %v12804_v62  ;;  %v248_v55 = vsub.f32 %v12510_v9, %v12804_v62 }
  0xdc   :  { %v291_v33 = vpop.xlane.xlu1 %290  ;;  %v387_v36 = vpop.xlane.xlu0 %386  ;;  %v245_v59 = vsub.f32 %v12489_v1, %v12804_v62  ;;  %v246_v60 = vsub.f32 %v12494_v2, %v12804_v62  ;;  %v249_v15 = vsub.f32 %v12520_v13, %v12804_v62  ;;  %v250_v7 = vsub.f32 %v12530_v17, %v12804_v62 }
  0xdd   :  { %v239_v10 = vadd.f32 %v238_v18, %v237_v58  ;;  %v329_v23 = vmul.f32 0.0625, %v291_v33  ;;  %v253_v0 = vsub.f32 %v12559_v28, %v12804_v62  ;;  %v254_v9 = vsub.f32 %v12564_v29, %v12804_v62 }
  0xde   :  { %v343_v58 = vadd.f32 %v342_v27, %v328_v30  ;;  %v443_v18 = vadd.f32 %v428_v61, %v427_v54  ;;  %v251_v50 = vsub.f32 %v12540_v21, %v12804_v62  ;;  %v252_v52 = vsub.f32 %v12550_v25, %v12804_v62 }
  0xdf   :  { %v240_v43 = vmul.f32 0.0078125, %v239_v10  ;;  %v257_v54 = vsub.f32 %v12600_v45, %v12804_v62 }
  0xe0   :  { %v294_v44 = vpop.xlane.xlu1 %293  ;;  %v390_v47 = vpop.xlane.xlu0 %389 }
  0xe1   :  { %v242_v39 = vsub.f32 %v240_v43, %v241_v34  ;;  %v344_v43 = vadd.f32 %v343_v58, %v329_v23 }
  0xe3   :  { %v243_v11 = vadd.f32 1e-07, %v242_v39  ;;  %v429_v39 = vmul.f32 0.0625, %v387_v36  ;;  %v258_v36 = vsub.f32 %v12610_v49, %v12804_v62 }
  0xe4   :  { %v297_v63 = vpop.xlane.xlu1 %296  ;;  %v12808_v48 = vpop.xlane.xlu0 %392 }
  0xe5   :  { %11683 = vrsqrt.f32 %v243_v11  ;;  %v330_v11 = vmul.f32 0.0625, %v294_v44  ;;  %v430_v44 = vmul.f32 0.0625, %v390_v47  ;;  %v331_v27 = vmul.f32 0.0625, %v297_v63 }
  0xe6   :  { %v444_v45 = vadd.f32 %v443_v18, %v429_v39  ;;  %v431_v49 = vmul.f32 0.0625, %v12808_v48 }
  0xe8   :  { %v300_v46 = vpop.xlane.xlu1 %299  ;;  %v12810_v20 = vpop.xlane.xlu0 %395 }
  0xe9   :  { %v332_v47 = vmul.f32 0.0625, %v300_v46 }
  0xec   :  { %v12812_v26 = vpop.xlane.xlu1 %302  ;;  %v12814_v6 = vpop.xlane.xlu0 %398 }
  0xed   :  { %v333_v48 = vmul.f32 0.0625, %v12812_v26  ;;  %v433_v18 = vmul.f32 0.0625, %v12814_v6  ;;  %v260_v26 = vsub.f32 %v12630_v57, %v12804_v62 }
  0xef   :  { %v12824_v5 = vpop.eup %11683 }
  0xf0   :  { %v306_v16 = vpop.xlane.xlu1 %305  ;;  %v12834_v42 = vpop.xlane.xlu0 %401  ;;  %v263_v1 = vmul.f32 %v12824_v5, %v247_v32  ;;  %v264_v2 = vmul.f32 %v12824_v5, %v248_v55  ;;  %v261_v38 = vmul.f32 %v12824_v5, %v245_v59  ;;  %v262_v13 = vmul.f32 %v12824_v5, %v246_v60 }
  0xf1   :  { %v265_v17 = vmul.f32 %v12824_v5, %v249_v15  ;;  %v266_v28 = vmul.f32 %v12824_v5, %v250_v7  ;;  %v269_v29 = vmul.f32 %v12824_v5, %v253_v0  ;;  %v270_v34 = vmul.f32 %v12824_v5, %v254_v9 }
  0xf2   :  { %v504_v33 = vpack.c.bf16 %v264_v2, %v263_v1  ;;  %v503_v10 = vpack.c.bf16 %v262_v13, %v261_v38  ;;  %v267_v30 = vmul.f32 %v12824_v5, %v251_v50  ;;  %v268_v32 = vmul.f32 %v12824_v5, %v252_v52 }
  0xf3   :  { %v505_v21 = vpack.c.bf16 %v266_v28, %v265_v17  ;;  %v507_v61 = vpack.c.bf16 %v270_v34, %v269_v29  ;;  %v273_v25 = vmul.f32 %v12824_v5, %v257_v54  ;;  %v274_v23 = vmul.f32 %v12824_v5, %v258_v36 }
  0xf4   :  { %v309_v12 = vpop.xlane.xlu1 %308  ;;  %1043 = vrot.lane.b32.xlu1 %v504_v33, %s12450_s0  ;;  %1041 = vrot.lane.b32.xlu0 %v503_v10, %s12450_s0  ;;  %v405_v22 = vpop.xlane.xlu0 %404  ;;  %v345_v55 = vadd.f32 %v344_v43, %v330_v11  ;;  %v255_v60 = vsub.f32 %v12580_v37, %v12804_v62  ;;  %v256_v15 = vsub.f32 %v12590_v41, %v12804_v62  ;;  %v432_v9 = vmul.f32 0.0625, %v12810_v20 }
  0xf5   :  { %10667 = vmatprep.mubr.msk.bf16.mxu0 %vm523_vm2, %v503_v10  ;;  %v445_v7 = vadd.f32 %v444_v45, %v430_v44  ;;  %v506_v46 = vpack.c.bf16 %v268_v32, %v267_v30  ;;  %v509_v1 = vpack.c.bf16 %v274_v23, %v273_v25  ;;  %v334_v37 = vmul.f32 0.0625, %v306_v16 }
  0xf6   :  { %10668 = vmatmul.mubr.msk.bf16.vlgmr.msra.gmra.mrb[0].mxu0 %vm523_vm2, %v504_v33  ;;  %v346_v0 = vadd.f32 %v345_v55, %v331_v27  ;;  %v271_v2 = vmul.f32 %v12824_v5, %v255_v60  ;;  %v272_v38 = vmul.f32 %v12824_v5, %v256_v15  ;;  %v259_v20 = vsub.f32 %v12620_v53, %v12804_v62 }
  0xf7   :  { %10671 = vmatprep.mubr.msk.bf16.mxu0 %vm523_vm2, %v505_v21  ;;  %v446_v13 = vadd.f32 %v445_v7, %v431_v49  ;;  %v434_v10 = vmul.f32 0.0625, %v12834_v42  ;;  %v335_v29 = vmul.f32 0.0625, %v309_v12  ;;  %v276_v34 = vmul.f32 %v12824_v5, %v260_v26 }
  0xf8   :  { %v312_v63 = vpop.xlane.xlu1 %311  ;;  %1045 = vrot.lane.b32.xlu1 %v505_v21, %s12450_s0  ;;  %1049 = vrot.lane.b32.xlu0 %v507_v61, %s12450_s0  ;;  %v408_v59 = vpop.xlane.xlu0 %407  ;;  %v347_v58 = vadd.f32 %v346_v0, %v332_v47  ;;  %v508_v6 = vpack.c.bf16 %v272_v38, %v271_v2  ;;  %v275_v16 = vmul.f32 %v12824_v5, %v259_v20  ;;  %v435_v11 = vmul.f32 0.0625, %v405_v22 }
  0xf9   :  { %v447_v28 = vadd.f32 %v446_v13, %v432_v9  ;;  %v336_v50 = vmul.f32 0.0625, %v312_v63  ;;  %v436_v12 = vmul.f32 0.0625, %v408_v59 }
  0xfa   :  { %v348_v33 = vadd.f32 %v347_v58, %v333_v48  ;;  %v510_v54 = vpack.c.bf16 %v276_v34, %v275_v16 }
  0xfb   :  { %v448_v43 = vadd.f32 %v447_v28, %v433_v18 }
  0xfc   :  { %v315_v17 = vpop.xlane.xlu1 %314  ;;  %1047 = vrot.lane.b32.xlu1 %v506_v46, %s12450_s0  ;;  %1053 = vrot.lane.b32.xlu0 %v509_v1, %s12450_s0  ;;  %v411_v41 = vpop.xlane.xlu0 %410  ;;  %v349_v39 = vadd.f32 %v348_v33, %v334_v37 }
  0xfd   :  { %v449_v62 = vadd.f32 %v448_v43, %v434_v10  ;;  %v337_v52 = vmul.f32 0.0625, %v315_v17  ;;  %v437_v27 = vmul.f32 0.0625, %v411_v41 }
  0xfe   :  { %10672 = vmatmul.mubr.msk.bf16.gmra.mrb[4].mxu0 %vm523_vm2, %v506_v46  ;;  %v350_v42 = vadd.f32 %v349_v39, %v335_v29 }
  0xff   :  { %10675 = vmatprep.mubr.msk.bf16.mxu0 %vm523_vm2, %v507_v61  ;;  %v450_v36 = vadd.f32 %v449_v62, %v435_v11 }
 0x100   :  { %v318_v53 = vpop.xlane.xlu1 %317  ;;  %1051 = vrot.lane.b32.xlu1 %v508_v6, %s12450_s0  ;;  %v414_v57 = vpop.xlane.xlu0 %413  ;;  %v351_v44 = vadd.f32 %v350_v42, %v336_v50 }
 0x101   :  { %v338_v21 = vmul.f32 0.0625, %v318_v53  ;;  %v451_v30 = vadd.f32 %v450_v36, %v436_v12  ;;  %v438_v61 = vmul.f32 0.0625, %v414_v57 }
 0x102   :  { %v352_v32 = vadd.f32 %v351_v44, %v337_v52 }
 0x103   :  { %v452_v23 = vadd.f32 %v451_v30, %v437_v27 }
 0x104   :  { %v321_v5 = vpop.xlane.xlu1 %320  ;;  %1055 = vrot.lane.b32.xlu1 %v510_v54, %s12450_s0  ;;  %v417_v22 = vpop.xlane.xlu0 %416  ;;  %v353_v45 = vadd.f32 %v352_v32, %v338_v21 }
 0x105   :  { %v339_v25 = vmul.f32 0.0625, %v321_v5  ;;  %v439_v55 = vmul.f32 0.0625, %v417_v22  ;;  %v453_v63 = vadd.f32 %v452_v23, %v438_v61 }
 0x106   :  { %10676 = vmatmul.mubr.msk.bf16.gmra.mrb[8].mxu0 %vm523_vm2, %v508_v6 }
 0x107   :  { %10679 = vmatprep.mubr.msk.bf16.mxu0 %vm523_vm2, %v509_v1  ;;  %v354_v59 = vadd.f32 %v353_v45, %v339_v25  ;;  %v454_v7 = vadd.f32 %v453_v63, %v439_v55  ;;  %v18519_v63 = vld [vmem:[#allocation6_spill] sm:$0xff] }
 0x108   :  { %v324_v49 = vpop.xlane.xlu1 %323  ;;  %v420_v47 = vpop.xlane.xlu0 %419 }
 0x109   :  { %v340_v60 = vmul.f32 0.0625, %v324_v49  ;;  %v440_v15 = vmul.f32 0.0625, %v420_v47 }
 0x10b   :  { %v355_v0 = vadd.f32 %v354_v59, %v340_v60  ;;  %v455_v2 = vadd.f32 %v454_v7, %v440_v15  ;;  %v18520_v60 = vld [vmem:[#allocation7_spill] sm:$0xff] }
 0x10c   :  { %v423_v9 = vpop.xlane.xlu0 %422  ;;  %v426_v48 = vpop.xlane.xlu1 %425 }
 0x10d   :  { %v356_v46 = vrot.slane %v355_v0, 4  ;;  %v441_v38 = vmul.f32 0.0625, %v423_v9  ;;  %v442_v13 = vmul.f32 0.0625, %v426_v48 }
 0x10e   :  { %10680 = vmatmul.mubr.msk.bf16.gmra.mrb[12].mxu0 %vm523_vm2, %v510_v54 }
 0x10f   :  { %v357_v58 = vadd.f32 %v356_v46, %v355_v0  ;;  %v456_v18 = vadd.f32 %v455_v2, %v441_v38 }
 0x111   :  { %v358_v37 = vrot.slane %v357_v58, 2  ;;  %v457_v1 = vadd.f32 %v456_v18, %v442_v13 }
 0x113   :  { %v359_v17 = vadd.f32 %v358_v37, %v357_v58  ;;  %v458_v41 = vrot.slane %v457_v1, 4 }
 0x115   :  { %v360_v20 = vrot.slane %v359_v17, 1  ;;  %v459_v26 = vadd.f32 %v458_v41, %v457_v1 }
 0x117   :  { %v361_v28 = vadd.f32 %v360_v20, %v359_v17  ;;  %v460_v33 = vrot.slane %v459_v26, 2 }
 0x119   :  { %v461_v10 = vadd.f32 %v460_v33, %v459_v26  ;;  %v362_v29 = vmul.f32 0.0078125, %v361_v28 }
 0x11b   :  { %v462_v6 = vrot.slane %v461_v10, 1  ;;  %v465_v43 = vmul.f32 %v362_v29, %v362_v29  ;;  %v471_v50 = vsub.f32 %v12660_v8, %v362_v29  ;;  %v472_v53 = vsub.f32 %v12670_v14, %v362_v29 }
 0x11c   :  { %v469_v57 = vsub.f32 %v12649_v4, %v362_v29  ;;  %v470_v62 = vsub.f32 %v12644_v3, %v362_v29  ;;  %v473_v12 = vsub.f32 %v12680_v19, %v362_v29  ;;  %v474_v52 = vsub.f32 %v12690_v24, %v362_v29 }
 0x11d   :  { %v463_v16 = vadd.f32 %v462_v6, %v461_v10  ;;  %v475_v54 = vsub.f32 %v12700_v31, %v362_v29  ;;  %v476_v36 = vsub.f32 %v12710_v35, %v362_v29  ;;  %v479_v3 = vsub.f32 %v12740_v51, %v362_v29  ;;  %v18516_v31 = vld [vmem:[#allocation5_spill] sm:$0xff] }
 0x11e   :  { %v480_v19 = vsub.f32 %v12750_v56, %v362_v29  ;;  %v477_v24 = vsub.f32 %v12720_v40, %v362_v29  ;;  %v478_v35 = vsub.f32 %v18516_v31, %v362_v29  ;;  %v18517_v56 = vld [vmem:[#allocation8_spill] sm:$0xff]  ;;  %v18518_v40 = vld [vmem:[#allocation9_spill] sm:$0xff]  ;;  %v481_v59 = vsub.f32 %v18519_v63, %v362_v29 }
 0x11f   :  { %v464_v34 = vmul.f32 0.0078125, %v463_v16  ;;  %v483_v49 = vsub.f32 %v18517_v56, %v362_v29  ;;  %v484_v47 = vsub.f32 %v18518_v40, %v362_v29  ;;  %v482_v15 = vsub.f32 %v18520_v60, %v362_v29 }
 0x121   :  { %v466_v39 = vsub.f32 %v464_v34, %v465_v43 }
 0x123   :  { %v467_v11 = vadd.f32 1e-07, %v466_v39  ;;  %v12940_v39 = vld [vmem:[%s18394_s2] ss:$0 sm:$0xff] }
 0x125   :  { %11685 = vrsqrt.f32 %v467_v11 }
 0x12f   :  { %v11686_v42 = vpop.eup %11685 }
 0x130   :  { %v487_v44 = vmul.f32 %v11686_v42, %v471_v50  ;;  %v488_v27 = vmul.f32 %v11686_v42, %v472_v53  ;;  %v485_v21 = vmul.f32 %v11686_v42, %v469_v57  ;;  %v486_v5 = vmul.f32 %v11686_v42, %v470_v62 }
 0x131   :  { %v489_v8 = vmul.f32 %v11686_v42, %v473_v12  ;;  %v490_v22 = vmul.f32 %v11686_v42, %v474_v52  ;;  %v491_v4 = vmul.f32 %v11686_v42, %v475_v54  ;;  %v492_v32 = vmul.f32 %v11686_v42, %v476_v36 }
 0x132   :  { %v512_v14 = vpack.c.bf16 %v488_v27, %v487_v44  ;;  %v511_v30 = vpack.c.bf16 %v486_v5, %v485_v21  ;;  %v495_v25 = vmul.f32 %v11686_v42, %v479_v3  ;;  %v496_v23 = vmul.f32 %v11686_v42, %v480_v19 }
 0x133   :  { %v513_v61 = vpack.c.bf16 %v490_v22, %v489_v8  ;;  %v514_v45 = vpack.c.bf16 %v492_v32, %v491_v4  ;;  %v493_v55 = vmul.f32 %v11686_v42, %v477_v24  ;;  %v494_v51 = vmul.f32 %v11686_v42, %v478_v35 }
 0x134   :  { %1059 = vrot.lane.b32.xlu1 %v512_v14, %s12450_s0  ;;  %1057 = vrot.lane.b32.xlu0 %v511_v30, %s12450_s0  ;;  %v516_v7 = vpack.c.bf16 %v496_v23, %v495_v25  ;;  %v499_v0 = vmul.f32 %v11686_v42, %v483_v49  ;;  %v500_v48 = vmul.f32 %v11686_v42, %v484_v47 }
 0x135   :  { %10683 = vmatprep.mubr.msk.bf16.mxu0 %vm523_vm2, %v511_v30  ;;  %v515_v9 = vpack.c.bf16 %v494_v51, %v493_v55  ;;  %v497_v46 = vmul.f32 %v11686_v42, %v481_v59  ;;  %v498_v2 = vmul.f32 %v11686_v42, %v482_v15 }
 0x136   :  { %10684 = vmatmul.mubr.msk.bf16.gmra.mrb[16].mxu0 %vm523_vm2, %v512_v14  ;;  %v518_v38 = vpack.c.bf16 %v500_v48, %v499_v0 }
 0x137   :  { %10687 = vmatprep.mubr.msk.bf16.mxu0 %vm523_vm2, %v513_v61  ;;  %v517_v13 = vpack.c.bf16 %v498_v2, %v497_v46 }
 0x138   :  { %1063 = vrot.lane.b32.xlu1 %v514_v45, %s12450_s0  ;;  %1061 = vrot.lane.b32.xlu0 %v513_v61, %s12450_s0 }
 0x13c   :  { %1067 = vrot.lane.b32.xlu1 %v516_v7, %s12450_s0  ;;  %1065 = vrot.lane.b32.xlu0 %v515_v9, %s12450_s0 }
 0x13e   :  { %10688 = vmatmul.mubr.msk.bf16.gmra.mrb[20].mxu0 %vm523_vm2, %v514_v45 }
 0x13f   :  { %10691 = vmatprep.mubr.msk.bf16.mxu0 %vm523_vm2, %v515_v9 }
 0x140   :  { %1071 = vrot.lane.b32.xlu1 %v518_v38, %s12450_s0  ;;  %1069 = vrot.lane.b32.xlu0 %v517_v13, %s12450_s0 }
 0x146   :  { %10692 = vmatmul.mubr.msk.bf16.gmra.mrb[24].mxu0 %vm523_vm2, %v516_v7 }
 0x147   :  { %10695 = vmatprep.mubr.msk.bf16.mxu0 %vm523_vm2, %v517_v13 }
 0x14e   :  { %10696 = vmatmul.mubr.msk.bf16.gmra.mrb[28].mxu0 %vm523_vm2, %v518_v38 }
 0x166   :  { %v1044_v58 = vpop.permute.xlu1 %1043  ;;  %v1042_v18 = vpop.permute.xlu0 %1041 }
 0x167   :  { %10701 = vmatprep.mubr.msk.bf16.mxu1 %vm523_vm2, %v1042_v18 }
 0x168   :  { %10702 = vmatmul.mubr.msk.bf16.vlgmr.msra.gmra.mrb[0].mxu1 %vm523_vm2, %v1044_v58 }
 0x16a   :  { %v1046_v37 = vpop.permute.xlu1 %1045  ;;  %v1050_v17 = vpop.permute.xlu0 %1049 }
 0x16b   :  { %10705 = vmatprep.mubr.msk.bf16.mxu1 %vm523_vm2, %v1046_v37 }
 0x16e   :  { %v1048_v1 = vpop.permute.xlu1 %1047  ;;  %v1054_v20 = vpop.permute.xlu0 %1053 }
 0x170   :  { %10706 = vmatmul.mubr.msk.bf16.gmra.mrb[4].mxu1 %vm523_vm2, %v1048_v1 }
 0x171   :  { %10709 = vmatprep.mubr.msk.bf16.mxu1 %vm523_vm2, %v1050_v17 }
 0x172   :  { %v1052_v41 = vpop.permute.xlu1 %1051 }
 0x176   :  { %v1056_v26 = vpop.permute.xlu1 %1055 }
 0x178   :  { %10710 = vmatmul.mubr.msk.bf16.gmra.mrb[8].mxu1 %vm523_vm2, %v1052_v41 }
 0x179   :  { %10713 = vmatprep.mubr.msk.bf16.mxu1 %vm523_vm2, %v1054_v20 }
 0x180   :  { %10714 = vmatmul.mubr.msk.bf16.gmra.mrb[12].mxu1 %vm523_vm2, %v1056_v26 }
 0x1a6   :  { %v1060_v28 = vpop.permute.xlu1 %1059  ;;  %v1058_v33 = vpop.permute.xlu0 %1057 }
 0x1a7   :  { %10717 = vmatprep.mubr.msk.bf16.mxu1 %vm523_vm2, %v1058_v33 }
 0x1a8   :  { %10718 = vmatmul.mubr.msk.bf16.gmra.mrb[16].mxu1 %vm523_vm2, %v1060_v28  ;;  %v11663_v28 = vld [vmem:[%s18393_s1 + $0x10] sm:$0xff]  }
 0x1a9   :  { %10733 = vmatprep.subr.bf16.mxu0 %v11663_v28 }
 0x1aa   :  { %v1062_v10 = vpop.permute.xlu0 %1061  ;;  %v1064_v29 = vpop.permute.xlu1 %1063  ;;  %10734 = vmatpush3.bf16.msra.mxu0 %v11663_v28 }
 0x1ab   :  { %10721 = vmatprep.mubr.msk.bf16.mxu1 %vm523_vm2, %v1062_v10 }
 0x1ae   :  { %v1066_v6 = vpop.permute.xlu0 %1065  ;;  %v1068_v16 = vpop.permute.xlu1 %1067 }
 0x1b0   :  { %10722 = vmatmul.mubr.msk.bf16.gmra.mrb[20].mxu1 %vm523_vm2, %v1064_v29 }
 0x1b1   :  { %10725 = vmatprep.mubr.msk.bf16.mxu1 %vm523_vm2, %v1066_v6 }
 0x1b2   :  { %v1070_v34 = vpop.permute.xlu0 %1069  ;;  %v1072_v43 = vpop.permute.xlu1 %1071 }
 0x1b8   :  { %10726 = vmatmul.mubr.msk.bf16.gmra.mrb[24].mxu1 %vm523_vm2, %v1068_v16 }
 0x1b9   :  { %10729 = vmatprep.mubr.msk.bf16.mxu1 %vm523_vm2, %v1070_v34 }
 0x1c0   :  { %10730 = vmatmul.mubr.msk.bf16.gmra.mrb[28].mxu1 %vm523_vm2, %v1072_v43 }
 0x1c9   :  { %v10669_v11 = vpop.f32.mrb[0].mxu0 }
 0x1ca   :  { %v12943_v50 = vadd.f32 %v10669_v11, %v12940_v39  ;;  %v610_v53 = vpop.f32.mrb[1].mxu0 }
 0x1cb   :  { %v12946_v57 = vadd.f32 %v12940_v39, %v610_v53  ;;  %v10670_v62 = vpop.f32.mrb[2].mxu0 }
 0x1cc   :  { %v739_v42 = vmul.f32 %v12943_v50, %v12943_v50  ;;  %v12951_v12 = vadd.f32 %v10670_v62, %v12940_v39  ;;  %v613_v52 = vpop.f32.mrb[3].mxu0 }
 0x1cd   :  { %v737_v54 = vmul.f32 %v12946_v57, %v12946_v57  ;;  %v12956_v36 = vadd.f32 %v12940_v39, %v613_v52 }
 0x1ce   :  { %v771_v44 = vmul.f32 %v739_v42, %v12943_v50  ;;  %v740_v27 = vmul.f32 %v12951_v12, %v12951_v12 }
 0x1cf   :  { %v769_v21 = vmul.f32 %v737_v54, %v12946_v57  ;;  %v738_v5 = vmul.f32 %v12956_v36, %v12956_v36 }
 0x1d0   :  { %v803_v8 = vmul.f32 0.044715, %v771_v44  ;;  %v772_v22 = vmul.f32 %v740_v27, %v12951_v12 }
 0x1d1   :  { %v801_v14 = vmul.f32 0.044715, %v769_v21  ;;  %v770_v30 = vmul.f32 %v738_v5, %v12956_v36  ;;  %v10673_v4 = vpop.f32.mrb[4].mxu0 }
 0x1d2   :  { %v835_v32 = vadd.f32 %v803_v8, %v12943_v50  ;;  %v804_v3 = vmul.f32 0.044715, %v772_v22  ;;  %v12968_v19 = vadd.f32 %v10673_v4, %v12940_v39  ;;  %v626_v24 = vpop.f32.mrb[5].mxu0 }
 0x1d3   :  { %v833_v31 = vadd.f32 %v801_v14, %v12946_v57  ;;  %v802_v35 = vmul.f32 0.044715, %v770_v30  ;;  %v12972_v61 = vadd.f32 %v12940_v39, %v626_v24  ;;  %v10674_v25 = vpop.f32.mrb[6].mxu0 }
 0x1d4   :  { %v867_v23 = vmul.f32 0.7978846, %v835_v32  ;;  %v836_v45 = vadd.f32 %v804_v3, %v12951_v12  ;;  %v743_v55 = vmul.f32 %v12968_v19, %v12968_v19  ;;  %v12978_v51 = vadd.f32 %v10674_v25, %v12940_v39  ;;  %v629_v56 = vpop.f32.mrb[7].mxu0 }
 0x1d5   :  { %v865_v49 = vmul.f32 0.7978846, %v833_v31  ;;  %v834_v40 = vadd.f32 %v802_v35, %v12956_v36  ;;  %v741_v47 = vmul.f32 %v12972_v61, %v12972_v61  ;;  %v12984_v63 = vadd.f32 %v12940_v39, %v629_v56 }
 0x1d6   :  { %11687 = vtanh.f32 %v867_v23  ;;  %v868_v59 = vmul.f32 0.7978846, %v836_v45  ;;  %v775_v60 = vmul.f32 %v743_v55, %v12968_v19  ;;  %v744_v15 = vmul.f32 %v12978_v51, %v12978_v51 }
 0x1d7   :  { %11689 = vtanh.f32 %v865_v49  ;;  %v866_v7 = vmul.f32 0.7978846, %v834_v40  ;;  %v773_v0 = vmul.f32 %v741_v47, %v12972_v61  ;;  %v742_v9 = vmul.f32 %v12984_v63, %v12984_v63 }
 0x1d8   :  { %11691 = vtanh.f32 %v868_v59  ;;  %v807_v48 = vmul.f32 0.044715, %v775_v60  ;;  %v776_v46 = vmul.f32 %v744_v15, %v12978_v51 }
 0x1d9   :  { %v805_v2 = vmul.f32 0.044715, %v773_v0  ;;  %v774_v38 = vmul.f32 %v742_v9, %v12984_v63  ;;  %v10677_v13 = vpop.f32.mrb[8].mxu0  ;;  %11693 = vtanh.f32 %v866_v7 }
 0x1da   :  { %v839_v58 = vadd.f32 %v807_v48, %v12968_v19  ;;  %v808_v18 = vmul.f32 0.044715, %v776_v46  ;;  %v12996_v37 = vadd.f32 %v10677_v13, %v12940_v39  ;;  %v642_v1 = vpop.f32.mrb[9].mxu0 }
 0x1db   :  { %v837_v17 = vadd.f32 %v805_v2, %v12972_v61  ;;  %v806_v41 = vmul.f32 0.044715, %v774_v38  ;;  %v13000_v20 = vadd.f32 %v12940_v39, %v642_v1  ;;  %v10678_v26 = vpop.f32.mrb[10].mxu0 }
 0x1dc   :  { %v871_v33 = vmul.f32 0.7978846, %v839_v58  ;;  %v840_v10 = vadd.f32 %v808_v18, %v12978_v51  ;;  %v747_v29 = vmul.f32 %v12996_v37, %v12996_v37  ;;  %v13009_v6 = vadd.f32 %v10678_v26, %v12940_v39  ;;  %v645_v16 = vpop.f32.mrb[11].mxu0 }
 0x1dd   :  { %v869_v34 = vmul.f32 0.7978846, %v837_v17  ;;  %v838_v43 = vadd.f32 %v806_v41, %v12984_v63  ;;  %v745_v11 = vmul.f32 %v13000_v20, %v13000_v20  ;;  %v13015_v53 = vadd.f32 %v12940_v39, %v645_v16 }
 0x1de   :  { %11695 = vtanh.f32 %v871_v33  ;;  %v872_v62 = vmul.f32 0.7978846, %v840_v10  ;;  %v779_v42 = vmul.f32 %v747_v29, %v12996_v37  ;;  %v748_v52 = vmul.f32 %v13009_v6, %v13009_v6 }
 0x1df   :  { %11697 = vtanh.f32 %v869_v34  ;;  %v870_v54 = vmul.f32 0.7978846, %v838_v43  ;;  %v777_v44 = vmul.f32 %v745_v11, %v13000_v20  ;;  %v746_v27 = vmul.f32 %v13015_v53, %v13015_v53 }
 0x1e0   :  { %v11688_v21 = vpop.eup %11687  ;;  %11699 = vtanh.f32 %v872_v62  ;;  %v811_v5 = vmul.f32 0.044715, %v779_v42  ;;  %v780_v8 = vmul.f32 %v748_v52, %v13009_v6 }
 0x1e1   :  { %v11690_v22 = vpop.eup %11689  ;;  %v931_v14 = vadd.f32 1.0, %v11688_v21  ;;  %11701 = vtanh.f32 %v870_v54  ;;  %v809_v30 = vmul.f32 0.044715, %v777_v44  ;;  %v778_v4 = vmul.f32 %v746_v27, %v13015_v53  ;;  %v10681_v32 = vpop.f32.mrb[12].mxu0 }
 0x1e2   :  { %v11692_v3 = vpop.eup %11691  ;;  %v843_v24 = vadd.f32 %v811_v5, %v12996_v37  ;;  %v812_v31 = vmul.f32 0.044715, %v780_v8  ;;  %v13027_v35 = vadd.f32 %v10681_v32, %v12940_v39  ;;  %v658_v25 = vpop.f32.mrb[13].mxu0  ;;  %v929_v23 = vadd.f32 1.0, %v11690_v22 }
 0x1e3   :  { %v963_v45 = vmul.f32 0.5, %v931_v14  ;;  %v932_v55 = vadd.f32 1.0, %v11692_v3  ;;  %v841_v56 = vadd.f32 %v809_v30, %v13000_v20  ;;  %v810_v49 = vmul.f32 0.044715, %v778_v4  ;;  %v10682_v40 = vpop.f32.mrb[14].mxu0  ;;  %v11694_v0 = vpop.eup %11693 }
 0x1e4   :  { %v875_v47 = vmul.f32 0.7978846, %v843_v24  ;;  %v844_v59 = vadd.f32 %v812_v31, %v13009_v6  ;;  %v751_v60 = vmul.f32 %v13027_v35, %v13027_v35  ;;  %v13034_v15 = vadd.f32 %v12940_v39, %v658_v25  ;;  %v661_v7 = vpop.f32.mrb[15].mxu0 }
 0x1e5   :  { %v13037_v9 = vmul.f32 %v963_v45, %v12943_v50  ;;  %v964_v48 = vmul.f32 0.5, %v932_v55  ;;  %v873_v46 = vmul.f32 0.7978846, %v841_v56  ;;  %v842_v2 = vadd.f32 %v810_v49, %v13015_v53 }
 0x1e6   :  { %11703 = vtanh.f32 %v875_v47  ;;  %v876_v38 = vmul.f32 0.7978846, %v844_v59  ;;  %v783_v13 = vmul.f32 %v751_v60, %v13027_v35  ;;  %v749_v58 = vmul.f32 %v13034_v15, %v13034_v15 }
 0x1e7   :  { %v13044_v18 = vmul.f32 %v964_v48, %v12951_v12  ;;  %11705 = vtanh.f32 %v873_v46  ;;  %v874_v1 = vmul.f32 0.7978846, %v842_v2  ;;  %v13047_v17 = vadd.f32 %v10682_v40, %v12940_v39 }
 0x1e8   :  { %v11696_v50 = vpop.eup %11695  ;;  %11707 = vtanh.f32 %v876_v38  ;;  %v815_v41 = vmul.f32 0.044715, %v783_v13  ;;  %v781_v26 = vmul.f32 %v749_v58, %v13034_v15  ;;  %v13051_v28 = vadd.f32 %v12940_v39, %v661_v7 }
 0x1e9   :  { %v11698_v33 = vpop.eup %11697  ;;  %11709 = vtanh.f32 %v874_v1  ;;  %v752_v12 = vmul.f32 %v13047_v17, %v13047_v17  ;;  %v930_v29 = vadd.f32 1.0, %v11694_v0  ;;  %v961_v62 = vmul.f32 0.5, %v929_v23 }
 0x1ea   :  { %v11700_v16 = vpop.eup %11699  ;;  %v847_v34 = vadd.f32 %v815_v41, %v13027_v35  ;;  %v813_v43 = vmul.f32 0.044715, %v781_v26  ;;  %v750_v11 = vmul.f32 %v13051_v28, %v13051_v28  ;;  %v933_v44 = vadd.f32 1.0, %v11698_v33 }
 0x1eb   :  { %v11702_v42 = vpop.eup %11701  ;;  %v784_v52 = vmul.f32 %v752_v12, %v13047_v17  ;;  %v962_v54 = vmul.f32 0.5, %v930_v29  ;;  %v935_v27 = vadd.f32 1.0, %v11696_v50  ;;  %v13064_v22 = vmul.f32 %v961_v62, %v12946_v57 }
 0x1ec   :  { %v879_v21 = vmul.f32 0.7978846, %v847_v34  ;;  %v845_v5 = vadd.f32 %v813_v43, %v13034_v15  ;;  %v782_v8 = vmul.f32 %v750_v11, %v13051_v28  ;;  %v934_v4 = vadd.f32 1.0, %v11702_v42 }
 0x1ed   :  { %v816_v14 = vmul.f32 0.044715, %v784_v52  ;;  %v13067_v30 = vmul.f32 %v962_v54, %v12956_v36  ;;  %v965_v32 = vmul.f32 0.5, %v933_v44  ;;  %v936_v31 = vadd.f32 1.0, %v11700_v16 }
 0x1ee   :  { %11711 = vtanh.f32 %v879_v21  ;;  %v877_v3 = vmul.f32 0.7978846, %v845_v5  ;;  %v814_v24 = vmul.f32 0.044715, %v782_v8  ;;  %v966_v45 = vmul.f32 0.5, %v934_v4 }
 0x1ef   :  { %v848_v25 = vadd.f32 %v816_v14, %v13047_v17  ;;  %v967_v56 = vmul.f32 0.5, %v935_v27  ;;  %v968_v49 = vmul.f32 0.5, %v936_v31  ;;  %v13074_v47 = vmul.f32 %v965_v32, %v12972_v61 }
 0x1f0   :  { %v11704_v55 = vpop.eup %11703  ;;  %11713 = vtanh.f32 %v877_v3  ;;  %v846_v57 = vadd.f32 %v814_v24, %v13051_v28  ;;  %v13077_v59 = vmul.f32 %v966_v45, %v12984_v63 }
 0x1f1   :  { %v11706_v36 = vpop.eup %11705  ;;  %v880_v40 = vmul.f32 0.7978846, %v848_v25  ;;  %v939_v60 = vadd.f32 1.0, %v11704_v55  ;;  %v13080_v48 = vmul.f32 %v967_v56, %v12968_v19  ;;  %v13083_v46 = vmul.f32 %v968_v49, %v12978_v51 }
 0x1f2   :  { %v11708_v7 = vpop.eup %11707  ;;  %v878_v0 = vmul.f32 0.7978846, %v846_v57  ;;  %v937_v2 = vadd.f32 1.0, %v11706_v36 }
 0x1f3   :  { %v11710_v38 = vpop.eup %11709  ;;  %11715 = vtanh.f32 %v880_v40  ;;  %v940_v61 = vadd.f32 1.0, %v11708_v7  ;;  %v971_v58 = vmul.f32 0.5, %v939_v60 }
 0x1f4   :  { %11717 = vtanh.f32 %v878_v0  ;;  %v938_v1 = vadd.f32 1.0, %v11710_v38  ;;  %v969_v50 = vmul.f32 0.5, %v937_v2 }
 0x1f5   :  { %v972_v41 = vmul.f32 0.5, %v940_v61  ;;  %v13090_v26 = vmul.f32 %v971_v58, %v12996_v37 }
 0x1f6   :  { %v970_v19 = vmul.f32 0.5, %v938_v1  ;;  %v13096_v12 = vmul.f32 %v969_v50, %v13000_v20 }
 0x1f7   :  { %v13093_v51 = vmul.f32 %v972_v41, %v13009_v6 }
 0x1f8   :  { %v11712_v33 = vpop.eup %11711  ;;  %v13099_v29 = vmul.f32 %v970_v19, %v13015_v53 }
 0x1f9   :  { %v943_v11 = vadd.f32 1.0, %v11712_v33  ;;  %v13156_v33 = vld [vmem:[%s18393_s1 + $0x8] sm:$0xff]  }
 0x1fa   :  { %v11714_v34 = vpop.eup %11713  ;;  %10767 = vmatprep.subr.bf16.mxu0 %v13156_v33 }
 0x1fb   :  { %v941_v37 = vadd.f32 1.0, %v11714_v34  ;;  %v975_v52 = vmul.f32 0.5, %v943_v11 }
 0x1fd   :  { %v11716_v62 = vpop.eup %11715  ;;  %v973_v44 = vmul.f32 0.5, %v941_v37  ;;  %v13106_v53 = vmul.f32 %v975_v52, %v13027_v35 }
 0x1fe   :  { %v11718_v42 = vpop.eup %11717  ;;  %v944_v6 = vadd.f32 1.0, %v11716_v62 }
 0x1ff   :  { %v942_v54 = vadd.f32 1.0, %v11718_v42  ;;  %v13112_v5 = vmul.f32 %v973_v44, %v13034_v15 }
 0x200   :  { %v976_v20 = vmul.f32 0.5, %v944_v6 }
 0x201   :  { %v974_v27 = vmul.f32 0.5, %v942_v54 }
 0x202   :  { %v13109_v21 = vmul.f32 %v976_v20, %v13047_v17 }
 0x203   :  { %v13115_v8 = vmul.f32 %v974_v27, %v13051_v28 }
 0x209   :  { %v10685_v32 = vpop.f32.mrb[16].mxu0 }
 0x20a   :  { %v13122_v3 = vadd.f32 %v10685_v32, %v12940_v39  ;;  %v674_v35 = vpop.f32.mrb[17].mxu0 }
 0x20b   :  { %v13125_v17 = vadd.f32 %v12940_v39, %v674_v35  ;;  %v10686_v24 = vpop.f32.mrb[18].mxu0 }
 0x20c   :  { %v755_v15 = vmul.f32 %v13122_v3, %v13122_v3  ;;  %v13130_v28 = vadd.f32 %v10686_v24, %v12940_v39  ;;  %v677_v31 = vpop.f32.mrb[19].mxu0 }
 0x20d   :  { %v753_v25 = vmul.f32 %v13125_v17, %v13125_v17  ;;  %v13135_v45 = vadd.f32 %v12940_v39, %v677_v31 }
 0x20e   :  { %v787_v55 = vmul.f32 %v755_v15, %v13122_v3  ;;  %v756_v57 = vmul.f32 %v13130_v28, %v13130_v28 }
 0x20f   :  { %v785_v56 = vmul.f32 %v753_v25, %v13125_v17  ;;  %v754_v49 = vmul.f32 %v13135_v45, %v13135_v45 }
 0x210   :  { %v819_v36 = vmul.f32 0.044715, %v787_v55  ;;  %v788_v40 = vmul.f32 %v756_v57, %v13130_v28 }
 0x211   :  { %v817_v60 = vmul.f32 0.044715, %v785_v56  ;;  %v786_v7 = vmul.f32 %v754_v49, %v13135_v45  ;;  %v10689_v0 = vpop.f32.mrb[20].mxu0 }
 0x212   :  { %v851_v2 = vadd.f32 %v819_v36, %v13122_v3  ;;  %v820_v38 = vmul.f32 0.044715, %v788_v40  ;;  %v13147_v61 = vadd.f32 %v10689_v0, %v12940_v39  ;;  %v690_v58 = vpop.f32.mrb[21].mxu0 }
 0x213   :  { %v849_v1 = vadd.f32 %v817_v60, %v13125_v17  ;;  %v818_v50 = vmul.f32 0.044715, %v786_v7  ;;  %v13151_v41 = vadd.f32 %v12940_v39, %v690_v58  ;;  %v10690_v19 = vpop.f32.mrb[22].mxu0 }
 0x214   :  { %v883_v34 = vmul.f32 0.7978846, %v851_v2  ;;  %v852_v11 = vadd.f32 %v820_v38, %v13130_v28  ;;  %v759_v37 = vmul.f32 %v13147_v61, %v13147_v61  ;;  %v13162_v62 = vadd.f32 %v10690_v19, %v12940_v39  ;;  %v693_v42 = vpop.f32.mrb[23].mxu0 }
 0x215   :  { %v881_v6 = vmul.f32 0.7978846, %v849_v1  ;;  %v850_v52 = vadd.f32 %v818_v50, %v13135_v45  ;;  %v757_v54 = vmul.f32 %v13151_v41, %v13151_v41  ;;  %v13168_v44 = vadd.f32 %v12940_v39, %v693_v42 }
 0x216   :  { %11719 = vtanh.f32 %v883_v34  ;;  %v884_v20 = vmul.f32 0.7978846, %v852_v11  ;;  %v791_v27 = vmul.f32 %v759_v37, %v13147_v61  ;;  %v760_v32 = vmul.f32 %v13162_v62, %v13162_v62 }
 0x217   :  { %11721 = vtanh.f32 %v881_v6  ;;  %v882_v35 = vmul.f32 0.7978846, %v850_v52  ;;  %v789_v24 = vmul.f32 %v757_v54, %v13151_v41  ;;  %v758_v15 = vmul.f32 %v13168_v44, %v13168_v44 }
 0x218   :  { %11723 = vtanh.f32 %v884_v20  ;;  %v823_v31 = vmul.f32 0.044715, %v791_v27  ;;  %v792_v25 = vmul.f32 %v760_v32, %v13162_v62 }
 0x219   :  { %v821_v55 = vmul.f32 0.044715, %v789_v24  ;;  %v790_v57 = vmul.f32 %v758_v15, %v13168_v44  ;;  %v10693_v56 = vpop.f32.mrb[24].mxu0  ;;  %11725 = vtanh.f32 %v882_v35 }
 0x21a   :  { %v855_v49 = vadd.f32 %v823_v31, %v13147_v61  ;;  %v824_v36 = vmul.f32 0.044715, %v792_v25  ;;  %v13181_v40 = vadd.f32 %v10693_v56, %v12940_v39  ;;  %v706_v60 = vpop.f32.mrb[25].mxu0 }
 0x21b   :  { %v853_v7 = vadd.f32 %v821_v55, %v13151_v41  ;;  %v822_v0 = vmul.f32 0.044715, %v790_v57  ;;  %v13185_v2 = vadd.f32 %v12940_v39, %v706_v60  ;;  %v10694_v38 = vpop.f32.mrb[26].mxu0 }
 0x21c   :  { %v887_v58 = vmul.f32 0.7978846, %v855_v49  ;;  %v856_v1 = vadd.f32 %v824_v36, %v13162_v62  ;;  %v763_v50 = vmul.f32 %v13181_v40, %v13181_v40  ;;  %v13191_v19 = vadd.f32 %v10694_v38, %v12940_v39  ;;  %v709_v34 = vpop.f32.mrb[27].mxu0 }
 0x21d   :  { %v885_v11 = vmul.f32 0.7978846, %v853_v7  ;;  %v854_v37 = vadd.f32 %v822_v0, %v13168_v44  ;;  %v761_v42 = vmul.f32 %v13185_v2, %v13185_v2  ;;  %v13197_v6 = vadd.f32 %v12940_v39, %v709_v34 }
 0x21e   :  { %11727 = vtanh.f32 %v887_v58  ;;  %v888_v52 = vmul.f32 0.7978846, %v856_v1  ;;  %v795_v54 = vmul.f32 %v763_v50, %v13181_v40  ;;  %v764_v20 = vmul.f32 %v13191_v19, %v13191_v19 }
 0x21f   :  { %11729 = vtanh.f32 %v885_v11  ;;  %v886_v27 = vmul.f32 0.7978846, %v854_v37  ;;  %v793_v32 = vmul.f32 %v761_v42, %v13185_v2  ;;  %v762_v35 = vmul.f32 %v13197_v6, %v13197_v6 }
 0x220   :  { %v11720_v24 = vpop.eup %11719  ;;  %11731 = vtanh.f32 %v888_v52  ;;  %v827_v15 = vmul.f32 0.044715, %v795_v54  ;;  %v796_v31 = vmul.f32 %v764_v20, %v13191_v19 }
 0x221   :  { %v11722_v25 = vpop.eup %11721  ;;  %11733 = vtanh.f32 %v886_v27  ;;  %v825_v55 = vmul.f32 0.044715, %v793_v32  ;;  %v794_v57 = vmul.f32 %v762_v35, %v13197_v6  ;;  %v10697_v56 = vpop.f32.mrb[28].mxu0  ;;  %v947_v49 = vadd.f32 1.0, %v11720_v24 }
 0x222   :  { %v11724_v36 = vpop.eup %11723  ;;  %v859_v60 = vadd.f32 %v827_v15, %v13181_v40  ;;  %v828_v7 = vmul.f32 0.044715, %v796_v31  ;;  %v13209_v0 = vadd.f32 %v10697_v56, %v12940_v39  ;;  %v722_v38 = vpop.f32.mrb[29].mxu0  ;;  %v945_v58 = vadd.f32 1.0, %v11722_v25 }
 0x223   :  { %v857_v1 = vadd.f32 %v825_v55, %v13185_v2  ;;  %v826_v50 = vmul.f32 0.044715, %v794_v57  ;;  %v13213_v34 = vadd.f32 %v12940_v39, %v722_v38  ;;  %v10698_v11 = vpop.f32.mrb[30].mxu0  ;;  %v948_v37 = vadd.f32 1.0, %v11724_v36  ;;  %v11726_v32 = vpop.eup %11725 }
 0x224   :  { %v891_v42 = vmul.f32 0.7978846, %v859_v60  ;;  %v860_v52 = vadd.f32 %v828_v7, %v13191_v19  ;;  %v767_v54 = vmul.f32 %v13209_v0, %v13209_v0  ;;  %v13219_v20 = vadd.f32 %v10698_v11, %v12940_v39  ;;  %v725_v27 = vpop.f32.mrb[31].mxu0 }
 0x225   :  { %v889_v35 = vmul.f32 0.7978846, %v857_v1  ;;  %v858_v24 = vadd.f32 %v826_v50, %v13197_v6  ;;  %v765_v15 = vmul.f32 %v13213_v34, %v13213_v34  ;;  %v13225_v31 = vadd.f32 %v12940_v39, %v725_v27 }
 0x226   :  { %11735 = vtanh.f32 %v891_v42  ;;  %v892_v25 = vmul.f32 0.7978846, %v860_v52  ;;  %v799_v55 = vmul.f32 %v767_v54, %v13209_v0  ;;  %v768_v57 = vmul.f32 %v13219_v20, %v13219_v20 }
 0x227   :  { %11737 = vtanh.f32 %v889_v35  ;;  %v890_v56 = vmul.f32 0.7978846, %v858_v24  ;;  %v797_v36 = vmul.f32 %v765_v15, %v13213_v34  ;;  %v766_v60 = vmul.f32 %v13225_v31, %v13225_v31 }
 0x228   :  { %v11728_v7 = vpop.eup %11727  ;;  %11739 = vtanh.f32 %v892_v25  ;;  %v831_v38 = vmul.f32 0.044715, %v799_v55  ;;  %v800_v1 = vmul.f32 %v768_v57, %v13219_v20  ;;  %v946_v50 = vadd.f32 1.0, %v11726_v32 }
 0x229   :  { %v11730_v11 = vpop.eup %11729  ;;  %11741 = vtanh.f32 %v890_v56  ;;  %v829_v42 = vmul.f32 0.044715, %v797_v36  ;;  %v798_v52 = vmul.f32 %v766_v60, %v13225_v31  ;;  %v977_v54 = vmul.f32 0.5, %v945_v58 }
 0x22a   :  { %v11732_v27 = vpop.eup %11731  ;;  %v863_v35 = vadd.f32 %v831_v38, %v13209_v0  ;;  %v832_v24 = vmul.f32 0.044715, %v800_v1  ;;  %v978_v15 = vmul.f32 0.5, %v946_v50  ;;  %v979_v14 = vmul.f32 0.5, %v947_v49 }
 0x22b   :  { %v11734_v4 = vpop.eup %11733  ;;  %v861_v16 = vadd.f32 %v829_v42, %v13213_v34  ;;  %v830_v25 = vmul.f32 0.044715, %v798_v52  ;;  %v13238_v55 = vmul.f32 %v977_v54, %v13125_v17  ;;  %v980_v32 = vmul.f32 0.5, %v948_v37 }
 0x22c   :  { %v895_v57 = vmul.f32 0.7978846, %v863_v35  ;;  %v864_v56 = vadd.f32 %v832_v24, %v13219_v20  ;;  %v13242_v36 = vmul.f32 %v978_v15, %v13135_v45  ;;  %v13245_v58 = vmul.f32 %v979_v14, %v13122_v3 }
 0x22d   :  { %v893_v60 = vmul.f32 0.7978846, %v861_v16  ;;  %v862_v49 = vadd.f32 %v830_v25, %v13225_v31  ;;  %v13249_v38 = vmul.f32 %v980_v32, %v13130_v28  ;;  %v949_v1 = vadd.f32 1.0, %v11730_v11 }
 0x22e   :  { %11743 = vtanh.f32 %v895_v57  ;;  %v896_v17 = vmul.f32 0.7978846, %v864_v56  ;;  %v950_v50 = vadd.f32 1.0, %v11734_v4  ;;  %v951_v52 = vadd.f32 1.0, %v11728_v7 }
 0x22f   :  { %11745 = vtanh.f32 %v893_v60  ;;  %v894_v42 = vmul.f32 0.7978846, %v862_v49  ;;  %v981_v14 = vmul.f32 0.5, %v949_v1  ;;  %v952_v54 = vadd.f32 1.0, %v11732_v27 }
 0x230   :  { %v11736_v3 = vpop.eup %11735  ;;  %11747 = vtanh.f32 %v896_v17  ;;  %v982_v16 = vmul.f32 0.5, %v950_v50  ;;  %v983_v15 = vmul.f32 0.5, %v951_v52 }
 0x231   :  { %v11738_v28 = vpop.eup %11737  ;;  %11749 = vtanh.f32 %v894_v42  ;;  %v13256_v11 = vmul.f32 %v981_v14, %v13151_v41  ;;  %v955_v35 = vadd.f32 1.0, %v11736_v3  ;;  %v984_v25 = vmul.f32 0.5, %v952_v54 }
 0x232   :  { %v11740_v24 = vpop.eup %11739  ;;  %v13259_v4 = vmul.f32 %v982_v16, %v13168_v44  ;;  %v953_v32 = vadd.f32 1.0, %v11738_v28  ;;  %v13264_v27 = vmul.f32 %v983_v15, %v13147_v61 }
 0x233   :  { %v11742_v57 = vpop.eup %11741  ;;  %v956_v56 = vadd.f32 1.0, %v11740_v24  ;;  %v987_v60 = vmul.f32 0.5, %v955_v35  ;;  %v13267_v41 = vmul.f32 %v984_v25, %v13162_v62 }
 0x234   :  { %18521 = vst [vmem:[#allocation5_spill] sm:$0xff] %v13264_v27  ;;  %v954_v49 = vadd.f32 1.0, %v11742_v57  ;;  %v985_v1 = vmul.f32 0.5, %v953_v32 }
 0x235   :  { %18522 = vst [vmem:[#allocation8_spill] sm:$0xff] %v13267_v41  ;;  %v988_v17 = vmul.f32 0.5, %v956_v56  ;;  %v13272_v42 = vmul.f32 %v987_v60, %v13181_v40 }
 0x236   :  { %v986_v50 = vmul.f32 0.5, %v954_v49  ;;  %v13278_v61 = vmul.f32 %v985_v1, %v13185_v2 }
 0x237   :  { %18523 = vst [vmem:[#allocation9_spill] sm:$0xff] %v13272_v42  ;;  %v13275_v14 = vmul.f32 %v988_v17, %v13191_v19 }
 0x238   :  { %v11744_v3 = vpop.eup %11743  ;;  %18525 = vst [vmem:[#allocation7_spill] sm:$0xff] %v13278_v61  ;;  %v13281_v62 = vmul.f32 %v986_v50, %v13197_v6 }
 0x239   :  { %18524 = vst [vmem:[#allocation6_spill] sm:$0xff] %v13275_v14  ;;  %v11746_v16 = vpop.eup %11745  ;;  %v959_v54 = vadd.f32 1.0, %v11744_v3 }
 0x23a   :  { %18526 = vst [vmem:[#allocation10_spill] sm:$0xff] %v13281_v62  ;;  %v11748_v28 = vpop.eup %11747  ;;  %v957_v35 = vadd.f32 1.0, %v11746_v16 }
 0x23b   :  { %v11750_v24 = vpop.eup %11749  ;;  %v10703_v19 = vpop.f32.mrb[0].mxu1  ;;  %v960_v15 = vadd.f32 1.0, %v11748_v28  ;;  %v991_v25 = vmul.f32 0.5, %v959_v54 }
 0x23c   :  { %v13288_v2 = vadd.f32 %v10703_v19, %v12940_v39  ;;  %v1155_v32 = vpop.f32.mrb[1].mxu1  ;;  %v958_v6 = vadd.f32 1.0, %v11750_v24  ;;  %v989_v57 = vmul.f32 0.5, %v957_v35 }
 0x23d   :  { %v13291_v56 = vadd.f32 %v12940_v39, %v1155_v32  ;;  %v10704_v60 = vpop.f32.mrb[2].mxu1  ;;  %v992_v49 = vmul.f32 0.5, %v960_v15  ;;  %v13304_v28 = vmul.f32 %v991_v25, %v13209_v0 }
 0x23e   :  { %v1284_v1 = vmul.f32 %v13288_v2, %v13288_v2  ;;  %v13296_v17 = vadd.f32 %v10704_v60, %v12940_v39  ;;  %v1158_v50 = vpop.f32.mrb[3].mxu1  ;;  %v990_v3 = vmul.f32 0.5, %v958_v6  ;;  %v13313_v15 = vmul.f32 %v989_v57, %v13213_v34 }
 0x23f   :  { %v1282_v16 = vmul.f32 %v13291_v56, %v13291_v56  ;;  %v13301_v54 = vadd.f32 %v12940_v39, %v1158_v50  ;;  %18527 = vst [vmem:[#allocation11_spill] sm:$0xff] %v13304_v28  ;;  %v13307_v35 = vmul.f32 %v992_v49, %v13219_v20 }
 0x240   :  { %v1316_v24 = vmul.f32 %v1284_v1, %v13288_v2  ;;  %v1285_v19 = vmul.f32 %v13296_v17, %v13296_v17  ;;  %18529 = vst [vmem:[#allocation13_spill] sm:$0xff] %v13313_v15  ;;  %v13316_v32 = vmul.f32 %v990_v3, %v13225_v31 }
 0x241   :  { %18528 = vst [vmem:[#allocation12_spill] sm:$0xff] %v13307_v35  ;;  %v1314_v6 = vmul.f32 %v1282_v16, %v13291_v56  ;;  %v1283_v0 = vmul.f32 %v13301_v54, %v13301_v54 }
 0x242   :  { %18530 = vst [vmem:[#allocation14_spill] sm:$0xff] %v13316_v32  ;;  %v1348_v25 = vmul.f32 0.044715, %v1316_v24  ;;  %v1317_v60 = vmul.f32 %v1285_v19, %v13296_v17 }
 0x243   :  { %v1346_v1 = vmul.f32 0.044715, %v1314_v6  ;;  %v1315_v34 = vmul.f32 %v1283_v0, %v13301_v54  ;;  %v10707_v57 = vpop.f32.mrb[4].mxu1 }
 0x244   :  { %v1380_v31 = vadd.f32 %v1348_v25, %v13288_v2  ;;  %v1349_v50 = vmul.f32 0.044715, %v1317_v60  ;;  %v13329_v3 = vadd.f32 %v10707_v57, %v12940_v39  ;;  %v1171_v16 = vpop.f32.mrb[5].mxu1 }
 0x245   :  { %v1378_v52 = vadd.f32 %v1346_v1, %v13291_v56  ;;  %v1347_v20 = vmul.f32 0.044715, %v1315_v34  ;;  %v13333_v24 = vadd.f32 %v12940_v39, %v1171_v16  ;;  %v10708_v19 = vpop.f32.mrb[6].mxu1 }
 0x246   :  { %v1412_v40 = vmul.f32 0.7978846, %v1380_v31  ;;  %v1381_v6 = vadd.f32 %v1349_v50, %v13296_v17  ;;  %v1288_v0 = vmul.f32 %v13329_v3, %v13329_v3  ;;  %v13339_v25 = vadd.f32 %v10708_v19, %v12940_v39  ;;  %v1174_v60 = vpop.f32.mrb[7].mxu1 }
 0x247   :  { %v1410_v57 = vmul.f32 0.7978846, %v1378_v52  ;;  %v1379_v49 = vadd.f32 %v1347_v20, %v13301_v54  ;;  %v1286_v1 = vmul.f32 %v13333_v24, %v13333_v24  ;;  %v13345_v34 = vadd.f32 %v12940_v39, %v1174_v60 }
 0x248   :  { %11751 = vtanh.f32 %v1412_v40  ;;  %v1413_v31 = vmul.f32 0.7978846, %v1381_v6  ;;  %v1320_v50 = vmul.f32 %v1288_v0, %v13329_v3  ;;  %v1289_v16 = vmul.f32 %v13339_v25, %v13339_v25 }
 0x249   :  { %11753 = vtanh.f32 %v1410_v57  ;;  %v1411_v19 = vmul.f32 0.7978846, %v1379_v49  ;;  %v1318_v44 = vmul.f32 %v1286_v1, %v13333_v24  ;;  %v1287_v52 = vmul.f32 %v13345_v34, %v13345_v34 }
 0x24a   :  { %11755 = vtanh.f32 %v1413_v31  ;;  %v1352_v20 = vmul.f32 0.044715, %v1320_v50  ;;  %v1321_v7 = vmul.f32 %v1289_v16, %v13339_v25 }
 0x24b   :  { %v1350_v60 = vmul.f32 0.044715, %v1318_v44  ;;  %v1319_v40 = vmul.f32 %v1287_v52, %v13345_v34  ;;  %v10711_v6 = vpop.f32.mrb[8].mxu1  ;;  %11757 = vtanh.f32 %v1411_v19 }
 0x24c   :  { %v1384_v0 = vadd.f32 %v1352_v20, %v13329_v3  ;;  %v1353_v45 = vmul.f32 0.044715, %v1321_v7  ;;  %v13357_v37 = vadd.f32 %v10711_v6, %v12940_v39  ;;  %v1187_v49 = vpop.f32.mrb[9].mxu1 }
 0x24d   :  { %v1382_v57 = vadd.f32 %v1350_v60, %v13333_v24  ;;  %v1351_v1 = vmul.f32 0.044715, %v1319_v40  ;;  %v13361_v31 = vadd.f32 %v12940_v39, %v1187_v49  ;;  %v10712_v50 = vpop.f32.mrb[10].mxu1 }
 0x24e   :  { %v1416_v16 = vmul.f32 0.7978846, %v1384_v0  ;;  %v1385_v44 = vadd.f32 %v1353_v45, %v13339_v25  ;;  %v1292_v52 = vmul.f32 %v13357_v37, %v13357_v37  ;;  %v13367_v7 = vadd.f32 %v10712_v50, %v12940_v39  ;;  %v1190_v20 = vpop.f32.mrb[11].mxu1 }
 0x24f   :  { %v1414_v6 = vmul.f32 0.7978846, %v1382_v57  ;;  %v1383_v19 = vadd.f32 %v1351_v1, %v13345_v34  ;;  %v1290_v60 = vmul.f32 %v13361_v31, %v13361_v31  ;;  %v13373_v40 = vadd.f32 %v12940_v39, %v1190_v20 }
 0x250   :  { %11759 = vtanh.f32 %v1416_v16  ;;  %v1417_v0 = vmul.f32 0.7978846, %v1385_v44  ;;  %v1324_v45 = vmul.f32 %v1292_v52, %v13357_v37  ;;  %v1293_v49 = vmul.f32 %v13367_v7, %v13367_v7 }
 0x251   :  { %11761 = vtanh.f32 %v1414_v6  ;;  %v1415_v50 = vmul.f32 0.7978846, %v1383_v19  ;;  %v1322_v43 = vmul.f32 %v1290_v60, %v13361_v31  ;;  %v1291_v57 = vmul.f32 %v13373_v40, %v13373_v40 }
 0x252   :  { %v11752_v1 = vpop.eup %11751  ;;  %11763 = vtanh.f32 %v1417_v0  ;;  %v1356_v63 = vmul.f32 0.044715, %v1324_v45  ;;  %v1325_v20 = vmul.f32 %v1293_v49, %v13367_v7 }
 0x253   :  { %v11754_v13 = vpop.eup %11753  ;;  %v1476_v16 = vadd.f32 1.0, %v11752_v1  ;;  %11765 = vtanh.f32 %v1415_v50  ;;  %v1354_v44 = vmul.f32 0.044715, %v1322_v43  ;;  %v1323_v52 = vmul.f32 %v1291_v57, %v13373_v40  ;;  %v10715_v10 = vpop.f32.mrb[12].mxu1 }
 0x254   :  { %v11756_v23 = vpop.eup %11755  ;;  %v1388_v6 = vadd.f32 %v1356_v63, %v13357_v37  ;;  %v1357_v19 = vmul.f32 0.044715, %v1325_v20  ;;  %v13385_v60 = vadd.f32 %v10715_v10, %v12940_v39  ;;  %v1203_v28 = vpop.f32.mrb[13].mxu1  ;;  %v1474_v35 = vadd.f32 1.0, %v11754_v13 }
 0x255   :  { %v1508_v0 = vmul.f32 0.5, %v1476_v16  ;;  %v1477_v45 = vadd.f32 1.0, %v11756_v23  ;;  %v1386_v49 = vadd.f32 %v1354_v44, %v13361_v31  ;;  %v1355_v15 = vmul.f32 0.044715, %v1323_v52  ;;  %v10716_v1 = vpop.f32.mrb[14].mxu1  ;;  %v11758_v10 = vpop.eup %11757 }
 0x256   :  { %v1420_v50 = vmul.f32 0.7978846, %v1388_v6  ;;  %v1389_v43 = vadd.f32 %v1357_v19, %v13367_v7  ;;  %v1296_v57 = vmul.f32 %v13385_v60, %v13385_v60  ;;  %v13392_v63 = vadd.f32 %v12940_v39, %v1203_v28  ;;  %v1206_v20 = vpop.f32.mrb[15].mxu1  ;;  %v13403_v28 = vld [vmem:[%s18394_s2] ss:$0 sm:$0xff] }
 0x257   :  { %v1540_v32 = vmul.f32 %v1508_v0, %v13288_v2  ;;  %v1509_v13 = vmul.f32 0.5, %v1477_v45  ;;  %v1418_v16 = vmul.f32 0.7978846, %v1386_v49  ;;  %v1387_v23 = vadd.f32 %v1355_v15, %v13373_v40 }
 0x258   :  { %11767 = vtanh.f32 %v1420_v50  ;;  %v1421_v44 = vmul.f32 0.7978846, %v1389_v43  ;;  %v1328_v52 = vmul.f32 %v1296_v57, %v13385_v60  ;;  %v1294_v6 = vmul.f32 %v13392_v63, %v13392_v63 }
 0x259   :  { %v1541_v19 = vmul.f32 %v1509_v13, %v13296_v17  ;;  %11769 = vtanh.f32 %v1418_v16  ;;  %v1419_v39 = vmul.f32 0.7978846, %v1387_v23  ;;  %v13406_v2 = vadd.f32 %v13403_v28, %v10716_v1 }
 0x25a   :  { %v11760_v15 = vpop.eup %11759  ;;  %11771 = vtanh.f32 %v1421_v44  ;;  %v1360_v0 = vmul.f32 0.044715, %v1328_v52  ;;  %v1326_v45 = vmul.f32 %v1294_v6, %v13392_v63  ;;  %v13410_v49 = vadd.f32 %v13403_v28, %v1206_v20 }
 0x25b   :  { %v11762_v50 = vpop.eup %11761  ;;  %v1591_v17 = vpack.c.bf16 %v1541_v19, %v1540_v32  ;;  %11773 = vtanh.f32 %v1419_v39  ;;  %v1297_v43 = vmul.f32 %v13406_v2, %v13406_v2  ;;  %v1475_v57 = vadd.f32 1.0, %v11758_v10 }
 0x25c   :  { %v11764_v13 = vpop.eup %11763  ;;  %v1392_v16 = vadd.f32 %v1360_v0, %v13385_v60  ;;  %v1358_v1 = vmul.f32 0.044715, %v1326_v45  ;;  %v1295_v23 = vmul.f32 %v13410_v49, %v13410_v49  ;;  %v1506_v44 = vmul.f32 0.5, %v1474_v35 }
 0x25d   :  { %v11766_v52 = vpop.eup %11765  ;;  %v1329_v6 = vmul.f32 %v1297_v43, %v13406_v2  ;;  %v1507_v20 = vmul.f32 0.5, %v1475_v57  ;;  %v1478_v42 = vadd.f32 1.0, %v11762_v50  ;;  %v1480_v14 = vadd.f32 1.0, %v11760_v15 }
 0x25e   :  { %v1424_v32 = vmul.f32 0.7978846, %v1392_v16  ;;  %v1390_v19 = vadd.f32 %v1358_v1, %v13392_v63  ;;  %v1327_v39 = vmul.f32 %v1295_v23, %v13410_v49  ;;  %v1538_v10 = vmul.f32 %v1506_v44, %v13291_v56 }
 0x25f   :  { %v1361_v61 = vmul.f32 0.044715, %v1329_v6  ;;  %v1539_v0 = vmul.f32 %v1507_v20, %v13301_v54  ;;  %v1479_v45 = vadd.f32 1.0, %v11766_v52  ;;  %v1510_v62 = vmul.f32 0.5, %v1478_v42 }
 0x260   :  { %11775 = vtanh.f32 %v1424_v32  ;;  %v1422_v35 = vmul.f32 0.7978846, %v1390_v19  ;;  %v1359_v27 = vmul.f32 0.044715, %v1327_v39  ;;  %v1481_v41 = vadd.f32 1.0, %v11764_v13 }
 0x261   :  { %v1393_v43 = vadd.f32 %v1361_v61, %v13406_v2  ;;  %v1590_v50 = vpack.c.bf16 %v1539_v0, %v1538_v10  ;;  %v1511_v15 = vmul.f32 0.5, %v1479_v45  ;;  %v1512_v1 = vmul.f32 0.5, %v1480_v14 }
 0x262   :  { %v11768_v57 = vpop.eup %11767  ;;  %11777 = vtanh.f32 %v1422_v35  ;;  %v1391_v16 = vadd.f32 %v1359_v27, %v13410_v49  ;;  %v1513_v23 = vmul.f32 0.5, %v1481_v41  ;;  %v1542_v42 = vmul.f32 %v1510_v62, %v13333_v24 }
 0x263   :  { %v11770_v56 = vpop.eup %11769  ;;  %v1425_v44 = vmul.f32 0.7978846, %v1393_v43  ;;  %10735 = vmatprep.mubr.msk.bf16.mxu0 %vm50_vm0, %v1590_v50  ;;  %v1543_v54 = vmul.f32 %v1511_v15, %v13345_v34  ;;  %v1484_v52 = vadd.f32 1.0, %v11768_v57  ;;  %v1544_v61 = vmul.f32 %v1512_v1, %v13329_v3 }
 0x264   :  { %v11772_v13 = vpop.eup %11771  ;;  %v1423_v6 = vmul.f32 0.7978846, %v1391_v16  ;;  %10736 = vmatmul.mubr.msk.bf16.vlgmr.msra.gmra.mrb[32].mxu0 %vm50_vm0, %v1591_v17  ;;  %v1545_v20 = vmul.f32 %v1513_v23, %v13339_v25  ;;  %v1482_v27 = vadd.f32 1.0, %v11770_v56 }
 0x265   :  { %v11774_v14 = vpop.eup %11773  ;;  %11779 = vtanh.f32 %v1425_v44  ;;  %v1592_v41 = vpack.c.bf16 %v1543_v54, %v1542_v42  ;;  %v1485_v32 = vadd.f32 1.0, %v11772_v13  ;;  %v1516_v19 = vmul.f32 0.5, %v1484_v52  ;;  %10768 = vmatpush3.bf16.msra.mxu0 %v13156_v33 }
 0x266   :  { %11781 = vtanh.f32 %v1423_v6  ;;  %v1593_v62 = vpack.c.bf16 %v1545_v20, %v1544_v61  ;;  %v1483_v24 = vadd.f32 1.0, %v11774_v14  ;;  %v1514_v34 = vmul.f32 0.5, %v1482_v27 }
 0x267   :  { %10739 = vmatprep.mubr.msk.bf16.mxu0 %vm50_vm0, %v1592_v41  ;;  %v1517_v39 = vmul.f32 0.5, %v1485_v32  ;;  %v1548_v3 = vmul.f32 %v1516_v19, %v13357_v37 }
 0x268   :  { %v1515_v17 = vmul.f32 0.5, %v1483_v24  ;;  %v1546_v0 = vmul.f32 %v1514_v34, %v13361_v31 }
 0x269   :  { %v1549_v25 = vmul.f32 %v1517_v39, %v13367_v7 }
 0x26a   :  { %v11776_v10 = vpop.eup %11775  ;;  %v1547_v45 = vmul.f32 %v1515_v17, %v13373_v40 }
 0x26b   :  { %v1595_v35 = vpack.c.bf16 %v1549_v25, %v1548_v3  ;;  %v1488_v50 = vadd.f32 1.0, %v11776_v10 }
 0x26c   :  { %v11778_v43 = vpop.eup %11777  ;;  %10740 = vmatmul.mubr.msk.bf16.gmra.mrb[36].mxu0 %vm50_vm0, %v1593_v62  ;;  %v1594_v33 = vpack.c.bf16 %v1547_v45, %v1546_v0 }
 0x26d   :  { %v1486_v15 = vadd.f32 1.0, %v11778_v43  ;;  %v1520_v37 = vmul.f32 0.5, %v1488_v50 }
 0x26e   :  { %10743 = vmatprep.mubr.msk.bf16.mxu0 %vm50_vm0, %v1594_v33 }
 0x26f   :  { %v11780_v57 = vpop.eup %11779  ;;  %v1518_v7 = vmul.f32 0.5, %v1486_v15  ;;  %v1552_v31 = vmul.f32 %v1520_v37, %v13385_v60 }
 0x270   :  { %v11782_v16 = vpop.eup %11781  ;;  %v1489_v1 = vadd.f32 1.0, %v11780_v57 }
 0x271   :  { %v1487_v23 = vadd.f32 1.0, %v11782_v16  ;;  %v1550_v42 = vmul.f32 %v1518_v7, %v13392_v63 }
 0x272   :  { %v1521_v56 = vmul.f32 0.5, %v1489_v1 }
 0x273   :  { %v1519_v44 = vmul.f32 0.5, %v1487_v23 }
 0x274   :  { %10744 = vmatmul.mubr.msk.bf16.gmra.mrb[40].mxu0 %vm50_vm0, %v1595_v35  ;;  %v1553_v40 = vmul.f32 %v1521_v56, %v13406_v2 }
 0x275   :  { %v1551_v54 = vmul.f32 %v1519_v44, %v13410_v49 }
 0x276   :  { %v1597_v52 = vpack.c.bf16 %v1553_v40, %v1552_v31 }
 0x277   :  { %v1596_v13 = vpack.c.bf16 %v1551_v54, %v1550_v42 }
 0x279   :  { %10747 = vmatprep.mubr.msk.bf16.mxu0 %vm50_vm0, %v1596_v13 }
 0x27b   :  { %v10719_v6 = vpop.f32.mrb[16].mxu1 }
 0x27c   :  { %10748 = vmatmul.mubr.msk.bf16.gmra.mrb[44].mxu0 %vm50_vm0, %v1597_v52  ;;  %v13446_v61 = vadd.f32 %v13403_v28, %v10719_v6  ;;  %v1219_v20 = vpop.f32.mrb[17].mxu1 }
 0x27d   :  { %v13449_v27 = vadd.f32 %v13403_v28, %v1219_v20  ;;  %v10720_v60 = vpop.f32.mrb[18].mxu1 }
 0x27e   :  { %v1300_v63 = vmul.f32 %v13446_v61, %v13446_v61  ;;  %v13454_v2 = vadd.f32 %v13403_v28, %v10720_v60  ;;  %v1222_v49 = vpop.f32.mrb[19].mxu1 }
 0x27f   :  { %v1298_v14 = vmul.f32 %v13449_v27, %v13449_v27  ;;  %v13459_v41 = vadd.f32 %v13403_v28, %v1222_v49 }
 0x280   :  { %v1332_v32 = vmul.f32 %v1300_v63, %v13446_v61  ;;  %v1301_v19 = vmul.f32 %v13454_v2, %v13454_v2 }
 0x281   :  { %v1330_v62 = vmul.f32 %v1298_v14, %v13449_v27  ;;  %v1299_v24 = vmul.f32 %v13459_v41, %v13459_v41 }
 0x282   :  { %v1364_v34 = vmul.f32 0.044715, %v1332_v32  ;;  %v1333_v39 = vmul.f32 %v1301_v19, %v13454_v2 }
 0x283   :  { %v1362_v17 = vmul.f32 0.044715, %v1330_v62  ;;  %v1331_v3 = vmul.f32 %v1299_v24, %v13459_v41  ;;  %v10723_v25 = vpop.f32.mrb[20].mxu1 }
 0x284   :  { %v1396_v10 = vadd.f32 %v1364_v34, %v13446_v61  ;;  %v1365_v0 = vmul.f32 0.044715, %v1333_v39  ;;  %v13471_v45 = vadd.f32 %v13403_v28, %v10723_v25  ;;  %v1235_v35 = vpop.f32.mrb[21].mxu1 }
 0x285   :  { %v1394_v43 = vadd.f32 %v1362_v17, %v13449_v27  ;;  %v1363_v33 = vmul.f32 0.044715, %v1331_v3  ;;  %v13475_v50 = vadd.f32 %v13403_v28, %v1235_v35  ;;  %v10724_v15 = vpop.f32.mrb[22].mxu1 }
 0x286   :  { %v1428_v57 = vmul.f32 0.7978846, %v1396_v10  ;;  %v1397_v16 = vadd.f32 %v1365_v0, %v13454_v2  ;;  %v1304_v1 = vmul.f32 %v13471_v45, %v13471_v45  ;;  %v13481_v37 = vadd.f32 %v13403_v28, %v10724_v15  ;;  %v1238_v23 = vpop.f32.mrb[23].mxu1 }
 0x287   :  { %v1426_v7 = vmul.f32 0.7978846, %v1394_v43  ;;  %v1395_v56 = vadd.f32 %v1363_v33, %v13459_v41  ;;  %v1302_v44 = vmul.f32 %v13475_v50, %v13475_v50  ;;  %v13487_v31 = vadd.f32 %v13403_v28, %v1238_v23 }
 0x288   :  { %11783 = vtanh.f32 %v1428_v57  ;;  %v1429_v40 = vmul.f32 0.7978846, %v1397_v16  ;;  %v1336_v42 = vmul.f32 %v1304_v1, %v13471_v45  ;;  %v1305_v54 = vmul.f32 %v13481_v37, %v13481_v37 }
 0x289   :  { %11785 = vtanh.f32 %v1426_v7  ;;  %v1427_v52 = vmul.f32 0.7978846, %v1395_v56  ;;  %v1334_v13 = vmul.f32 %v1302_v44, %v13475_v50  ;;  %v1303_v6 = vmul.f32 %v13487_v31, %v13487_v31 }
 0x28a   :  { %11787 = vtanh.f32 %v1429_v40  ;;  %v1368_v20 = vmul.f32 0.044715, %v1336_v42  ;;  %v1337_v60 = vmul.f32 %v1305_v54, %v13481_v37 }
 0x28b   :  { %v1366_v63 = vmul.f32 0.044715, %v1334_v13  ;;  %v1335_v49 = vmul.f32 %v1303_v6, %v13487_v31  ;;  %v10727_v14 = vpop.f32.mrb[24].mxu1  ;;  %11789 = vtanh.f32 %v1427_v52 }
 0x28c   :  { %v1400_v32 = vadd.f32 %v1368_v20, %v13471_v45  ;;  %v1369_v19 = vmul.f32 0.044715, %v1337_v60  ;;  %v13499_v62 = vadd.f32 %v13403_v28, %v10727_v14  ;;  %v1251_v24 = vpop.f32.mrb[25].mxu1 }
 0x28d   :  { %v1398_v34 = vadd.f32 %v1366_v63, %v13475_v50  ;;  %v1367_v39 = vmul.f32 0.044715, %v1335_v49  ;;  %v13503_v17 = vadd.f32 %v13403_v28, %v1251_v24  ;;  %v10728_v3 = vpop.f32.mrb[26].mxu1 }
 0x28e   :  { %v1432_v25 = vmul.f32 0.7978846, %v1400_v32  ;;  %v1401_v10 = vadd.f32 %v1369_v19, %v13481_v37  ;;  %v1308_v0 = vmul.f32 %v13499_v62, %v13499_v62  ;;  %v13509_v35 = vadd.f32 %v13403_v28, %v10728_v3  ;;  %v1254_v43 = vpop.f32.mrb[27].mxu1 }
 0x28f   :  { %v1430_v33 = vmul.f32 0.7978846, %v1398_v34  ;;  %v1399_v15 = vadd.f32 %v1367_v39, %v13487_v31  ;;  %v1306_v57 = vmul.f32 %v13503_v17, %v13503_v17  ;;  %v13515_v16 = vadd.f32 %v13403_v28, %v1254_v43 }
 0x290   :  { %11791 = vtanh.f32 %v1432_v25  ;;  %v1433_v1 = vmul.f32 0.7978846, %v1401_v10  ;;  %v1340_v23 = vmul.f32 %v1308_v0, %v13499_v62  ;;  %v1309_v7 = vmul.f32 %v13509_v35, %v13509_v35 }
 0x291   :  { %11793 = vtanh.f32 %v1430_v33  ;;  %v1431_v56 = vmul.f32 0.7978846, %v1399_v15  ;;  %v1338_v44 = vmul.f32 %v1306_v57, %v13503_v17  ;;  %v1307_v40 = vmul.f32 %v13515_v16, %v13515_v16 }
 0x292   :  { %v11784_v42 = vpop.eup %11783  ;;  %11795 = vtanh.f32 %v1433_v1  ;;  %v1372_v54 = vmul.f32 0.044715, %v1340_v23  ;;  %v1341_v52 = vmul.f32 %v1309_v7, %v13509_v35 }
 0x293   :  { %v11786_v13 = vpop.eup %11785  ;;  %11797 = vtanh.f32 %v1431_v56  ;;  %v1370_v6 = vmul.f32 0.044715, %v1338_v44  ;;  %v1339_v20 = vmul.f32 %v1307_v40, %v13515_v16  ;;  %v10731_v60 = vpop.f32.mrb[28].mxu1  ;;  %v1492_v63 = vadd.f32 1.0, %v11784_v42 }
 0x294   :  { %v11788_v49 = vpop.eup %11787  ;;  %v1404_v14 = vadd.f32 %v1372_v54, %v13499_v62  ;;  %v1373_v32 = vmul.f32 0.044715, %v1341_v52  ;;  %v13527_v19 = vadd.f32 %v13403_v28, %v10731_v60  ;;  %v1267_v24 = vpop.f32.mrb[29].mxu1  ;;  %v1490_v34 = vadd.f32 1.0, %v11786_v13 }
 0x295   :  { %v1402_v39 = vadd.f32 %v1370_v6, %v13503_v17  ;;  %v1371_v3 = vmul.f32 0.044715, %v1339_v20  ;;  %v13531_v25 = vadd.f32 %v13403_v28, %v1267_v24  ;;  %v10732_v10 = vpop.f32.mrb[30].mxu1  ;;  %v1493_v0 = vadd.f32 1.0, %v11788_v49  ;;  %v11790_v23 = vpop.eup %11789 }
 0x296   :  { %v1436_v43 = vmul.f32 0.7978846, %v1404_v14  ;;  %v1405_v33 = vadd.f32 %v1373_v32, %v13509_v35  ;;  %v1312_v15 = vmul.f32 %v13527_v19, %v13527_v19  ;;  %v13537_v57 = vadd.f32 %v13403_v28, %v10732_v10  ;;  %v1270_v1 = vpop.f32.mrb[31].mxu1 }
 0x297   :  { %v1434_v7 = vmul.f32 0.7978846, %v1402_v39  ;;  %v1403_v56 = vadd.f32 %v1371_v3, %v13515_v16  ;;  %v1310_v44 = vmul.f32 %v13531_v25, %v13531_v25  ;;  %v13543_v40 = vadd.f32 %v13403_v28, %v1270_v1 }
 0x298   :  { %11799 = vtanh.f32 %v1436_v43  ;;  %v1437_v42 = vmul.f32 0.7978846, %v1405_v33  ;;  %v1344_v54 = vmul.f32 %v1312_v15, %v13527_v19  ;;  %v1313_v52 = vmul.f32 %v13537_v57, %v13537_v57 }
 0x299   :  { %11801 = vtanh.f32 %v1434_v7  ;;  %v1435_v13 = vmul.f32 0.7978846, %v1403_v56  ;;  %v1342_v6 = vmul.f32 %v1310_v44, %v13531_v25  ;;  %v1311_v20 = vmul.f32 %v13543_v40, %v13543_v40 }
 0x29a   :  { %v11792_v60 = vpop.eup %11791  ;;  %11803 = vtanh.f32 %v1437_v42  ;;  %v1376_v49 = vmul.f32 0.044715, %v1344_v54  ;;  %v1345_v28 = vmul.f32 %v1313_v52, %v13537_v57  ;;  %v1491_v14 = vadd.f32 1.0, %v11790_v23 }
 0x29b   :  { %v11794_v32 = vpop.eup %11793  ;;  %11805 = vtanh.f32 %v1435_v13  ;;  %v1374_v24 = vmul.f32 0.044715, %v1342_v6  ;;  %v1343_v39 = vmul.f32 %v1311_v20, %v13543_v40  ;;  %v1522_v3 = vmul.f32 0.5, %v1490_v34 }
 0x29c   :  { %v11796_v10 = vpop.eup %11795  ;;  %v1408_v43 = vadd.f32 %v1376_v49, %v13527_v19  ;;  %v1377_v33 = vmul.f32 0.044715, %v1345_v28  ;;  %v1523_v15 = vmul.f32 0.5, %v1491_v14  ;;  %v1524_v1 = vmul.f32 0.5, %v1492_v63 }
 0x29d   :  { %v11798_v7 = vpop.eup %11797  ;;  %v1406_v56 = vadd.f32 %v1374_v24, %v13531_v25  ;;  %v1375_v44 = vmul.f32 0.044715, %v1343_v39  ;;  %v1554_v42 = vmul.f32 %v1522_v3, %v13449_v27  ;;  %v1525_v54 = vmul.f32 0.5, %v1493_v0 }
 0x29e   :  { %v1440_v23 = vmul.f32 0.7978846, %v1408_v43  ;;  %v1409_v52 = vadd.f32 %v1377_v33, %v13537_v57  ;;  %v1555_v13 = vmul.f32 %v1523_v15, %v13459_v41  ;;  %v1556_v34 = vmul.f32 %v1524_v1, %v13446_v61 }
 0x29f   :  { %v1438_v6 = vmul.f32 0.7978846, %v1406_v56  ;;  %v1407_v20 = vadd.f32 %v1375_v44, %v13543_v40  ;;  %v1557_v49 = vmul.f32 %v1525_v54, %v13454_v2  ;;  %v1494_v63 = vadd.f32 1.0, %v11794_v32 }
 0x2a0   :  { %11807 = vtanh.f32 %v1440_v23  ;;  %v1441_v28 = vmul.f32 0.7978846, %v1409_v52  ;;  %v1598_v14 = vpack.c.bf16 %v1555_v13, %v1554_v42  ;;  %v1495_v24 = vadd.f32 1.0, %v11798_v7 }
 0x2a1   :  { %11809 = vtanh.f32 %v1438_v6  ;;  %v1439_v27 = vmul.f32 0.7978846, %v1407_v20  ;;  %v1599_v0 = vpack.c.bf16 %v1557_v49, %v1556_v34  ;;  %v1526_v39 = vmul.f32 0.5, %v1494_v63 }
 0x2a2   :  { %v11800_v3 = vpop.eup %11799  ;;  %11811 = vtanh.f32 %v1441_v28  ;;  %10751 = vmatprep.mubr.msk.bf16.mxu0 %vm50_vm0, %v1598_v14  ;;  %v1527_v41 = vmul.f32 0.5, %v1495_v24  ;;  %v1496_v61 = vadd.f32 1.0, %v11792_v60  ;;  %v1497_v43 = vadd.f32 1.0, %v11796_v10 }
 0x2a3   :  { %v11802_v33 = vpop.eup %11801  ;;  %11813 = vtanh.f32 %v1439_v27  ;;  %10752 = vmatmul.mubr.msk.bf16.gmra.mrb[48].mxu0 %vm50_vm0, %v1599_v0  ;;  %v1558_v2 = vmul.f32 %v1526_v39, %v13475_v50  ;;  %v1500_v32 = vadd.f32 1.0, %v11800_v3 }
 0x2a4   :  { %v11804_v15 = vpop.eup %11803  ;;  %v1559_v1 = vmul.f32 %v1527_v41, %v13487_v31  ;;  %v1528_v7 = vmul.f32 0.5, %v1496_v61  ;;  %v1529_v56 = vmul.f32 0.5, %v1497_v43  ;;  %v1498_v44 = vadd.f32 1.0, %v11802_v33 }
 0x2a5   :  { %v11806_v42 = vpop.eup %11805  ;;  %v1501_v54 = vadd.f32 1.0, %v11804_v15  ;;  %v1532_v23 = vmul.f32 0.5, %v1500_v32 }
 0x2a6   :  { %v1600_v52 = vpack.c.bf16 %v1559_v1, %v1558_v2  ;;  %v1560_v60 = vmul.f32 %v1528_v7, %v13471_v45  ;;  %v1561_v10 = vmul.f32 %v1529_v56, %v13481_v37  ;;  %v1499_v13 = vadd.f32 1.0, %v11806_v42 }
 0x2a7   :  { %v1530_v34 = vmul.f32 0.5, %v1498_v44  ;;  %v1533_v6 = vmul.f32 0.5, %v1501_v54  ;;  %v1564_v31 = vmul.f32 %v1532_v23, %v13499_v62  ;;  %v18531_v7 = vpack.c.bf16 %v13067_v30, %v13064_v22 }
 0x2a8   :  { %10755 = vmatprep.mubr.msk.bf16.mxu0 %vm50_vm0, %v1600_v52  ;;  %v1601_v50 = vpack.c.bf16 %v1561_v10, %v1560_v60  ;;  %v1531_v20 = vmul.f32 0.5, %v1499_v13  ;;  %v18535_v22 = vpack.c.bf16 %v13099_v29, %v13096_v12  ;;  %v18538_v30 = vpack.c.bf16 %v13109_v21, %v13106_v53  ;;  %v18545_v12 = vld [vmem:[#allocation10_spill] sm:$0xff]  ;;  %v18546_v29 = vld [vmem:[#allocation7_spill] sm:$0xff] }
 0x2a9   :  { %v1565_v49 = vmul.f32 %v1533_v6, %v13509_v35  ;;  %v1562_v28 = vmul.f32 %v1530_v34, %v13503_v17  ;;  %v18547_v53 = vpack.c.bf16 %v18545_v12, %v18546_v29  ;;  %v18548_v21 = vld [vmem:[#allocation6_spill] sm:$0xff] }
 0x2aa   :  { %v11808_v63 = vpop.eup %11807  ;;  %v1563_v14 = vmul.f32 %v1531_v20, %v13515_v16 }
 0x2ab   :  { %v11810_v24 = vpop.eup %11809  ;;  %10756 = vmatmul.mubr.msk.bf16.gmra.mrb[52].mxu0 %vm50_vm0, %v1601_v50  ;;  %v1603_v45 = vpack.c.bf16 %v1565_v49, %v1564_v31  ;;  %v1504_v37 = vadd.f32 1.0, %v11808_v63 }
 0x2ac   :  { %v11812_v27 = vpop.eup %11811  ;;  %v1602_v0 = vpack.c.bf16 %v1563_v14, %v1562_v28  ;;  %v1502_v39 = vadd.f32 1.0, %v11810_v24 }
 0x2ad   :  { %v11814_v3 = vpop.eup %11813  ;;  %v1505_v41 = vadd.f32 1.0, %v11812_v27  ;;  %v1536_v61 = vmul.f32 0.5, %v1504_v37 }
 0x2ae   :  { %10759 = vmatprep.mubr.msk.bf16.mxu0 %vm50_vm0, %v1602_v0  ;;  %v1503_v62 = vadd.f32 1.0, %v11814_v3  ;;  %v1534_v35 = vmul.f32 0.5, %v1502_v39 }
 0x2af   :  { %v1537_v43 = vmul.f32 0.5, %v1505_v41  ;;  %v1568_v17 = vmul.f32 %v1536_v61, %v13527_v19  ;;  %v18532_v19 = vpack.c.bf16 %v13044_v18, %v13037_v9  ;;  %v18536_v9 = vpack.c.bf16 %v13093_v51, %v13090_v26  ;;  %v18543_v26 = vld [vmem:[#allocation5_spill] sm:$0xff] }
 0x2b0   :  { %v1535_v33 = vmul.f32 0.5, %v1503_v62  ;;  %v1566_v2 = vmul.f32 %v1534_v35, %v13531_v25  ;;  %v18533_v25 = vpack.c.bf16 %v13077_v59, %v13074_v47  ;;  %v18537_v18 = vpack.c.bf16 %v13115_v8, %v13112_v5  ;;  %v18549_v5 = vld [vmem:[#allocation9_spill] sm:$0xff] }
 0x2b1   :  { %v1569_v16 = vmul.f32 %v1537_v43, %v13537_v57  ;;  %v18534_v57 = vpack.c.bf16 %v13083_v46, %v13080_v48  ;;  %v18539_v47 = vpack.c.bf16 %v13242_v36, %v13238_v55  ;;  %v18540_v59 = vpack.c.bf16 %v13249_v38, %v13245_v58  ;;  %v18542_v46 = vld [vmem:[#allocation8_spill] sm:$0xff]  ;;  %v18551_v55 = vld [vmem:[#allocation14_spill] sm:$0xff]  ;;  %v18552_v36 = vld [vmem:[#allocation13_spill] sm:$0xff] }
 0x2b2   :  { %v1567_v32 = vmul.f32 %v1535_v33, %v13543_v40  ;;  %v18541_v48 = vpack.c.bf16 %v13259_v4, %v13256_v11  ;;  %v18544_v51 = vpack.c.bf16 %v18542_v46, %v18543_v26  ;;  %v18550_v8 = vpack.c.bf16 %v18548_v21, %v18549_v5  ;;  %v18554_v38 = vld [vmem:[#allocation12_spill] sm:$0xff]  ;;  %v18555_v11 = vld [vmem:[#allocation11_spill] sm:$0xff] }
 0x2b3   :  { %10760 = vmatmul.mubr.msk.bf16.gmra.mrb[56].mxu0 %vm50_vm0, %v1603_v45  ;;  %v1605_v15 = vpack.c.bf16 %v1569_v16, %v1568_v17  ;;  %v18553_v58 = vpack.c.bf16 %v18551_v55, %v18552_v36  ;;  %v18556_v4 = vpack.c.bf16 %v18554_v38, %v18555_v11  ;;  %v13648_v40 = vld [vmem:[%s18394_s2 + $0x1] ss:$0 sm:$0xff] }
 0x2b4   :  { %v1604_v1 = vpack.c.bf16 %v1567_v32, %v1566_v2 }
 0x2b6   :  { %10763 = vmatprep.mubr.msk.bf16.mxu0 %vm50_vm0, %v1604_v1 }
 0x2bb   :  { %10764 = vmatmul.mubr.msk.bf16.gmra.mrb[60].mxu0 %vm50_vm0, %v1605_v15 }
 0x2bc   :  { %10769 = vmatprep.mubr.msk.bf16.mxu0 %vm50_vm0, %v18531_v7 }
 0x2c3   :  { %10770 = vmatmul.mubr.msk.bf16.vlgmr.msra.gmra.mrb[32].mxu0 %vm50_vm0, %v18532_v19 }
 0x2c4   :  { %10773 = vmatprep.mubr.msk.bf16.mxu0 %vm50_vm0, %v18533_v25 }
 0x2cb   :  { %10774 = vmatmul.mubr.msk.bf16.gmra.mrb[36].mxu0 %vm50_vm0, %v18534_v57 }
 0x2cc   :  { %10777 = vmatprep.mubr.msk.bf16.mxu0 %vm50_vm0, %v18535_v22 }
 0x2d3   :  { %10778 = vmatmul.mubr.msk.bf16.gmra.mrb[40].mxu0 %vm50_vm0, %v18536_v9 }
 0x2d4   :  { %10781 = vmatprep.mubr.msk.bf16.mxu0 %vm50_vm0, %v18537_v18 }
 0x2db   :  { %10782 = vmatmul.mubr.msk.bf16.gmra.mrb[44].mxu0 %vm50_vm0, %v18538_v30 }
 0x2dc   :  { %10785 = vmatprep.mubr.msk.bf16.mxu0 %vm50_vm0, %v18539_v47 }
 0x2e3   :  { %10786 = vmatmul.mubr.msk.bf16.gmra.mrb[48].mxu0 %vm50_vm0, %v18540_v59 }
 0x2e4   :  { %10789 = vmatprep.mubr.msk.bf16.mxu0 %vm50_vm0, %v18541_v48 }
 0x2eb   :  { %10790 = vmatmul.mubr.msk.bf16.gmra.mrb[52].mxu0 %vm50_vm0, %v18544_v51 }
 0x2ec   :  { %10793 = vmatprep.mubr.msk.bf16.mxu0 %vm50_vm0, %v18547_v53 }
 0x2f3   :  { %10794 = vmatmul.mubr.msk.bf16.gmra.mrb[56].mxu0 %vm50_vm0, %v18550_v8 }
 0x2f4   :  { %10797 = vmatprep.mubr.msk.bf16.mxu0 %vm50_vm0, %v18553_v58 }
 0x2fb   :  { %10798 = vmatmul.mubr.msk.bf16.gmra.mrb[60].mxu0 %vm50_vm0, %v18556_v4 }
 0x396   :  { %v10771_v56 = vpop.f32.mrb[32].mxu0 }
 0x397   :  { %v13651_v44 = vadd.f32 %v10771_v56, %v13648_v40  ;;  %v1909_v42 = vpop.f32.mrb[33].mxu0 }
 0x398   :  { %v13654_v54 = vadd.f32 %v13648_v40, %v1909_v42  ;;  %v10772_v23 = vpop.f32.mrb[34].mxu0 }
 0x399   :  { %v2075_v52 = vmul.f32 %v13651_v44, %v13651_v44  ;;  %v13659_v60 = vadd.f32 %v10772_v23, %v13648_v40  ;;  %v1912_v10 = vpop.f32.mrb[35].mxu0 }
 0x39a   :  { %v2073_v13 = vmul.f32 %v13654_v54, %v13654_v54  ;;  %v13664_v34 = vadd.f32 %v13648_v40, %v1912_v10 }
 0x39b   :  { %v2107_v6 = vmul.f32 %v2075_v52, %v13651_v44  ;;  %v2076_v49 = vmul.f32 %v13659_v60, %v13659_v60 }
 0x39c   :  { %v2105_v50 = vmul.f32 %v2073_v13, %v13654_v54  ;;  %v2074_v20 = vmul.f32 %v13664_v34, %v13664_v34 }
 0x39d   :  { %v2139_v31 = vmul.f32 0.044715, %v2107_v6  ;;  %v2108_v0 = vmul.f32 %v2076_v49, %v13659_v60 }
 0x39e   :  { %v2106_v63 = vmul.f32 %v2074_v20, %v13664_v34  ;;  %v10775_v28 = vpop.f32.mrb[36].mxu0  ;;  %v2137_v45 = vmul.f32 0.044715, %v2105_v50 }
 0x39f   :  { %v1925_v14 = vpop.f32.mrb[37].mxu0  ;;  %v2171_v24 = vadd.f32 %v2139_v31, %v13651_v44  ;;  %v2140_v35 = vmul.f32 0.044715, %v2108_v0  ;;  %v13687_v19 = vadd.f32 %v10775_v28, %v13648_v40 }
 0x3a0   :  { %v2138_v37 = vmul.f32 0.044715, %v2106_v63  ;;  %v10776_v27 = vpop.f32.mrb[38].mxu0  ;;  %v2169_v62 = vadd.f32 %v2137_v45, %v13654_v54  ;;  %v13693_v18 = vadd.f32 %v13648_v40, %v1925_v14 }
 0x3a1   :  { %v1928_v39 = vpop.f32.mrb[39].mxu0  ;;  %v2203_v3 = vmul.f32 0.7978846, %v2171_v24  ;;  %v13676_v41 = vadd.f32 %v10776_v27, %v13648_v40  ;;  %v2172_v1 = vadd.f32 %v2140_v35, %v13659_v60  ;;  %v2079_v30 = vmul.f32 %v13687_v19, %v13687_v19 }
 0x3a2   :  { %v2170_v61 = vadd.f32 %v2138_v37, %v13664_v34  ;;  %v13683_v16 = vadd.f32 %v13648_v40, %v1928_v39  ;;  %v2201_v15 = vmul.f32 0.7978846, %v2169_v62  ;;  %v2077_v12 = vmul.f32 %v13693_v18, %v13693_v18 }
 0x3a3   :  { %11815 = vtanh.f32 %v2203_v3  ;;  %v2080_v33 = vmul.f32 %v13676_v41, %v13676_v41  ;;  %v2204_v9 = vmul.f32 0.7978846, %v2172_v1  ;;  %v2111_v21 = vmul.f32 %v2079_v30, %v13687_v19 }
 0x3a4   :  { %v2202_v43 = vmul.f32 0.7978846, %v2170_v61  ;;  %v2078_v57 = vmul.f32 %v13683_v16, %v13683_v16  ;;  %v2109_v36 = vmul.f32 %v2077_v12, %v13693_v18 }
 0x3a5   :  { %v2112_v25 = vmul.f32 %v2080_v33, %v13676_v41  ;;  %v2143_v11 = vmul.f32 0.044715, %v2111_v21 }
 0x3a6   :  { %v10779_v17 = vpop.f32.mrb[40].mxu0  ;;  %11817 = vtanh.f32 %v2202_v43  ;;  %v2110_v46 = vmul.f32 %v2078_v57, %v13683_v16  ;;  %v2141_v31 = vmul.f32 0.044715, %v2109_v36 }
 0x3a7   :  { %v1941_v2 = vpop.f32.mrb[41].mxu0  ;;  %11819 = vtanh.f32 %v2201_v15  ;;  %v2144_v47 = vmul.f32 0.044715, %v2112_v25  ;;  %v13716_v52 = vadd.f32 %v10779_v17, %v13648_v40  ;;  %v2175_v28 = vadd.f32 %v2143_v11, %v13687_v19 }
 0x3a8   :  { %v10780_v32 = vpop.f32.mrb[42].mxu0  ;;  %11821 = vtanh.f32 %v2204_v9  ;;  %v2142_v55 = vmul.f32 0.044715, %v2110_v46  ;;  %v13734_v14 = vadd.f32 %v13648_v40, %v1941_v2 }
 0x3a9   :  { %v1944_v7 = vpop.f32.mrb[43].mxu0  ;;  %v2176_v5 = vadd.f32 %v2144_v47, %v13676_v41  ;;  %v13719_v10 = vadd.f32 %v10780_v32, %v13648_v40  ;;  %v2083_v27 = vmul.f32 %v13716_v52, %v13716_v52  ;;  %v2207_v62 = vmul.f32 0.7978846, %v2175_v28 }
 0x3aa   :  { %v2174_v23 = vadd.f32 %v2142_v55, %v13683_v16  ;;  %v2081_v35 = vmul.f32 %v13734_v14, %v13734_v14 }
 0x3ab   :  { %v2208_v4 = vmul.f32 0.7978846, %v2176_v5  ;;  %v2084_v0 = vmul.f32 %v13719_v10, %v13719_v10  ;;  %v2115_v17 = vmul.f32 %v2083_v27, %v13716_v52 }
 0x3ac   :  { %v2206_v37 = vmul.f32 0.7978846, %v2174_v23  ;;  %v2113_v30 = vmul.f32 %v2081_v35, %v13734_v14 }
 0x3ad   :  { %v11816_v22 = vpop.eup %11815  ;;  %11823 = vtanh.f32 %v2208_v4  ;;  %v2116_v2 = vmul.f32 %v2084_v0, %v13719_v10 }
 0x3ae   :  { %v13697_v59 = vpop.f32.mrb[44].mxu0  ;;  %v2267_v48 = vadd.f32 1.0, %v11816_v22  ;;  %11825 = vtanh.f32 %v2206_v37  ;;  %v2145_v55 = vmul.f32 0.044715, %v2113_v30 }
 0x3af   :  { %v13700_v26 = vpop.f32.mrb[45].mxu0  ;;  %11827 = vtanh.f32 %v2207_v62  ;;  %v2148_v46 = vmul.f32 0.044715, %v2116_v2  ;;  %v13775_v12 = vadd.f32 %v13697_v59, %v13648_v40 }
 0x3b0   :  { %v10784_v51 = vpop.f32.mrb[46].mxu0  ;;  %v2299_v53 = vmul.f32 0.5, %v2267_v48  ;;  %v11818_v8 = vpop.eup %11817  ;;  %v2147_v48 = vmul.f32 0.044715, %v2115_v17  ;;  %v13779_v21 = vadd.f32 %v13648_v40, %v13700_v26 }
 0x3b1   :  { %v13704_v29 = vpop.f32.mrb[47].mxu0  ;;  %v11820_v38 = vpop.eup %11819  ;;  %v2266_v42 = vadd.f32 1.0, %v11818_v8  ;;  %v13763_v57 = vadd.f32 %v10784_v51, %v13648_v40  ;;  %v2180_v11 = vadd.f32 %v2148_v46, %v13719_v10  ;;  %v2087_v4 = vmul.f32 %v13775_v12, %v13775_v12 }
 0x3b2   :  { %v13710_v58 = vmul.f32 %v2299_v53, %v13651_v44  ;;  %v13726_v44 = vadd.f32 %v13648_v40, %v1944_v7  ;;  %v2265_v49 = vadd.f32 1.0, %v11820_v38  ;;  %v11822_v45 = vpop.eup %11821  ;;  %v13783_v5 = vadd.f32 %v13648_v40, %v13704_v29 }
 0x3b3   :  { %v2298_v50 = vmul.f32 0.5, %v2266_v42  ;;  %v2268_v43 = vadd.f32 1.0, %v11822_v45  ;;  %v2088_v8 = vmul.f32 %v13763_v57, %v13763_v57  ;;  %v2119_v35 = vmul.f32 %v2087_v4, %v13775_v12 }
 0x3b4   :  { %v2370_v13 = vsel %vm2363_vm3, %v13710_v58, 0.0  ;;  %v2082_v39 = vmul.f32 %v13726_v44, %v13726_v44  ;;  %v2297_v61 = vmul.f32 0.5, %v2265_v49  ;;  %v2495_v29 = vmul.f32 %v13710_v58, %v13710_v58 }
 0x3b5   :  { %2371 = vadd.xlane.f32.xlu0 %v2370_v13  ;;  %v13737_v24 = vmul.f32 %v2298_v50, %v13664_v34  ;;  %v2173_v34 = vadd.f32 %v2141_v31, %v13693_v18  ;;  %v2300_v7 = vmul.f32 0.5, %v2268_v43  ;;  %v2179_v13 = vadd.f32 %v2147_v48, %v13716_v52 }
 0x3b6   :  { %v13712_v56 = vpop.f32.mrb[48].mxu0  ;;  %v13755_v32 = vmul.f32 %v2297_v61, %v13654_v54  ;;  %v2114_v1 = vmul.f32 %v2082_v39, %v13726_v44  ;;  %v2085_v31 = vmul.f32 %v13779_v21, %v13779_v21  ;;  %v2086_v49 = vmul.f32 %v13783_v5, %v13783_v5 }
 0x3b7   :  { %v13723_v6 = vpop.f32.mrb[49].mxu0  ;;  %v2367_v3 = vsel %vm2363_vm3, %v13737_v24, 0.0  ;;  %v13771_v54 = vmul.f32 %v2300_v7, %v13659_v60  ;;  %v2205_v47 = vmul.f32 0.7978846, %v2173_v34  ;;  %v11824_v51 = vpop.eup %11823  ;;  %v2494_v26 = vmul.f32 %v13737_v24, %v13737_v24 }
 0x3b8   :  { %v13728_v20 = vpop.f32.mrb[50].mxu0  ;;  %2368 = vadd.xlane.f32.xlu1 %v2367_v3  ;;  %v2364_v22 = vsel %vm2363_vm3, %v13755_v32, 0.0  ;;  %v2146_v53 = vmul.f32 0.044715, %v2114_v1  ;;  %v2272_v42 = vadd.f32 1.0, %v11824_v51  ;;  %v11826_v45 = vpop.eup %11825  ;;  %v2120_v37 = vmul.f32 %v2088_v8, %v13763_v57 }
 0x3b9   :  { %v13730_v63 = vpop.f32.mrb[51].mxu0  ;;  %2365 = vadd.xlane.f32.xlu0 %v2364_v22  ;;  %v2496_v60 = vmul.f32 %v13771_v54, %v13771_v54  ;;  %v2373_v59 = vsel %vm2363_vm3, %v13771_v54, 0.0  ;;  %11829 = vtanh.f32 %v2205_v47  ;;  %v2531_v27 = vsel %vm2363_vm3, %v2495_v29, 0.0  ;;  %v11828_v17 = vpop.eup %11827 }
 0x3ba   :  { %v2178_v50 = vadd.f32 %v2146_v53, %v13726_v44  ;;  %v2304_v0 = vmul.f32 0.5, %v2272_v42  ;;  %v2493_v39 = vmul.f32 %v13755_v32, %v13755_v32  ;;  %v2177_v61 = vadd.f32 %v2145_v55, %v13734_v14 }
 0x3bb   :  { %v2534_v36 = vsel %vm2363_vm3, %v2496_v60, 0.0  ;;  %v2528_v62 = vsel %vm2363_vm3, %v2494_v26, 0.0  ;;  %v2212_v34 = vmul.f32 0.7978846, %v2180_v11  ;;  %v2117_v1 = vmul.f32 %v2085_v31, %v13779_v21 }
 0x3bc   :  { %2535 = vadd.xlane.f32.xlu1 %v2534_v36  ;;  %v13821_v43 = vmul.f32 %v2304_v0, %v13676_v41  ;;  %v2210_v2 = vmul.f32 0.7978846, %v2178_v50  ;;  %v2270_v7 = vadd.f32 1.0, %v11826_v45  ;;  %v2211_v22 = vmul.f32 0.7978846, %v2179_v13 }
 0x3bd   :  { %2374 = vadd.xlane.f32.xlu0 %v2373_v59  ;;  %v2152_v30 = vmul.f32 0.044715, %v2120_v37  ;;  %v2118_v47 = vmul.f32 %v2086_v49, %v13783_v5  ;;  %v2525_v48 = vsel %vm2363_vm3, %v2493_v39, 0.0  ;;  %v2209_v46 = vmul.f32 0.7978846, %v2177_v61 }
 0x3be   :  { %v13750_v33 = vpop.f32.mrb[52].mxu0  ;;  %v2385_v51 = vsel %vm2363_vm3, %v13821_v43, 0.0  ;;  %v2302_v53 = vmul.f32 0.5, %v2270_v7  ;;  %11831 = vtanh.f32 %v2212_v34  ;;  %v2151_v41 = vmul.f32 0.044715, %v2119_v35 }
 0x3bf   :  { %v13757_v15 = vpop.f32.mrb[53].mxu0  ;;  %v13832_v8 = vadd.f32 %v13728_v20, %v13648_v40  ;;  %v2271_v59 = vadd.f32 1.0, %v11828_v17  ;;  %11833 = vtanh.f32 %v2210_v2  ;;  %v2149_v36 = vmul.f32 0.044715, %v2117_v1 }
 0x3c0   :  { %v13760_v25 = vpop.f32.mrb[54].mxu0  ;;  %2529 = vadd.xlane.f32.xlu1 %v2528_v62  ;;  %v13837_v26 = vmul.f32 %v2302_v53, %v13683_v16  ;;  %11835 = vtanh.f32 %v2211_v22  ;;  %v2184_v4 = vadd.f32 %v2152_v30, %v13763_v57  ;;  %v2150_v42 = vmul.f32 0.044715, %v2118_v47 }
 0x3c1   :  { %v13767_v9 = vpop.f32.mrb[55].mxu0  ;;  %2532 = vadd.xlane.f32.xlu0 %v2531_v27  ;;  %v2303_v13 = vmul.f32 0.5, %v2271_v59  ;;  %11837 = vtanh.f32 %v2209_v46  ;;  %v2183_v31 = vadd.f32 %v2151_v41, %v13775_v12  ;;  %v13849_v16 = vadd.f32 %v13712_v56, %v13648_v40 }
 0x3c2   :  { %v2379_v20 = vsel %vm2363_vm3, %v13837_v26, 0.0  ;;  %v2092_v49 = vmul.f32 %v13832_v8, %v13832_v8  ;;  %v2181_v37 = vadd.f32 %v2149_v36, %v13779_v21  ;;  %v13859_v27 = vadd.f32 %v13648_v40, %v13730_v63 }
 0x3c3   :  { %v11830_v11 = vpop.eup %11829  ;;  %v13854_v45 = vmul.f32 %v2303_v13, %v13687_v19  ;;  %v2500_v0 = vmul.f32 %v13821_v43, %v13821_v43  ;;  %v2216_v61 = vmul.f32 0.7978846, %v2184_v4  ;;  %v2182_v56 = vadd.f32 %v2150_v42, %v13783_v5 }
 0x3c4   :  { %2386 = vadd.xlane.f32.xlu1 %v2385_v51  ;;  %v2269_v39 = vadd.f32 1.0, %v11830_v11  ;;  %v2215_v35 = vmul.f32 0.7978846, %v2183_v31  ;;  %v2091_v17 = vmul.f32 %v13849_v16, %v13849_v16  ;;  %v13871_v63 = vadd.f32 %v13648_v40, %v13723_v6 }
 0x3c5   :  { %2526 = vadd.xlane.f32.xlu0 %v2525_v48  ;;  %v2382_v62 = vsel %vm2363_vm3, %v13854_v45, 0.0  ;;  %v2546_v19 = vsel %vm2363_vm3, %v2500_v0, 0.0  ;;  %v2124_v2 = vmul.f32 %v2092_v49, %v13832_v8  ;;  %v2213_v1 = vmul.f32 0.7978846, %v2181_v37 }
 0x3c6   :  { %v13796_v38 = vpop.f32.mrb[56].mxu0  ;;  %v2301_v34 = vmul.f32 0.5, %v2269_v39  ;;  %v2090_v7 = vmul.f32 %v13859_v27, %v13859_v27  ;;  %v2498_v30 = vmul.f32 %v13837_v26, %v13837_v26  ;;  %11839 = vtanh.f32 %v2216_v61 }
 0x3c7   :  { %v13801_v23 = vpop.f32.mrb[57].mxu0  ;;  %v2214_v48 = vmul.f32 0.7978846, %v2182_v56  ;;  %v2499_v53 = vmul.f32 %v13854_v45, %v13854_v45  ;;  %11841 = vtanh.f32 %v2215_v35  ;;  %v2089_v59 = vmul.f32 %v13871_v63, %v13871_v63 }
 0x3c8   :  { %v13809_v28 = vpop.f32.mrb[58].mxu0  ;;  %2380 = vadd.xlane.f32.xlu1 %v2379_v20  ;;  %v13877_v22 = vmul.f32 %v2301_v34, %v13693_v18  ;;  %v11832_v47 = vpop.eup %11831  ;;  %v2540_v51 = vsel %vm2363_vm3, %v2498_v30, 0.0  ;;  %v2123_v18 = vmul.f32 %v2091_v17, %v13849_v16  ;;  %v2156_v36 = vmul.f32 0.044715, %v2124_v2 }
 0x3c9   :  { %v13815_v3 = vpop.f32.mrb[59].mxu0  ;;  %2383 = vadd.xlane.f32.xlu0 %v2382_v62  ;;  %v11834_v46 = vpop.eup %11833  ;;  %11843 = vtanh.f32 %v2213_v1  ;;  %v2122_v4 = vmul.f32 %v2090_v7, %v13859_v27  ;;  %v2276_v42 = vadd.f32 1.0, %v11832_v47  ;;  %v2543_v20 = vsel %vm2363_vm3, %v2499_v53, 0.0 }
 0x3ca   :  { %v2376_v6 = vsel %vm2363_vm3, %v13877_v22, 0.0  ;;  %v11836_v41 = vpop.eup %11835  ;;  %11845 = vtanh.f32 %v2214_v48  ;;  %v2274_v13 = vadd.f32 1.0, %v11834_v46  ;;  %v2497_v49 = vmul.f32 %v13877_v22, %v13877_v22 }
 0x3cb   :  { %v11838_v11 = vpop.eup %11837  ;;  %v2308_v31 = vmul.f32 0.5, %v2276_v42  ;;  %v2275_v37 = vadd.f32 1.0, %v11836_v41  ;;  %v2155_v0 = vmul.f32 0.044715, %v2123_v18  ;;  %v2121_v39 = vmul.f32 %v2089_v59, %v13871_v63 }
 0x3cc   :  { %2547 = vadd.xlane.f32.xlu1 %v2546_v19  ;;  %v2188_v61 = vadd.f32 %v2156_v36, %v13832_v8  ;;  %v2306_v56 = vmul.f32 0.5, %v2274_v13  ;;  %v2154_v62 = vmul.f32 0.044715, %v2122_v4  ;;  %v2273_v35 = vadd.f32 1.0, %v11838_v11 }
 0x3cd   :  { %2377 = vadd.xlane.f32.xlu0 %v2376_v6  ;;  %v13896_v19 = vmul.f32 %v2308_v31, %v13719_v10  ;;  %v2307_v34 = vmul.f32 0.5, %v2275_v37  ;;  %v13900_v17 = vadd.f32 %v13760_v25, %v13648_v40  ;;  %v2537_v1 = vsel %vm2363_vm3, %v2497_v49, 0.0 }
 0x3ce   :  { %v13828_v60 = vpop.f32.mrb[60].mxu0  ;;  %v13906_v7 = vmul.f32 %v2306_v56, %v13726_v44  ;;  %v2187_v10 = vadd.f32 %v2155_v0, %v13849_v16  ;;  %v2153_v48 = vmul.f32 0.044715, %v2121_v39  ;;  %v13914_v46 = vadd.f32 %v13750_v33, %v13648_v40 }
 0x3cf   :  { %v13834_v55 = vpop.f32.mrb[61].mxu0  ;;  %v2397_v2 = vsel %vm2363_vm3, %v13896_v19, 0.0  ;;  %v13909_v30 = vmul.f32 %v2307_v34, %v13716_v52  ;;  %v2305_v25 = vmul.f32 0.5, %v2273_v35  ;;  %v2220_v6 = vmul.f32 0.7978846, %v2188_v61  ;;  %v11665_v35 = vld [vmem:[%s18393_s1 + $0x18] sm:$0xff]  }
 0x3d0   :  { %v13839_v29 = vpop.f32.mrb[62].mxu0  ;;  %2541 = vadd.xlane.f32.xlu1 %v2540_v51  ;;  %v11840_v47 = vpop.eup %11839  ;;  %v2186_v51 = vadd.f32 %v2154_v62, %v13859_v27  ;;  %v13919_v44 = vadd.f32 %v13648_v40, %v13767_v9  ;;  %v2096_v53 = vmul.f32 %v13900_v17, %v13900_v17  ;;  %v2504_v41 = vmul.f32 %v13896_v19, %v13896_v19 }
 0x3d1   :  { %v13842_v50 = vpop.f32.mrb[63].mxu0  ;;  %2544 = vadd.xlane.f32.xlu0 %v2543_v20  ;;  %v11842_v52 = vpop.eup %11841  ;;  %v2391_v33 = vsel %vm2363_vm3, %v13906_v7, 0.0  ;;  %v2394_v59 = vsel %vm2363_vm3, %v13909_v30, 0.0  ;;  %v13930_v36 = vmul.f32 %v2305_v25, %v13734_v14  ;;  %v2280_v11 = vadd.f32 1.0, %v11840_v47  ;;  %10801 = vmatprep.subr.bf16.mxu1 %v11665_v35 }
 0x3d2   :  { %v2219_v4 = vmul.f32 0.7978846, %v2187_v10  ;;  %v2185_v42 = vadd.f32 %v2153_v48, %v13871_v63  ;;  %v2095_v13 = vmul.f32 %v13914_v46, %v13914_v46  ;;  %11847 = vtanh.f32 %v2220_v6  ;;  %10802 = vmatpush3.bf16.msra.mxu1 %v11665_v35 }
 0x3d3   :  { %v11844_v18 = vpop.eup %11843  ;;  %v2218_v20 = vmul.f32 0.7978846, %v2186_v51  ;;  %v13937_v31 = vadd.f32 %v13648_v40, %v13757_v15  ;;  %v2094_v14 = vmul.f32 %v13919_v44, %v13919_v44  ;;  %v2128_v49 = vmul.f32 %v2096_v53, %v13900_v17 }
 0x3d4   :  { %2398 = vadd.xlane.f32.xlu1 %v2397_v2  ;;  %v11846_v9 = vpop.eup %11845  ;;  %v2558_v37 = vsel %vm2363_vm3, %v2504_v41, 0.0  ;;  %v2502_v0 = vmul.f32 %v13906_v7, %v13906_v7  ;;  %v2503_v39 = vmul.f32 %v13909_v30, %v13909_v30  ;;  %v2388_v61 = vsel %vm2363_vm3, %v13930_v36, 0.0 }
 0x3d5   :  { %2538 = vadd.xlane.f32.xlu0 %v2537_v1  ;;  %v2312_v56 = vmul.f32 0.5, %v2280_v11  ;;  %v2278_v62 = vadd.f32 1.0, %v11846_v9  ;;  %v2279_v15 = vadd.f32 1.0, %v11842_v52  ;;  %11849 = vtanh.f32 %v2219_v4 }
 0x3d6   :  { %v2127_v34 = vmul.f32 %v2095_v13, %v13914_v46  ;;  %v2217_v2 = vmul.f32 0.7978846, %v2185_v42  ;;  %11851 = vtanh.f32 %v2218_v20  ;;  %v2093_v1 = vmul.f32 %v13937_v31, %v13937_v31 }
 0x3d7   :  { %v2126_v47 = vmul.f32 %v2094_v14, %v13919_v44  ;;  %v2160_v10 = vmul.f32 0.044715, %v2128_v49  ;;  %v2552_v48 = vsel %vm2363_vm3, %v2502_v0, 0.0  ;;  %v2555_v25 = vsel %vm2363_vm3, %v2503_v39, 0.0 }
 0x3d8   :  { %2392 = vadd.xlane.f32.xlu1 %v2391_v33  ;;  %v2277_v6 = vadd.f32 1.0, %v11844_v18  ;;  %v13959_v51 = vmul.f32 %v2312_v56, %v13763_v57  ;;  %v2501_v52 = vmul.f32 %v13930_v36, %v13930_v36  ;;  %v2310_v53 = vmul.f32 0.5, %v2278_v62 }
 0x3d9   :  { %2395 = vadd.xlane.f32.xlu0 %v2394_v59  ;;  %v2311_v41 = vmul.f32 0.5, %v2279_v15  ;;  %v2159_v33 = vmul.f32 0.044715, %v2127_v34  ;;  %v2125_v59 = vmul.f32 %v2093_v1, %v13937_v31  ;;  %v2158_v11 = vmul.f32 0.044715, %v2126_v47 }
 0x3da   :  { %v13966_v9 = vadd.f32 %v13809_v28, %v13648_v40  ;;  %11853 = vtanh.f32 %v2217_v2  ;;  %v2192_v57 = vadd.f32 %v2160_v10, %v13900_v17  ;;  %v2309_v18 = vmul.f32 0.5, %v2277_v6 }
 0x3db   :  { %v2409_v42 = vsel %vm2363_vm3, %v13959_v51, 0.0  ;;  %v2549_v13 = vsel %vm2363_vm3, %v2501_v52, 0.0  ;;  %v13973_v20 = vmul.f32 %v2310_v53, %v13783_v5  ;;  %v13976_v14 = vmul.f32 %v2311_v41, %v13775_v12 }
 0x3dc   :  { %2559 = vadd.xlane.f32.xlu1 %v2558_v37  ;;  %v11848_v4 = vpop.eup %11847  ;;  %v2191_v49 = vadd.f32 %v2159_v33, %v13914_v46  ;;  %v13981_v28 = vadd.f32 %v13796_v38, %v13648_v40  ;;  %v2157_v37 = vmul.f32 0.044715, %v2125_v59  ;;  %v2190_v0 = vadd.f32 %v2158_v11, %v13919_v44 }
 0x3dd   :  { %2389 = vadd.xlane.f32.xlu0 %v2388_v61  ;;  %v2100_v39 = vmul.f32 %v13966_v9, %v13966_v9  ;;  %v13988_v5 = vadd.f32 %v13648_v40, %v13815_v3  ;;  %v2224_v61 = vmul.f32 0.7978846, %v2192_v57  ;;  %v2284_v56 = vadd.f32 1.0, %v11848_v4 }
 0x3de   :  { %v2403_v38 = vsel %vm2363_vm3, %v13973_v20, 0.0  ;;  %v2406_v15 = vsel %vm2363_vm3, %v13976_v14, 0.0  ;;  %v2506_v34 = vmul.f32 %v13973_v20, %v13973_v20  ;;  %v13997_v35 = vmul.f32 %v2309_v18, %v13779_v21  ;;  %v11666_v21 = vld [vmem:[%s18393_s1 + $0x20] sm:$0xff]  }
 0x3df   :  { %v11850_v12 = vpop.eup %11849  ;;  %v2223_v2 = vmul.f32 0.7978846, %v2191_v49  ;;  %v2099_v3 = vmul.f32 %v13981_v28, %v13981_v28  ;;  %v14003_v1 = vadd.f32 %v13648_v40, %v13801_v23  ;;  %v2189_v47 = vadd.f32 %v2157_v37, %v13937_v31  ;;  %10803 = vmatprep.subr.bf16.mxu1 %v11666_v21 }
 0x3e0   :  { %2553 = vadd.xlane.f32.xlu1 %v2552_v48  ;;  %v11852_v62 = vpop.eup %11851  ;;  %v2222_v10 = vmul.f32 0.7978846, %v2190_v0  ;;  %v2132_v48 = vmul.f32 %v2100_v39, %v13966_v9  ;;  %11855 = vtanh.f32 %v2224_v61  ;;  %v2508_v6 = vmul.f32 %v13959_v51, %v13959_v51  ;;  %10804 = vmatpush3.bf16.msra.mxu1 %v11666_v21 }
 0x3e1   :  { %2556 = vadd.xlane.f32.xlu0 %v2555_v25  ;;  %v2098_v25 = vmul.f32 %v13988_v5, %v13988_v5  ;;  %v2316_v23 = vmul.f32 0.5, %v2284_v56  ;;  %v2282_v52 = vadd.f32 1.0, %v11852_v62  ;;  %v2564_v53 = vsel %vm2363_vm3, %v2506_v34, 0.0 }
 0x3e2   :  { %v2400_v41 = vsel %vm2363_vm3, %v13997_v35, 0.0  ;;  %v2505_v33 = vmul.f32 %v13997_v35, %v13997_v35  ;;  %v2283_v59 = vadd.f32 1.0, %v11850_v12  ;;  %11857 = vtanh.f32 %v2223_v2 }
 0x3e3   :  { %v2131_v57 = vmul.f32 %v2099_v3, %v13981_v28  ;;  %v2097_v18 = vmul.f32 %v14003_v1, %v14003_v1  ;;  %11859 = vtanh.f32 %v2222_v10  ;;  %v2164_v4 = vmul.f32 0.044715, %v2132_v48 }
 0x3e4   :  { %2410 = vadd.xlane.f32.xlu1 %v2409_v42  ;;  %v11854_v11 = vpop.eup %11853  ;;  %v2130_v42 = vmul.f32 %v2098_v25, %v13988_v5  ;;  %v2570_v49 = vsel %vm2363_vm3, %v2508_v6, 0.0  ;;  %v14025_v37 = vmul.f32 %v2316_v23, %v13832_v8  ;;  %v2314_v0 = vmul.f32 0.5, %v2282_v52 }
 0x3e5   :  { %2550 = vadd.xlane.f32.xlu0 %v2549_v13  ;;  %v2221_v13 = vmul.f32 0.7978846, %v2189_v47  ;;  %v2561_v39 = vsel %vm2363_vm3, %v2505_v33, 0.0  ;;  %v2507_v12 = vmul.f32 %v13976_v14, %v13976_v14  ;;  %v2315_v61 = vmul.f32 0.5, %v2283_v59 }
 0x3e6   :  { %v2281_v56 = vadd.f32 1.0, %v11854_v11  ;;  %v2163_v62 = vmul.f32 0.044715, %v2131_v57  ;;  %v2162_v34 = vmul.f32 0.044715, %v2130_v42  ;;  %v14034_v8 = vadd.f32 %v13839_v29, %v13648_v40 }
 0x3e7   :  { %11861 = vtanh.f32 %v2221_v13  ;;  %v14037_v2 = vmul.f32 %v2314_v0, %v13859_v27  ;;  %v2421_v3 = vsel %vm2363_vm3, %v14025_v37, 0.0  ;;  %v2567_v47 = vsel %vm2363_vm3, %v2507_v12, 0.0 }
 0x3e8   :  { %2404 = vadd.xlane.f32.xlu1 %v2403_v38  ;;  %v2129_v38 = vmul.f32 %v2097_v18, %v14003_v1  ;;  %v14043_v10 = vmul.f32 %v2315_v61, %v13849_v16  ;;  %v2313_v48 = vmul.f32 0.5, %v2281_v56  ;;  %v2195_v21 = vadd.f32 %v2163_v62, %v13981_v28 }
 0x3e9   :  { %2407 = vadd.xlane.f32.xlu0 %v2406_v15  ;;  %v2196_v15 = vadd.f32 %v2164_v4, %v13966_v9  ;;  %v14048_v29 = vadd.f32 %v13828_v60, %v13648_v40  ;;  %v2194_v23 = vadd.f32 %v2162_v34, %v13988_v5  ;;  %v14053_v52 = vadd.f32 %v13648_v40, %v13842_v50 }
 0x3ea   :  { %v11856_v25 = vpop.eup %11855  ;;  %v2161_v6 = vmul.f32 0.044715, %v2129_v38  ;;  %v2415_v60 = vsel %vm2363_vm3, %v14037_v2, 0.0  ;;  %v2418_v59 = vsel %vm2363_vm3, %v14043_v10, 0.0  ;;  %v14064_v11 = vmul.f32 %v2313_v48, %v13871_v63 }
 0x3eb   :  { %v2228_v27 = vmul.f32 0.7978846, %v2196_v15  ;;  %v2288_v57 = vadd.f32 1.0, %v11856_v25  ;;  %v2227_v50 = vmul.f32 0.7978846, %v2195_v21  ;;  %v2103_v4 = vmul.f32 %v14048_v29, %v14048_v29 }
 0x3ec   :  { %2565 = vadd.xlane.f32.xlu1 %v2564_v53  ;;  %v11858_v16 = vpop.eup %11857  ;;  %v2104_v53 = vmul.f32 %v14034_v8, %v14034_v8  ;;  %v2193_v18 = vadd.f32 %v2161_v6, %v14003_v1  ;;  %v2226_v42 = vmul.f32 0.7978846, %v2194_v23  ;;  %v14071_v13 = vadd.f32 %v13648_v40, %v13834_v55 }
 0x3ed   :  { %2401 = vadd.xlane.f32.xlu0 %v2400_v41  ;;  %v2512_v41 = vmul.f32 %v14025_v37, %v14025_v37  ;;  %v11860_v33 = vpop.eup %11859  ;;  %11863 = vtanh.f32 %v2228_v27  ;;  %v2510_v0 = vmul.f32 %v14037_v2, %v14037_v2  ;;  %v2287_v12 = vadd.f32 1.0, %v11858_v16 }
 0x3ee   :  { %v2136_v63 = vmul.f32 %v2104_v53, %v14034_v8  ;;  %v2412_v56 = vsel %vm2363_vm3, %v14064_v11, 0.0  ;;  %v2511_v62 = vmul.f32 %v14043_v10, %v14043_v10  ;;  %v2320_v40 = vmul.f32 0.5, %v2288_v57 }
 0x3ef   :  { %v2582_v61 = vsel %vm2363_vm3, %v2512_v41, 0.0  ;;  %11865 = vtanh.f32 %v2227_v50  ;;  %v2135_v38 = vmul.f32 %v2103_v4, %v14048_v29  ;;  %v2225_v15 = vmul.f32 0.7978846, %v2193_v18 }
 0x3f0   :  { %2571 = vadd.xlane.f32.xlu1 %v2570_v49  ;;  %v2102_v49 = vmul.f32 %v14053_v52, %v14053_v52  ;;  %11867 = vtanh.f32 %v2226_v42  ;;  %v2101_v34 = vmul.f32 %v14071_v13, %v14071_v13  ;;  %v2576_v48 = vsel %vm2363_vm3, %v2510_v0, 0.0 }
 0x3f1   :  { %2562 = vadd.xlane.f32.xlu0 %v2561_v39  ;;  %v2286_v39 = vadd.f32 1.0, %v11860_v33  ;;  %v11862_v55 = vpop.eup %11861  ;;  %v2319_v21 = vmul.f32 0.5, %v2287_v12  ;;  %v2579_v6 = vsel %vm2363_vm3, %v2511_v62, 0.0  ;;  %v14090_v27 = vmul.f32 %v2320_v40, %v13900_v17 }
 0x3f2   :  { %v2509_v23 = vmul.f32 %v14064_v11, %v14064_v11  ;;  %v2285_v16 = vadd.f32 1.0, %v11862_v55  ;;  %v2167_v53 = vmul.f32 0.044715, %v2135_v38  ;;  %v2133_v41 = vmul.f32 %v2101_v34, %v14071_v13 }
 0x3f3   :  { %v2318_v25 = vmul.f32 0.5, %v2286_v39  ;;  %11869 = vtanh.f32 %v2225_v15  ;;  %v2433_v17 = vsel %vm2363_vm3, %v14090_v27, 0.0  ;;  %v14103_v18 = vmul.f32 %v2319_v21, %v13914_v46 }
 0x3f4   :  { %2422 = vadd.xlane.f32.xlu1 %v2421_v3  ;;  %v2134_v3 = vmul.f32 %v2102_v49, %v14053_v52  ;;  %v2573_v50 = vsel %vm2363_vm3, %v2509_v23, 0.0  ;;  %v2317_v4 = vmul.f32 0.5, %v2285_v16  ;;  %v2199_v42 = vadd.f32 %v2167_v53, %v14048_v29 }
 0x3f5   :  { %2568 = vadd.xlane.f32.xlu0 %v2567_v47  ;;  %v2168_v47 = vmul.f32 0.044715, %v2136_v63  ;;  %v2165_v49 = vmul.f32 0.044715, %v2133_v41  ;;  %v2516_v46 = vmul.f32 %v14090_v27, %v14090_v27 }
 0x3f6   :  { %v2166_v33 = vmul.f32 0.044715, %v2134_v3  ;;  %v14114_v62 = vmul.f32 %v2317_v4, %v13937_v31  ;;  %v2231_v40 = vmul.f32 0.7978846, %v2199_v42  ;;  %v2515_v31 = vmul.f32 %v14103_v18, %v14103_v18 }
 0x3f7   :  { %v11864_v57 = vpop.eup %11863  ;;  %v2197_v55 = vadd.f32 %v2165_v49, %v14071_v13 }
 0x3f8   :  { %2416 = vadd.xlane.f32.xlu1 %v2415_v60  ;;  %v2200_v60 = vadd.f32 %v2168_v47, %v14034_v8  ;;  %v2198_v63 = vadd.f32 %v2166_v33, %v14053_v52  ;;  %v2292_v39 = vadd.f32 1.0, %v11864_v57  ;;  %v2594_v47 = vsel %vm2363_vm3, %v2516_v46, 0.0 }
 0x3f9   :  { %2419 = vadd.xlane.f32.xlu0 %v2418_v59  ;;  %v14097_v59 = vmul.f32 %v2318_v25, %v13919_v44  ;;  %v11866_v0 = vpop.eup %11865  ;;  %v2591_v33 = vsel %vm2363_vm3, %v2515_v31, 0.0 }
 0x3fa   :  { %v2232_v44 = vmul.f32 0.7978846, %v2200_v60  ;;  %v11868_v12 = vpop.eup %11867  ;;  %v2230_v38 = vmul.f32 0.7978846, %v2198_v63  ;;  %v2324_v15 = vmul.f32 0.5, %v2292_v39  ;;  %v2291_v3 = vadd.f32 1.0, %v11866_v0 }
 0x3fb   :  { %v2290_v34 = vadd.f32 1.0, %v11868_v12  ;;  %v2514_v25 = vmul.f32 %v14097_v59, %v14097_v59  ;;  %v2513_v60 = vmul.f32 %v14114_v62, %v14114_v62 }
 0x3fc   :  { %2583 = vadd.xlane.f32.xlu1 %v2582_v61  ;;  %v2427_v61 = vsel %vm2363_vm3, %v14097_v59, 0.0  ;;  %11871 = vtanh.f32 %v2232_v44  ;;  %v14125_v23 = vmul.f32 %v2324_v15, %v13966_v9  ;;  %v2323_v53 = vmul.f32 0.5, %v2291_v3 }
 0x3fd   :  { %2413 = vadd.xlane.f32.xlu0 %v2412_v56  ;;  %v2430_v56 = vsel %vm2363_vm3, %v14103_v18, 0.0  ;;  %v11870_v21 = vpop.eup %11869  ;;  %11873 = vtanh.f32 %v2231_v40  ;;  %v2322_v16 = vmul.f32 0.5, %v2290_v34  ;;  %v2588_v41 = vsel %vm2363_vm3, %v2514_v25, 0.0 }
 0x3fe   :  { %11875 = vtanh.f32 %v2230_v38  ;;  %v2289_v57 = vadd.f32 1.0, %v11870_v21  ;;  %v14138_v4 = vmul.f32 %v2323_v53, %v13981_v28  ;;  %v2520_v0 = vmul.f32 %v14125_v23, %v14125_v23 }
 0x3ff   :  { %v14135_v9 = vmul.f32 %v2322_v16, %v13988_v5 }
 0x400   :  { %2577 = vadd.xlane.f32.xlu1 %v2576_v48  ;;  %v2424_v48 = vsel %vm2363_vm3, %v14114_v62, 0.0  ;;  %v2321_v42 = vmul.f32 0.5, %v2289_v57  ;;  %v2442_v12 = vsel %vm2363_vm3, %v14138_v4, 0.0  ;;  %v2519_v38 = vmul.f32 %v14138_v4, %v14138_v4 }
 0x401   :  { %2580 = vadd.xlane.f32.xlu0 %v2579_v6  ;;  %v2229_v6 = vmul.f32 0.7978846, %v2197_v55  ;;  %v2439_v39 = vsel %vm2363_vm3, %v14135_v9, 0.0  ;;  %v2518_v55 = vmul.f32 %v14135_v9, %v14135_v9 }
 0x402   :  { %v14147_v5 = vmul.f32 %v2321_v42, %v14003_v1  ;;  %v2603_v25 = vsel %vm2363_vm3, %v2519_v38, 0.0 }
 0x403   :  { %11877 = vtanh.f32 %v2229_v6 }
 0x404   :  { %2434 = vadd.xlane.f32.xlu1 %v2433_v17  ;;  %v2445_v17 = vsel %vm2363_vm3, %v14125_v23, 0.0  ;;  %v2436_v40 = vsel %vm2363_vm3, %v14147_v5, 0.0  ;;  %v2517_v1 = vmul.f32 %v14147_v5, %v14147_v5 }
 0x405   :  { %2574 = vadd.xlane.f32.xlu0 %v2573_v50  ;;  %v2585_v50 = vsel %vm2363_vm3, %v2513_v60, 0.0 }
 0x406   :  { %v11872_v49 = vpop.eup %11871  ;;  %v2597_v6 = vsel %vm2363_vm3, %v2517_v1, 0.0 }
 0x407   :  { %v11874_v63 = vpop.eup %11873  ;;  %v2296_v28 = vadd.f32 1.0, %v11872_v49 }
 0x408   :  { %2428 = vadd.xlane.f32.xlu1 %v2427_v61  ;;  %v11876_v44 = vpop.eup %11875  ;;  %v2606_v61 = vsel %vm2363_vm3, %v2520_v0, 0.0  ;;  %v2295_v46 = vadd.f32 1.0, %v11874_v63 }
 0x409   :  { %2431 = vadd.xlane.f32.xlu0 %v2430_v56  ;;  %v2294_v56 = vadd.f32 1.0, %v11876_v44  ;;  %v2328_v15 = vmul.f32 0.5, %v2296_v28 }
 0x40b   :  { %v2326_v3 = vmul.f32 0.5, %v2294_v56  ;;  %v14161_v31 = vmul.f32 %v2328_v15, %v14034_v8 }
 0x40c   :  { %2595 = vadd.xlane.f32.xlu1 %v2594_v47  ;;  %v2327_v47 = vmul.f32 0.5, %v2295_v46 }
 0x40d   :  { %2425 = vadd.xlane.f32.xlu0 %v2424_v48  ;;  %v11878_v34 = vpop.eup %11877  ;;  %v2600_v48 = vsel %vm2363_vm3, %v2518_v55, 0.0  ;;  %v2457_v16 = vsel %vm2363_vm3, %v14161_v31, 0.0  ;;  %v14167_v53 = vmul.f32 %v2326_v3, %v14053_v52 }
 0x40e   :  { %v2293_v21 = vadd.f32 1.0, %v11878_v34 }
 0x40f   :  { %v2451_v8 = vsel %vm2363_vm3, %v14167_v53, 0.0  ;;  %v2522_v57 = vmul.f32 %v14167_v53, %v14167_v53 }
 0x410   :  { %2589 = vadd.xlane.f32.xlu1 %v2588_v41  ;;  %v14170_v41 = vmul.f32 %v2327_v47, %v14048_v29 }
 0x411   :  { %2592 = vadd.xlane.f32.xlu0 %v2591_v33  ;;  %v2325_v33 = vmul.f32 0.5, %v2293_v21  ;;  %v2612_v29 = vsel %vm2363_vm3, %v2522_v57, 0.0 }
 0x412   :  { %v2454_v60 = vsel %vm2363_vm3, %v14170_v41, 0.0  ;;  %v2523_v63 = vmul.f32 %v14170_v41, %v14170_v41 }
 0x414   :  { %2446 = vadd.xlane.f32.xlu1 %v2445_v17  ;;  %v14179_v17 = vmul.f32 %v2325_v33, %v14071_v13  ;;  %v2615_v0 = vsel %vm2363_vm3, %v2523_v63, 0.0 }
 0x415   :  { %2586 = vadd.xlane.f32.xlu0 %v2585_v50  ;;  %v2524_v50 = vmul.f32 %v14161_v31, %v14161_v31 }
 0x416   :  { %v2448_v52 = vsel %vm2363_vm3, %v14179_v17, 0.0  ;;  %v2521_v42 = vmul.f32 %v14179_v17, %v14179_v17 }
 0x417   :  { %v2618_v49 = vsel %vm2363_vm3, %v2524_v50, 0.0 }
 0x418   :  { %2440 = vadd.xlane.f32.xlu1 %v2439_v39  ;;  %v2609_v13 = vsel %vm2363_vm3, %v2521_v42, 0.0 }
 0x419   :  { %2443 = vadd.xlane.f32.xlu0 %v2442_v12 }
 0x41c   :  { %2607 = vadd.xlane.f32.xlu1 %v2606_v61 }
 0x41d   :  { %2437 = vadd.xlane.f32.xlu0 %v2436_v40 }
 0x420   :  { %2601 = vadd.xlane.f32.xlu1 %v2600_v48 }
 0x421   :  { %2604 = vadd.xlane.f32.xlu0 %v2603_v25 }
 0x424   :  { %2458 = vadd.xlane.f32.xlu1 %v2457_v16 }
 0x425   :  { %2598 = vadd.xlane.f32.xlu0 %v2597_v6 }
 0x428   :  { %2452 = vadd.xlane.f32.xlu1 %v2451_v8 }
 0x429   :  { %2455 = vadd.xlane.f32.xlu0 %v2454_v60 }
 0x42c   :  { %2613 = vadd.xlane.f32.xlu1 %v2612_v29 }
 0x42d   :  { %2449 = vadd.xlane.f32.xlu0 %v2448_v52 }
 0x430   :  { %2619 = vadd.xlane.f32.xlu1 %v2618_v49 }
 0x431   :  { %2610 = vadd.xlane.f32.xlu0 %v2609_v13 }
 0x435   :  { %2616 = vadd.xlane.f32.xlu0 %v2615_v0 }
 0x442   :  { %v2372_v44 = vpop.xlane.xlu0 %2371 }
 0x443   :  { %v2463_v61 = vmul.f32 0.03125, %v2372_v44 }
 0x445   :  { %v2369_v39 = vpop.xlane.xlu1 %2368  ;;  %v2687_v34 = vmul.f32 %v2463_v61, %v2463_v61 }
 0x446   :  { %v2366_v12 = vpop.xlane.xlu0 %2365  ;;  %v2462_v40 = vmul.f32 0.03125, %v2369_v39 }
 0x447   :  { %v2461_v1 = vmul.f32 0.03125, %v2366_v12 }
 0x448   :  { %v2686_v25 = vmul.f32 %v2462_v40, %v2462_v40 }
 0x449   :  { %v2536_v56 = vpop.xlane.xlu1 %2535  ;;  %v2685_v60 = vmul.f32 %v2461_v1, %v2461_v1 }
 0x44a   :  { %v2375_v28 = vpop.xlane.xlu0 %2374  ;;  %v2624_v55 = vmul.f32 0.03125, %v2536_v56  ;;  %v2655_v56 = vsub.f32 %v13710_v58, %v2463_v61  ;;  %v2653_v61 = vsub.f32 %v13755_v32, %v2461_v1 }
 0x44b   :  { %v2464_v46 = vmul.f32 0.03125, %v2375_v28 }
 0x44d   :  { %v2688_v38 = vmul.f32 %v2464_v46, %v2464_v46  ;;  %v2530_v47 = vpop.xlane.xlu1 %2529 }
 0x44e   :  { %v2533_v15 = vpop.xlane.xlu0 %2532  ;;  %v2622_v21 = vmul.f32 0.03125, %v2530_v47 }
 0x44f   :  { %v2720_v3 = vsub.f32 %v2624_v55, %v2688_v38  ;;  %v2623_v48 = vmul.f32 0.03125, %v2533_v15  ;;  %v2654_v38 = vsub.f32 %v13737_v24, %v2462_v40  ;;  %v11667_v24 = vld [vmem:[%s18393_s1 + $0x28] sm:$0xff]   ;;  %v14213_v40 = vld [vmem:[%s18394_s2 + $0x2] ss:$0 sm:$0xff] }
 0x450   :  { %v2718_v33 = vsub.f32 %v2622_v21, %v2686_v25  ;;  %10837 = vmatprep.subr.bf16.mxu1 %v11667_v24 }
 0x451   :  { %v2752_v6 = vadd.f32 1e-05, %v2720_v3  ;;  %v2719_v16 = vsub.f32 %v2623_v48, %v2687_v34  ;;  %v2387_v29 = vpop.xlane.xlu1 %2386  ;;  %v2656_v48 = vsub.f32 %v13771_v54, %v2464_v46 }
 0x452   :  { %v2527_v8 = vpop.xlane.xlu0 %2526  ;;  %v2750_v50 = vadd.f32 1e-05, %v2718_v33  ;;  %v14193_v0 = vmul.f32 0.03125, %v2387_v29 }
 0x453   :  { %v2751_v57 = vadd.f32 1e-05, %v2719_v16  ;;  %v2621_v52 = vmul.f32 0.03125, %v2527_v8  ;;  %11879 = vrsqrt.f32 %v2752_v6 }
 0x454   :  { %v2692_v15 = vmul.f32 %v14193_v0, %v14193_v0 }
 0x455   :  { %11881 = vrsqrt.f32 %v2751_v57  ;;  %v2717_v42 = vsub.f32 %v2621_v52, %v2685_v60  ;;  %v2381_v13 = vpop.xlane.xlu1 %2380 }
 0x456   :  { %11883 = vrsqrt.f32 %v2750_v50  ;;  %v2384_v63 = vpop.xlane.xlu0 %2383  ;;  %v14195_v39 = vmul.f32 0.03125, %v2381_v13  ;;  %v14224_v13 = vld [vmem:[%s18394_s2 + $0x3] ss:$0 sm:$0xff] }
 0x457   :  { %v2749_v49 = vadd.f32 1e-05, %v2717_v42  ;;  %v14202_v21 = vmul.f32 0.03125, %v2384_v63 }
 0x458   :  { %v2690_v6 = vmul.f32 %v14195_v39, %v14195_v39 }
 0x459   :  { %11885 = vrsqrt.f32 %v2749_v49  ;;  %v2548_v44 = vpop.xlane.xlu1 %2547  ;;  %v2691_v52 = vmul.f32 %v14202_v21, %v14202_v21 }
 0x45a   :  { %v2628_v12 = vmul.f32 0.03125, %v2548_v44  ;;  %v2378_v34 = vpop.xlane.xlu0 %2377 }
 0x45b   :  { %v14216_v60 = vmul.f32 0.03125, %v2378_v34 }
 0x45c   :  { %v2724_v16 = vsub.f32 %v2628_v12, %v2692_v15 }
 0x45d   :  { %v11880_v28 = vpop.eup %11879  ;;  %v2542_v3 = vpop.xlane.xlu1 %2541 }
 0x45e   :  { %v2626_v33 = vmul.f32 0.03125, %v2542_v3  ;;  %v2816_v54 = vmul.f32 %v11880_v28, %v2656_v48  ;;  %v2545_v29 = vpop.xlane.xlu0 %2544  ;;  %v2756_v32 = vadd.f32 1e-05, %v2724_v16  ;;  %v2689_v28 = vmul.f32 %v14216_v60, %v14216_v60 }
 0x45f   :  { %v11882_v55 = vpop.eup %11881  ;;  %v2627_v50 = vmul.f32 0.03125, %v2545_v29 }
 0x460   :  { %v11884_v47 = vpop.eup %11883  ;;  %v2815_v25 = vmul.f32 %v11882_v55, %v2655_v56  ;;  %v2722_v57 = vsub.f32 %v2626_v33, %v2690_v6  ;;  %v2852_v63 = vmul.f32 %v14213_v40, %v2816_v54 }
 0x461   :  { %v2814_v58 = vmul.f32 %v11884_v47, %v2654_v38  ;;  %v2723_v44 = vsub.f32 %v2627_v50, %v2691_v52  ;;  %v2399_v56 = vpop.xlane.xlu1 %2398 }
 0x462   :  { %v2851_v8 = vmul.f32 %v14213_v40, %v2815_v25  ;;  %v2754_v1 = vadd.f32 1e-05, %v2722_v57  ;;  %v2539_v55 = vpop.xlane.xlu0 %2538  ;;  %v2888_v48 = vadd.f32 %v14224_v13, %v2852_v63  ;;  %v2658_v63 = vsub.f32 %v13837_v26, %v14195_v39 }
 0x463   :  { %v11886_v46 = vpop.eup %11885  ;;  %v2850_v49 = vmul.f32 %v14213_v40, %v2814_v58  ;;  %v2755_v15 = vadd.f32 1e-05, %v2723_v44  ;;  %v2625_v34 = vmul.f32 0.03125, %v2539_v55  ;;  %v14234_v58 = vmul.f32 0.03125, %v2399_v56 }
 0x464   :  { %v2813_v42 = vmul.f32 %v11886_v46, %v2653_v61  ;;  %v2887_v38 = vadd.f32 %v14224_v13, %v2851_v8  ;;  %11887 = vrsqrt.f32 %v2754_v1  ;;  %v2659_v44 = vsub.f32 %v13854_v45, %v14202_v21 }
 0x465   :  { %11889 = vrsqrt.f32 %v2756_v32  ;;  %v2886_v47 = vadd.f32 %v14224_v13, %v2850_v49  ;;  %v2721_v25 = vsub.f32 %v2625_v34, %v2689_v28  ;;  %v2393_v6 = vpop.xlane.xlu1 %2392  ;;  %v2696_v29 = vmul.f32 %v14234_v58, %v14234_v58 }
 0x466   :  { %v2849_v12 = vmul.f32 %v14213_v40, %v2813_v42  ;;  %11891 = vrsqrt.f32 %v2755_v15  ;;  %v2396_v16 = vpop.xlane.xlu0 %2395  ;;  %v2922_v54 = vpack.c.bf16 %v2888_v48, %v2887_v38  ;;  %v14238_v46 = vmul.f32 0.03125, %v2393_v6 }
 0x467   :  { %v2753_v61 = vadd.f32 1e-05, %v2721_v25  ;;  %v14242_v52 = vmul.f32 0.03125, %v2396_v16  ;;  %v2660_v32 = vsub.f32 %v13821_v43, %v14193_v0  ;;  %v2657_v45 = vsub.f32 %v13877_v22, %v14216_v60 }
 0x468   :  { %v2885_v3 = vadd.f32 %v14224_v13, %v2849_v12 }
 0x469   :  { %11893 = vrsqrt.f32 %v2753_v61  ;;  %v2560_v8 = vpop.xlane.xlu1 %2559  ;;  %v2695_v38 = vmul.f32 %v14242_v52, %v14242_v52 }
 0x46a   :  { %v2921_v33 = vpack.c.bf16 %v2886_v47, %v2885_v3  ;;  %v2390_v57 = vpop.xlane.xlu0 %2389  ;;  %v2632_v50 = vmul.f32 0.03125, %v2560_v8 }
 0x46b   :  { %v14252_v12 = vmul.f32 0.03125, %v2390_v57 }
 0x46c   :  { %10805 = vmatprep.mubr.msk.bf16.mxu1 %vm2363_vm3, %v2921_v33  ;;  %v2728_v1 = vsub.f32 %v2632_v50, %v2696_v29 }
 0x46d   :  { %10806 = vmatmul.mubr.msk.bf16.vlgmr.msra.gmra.mrb[32].mxu1 %vm2363_vm3, %v2922_v54  ;;  %v2554_v28 = vpop.xlane.xlu1 %2553  ;;  %v2693_v21 = vmul.f32 %v14252_v12, %v14252_v12 }
 0x46e   :  { %10838 = vmatpush3.bf16.msra.mxu1 %v11667_v24  ;;  %v11888_v42 = vpop.eup %11887  ;;  %v2694_v24 = vmul.f32 %v14238_v46, %v14238_v46  ;;  %v2557_v56 = vpop.xlane.xlu0 %2556  ;;  %v2760_v43 = vadd.f32 1e-05, %v2728_v1  ;;  %v2630_v0 = vmul.f32 0.03125, %v2554_v28 }
 0x46f   :  { %v11890_v49 = vpop.eup %11889  ;;  %v2631_v15 = vmul.f32 0.03125, %v2557_v56  ;;  %v2818_v34 = vmul.f32 %v11888_v42, %v2658_v63 }
 0x470   :  { %v11892_v55 = vpop.eup %11891  ;;  %v2726_v26 = vsub.f32 %v2630_v0, %v2694_v24  ;;  %v2820_v47 = vmul.f32 %v11890_v49, %v2660_v32  ;;  %11895 = vrsqrt.f32 %v2760_v43 }
 0x471   :  { %v2819_v3 = vmul.f32 %v11892_v55, %v2659_v44  ;;  %v2727_v39 = vsub.f32 %v2631_v15, %v2695_v38  ;;  %v2411_v48 = vpop.xlane.xlu1 %2410  ;;  %v2854_v57 = vmul.f32 %v14213_v40, %v2818_v34 }
 0x472   :  { %v2551_v25 = vpop.xlane.xlu0 %2550  ;;  %v2758_v16 = vadd.f32 1e-05, %v2726_v26  ;;  %v2856_v50 = vmul.f32 %v14213_v40, %v2820_v47  ;;  %v14270_v28 = vmul.f32 0.03125, %v2411_v48  ;;  %v2664_v26 = vsub.f32 %v13896_v19, %v14234_v58 }
 0x473   :  { %v11894_v6 = vpop.eup %11893  ;;  %v2759_v33 = vadd.f32 1e-05, %v2727_v39  ;;  %v2629_v61 = vmul.f32 0.03125, %v2551_v25  ;;  %v2855_v54 = vmul.f32 %v14213_v40, %v2819_v3  ;;  %v2890_v44 = vadd.f32 %v14224_v13, %v2854_v57 }
 0x474   :  { %v2817_v8 = vmul.f32 %v11894_v6, %v2657_v45  ;;  %11897 = vrsqrt.f32 %v2758_v16  ;;  %v2892_v24 = vadd.f32 %v14224_v13, %v2856_v50  ;;  %v2662_v47 = vsub.f32 %v13906_v7, %v14238_v46 }
 0x475   :  { %v2725_v29 = vsub.f32 %v2629_v61, %v2693_v21  ;;  %11899 = vrsqrt.f32 %v2759_v33  ;;  %v2405_v22 = vpop.xlane.xlu1 %2404  ;;  %v2891_v49 = vadd.f32 %v14224_v13, %v2855_v54  ;;  %v2663_v45 = vsub.f32 %v13909_v30, %v14242_v52 }
 0x476   :  { %v2408_v60 = vpop.xlane.xlu0 %2407  ;;  %v2853_v42 = vmul.f32 %v14213_v40, %v2817_v8  ;;  %v14264_v1 = vmul.f32 0.03125, %v2405_v22  ;;  %v2700_v21 = vmul.f32 %v14270_v28, %v14270_v28  ;;  %v2661_v57 = vsub.f32 %v13930_v36, %v14252_v12 }
 0x477   :  { %v2757_v32 = vadd.f32 1e-05, %v2725_v29  ;;  %v2924_v34 = vpack.c.bf16 %v2892_v24, %v2891_v49  ;;  %v14286_v48 = vmul.f32 0.03125, %v2408_v60 }
 0x478   :  { %v2889_v63 = vadd.f32 %v14224_v13, %v2853_v42  ;;  %v2698_v43 = vmul.f32 %v14264_v1, %v14264_v1 }
 0x479   :  { %11901 = vrsqrt.f32 %v2757_v32  ;;  %v2566_v56 = vpop.xlane.xlu1 %2565  ;;  %v2699_v60 = vmul.f32 %v14286_v48, %v14286_v48 }
 0x47a   :  { %v2402_v55 = vpop.xlane.xlu0 %2401  ;;  %v2923_v38 = vpack.c.bf16 %v2890_v44, %v2889_v63  ;;  %v2634_v0 = vmul.f32 0.03125, %v2566_v56  ;;  %v11896_v3 = vpop.eup %11895 }
 0x47b   :  { %v14274_v15 = vmul.f32 0.03125, %v2402_v55  ;;  %v2824_v7 = vmul.f32 %v11896_v3, %v2664_v26 }
 0x47c   :  { %10809 = vmatprep.mubr.msk.bf16.mxu1 %vm2363_vm3, %v2923_v38  ;;  %v2730_v39 = vsub.f32 %v2634_v0, %v2698_v43 }
 0x47d   :  { %10810 = vmatmul.mubr.msk.bf16.gmra.mrb[36].mxu1 %vm2363_vm3, %v2924_v34  ;;  %v2572_v25 = vpop.xlane.xlu1 %2571  ;;  %v2697_v19 = vmul.f32 %v14274_v15, %v14274_v15  ;;  %v2860_v55 = vmul.f32 %v14213_v40, %v2824_v7  ;;  %v2665_v7 = vsub.f32 %v13997_v35, %v14274_v15  ;;  %v2667_v15 = vsub.f32 %v13976_v14, %v14286_v48 }
 0x47e   :  { %v2563_v6 = vpop.xlane.xlu0 %2562  ;;  %v11898_v16 = vpop.eup %11897  ;;  %v2762_v33 = vadd.f32 1e-05, %v2730_v39  ;;  %v2636_v58 = vmul.f32 0.03125, %v2572_v25 }
 0x47f   :  { %v2633_v61 = vmul.f32 0.03125, %v2563_v6  ;;  %v11900_v54 = vpop.eup %11899  ;;  %v2822_v8 = vmul.f32 %v11898_v16, %v2662_v47  ;;  %v2896_v39 = vadd.f32 %v14224_v13, %v2860_v55 }
 0x480   :  { %11903 = vrsqrt.f32 %v2762_v33  ;;  %v2732_v46 = vsub.f32 %v2636_v58, %v2700_v21  ;;  %v2823_v52 = vmul.f32 %v11900_v54, %v2663_v45 }
 0x481   :  { %v2729_v30 = vsub.f32 %v2633_v61, %v2697_v19  ;;  %v2423_v29 = vpop.xlane.xlu1 %2422  ;;  %v2858_v44 = vmul.f32 %v14213_v40, %v2822_v8  ;;  %v2666_v61 = vsub.f32 %v13973_v20, %v14264_v1  ;;  %v2668_v8 = vsub.f32 %v13959_v51, %v14270_v28 }
 0x482   :  { %v2569_v50 = vpop.xlane.xlu0 %2568  ;;  %v2764_v42 = vadd.f32 1e-05, %v2732_v46  ;;  %v2859_v24 = vmul.f32 %v14213_v40, %v2823_v52  ;;  %v14298_v43 = vmul.f32 0.03125, %v2423_v29 }
 0x483   :  { %v11902_v22 = vpop.eup %11901  ;;  %v2761_v32 = vadd.f32 1e-05, %v2729_v30  ;;  %v2635_v49 = vmul.f32 0.03125, %v2569_v50  ;;  %v2894_v26 = vadd.f32 %v14224_v13, %v2858_v44 }
 0x484   :  { %v2821_v63 = vmul.f32 %v11902_v22, %v2661_v57  ;;  %11905 = vrsqrt.f32 %v2764_v42  ;;  %v2895_v34 = vadd.f32 %v14224_v13, %v2859_v24  ;;  %v2704_v16 = vmul.f32 %v14298_v43, %v14298_v43 }
 0x485   :  { %v2731_v56 = vsub.f32 %v2635_v49, %v2699_v60  ;;  %11907 = vrsqrt.f32 %v2761_v32  ;;  %v2417_v36 = vpop.xlane.xlu1 %2416 }
 0x486   :  { %v2420_v12 = vpop.xlane.xlu0 %2419  ;;  %v2857_v38 = vmul.f32 %v14213_v40, %v2821_v63  ;;  %v14304_v47 = vmul.f32 0.03125, %v2417_v36  ;;  %v2926_v58 = vpack.c.bf16 %v2896_v39, %v2895_v34 }
 0x487   :  { %v2763_v0 = vadd.f32 1e-05, %v2731_v56  ;;  %v14308_v33 = vmul.f32 0.03125, %v2420_v12 }
 0x488   :  { %v2893_v3 = vadd.f32 %v14224_v13, %v2857_v38  ;;  %v2702_v46 = vmul.f32 %v14304_v47, %v14304_v47 }
 0x489   :  { %11909 = vrsqrt.f32 %v2763_v0  ;;  %v2584_v45 = vpop.xlane.xlu1 %2583  ;;  %v2703_v20 = vmul.f32 %v14308_v33, %v14308_v33 }
 0x48a   :  { %v2414_v21 = vpop.xlane.xlu0 %2413  ;;  %v2925_v25 = vpack.c.bf16 %v2894_v26, %v2893_v3  ;;  %v11904_v6 = vpop.eup %11903  ;;  %v2640_v19 = vmul.f32 0.03125, %v2584_v45 }
 0x48b   :  { %v2826_v57 = vmul.f32 %v11904_v6, %v2666_v61  ;;  %v14322_v1 = vmul.f32 0.03125, %v2414_v21 }
 0x48c   :  { %10813 = vmatprep.mubr.msk.bf16.mxu1 %vm2363_vm3, %v2925_v25  ;;  %v2736_v54 = vsub.f32 %v2640_v19, %v2704_v16 }
 0x48d   :  { %10814 = vmatmul.mubr.msk.bf16.gmra.mrb[40].mxu1 %vm2363_vm3, %v2926_v58  ;;  %v2578_v30 = vpop.xlane.xlu1 %2577  ;;  %v2862_v44 = vmul.f32 %v14213_v40, %v2826_v57  ;;  %v2701_v56 = vmul.f32 %v14322_v1, %v14322_v1 }
 0x48e   :  { %v2581_v52 = vpop.xlane.xlu0 %2580  ;;  %v11906_v29 = vpop.eup %11905  ;;  %v2638_v50 = vmul.f32 0.03125, %v2578_v30  ;;  %v2768_v42 = vadd.f32 1e-05, %v2736_v54 }
 0x48f   :  { %v2639_v22 = vmul.f32 0.03125, %v2581_v52  ;;  %v11908_v60 = vpop.eup %11907  ;;  %v2828_v51 = vmul.f32 %v11906_v29, %v2668_v8  ;;  %v2898_v39 = vadd.f32 %v14224_v13, %v2862_v44  ;;  %v2672_v29 = vsub.f32 %v14025_v37, %v14298_v43 }
 0x490   :  { %v2734_v28 = vsub.f32 %v2638_v50, %v2702_v46  ;;  %v2825_v35 = vmul.f32 %v11908_v60, %v2665_v7  ;;  %11911 = vrsqrt.f32 %v2768_v42  ;;  %v2671_v50 = vsub.f32 %v14043_v10, %v14308_v33 }
 0x491   :  { %v2735_v32 = vsub.f32 %v2639_v22, %v2703_v20  ;;  %v2435_v49 = vpop.xlane.xlu1 %2434  ;;  %v2864_v34 = vmul.f32 %v14213_v40, %v2828_v51  ;;  %v2670_v20 = vsub.f32 %v14037_v2, %v14304_v47  ;;  %v2669_v33 = vsub.f32 %v14064_v11, %v14322_v1 }
 0x492   :  { %v2575_v63 = vpop.xlane.xlu0 %2574  ;;  %v2766_v55 = vadd.f32 1e-05, %v2734_v28  ;;  %v2861_v38 = vmul.f32 %v14213_v40, %v2825_v35  ;;  %v14334_v21 = vmul.f32 0.03125, %v2435_v49 }
 0x493   :  { %v11910_v24 = vpop.eup %11909  ;;  %v2767_v36 = vadd.f32 1e-05, %v2735_v32  ;;  %v2637_v12 = vmul.f32 0.03125, %v2575_v63  ;;  %v2900_v19 = vadd.f32 %v14224_v13, %v2864_v34 }
 0x494   :  { %v2827_v0 = vmul.f32 %v11910_v24, %v2667_v15  ;;  %11913 = vrsqrt.f32 %v2766_v55  ;;  %v2897_v26 = vadd.f32 %v14224_v13, %v2861_v38  ;;  %v2708_v7 = vmul.f32 %v14334_v21, %v14334_v21 }
 0x495   :  { %v2733_v3 = vsub.f32 %v2637_v12, %v2701_v56  ;;  %11915 = vrsqrt.f32 %v2767_v36  ;;  %v2429_v14 = vpop.xlane.xlu1 %2428 }
 0x496   :  { %v2432_v48 = vpop.xlane.xlu0 %2431  ;;  %v2863_v45 = vmul.f32 %v14213_v40, %v2827_v0  ;;  %v2927_v6 = vpack.c.bf16 %v2898_v39, %v2897_v26  ;;  %v14338_v58 = vmul.f32 0.03125, %v2429_v14 }
 0x497   :  { %v2765_v25 = vadd.f32 1e-05, %v2733_v3  ;;  %v14343_v46 = vmul.f32 0.03125, %v2432_v48 }
 0x498   :  { %v2899_v16 = vadd.f32 %v14224_v13, %v2863_v45  ;;  %10817 = vmatprep.mubr.msk.bf16.mxu1 %vm2363_vm3, %v2927_v6  ;;  %v2706_v22 = vmul.f32 %v14338_v58, %v14338_v58 }
 0x499   :  { %11917 = vrsqrt.f32 %v2765_v25  ;;  %v2596_v61 = vpop.xlane.xlu1 %2595  ;;  %v2707_v28 = vmul.f32 %v14343_v46, %v14343_v46 }
 0x49a   :  { %v2426_v54 = vpop.xlane.xlu0 %2425  ;;  %v2928_v8 = vpack.c.bf16 %v2900_v19, %v2899_v16  ;;  %v2644_v30 = vmul.f32 0.03125, %v2596_v61  ;;  %v11912_v57 = vpop.eup %11911 }
 0x49b   :  { %v14356_v32 = vmul.f32 0.03125, %v2426_v54  ;;  %v2832_v10 = vmul.f32 %v11912_v57, %v2672_v29 }
 0x49c   :  { %10818 = vmatmul.mubr.msk.bf16.gmra.mrb[44].mxu1 %vm2363_vm3, %v2928_v8  ;;  %v2740_v52 = vsub.f32 %v2644_v30, %v2708_v7 }
 0x49d   :  { %v2590_v60 = vpop.xlane.xlu1 %2589  ;;  %v2705_v55 = vmul.f32 %v14356_v32, %v14356_v32  ;;  %v2868_v48 = vmul.f32 %v14213_v40, %v2832_v10 }
 0x49e   :  { %v2593_v42 = vpop.xlane.xlu0 %2592  ;;  %v11914_v51 = vpop.eup %11913  ;;  %v2642_v35 = vmul.f32 0.03125, %v2590_v60  ;;  %v2772_v43 = vadd.f32 1e-05, %v2740_v52  ;;  %v2674_v60 = vsub.f32 %v14097_v59, %v14338_v58 }
 0x49f   :  { %v2643_v15 = vmul.f32 0.03125, %v2593_v42  ;;  %v11916_v37 = vpop.eup %11915  ;;  %v2830_v49 = vmul.f32 %v11914_v51, %v2670_v20  ;;  %v2904_v19 = vadd.f32 %v14224_v13, %v2868_v48  ;;  %v2676_v20 = vsub.f32 %v14090_v27, %v14334_v21 }
 0x4a0   :  { %v2738_v2 = vsub.f32 %v2642_v35, %v2706_v22  ;;  %v2831_v63 = vmul.f32 %v11916_v37, %v2671_v50  ;;  %11919 = vrsqrt.f32 %v2772_v43  ;;  %v2675_v42 = vsub.f32 %v14103_v18, %v14343_v46 }
 0x4a1   :  { %v2739_v47 = vsub.f32 %v2643_v15, %v2707_v28  ;;  %v2447_v44 = vpop.xlane.xlu1 %2446  ;;  %v2866_v34 = vmul.f32 %v14213_v40, %v2830_v49  ;;  %v2673_v46 = vsub.f32 %v14114_v62, %v14356_v32 }
 0x4a2   :  { %v2587_v24 = vpop.xlane.xlu0 %2586  ;;  %v2770_v36 = vadd.f32 1e-05, %v2738_v2  ;;  %v2867_v3 = vmul.f32 %v14213_v40, %v2831_v63  ;;  %v14366_v39 = vmul.f32 0.03125, %v2447_v44 }
 0x4a3   :  { %v11918_v56 = vpop.eup %11917  ;;  %v2771_v12 = vadd.f32 1e-05, %v2739_v47  ;;  %v2641_v38 = vmul.f32 0.03125, %v2587_v24  ;;  %v2902_v16 = vadd.f32 %v14224_v13, %v2866_v34 }
 0x4a4   :  { %v2829_v0 = vmul.f32 %v11918_v56, %v2669_v33  ;;  %11921 = vrsqrt.f32 %v2770_v36  ;;  %v2903_v25 = vadd.f32 %v14224_v13, %v2867_v3  ;;  %v2712_v30 = vmul.f32 %v14366_v39, %v14366_v39 }
 0x4a5   :  { %v2737_v14 = vsub.f32 %v2641_v38, %v2705_v55  ;;  %11923 = vrsqrt.f32 %v2771_v12  ;;  %v2441_v11 = vpop.xlane.xlu1 %2440 }
 0x4a6   :  { %v2444_v1 = vpop.xlane.xlu0 %2443  ;;  %v2865_v26 = vmul.f32 %v14213_v40, %v2829_v0  ;;  %v14372_v61 = vmul.f32 0.03125, %v2441_v11  ;;  %v2930_v29 = vpack.c.bf16 %v2904_v19, %v2903_v25 }
 0x4a7   :  { %v2769_v45 = vadd.f32 1e-05, %v2737_v14  ;;  %v14376_v52 = vmul.f32 0.03125, %v2444_v1 }
 0x4a8   :  { %v2901_v6 = vadd.f32 %v14224_v13, %v2865_v26  ;;  %v2710_v51 = vmul.f32 %v14372_v61, %v14372_v61 }
 0x4a9   :  { %11925 = vrsqrt.f32 %v2769_v45  ;;  %v2608_v54 = vpop.xlane.xlu1 %2607  ;;  %v2711_v27 = vmul.f32 %v14376_v52, %v14376_v52 }
 0x4aa   :  { %v2438_v8 = vpop.xlane.xlu0 %2437  ;;  %v2929_v7 = vpack.c.bf16 %v2902_v16, %v2901_v6  ;;  %v2648_v57 = vmul.f32 0.03125, %v2608_v54  ;;  %v11920_v22 = vpop.eup %11919 }
 0x4ab   :  { %v14388_v28 = vmul.f32 0.03125, %v2438_v8  ;;  %v2836_v18 = vmul.f32 %v11920_v22, %v2676_v20  ;;  %v2680_v20 = vsub.f32 %v14125_v23, %v14366_v39  ;;  %v2678_v22 = vsub.f32 %v14135_v9, %v14372_v61  ;;  %v14427_v23 = vld [vmem:[%s18393_s1 + $0x48] sm:$0xff]  }
 0x4ac   :  { %10821 = vmatprep.mubr.msk.bf16.mxu1 %vm2363_vm3, %v2929_v7  ;;  %v2744_v50 = vsub.f32 %v2648_v57, %v2712_v30  ;;  %10877 = vmatprep.subr.bf16.mxu0 %v14427_v23 }
 0x4ad   :  { %10822 = vmatmul.mubr.msk.bf16.gmra.mrb[48].mxu1 %vm2363_vm3, %v2930_v29  ;;  %v2602_v35 = vpop.xlane.xlu1 %2601  ;;  %v2709_v10 = vmul.f32 %v14388_v28, %v14388_v28  ;;  %v2872_v3 = vmul.f32 %v14213_v40, %v2836_v18  ;;  %10878 = vmatpush3.bf16.msra.mxu0 %v14427_v23  ;;  %v14445_v18 = vld [vmem:[%s18393_s1 + $0x50] sm:$0xff]  }
 0x4ae   :  { %v2605_v15 = vpop.xlane.xlu0 %2604  ;;  %v11922_v37 = vpop.eup %11921  ;;  %v2776_v21 = vadd.f32 1e-05, %v2744_v50  ;;  %v2646_v43 = vmul.f32 0.03125, %v2602_v35  ;;  %10879 = vmatprep.subr.bf16.mxu0 %v14445_v18 }
 0x4af   :  { %v2647_v49 = vmul.f32 0.03125, %v2605_v15  ;;  %v11924_v2 = vpop.eup %11923  ;;  %v2834_v47 = vmul.f32 %v11922_v37, %v2674_v60  ;;  %v2908_v25 = vadd.f32 %v14224_v13, %v2872_v3  ;;  %v2679_v60 = vsub.f32 %v14138_v4, %v14376_v52 }
 0x4b0   :  { %v2742_v59 = vsub.f32 %v2646_v43, %v2710_v51  ;;  %v2835_v63 = vmul.f32 %v11924_v2, %v2675_v42  ;;  %11927 = vrsqrt.f32 %v2776_v21 }
 0x4b1   :  { %v2743_v58 = vsub.f32 %v2647_v49, %v2711_v27  ;;  %v2459_v33 = vpop.xlane.xlu1 %2458  ;;  %v2870_v38 = vmul.f32 %v14213_v40, %v2834_v47  ;;  %v2677_v47 = vsub.f32 %v14147_v5, %v14388_v28  ;;  %10880 = vmatpush3.bf16.msra.mxu0 %v14445_v18 }
 0x4b2   :  { %v2599_v44 = vpop.xlane.xlu0 %2598  ;;  %v2774_v56 = vadd.f32 1e-05, %v2742_v59  ;;  %v2871_v0 = vmul.f32 %v14213_v40, %v2835_v63  ;;  %v14406_v6 = vmul.f32 0.03125, %v2459_v33  ;;  %v14440_v63 = vld [vmem:[%s18393_s1 + $0x30] sm:$0xff]  }
 0x4b3   :  { %v11926_v24 = vpop.eup %11925  ;;  %v2775_v55 = vadd.f32 1e-05, %v2743_v58  ;;  %v2645_v36 = vmul.f32 0.03125, %v2599_v44  ;;  %v2906_v45 = vadd.f32 %v14224_v13, %v2870_v38  ;;  %10839 = vmatprep.subr.bf16.mxu1 %v14440_v63 }
 0x4b4   :  { %v2833_v12 = vmul.f32 %v11926_v24, %v2673_v46  ;;  %11929 = vrsqrt.f32 %v2774_v56  ;;  %v2907_v1 = vadd.f32 %v14224_v13, %v2871_v0  ;;  %v2716_v42 = vmul.f32 %v14406_v6, %v14406_v6  ;;  %10840 = vmatpush3.bf16.msra.mxu1 %v14440_v63 }
 0x4b5   :  { %v2741_v34 = vsub.f32 %v2645_v36, %v2709_v10  ;;  %11931 = vrsqrt.f32 %v2775_v55  ;;  %v2453_v62 = vpop.xlane.xlu1 %2452 }
 0x4b6   :  { %v2456_v32 = vpop.xlane.xlu0 %2455  ;;  %v2869_v14 = vmul.f32 %v14213_v40, %v2833_v12  ;;  %v14400_v11 = vmul.f32 0.03125, %v2453_v62  ;;  %v2932_v57 = vpack.c.bf16 %v2908_v25, %v2907_v1 }
 0x4b7   :  { %v2773_v48 = vadd.f32 1e-05, %v2741_v34  ;;  %v14422_v51 = vmul.f32 0.03125, %v2456_v32 }
 0x4b8   :  { %v2905_v26 = vadd.f32 %v14224_v13, %v2869_v14  ;;  %v2714_v8 = vmul.f32 %v14400_v11, %v14400_v11  ;;  %v2682_v14 = vsub.f32 %v14167_v53, %v14400_v11 }
 0x4b9   :  { %11933 = vrsqrt.f32 %v2773_v48  ;;  %v2614_v16 = vpop.xlane.xlu1 %2613  ;;  %v2715_v59 = vmul.f32 %v14422_v51, %v14422_v51  ;;  %v2683_v53 = vsub.f32 %v14170_v41, %v14422_v51 }
 0x4ba   :  { %v2450_v19 = vpop.xlane.xlu0 %2449  ;;  %v2931_v54 = vpack.c.bf16 %v2906_v45, %v2905_v26  ;;  %v2650_v7 = vmul.f32 0.03125, %v2614_v16  ;;  %v11928_v29 = vpop.eup %11927  ;;  %v2684_v26 = vsub.f32 %v14161_v31, %v14406_v6 }
 0x4bb   :  { %v14410_v30 = vmul.f32 0.03125, %v2450_v19  ;;  %v2840_v21 = vmul.f32 %v11928_v29, %v2680_v20 }
 0x4bc   :  { %10825 = vmatprep.mubr.msk.bf16.mxu1 %vm2363_vm3, %v2931_v54  ;;  %v2746_v50 = vsub.f32 %v2650_v7, %v2714_v8 }
 0x4bd   :  { %10826 = vmatmul.mubr.msk.bf16.gmra.mrb[52].mxu1 %vm2363_vm3, %v2932_v57  ;;  %v2620_v35 = vpop.xlane.xlu1 %2619  ;;  %v2713_v9 = vmul.f32 %v14410_v30, %v14410_v30  ;;  %v2876_v55 = vmul.f32 %v14213_v40, %v2840_v21  ;;  %v2681_v25 = vsub.f32 %v14179_v17, %v14410_v30 }
 0x4be   :  { %v2611_v15 = vpop.xlane.xlu0 %2610  ;;  %v11930_v39 = vpop.eup %11929  ;;  %v2778_v37 = vadd.f32 1e-05, %v2746_v50  ;;  %v2652_v61 = vmul.f32 0.03125, %v2620_v35 }
 0x4bf   :  { %v2649_v27 = vmul.f32 0.03125, %v2611_v15  ;;  %v11932_v4 = vpop.eup %11931  ;;  %v2838_v52 = vmul.f32 %v11930_v39, %v2678_v22  ;;  %v2912_v3 = vadd.f32 %v14224_v13, %v2876_v55  ;;  %v14482_v22 = vld [vmem:[%s18393_s1 + $0x38] sm:$0xff]  }
 0x4c0   :  { %11935 = vrsqrt.f32 %v2778_v37  ;;  %v2748_v43 = vsub.f32 %v2652_v61, %v2716_v42  ;;  %v2839_v2 = vmul.f32 %v11932_v4, %v2679_v60  ;;  %10857 = vmatprep.subr.bf16.mxu1 %v14482_v22 }
 0x4c1   :  { %v2745_v49 = vsub.f32 %v2649_v27, %v2713_v9  ;;  %v2874_v24 = vmul.f32 %v14213_v40, %v2838_v52  ;;  %v14507_v27 = vld [vmem:[%s18393_s1 + $0x40] sm:$0xff]  }
 0x4c2   :  { %v2617_v58 = vpop.xlane.xlu0 %2616  ;;  %v2780_v10 = vadd.f32 1e-05, %v2748_v43  ;;  %v2875_v5 = vmul.f32 %v14213_v40, %v2839_v2 }
 0x4c3   :  { %v11934_v46 = vpop.eup %11933  ;;  %v2777_v33 = vadd.f32 1e-05, %v2745_v49  ;;  %v2651_v44 = vmul.f32 0.03125, %v2617_v58  ;;  %v2910_v34 = vadd.f32 %v14224_v13, %v2874_v24 }
 0x4c4   :  { %v2837_v28 = vmul.f32 %v11934_v46, %v2677_v47  ;;  %11937 = vrsqrt.f32 %v2780_v10  ;;  %v2911_v38 = vadd.f32 %v14224_v13, %v2875_v5 }
 0x4c5   :  { %v2747_v56 = vsub.f32 %v2651_v44, %v2715_v59  ;;  %11939 = vrsqrt.f32 %v2777_v33 }
 0x4c6   :  { %v2873_v36 = vmul.f32 %v14213_v40, %v2837_v28  ;;  %v2934_v48 = vpack.c.bf16 %v2912_v3, %v2911_v38 }
 0x4c7   :  { %v2779_v12 = vadd.f32 1e-05, %v2747_v56 }
 0x4c8   :  { %v2909_v0 = vadd.f32 %v14224_v13, %v2873_v36 }
 0x4c9   :  { %11941 = vrsqrt.f32 %v2779_v12 }
 0x4ca   :  { %v2933_v62 = vpack.c.bf16 %v2910_v34, %v2909_v0  ;;  %v11936_v32 = vpop.eup %11935 }
 0x4cb   :  { %v2842_v1 = vmul.f32 %v11936_v32, %v2682_v14 }
 0x4cc   :  { %10829 = vmatprep.mubr.msk.bf16.mxu1 %vm2363_vm3, %v2933_v62 }
 0x4cd   :  { %10830 = vmatmul.mubr.msk.bf16.gmra.mrb[56].mxu1 %vm2363_vm3, %v2934_v48  ;;  %v2878_v8 = vmul.f32 %v14213_v40, %v2842_v1 }
 0x4ce   :  { %v11938_v45 = vpop.eup %11937 }
 0x4cf   :  { %v11940_v16 = vpop.eup %11939  ;;  %v2844_v19 = vmul.f32 %v11938_v45, %v2684_v26  ;;  %v2914_v6 = vadd.f32 %v14224_v13, %v2878_v8 }
 0x4d0   :  { %v2841_v54 = vmul.f32 %v11940_v16, %v2681_v25 }
 0x4d1   :  { %v2880_v29 = vmul.f32 %v14213_v40, %v2844_v19 }
 0x4d2   :  { %v2877_v7 = vmul.f32 %v14213_v40, %v2841_v54 }
 0x4d3   :  { %v11942_v11 = vpop.eup %11941  ;;  %v2916_v50 = vadd.f32 %v14224_v13, %v2880_v29 }
 0x4d4   :  { %v2843_v57 = vmul.f32 %v11942_v11, %v2683_v53  ;;  %v2913_v31 = vadd.f32 %v14224_v13, %v2877_v7 }
 0x4d6   :  { %v2879_v17 = vmul.f32 %v14213_v40, %v2843_v57  ;;  %v2935_v30 = vpack.c.bf16 %v2914_v6, %v2913_v31  ;;  %v9903_v40 = vld [vmem:[%s18394_s2 + $0x4] ss:$0 sm:$0xff] }
 0x4d8   :  { %v2915_v20 = vadd.f32 %v14224_v13, %v2879_v17  ;;  %10833 = vmatprep.mubr.msk.bf16.mxu1 %vm2363_vm3, %v2935_v30 }
 0x4da   :  { %v2936_v41 = vpack.c.bf16 %v2916_v50, %v2915_v20 }
 0x4dc   :  { %10834 = vmatmul.mubr.msk.bf16.gmra.mrb[60].mxu1 %vm2363_vm3, %v2936_v41  ;;  %v14643_v41 = vld [vmem:[%s18394_s2 + $0x5] ss:$0 sm:$0xff] }
 0x540   :  { %v10807_v60 = vpop.f32.mrb[32].mxu1 }
 0x541   :  { %v3036_v42 = vpop.f32.mrb[33].mxu1  ;;  %v14494_v37 = vadd.f32 %v10807_v60, %v9903_v40 }
 0x542   :  { %v10808_v51 = vpop.f32.mrb[34].mxu1  ;;  %v14490_v15 = vadd.f32 %v9903_v40, %v3036_v42 }
 0x543   :  { %v14488_v13 = vadd.f32 %v10808_v51, %v9903_v40  ;;  %v3039_v35 = vpop.f32.mrb[35].mxu1  ;;  %18560 = vst [vmem:[#allocation7_spill] sm:$0xff] %v14494_v37 }
 0x544   :  { %18558 = vst [vmem:[#allocation5_spill] sm:$0xff] %v14490_v15  ;;  %v14492_v39 = vadd.f32 %v9903_v40, %v3039_v35 }
 0x545   :  { %18557 = vst [vmem:[#allocation8_spill] sm:$0xff] %v14488_v13  ;;  %v14502_v61 = vpack.c.bf16 %v14488_v13, %v14494_v37 }
 0x546   :  { %18559 = vst [vmem:[#allocation10_spill] sm:$0xff] %v14492_v39  ;;  %v14498_v9 = vpack.c.bf16 %v14492_v39, %v14490_v15 }
 0x548   :  { %10841 = vmatprep.mubr.msk.bf16.mxu1 %vm2363_vm3, %v14498_v9  ;;  %10881 = vmatprep.mubr.msk.bf16.mxu0 %vm2363_vm3, %v14498_v9 }
 0x549   :  { %10842 = vmatmul.mubr.msk.bf16.vlgmr.msra.gmra.mrb[64].mxu1 %vm2363_vm3, %v14502_v61  ;;  %10882 = vmatmul.mubr.msk.bf16.vlgmr.msra.gmra.mrb[64].mxu0 %vm2363_vm3, %v14502_v61 }
 0x54a   :  { %10858 = vmatpush3.bf16.msra.mxu1 %v14482_v22 }
 0x54b   :  { %10859 = vmatprep.subr.bf16.mxu1 %v14507_v27 }
 0x54e   :  { %10860 = vmatpush3.bf16.msra.mxu1 %v14507_v27 }
 0x550   :  { %v10811_v4 = vpop.f32.mrb[36].mxu1 }
 0x551   :  { %v3052_v52 = vpop.f32.mrb[37].mxu1  ;;  %v14526_v59 = vadd.f32 %v10811_v4, %v9903_v40 }
 0x552   :  { %v10812_v21 = vpop.f32.mrb[38].mxu1  ;;  %v14522_v2 = vadd.f32 %v9903_v40, %v3052_v52 }
 0x553   :  { %v14520_v43 = vadd.f32 %v10812_v21, %v9903_v40  ;;  %v3055_v49 = vpop.f32.mrb[39].mxu1  ;;  %18564 = vst [vmem:[#allocation13_spill] sm:$0xff] %v14526_v59 }
 0x554   :  { %18562 = vst [vmem:[#allocation9_spill] sm:$0xff] %v14522_v2  ;;  %v14524_v47 = vadd.f32 %v9903_v40, %v3055_v49 }
 0x555   :  { %18561 = vst [vmem:[#allocation6_spill] sm:$0xff] %v14520_v43  ;;  %v14534_v46 = vpack.c.bf16 %v14520_v43, %v14526_v59 }
 0x556   :  { %18563 = vst [vmem:[#allocation14_spill] sm:$0xff] %v14524_v47  ;;  %v14530_v58 = vpack.c.bf16 %v14524_v47, %v14522_v2 }
 0x558   :  { %10845 = vmatprep.mubr.msk.bf16.mxu1 %vm2363_vm3, %v14530_v58  ;;  %10885 = vmatprep.mubr.msk.bf16.mxu0 %vm2363_vm3, %v14530_v58 }
 0x559   :  { %10846 = vmatmul.mubr.msk.bf16.gmra.mrb[68].mxu1 %vm2363_vm3, %v14534_v46  ;;  %10886 = vmatmul.mubr.msk.bf16.gmra.mrb[68].mxu0 %vm2363_vm3, %v14534_v46 }
 0x560   :  { %v10815_v10 = vpop.f32.mrb[40].mxu1 }
 0x561   :  { %v3068_v33 = vpop.f32.mrb[41].mxu1  ;;  %v14550_v55 = vadd.f32 %v10815_v10, %v9903_v40 }
 0x562   :  { %v10816_v44 = vpop.f32.mrb[42].mxu1  ;;  %v14546_v24 = vadd.f32 %v9903_v40, %v3068_v33 }
 0x563   :  { %v14544_v5 = vadd.f32 %v10816_v44, %v9903_v40  ;;  %v3071_v28 = vpop.f32.mrb[43].mxu1  ;;  %18568 = vst [vmem:[#allocation16_spill] sm:$0xff] %v14550_v55 }
 0x564   :  { %18566 = vst [vmem:[#allocation11_spill] sm:$0xff] %v14546_v24  ;;  %v14548_v56 = vadd.f32 %v9903_v40, %v3071_v28 }
 0x565   :  { %18565 = vst [vmem:[#allocation12_spill] sm:$0xff] %v14544_v5  ;;  %v14558_v12 = vpack.c.bf16 %v14544_v5, %v14550_v55 }
 0x566   :  { %18567 = vst [vmem:[#allocation15_spill] sm:$0xff] %v14548_v56  ;;  %v14554_v36 = vpack.c.bf16 %v14548_v56, %v14546_v24 }
 0x568   :  { %10849 = vmatprep.mubr.msk.bf16.mxu1 %vm2363_vm3, %v14554_v36  ;;  %10889 = vmatprep.mubr.msk.bf16.mxu0 %vm2363_vm3, %v14554_v36 }
 0x569   :  { %10850 = vmatmul.mubr.msk.bf16.gmra.mrb[72].mxu1 %vm2363_vm3, %v14558_v12  ;;  %10890 = vmatmul.mubr.msk.bf16.gmra.mrb[72].mxu0 %vm2363_vm3, %v14558_v12 }
 0x56f   :  { %v10819_v38 = vpop.f32.mrb[44].mxu1 }
 0x570   :  { %v3084_v0 = vpop.f32.mrb[45].mxu1  ;;  %v14574_v48 = vadd.f32 %v10819_v38, %v9903_v40 }
 0x571   :  { %v10820_v34 = vpop.f32.mrb[46].mxu1  ;;  %v14570_v32 = vadd.f32 %v9903_v40, %v3084_v0 }
 0x572   :  { %v14568_v3 = vadd.f32 %v10820_v34, %v9903_v40  ;;  %v3087_v62 = vpop.f32.mrb[47].mxu1  ;;  %18572 = vst [vmem:[#allocation20_spill] sm:$0xff] %v14574_v48 }
 0x573   :  { %18570 = vst [vmem:[#allocation18_spill] sm:$0xff] %v14570_v32  ;;  %v14572_v14 = vadd.f32 %v9903_v40, %v3087_v62  ;;  %v14648_v40 = vld [vmem:[%s18394_s2 + $0x7] ss:$0 sm:$0xff] }
 0x574   :  { %18569 = vst [vmem:[#allocation17_spill] sm:$0xff] %v14568_v3  ;;  %v14582_v26 = vpack.c.bf16 %v14568_v3, %v14574_v48 }
 0x575   :  { %18571 = vst [vmem:[#allocation19_spill] sm:$0xff] %v14572_v14  ;;  %v14578_v1 = vpack.c.bf16 %v14572_v14, %v14570_v32 }
 0x577   :  { %10853 = vmatprep.mubr.msk.bf16.mxu1 %vm2363_vm3, %v14578_v1  ;;  %10893 = vmatprep.mubr.msk.bf16.mxu0 %vm2363_vm3, %v14578_v1 }
 0x578   :  { %10854 = vmatmul.mubr.msk.bf16.gmra.mrb[76].mxu1 %vm2363_vm3, %v14582_v26  ;;  %10894 = vmatmul.mubr.msk.bf16.gmra.mrb[76].mxu0 %vm2363_vm3, %v14582_v26 }
 0x579   :  { %10861 = vmatprep.mubr.msk.bf16.mxu1 %vm2363_vm3, %v14498_v9 }
 0x580   :  { %v14594_v45 = vpop.f32.mrb[48].mxu1  ;;  %10862 = vmatmul.mubr.msk.bf16.vlgmr.msra.gmra.mrb[80].mxu1 %vm2363_vm3, %v14502_v61 }
 0x581   :  { %v14598_v25 = vpop.f32.mrb[49].mxu1  ;;  %10865 = vmatprep.mubr.msk.bf16.mxu1 %vm2363_vm3, %v14530_v58 }
 0x582   :  { %v14602_v16 = vpop.f32.mrb[50].mxu1 }
 0x583   :  { %v14604_v19 = vpop.f32.mrb[51].mxu1 }
 0x588   :  { %10866 = vmatmul.mubr.msk.bf16.gmra.mrb[84].mxu1 %vm2363_vm3, %v14534_v46 }
 0x589   :  { %10869 = vmatprep.mubr.msk.bf16.mxu1 %vm2363_vm3, %v14554_v36 }
 0x590   :  { %v14610_v54 = vpop.f32.mrb[52].mxu1  ;;  %10870 = vmatmul.mubr.msk.bf16.gmra.mrb[88].mxu1 %vm2363_vm3, %v14558_v12 }
 0x591   :  { %v14614_v8 = vpop.f32.mrb[53].mxu1  ;;  %10873 = vmatprep.mubr.msk.bf16.mxu1 %vm2363_vm3, %v14578_v1 }
 0x592   :  { %v14618_v53 = vpop.f32.mrb[54].mxu1 }
 0x593   :  { %v14620_v11 = vpop.f32.mrb[55].mxu1 }
 0x598   :  { %10874 = vmatmul.mubr.msk.bf16.gmra.mrb[92].mxu1 %vm2363_vm3, %v14582_v26 }
 0x5a0   :  { %v14624_v7 = vpop.f32.mrb[56].mxu1 }
 0x5a1   :  { %v14626_v57 = vpop.f32.mrb[57].mxu1 }
 0x5a2   :  { %v14628_v29 = vpop.f32.mrb[58].mxu1 }
 0x5a3   :  { %v14630_v31 = vpop.f32.mrb[59].mxu1 }
 0x5af   :  { %v14632_v6 = vpop.f32.mrb[60].mxu1 }
 0x5b0   :  { %v14634_v17 = vpop.f32.mrb[61].mxu1 }
 0x5b1   :  { %v14636_v30 = vpop.f32.mrb[62].mxu1 }
 0x5b2   :  { %v14638_v20 = vpop.f32.mrb[63].mxu1 }
 0x61c   :  { %v10843_v50 = vpop.f32.mrb[64].mxu1  ;;  %v10883_v60 = vpop.f32.mrb[64].mxu0 }
 0x61d   :  { %v3250_v42 = vpop.f32.mrb[65].mxu1  ;;  %v3486_v51 = vpop.f32.mrb[65].mxu0  ;;  %v14651_v52 = vadd.f32 %v10843_v50, %v14643_v41  ;;  %v3495_v21 = vadd.f32 %v10883_v60, %v14648_v40 }
 0x61e   :  { %v10844_v35 = vpop.f32.mrb[66].mxu1  ;;  %v10884_v4 = vpop.f32.mrb[66].mxu0  ;;  %v3251_v28 = vadd.f32 %v14643_v41, %v3250_v42  ;;  %v3487_v38 = vadd.f32 %v14648_v40, %v3486_v51 }
 0x61f   :  { %v14655_v49 = vadd.f32 %v10844_v35, %v14643_v41  ;;  %v3498_v10 = vadd.f32 %v10884_v4, %v14648_v40  ;;  %v3253_v33 = vpop.f32.mrb[67].mxu1  ;;  %v3489_v44 = vpop.f32.mrb[67].mxu0 }
 0x620   :  { %v3254_v0 = vadd.f32 %v14643_v41, %v3253_v33  ;;  %v3490_v34 = vadd.f32 %v14648_v40, %v3489_v44 }
 0x621   :  { %v3879_v50 = vpack.c.bf16 %v3498_v10, %v3495_v21 }
 0x622   :  { %v3549_v60 = vpack.c.bf16 %v3254_v0, %v3251_v28  ;;  %v3878_v3 = vpack.c.bf16 %v3490_v34, %v3487_v38 }
 0x624   :  { %10913 = vmatprep.mubr.msk.bf16.mxu1 %vm50_vm0, %v3549_v60  ;;  %10929 = vmatprep.subr.bf16.mxu0 %v3878_v3 }
 0x625   :  { %10930 = vmatpush3.bf16.msra.mxu0 %v3878_v3 }
 0x626   :  { %10931 = vmatprep.subr.bf16.mxu0 %v3879_v50 }
 0x629   :  { %10932 = vmatpush3.bf16.msra.mxu0 %v3879_v50 }
 0x62c   :  { %v10847_v35 = vpop.f32.mrb[68].mxu1  ;;  %v10887_v42 = vpop.f32.mrb[68].mxu0 }
 0x62d   :  { %v3266_v4 = vpop.f32.mrb[69].mxu1  ;;  %v3502_v51 = vpop.f32.mrb[69].mxu0  ;;  %v14666_v44 = vadd.f32 %v10847_v35, %v14643_v41  ;;  %v3511_v62 = vadd.f32 %v10887_v42, %v14648_v40 }
 0x62e   :  { %v10848_v48 = vpop.f32.mrb[70].mxu1  ;;  %v10888_v33 = vpop.f32.mrb[70].mxu0  ;;  %v14674_v38 = vadd.f32 %v14643_v41, %v3266_v4  ;;  %v3503_v0 = vadd.f32 %v14648_v40, %v3502_v51 }
 0x62f   :  { %v14670_v21 = vadd.f32 %v10848_v48, %v14643_v41  ;;  %v3514_v10 = vadd.f32 %v10888_v33, %v14648_v40  ;;  %v3269_v28 = vpop.f32.mrb[71].mxu1  ;;  %v3505_v3 = vpop.f32.mrb[71].mxu0 }
 0x630   :  { %v14678_v34 = vadd.f32 %v14643_v41, %v3269_v28  ;;  %v3506_v50 = vadd.f32 %v14648_v40, %v3505_v3 }
 0x631   :  { %v3881_v35 = vpack.c.bf16 %v3514_v10, %v3511_v62 }
 0x632   :  { %v3880_v42 = vpack.c.bf16 %v3506_v50, %v3503_v0 }
 0x634   :  { %10933 = vmatprep.subr.bf16.mxu0 %v3880_v42 }
 0x635   :  { %10934 = vmatpush3.bf16.msra.mxu0 %v3880_v42 }
 0x636   :  { %10935 = vmatprep.subr.bf16.mxu0 %v3881_v35 }
 0x639   :  { %10936 = vmatpush3.bf16.msra.mxu0 %v3881_v35 }
 0x63c   :  { %v10851_v4 = vpop.f32.mrb[72].mxu1  ;;  %v10891_v33 = vpop.f32.mrb[72].mxu0 }
 0x63d   :  { %v3282_v51 = vpop.f32.mrb[73].mxu1  ;;  %v3518_v14 = vpop.f32.mrb[73].mxu0  ;;  %v14686_v3 = vadd.f32 %v10851_v4, %v14643_v41  ;;  %v3527_v60 = vadd.f32 %v10891_v33, %v14648_v40 }
 0x63e   :  { %v10852_v28 = vpop.f32.mrb[74].mxu1  ;;  %v10892_v32 = vpop.f32.mrb[74].mxu0  ;;  %v14694_v35 = vadd.f32 %v14643_v41, %v3282_v51  ;;  %v3519_v42 = vadd.f32 %v14648_v40, %v3518_v14 }
 0x63f   :  { %v14690_v62 = vadd.f32 %v10852_v28, %v14643_v41  ;;  %v3530_v10 = vadd.f32 %v10892_v32, %v14648_v40  ;;  %v3285_v0 = vpop.f32.mrb[75].mxu1  ;;  %v3521_v50 = vpop.f32.mrb[75].mxu0 }
 0x640   :  { %v14698_v48 = vadd.f32 %v14643_v41, %v3285_v0  ;;  %v3522_v4 = vadd.f32 %v14648_v40, %v3521_v50 }
 0x641   :  { %v3883_v5 = vpack.c.bf16 %v3530_v10, %v3527_v60 }
 0x642   :  { %v3882_v32 = vpack.c.bf16 %v3522_v4, %v3519_v42 }
 0x644   :  { %10937 = vmatprep.subr.bf16.mxu0 %v3882_v32 }
 0x645   :  { %10938 = vmatpush3.bf16.msra.mxu0 %v3882_v32 }
 0x646   :  { %10939 = vmatprep.subr.bf16.mxu0 %v3883_v5 }
 0x649   :  { %10940 = vmatpush3.bf16.msra.mxu0 %v3883_v5 }
 0x64b   :  { %v10855_v51 = vpop.f32.mrb[76].mxu1  ;;  %v10895_v55 = vpop.f32.mrb[76].mxu0 }
 0x64c   :  { %v3298_v14 = vpop.f32.mrb[77].mxu1  ;;  %v3534_v56 = vpop.f32.mrb[77].mxu0  ;;  %v14706_v50 = vadd.f32 %v10855_v51, %v14643_v41  ;;  %v3543_v33 = vadd.f32 %v10895_v55, %v14648_v40 }
 0x64d   :  { %v10856_v0 = vpop.f32.mrb[78].mxu1  ;;  %v10896_v24 = vpop.f32.mrb[78].mxu0  ;;  %v14714_v5 = vadd.f32 %v14643_v41, %v3298_v14  ;;  %v3535_v32 = vadd.f32 %v14648_v40, %v3534_v56  ;;  %v14728_v14 = vld [vmem:[%s18394_s2 + $0x6] ss:$0 sm:$0xff] }
 0x64e   :  { %v14710_v60 = vadd.f32 %v10856_v0, %v14643_v41  ;;  %v3546_v10 = vadd.f32 %v10896_v24, %v14648_v40  ;;  %v3301_v42 = vpop.f32.mrb[79].mxu1  ;;  %v3537_v4 = vpop.f32.mrb[79].mxu0 }
 0x64f   :  { %v14718_v28 = vadd.f32 %v14643_v41, %v3301_v42  ;;  %v3538_v51 = vadd.f32 %v14648_v40, %v3537_v4 }
 0x650   :  { %v3885_v43 = vpack.c.bf16 %v3546_v10, %v3543_v33 }
 0x651   :  { %v3884_v24 = vpack.c.bf16 %v3538_v51, %v3535_v32 }
 0x653   :  { %v10863_v59 = vpop.f32.mrb[80].mxu1  ;;  %10941 = vmatprep.subr.bf16.mxu0 %v3884_v24 }
 0x654   :  { %v3368_v56 = vpop.f32.mrb[81].mxu1  ;;  %10942 = vmatpush3.bf16.msra.mxu0 %v3884_v24  ;;  %v3377_v40 = vadd.f32 %v10863_v59, %v14728_v14 }
 0x655   :  { %v10864_v42 = vpop.f32.mrb[82].mxu1  ;;  %10943 = vmatprep.subr.bf16.mxu0 %v3885_v43  ;;  %v3369_v10 = vadd.f32 %v14728_v14, %v3368_v56 }
 0x656   :  { %v3380_v4 = vadd.f32 %v10864_v42, %v14728_v14  ;;  %v3371_v33 = vpop.f32.mrb[83].mxu1 }
 0x657   :  { %v3372_v32 = vadd.f32 %v14728_v14, %v3371_v33 }
 0x658   :  { %v3558_v51 = vpack.c.bf16 %v3380_v4, %v3377_v40  ;;  %10944 = vmatpush3.bf16.msra.mxu0 %v3885_v43 }
 0x659   :  { %v3557_v55 = vpack.c.bf16 %v3372_v32, %v3369_v10 }
 0x65a   :  { %v3593_v32 = vsel %vm50_vm0, %v3558_v51, 0 }
 0x65b   :  { %v10867_v0 = vpop.f32.mrb[84].mxu1  ;;  %11623 = vmatprep.subr.msk.bf16.mxu1 %vm50_vm0, %v3557_v55  ;;  %v3590_v47 = vsel %vm50_vm0, %v3557_v55, 0 }
 0x65c   :  { %v3384_v24 = vpop.f32.mrb[85].mxu1  ;;  %10898 = vmatpush3.bf16.xpose.msra.mxu1 %v3590_v47  ;;  %v3393_v59 = vadd.f32 %v10867_v0, %v14728_v14 }
 0x65d   :  { %v10868_v2 = vpop.f32.mrb[86].mxu1  ;;  %11624 = vmatprep.subr.msk.bf16.mxu1 %vm50_vm0, %v3558_v51  ;;  %v3385_v33 = vadd.f32 %v14728_v14, %v3384_v24 }
 0x65e   :  { %v3396_v42 = vadd.f32 %v10868_v2, %v14728_v14  ;;  %v3387_v56 = vpop.f32.mrb[87].mxu1 }
 0x65f   :  { %v3388_v43 = vadd.f32 %v14728_v14, %v3387_v56 }
 0x660   :  { %v3560_v40 = vpack.c.bf16 %v3396_v42, %v3393_v59 }
 0x661   :  { %v3559_v4 = vpack.c.bf16 %v3388_v43, %v3385_v33 }
 0x663   :  { %v10871_v10 = vpop.f32.mrb[88].mxu1  ;;  %v3596_v33 = vsel %vm50_vm0, %v3559_v4, 0 }
 0x664   :  { %v3400_v55 = vpop.f32.mrb[89].mxu1  ;;  %10900 = vmatpush3.bf16.xpose.msra.mxu1 %v3593_v32  ;;  %v3409_v13 = vadd.f32 %v10871_v10, %v14728_v14 }
 0x665   :  { %v10872_v47 = vpop.f32.mrb[90].mxu1  ;;  %11625 = vmatprep.subr.msk.bf16.mxu1 %vm50_vm0, %v3559_v4  ;;  %v3401_v37 = vadd.f32 %v14728_v14, %v3400_v55 }
 0x666   :  { %v3412_v0 = vadd.f32 %v10872_v47, %v14728_v14  ;;  %v3403_v2 = vpop.f32.mrb[91].mxu1 }
 0x667   :  { %v3404_v24 = vadd.f32 %v14728_v14, %v3403_v2 }
 0x668   :  { %v3562_v56 = vpack.c.bf16 %v3412_v0, %v3409_v13 }
 0x669   :  { %v3561_v59 = vpack.c.bf16 %v3404_v24, %v3401_v37  ;;  %v3599_v37 = vsel %vm50_vm0, %v3560_v40, 0 }
 0x66a   :  { %v3605_v0 = vsel %vm50_vm0, %v3562_v56, 0 }
 0x66b   :  { %v10875_v42 = vpop.f32.mrb[92].mxu1  ;;  %v3602_v4 = vsel %vm50_vm0, %v3561_v59, 0 }
 0x66c   :  { %v3416_v51 = vpop.f32.mrb[93].mxu1  ;;  %10902 = vmatpush3.bf16.xpose.msra.mxu1 %v3596_v33  ;;  %v3425_v32 = vadd.f32 %v10875_v42, %v14728_v14  ;;  %v18576_v42 = vpack.c.bf16 %v14698_v48, %v14694_v35 }
 0x66d   :  { %v10876_v43 = vpop.f32.mrb[94].mxu1  ;;  %11626 = vmatprep.subr.msk.bf16.mxu1 %vm50_vm0, %v3560_v40  ;;  %v3417_v39 = vadd.f32 %v14728_v14, %v3416_v51  ;;  %v18573_v40 = vpack.c.bf16 %v14655_v49, %v14651_v52  ;;  %v18577_v52 = vpack.c.bf16 %v14690_v62, %v14686_v3  ;;  %v18578_v49 = vpack.c.bf16 %v14718_v28, %v14714_v5 }
 0x66e   :  { %v3428_v10 = vadd.f32 %v10876_v43, %v14728_v14  ;;  %v3419_v47 = vpop.f32.mrb[95].mxu1 }
 0x66f   :  { %v3420_v55 = vadd.f32 %v14728_v14, %v3419_v47 }
 0x670   :  { %v3564_v2 = vpack.c.bf16 %v3428_v10, %v3425_v32 }
 0x671   :  { %v3563_v13 = vpack.c.bf16 %v3420_v55, %v3417_v39 }
 0x672   :  { %v3611_v39 = vsel %vm50_vm0, %v3564_v2, 0 }
 0x673   :  { %v3608_v24 = vsel %vm50_vm0, %v3563_v13, 0 }
 0x674   :  { %10904 = vmatpush3.bf16.xpose.msra.mxu1 %v3599_v37 }
 0x675   :  { %11627 = vmatprep.subr.msk.bf16.mxu1 %vm50_vm0, %v3561_v59  ;;  %v18574_v59 = vpack.c.bf16 %v14678_v34, %v14674_v38 }
 0x67c   :  { %10906 = vmatpush3.bf16.xpose.msra.mxu1 %v3602_v4 }
 0x67d   :  { %11628 = vmatprep.subr.msk.bf16.mxu1 %vm50_vm0, %v3562_v56  ;;  %v18575_v56 = vpack.c.bf16 %v14670_v21, %v14666_v44  ;;  %v18579_v44 = vpack.c.bf16 %v14710_v60, %v14706_v50 }
 0x684   :  { %10908 = vmatpush3.bf16.xpose.msra.mxu1 %v3605_v0 }
 0x685   :  { %11629 = vmatprep.subr.msk.bf16.mxu1 %vm50_vm0, %v3563_v13 }
 0x68c   :  { %10910 = vmatpush3.bf16.xpose.msra.mxu1 %v3608_v24 }
 0x68d   :  { %11630 = vmatprep.subr.msk.bf16.mxu1 %vm50_vm0, %v3564_v2 }
 0x694   :  { %10912 = vmatpush3.bf16.xpose.msra.mxu1 %v3611_v39 }
 0x69b   :  { %10914 = vmatmul.mubr.msk.bf16.vlgmr.msra.gmra.mrb[96].mxu1 %vm50_vm0, %v18573_v40 }
 0x69c   :  { %10917 = vmatprep.mubr.msk.bf16.mxu1 %vm50_vm0, %v18574_v59 }
 0x6a3   :  { %10918 = vmatmul.mubr.msk.bf16.gmra.mrb[100].mxu1 %vm50_vm0, %v18575_v56 }
 0x6a4   :  { %10921 = vmatprep.mubr.msk.bf16.mxu1 %vm50_vm0, %v18576_v42 }
 0x6ab   :  { %10922 = vmatmul.mubr.msk.bf16.gmra.mrb[104].mxu1 %vm50_vm0, %v18577_v52 }
 0x6ac   :  { %10925 = vmatprep.mubr.msk.bf16.mxu1 %vm50_vm0, %v18578_v49 }
 0x6b3   :  { %10926 = vmatmul.mubr.msk.bf16.gmra.mrb[108].mxu1 %vm50_vm0, %v18579_v44 }
 0x6b4   :  { %10985 = vmatprep.mubr.msk.bf16.mxu1 %vm2363_vm3, %v14498_v9 }
 0x76e   :  { %v10915_v21 = vpop.f32.mrb[96].mxu1 }
 0x76f   :  { %v3647_v38 = vpop.f32.mrb[97].mxu1  ;;  %v3712_v35 = vmul.f32 0.25, %v10915_v21 }
 0x770   :  { %v3710_v34 = vmul.f32 0.25, %v3647_v38  ;;  %v10916_v48 = vpop.f32.mrb[98].mxu1 }
 0x771   :  { %v3650_v3 = vpop.f32.mrb[99].mxu1  ;;  %v3713_v28 = vmul.f32 0.25, %v10916_v48 }
 0x772   :  { %v3711_v62 = vmul.f32 0.25, %v3650_v3  ;;  %3726 = vmax.xlane.f32.xlu0 %v3710_v34 }
 0x774   :  { %3728 = vmax.xlane.f32.xlu1 %v3711_v62 }
 0x776   :  { %3730 = vmax.xlane.f32.xlu0 %v3712_v35  ;;  %v10919_v5 = vpop.f32.mrb[100].mxu1 }
 0x777   :  { %v3663_v33 = vpop.f32.mrb[101].mxu1  ;;  %v3716_v32 = vmul.f32 0.25, %v10919_v5 }
 0x778   :  { %v14792_v51 = vmul.f32 0.25, %v3663_v33  ;;  %3732 = vmax.xlane.f32.xlu1 %v3713_v28  ;;  %v10920_v50 = vpop.f32.mrb[102].mxu1 }
 0x779   :  { %v3666_v60 = vpop.f32.mrb[103].mxu1  ;;  %v3717_v10 = vmul.f32 0.25, %v10920_v50 }
 0x77a   :  { %v14794_v43 = vmul.f32 0.25, %v3666_v60  ;;  %3734 = vmax.xlane.f32.xlu0 %v14792_v51 }
 0x77c   :  { %3736 = vmax.xlane.f32.xlu1 %v14794_v43 }
 0x77e   :  { %3738 = vmax.xlane.f32.xlu0 %v3716_v32  ;;  %v10923_v47 = vpop.f32.mrb[104].mxu1 }
 0x77f   :  { %v3679_v55 = vpop.f32.mrb[105].mxu1  ;;  %v14803_v0 = vmul.f32 0.25, %v10923_v47 }
 0x780   :  { %v14798_v2 = vmul.f32 0.25, %v3679_v55  ;;  %3740 = vmax.xlane.f32.xlu1 %v3717_v10  ;;  %v10924_v13 = vpop.f32.mrb[106].mxu1 }
 0x781   :  { %v3682_v37 = vpop.f32.mrb[107].mxu1  ;;  %v14806_v24 = vmul.f32 0.25, %v10924_v13 }
 0x782   :  { %v14800_v4 = vmul.f32 0.25, %v3682_v37  ;;  %3742 = vmax.xlane.f32.xlu0 %v14798_v2 }
 0x784   :  { %3744 = vmax.xlane.f32.xlu1 %v14800_v4 }
 0x786   :  { %3746 = vmax.xlane.f32.xlu0 %v14803_v0  ;;  %v10927_v39 = vpop.f32.mrb[108].mxu1 }
 0x787   :  { %v3695_v40 = vpop.f32.mrb[109].mxu1  ;;  %v14815_v49 = vmul.f32 0.25, %v10927_v39 }
 0x788   :  { %v14809_v59 = vmul.f32 0.25, %v3695_v40  ;;  %3748 = vmax.xlane.f32.xlu1 %v14806_v24  ;;  %v10928_v56 = vpop.f32.mrb[110].mxu1 }
 0x789   :  { %v3698_v42 = vpop.f32.mrb[111].mxu1  ;;  %v14818_v44 = vmul.f32 0.25, %v10928_v56 }
 0x78a   :  { %v14812_v52 = vmul.f32 0.25, %v3698_v42  ;;  %3750 = vmax.xlane.f32.xlu0 %v14809_v59 }
 0x78c   :  { %3752 = vmax.xlane.f32.xlu1 %v14812_v52 }
 0x78e   :  { %3754 = vmax.xlane.f32.xlu0 %v14815_v49 }
 0x790   :  { %3756 = vmax.xlane.f32.xlu1 %v14818_v44 }
 0x7a1   :  { %4102 = vrot.lane.b32.xlu1 %v14507_v27, %s12451_s14 }
 0x7a4   :  { %4100 = vrot.lane.b32.xlu0 %v14482_v22, %s12451_s14 }
 0x7ff   :  { %v3727_v21 = vpop.xlane.xlu0 %3726 }
 0x800   :  { %v3758_v38 = vsub.f32 %v3710_v34, %v3727_v21 }
 0x801   :  { %v3729_v48 = vpop.xlane.xlu1 %3728 }
 0x802   :  { %v3774_v3 = vmul.f32 1.442695, %v3758_v38  ;;  %v3759_v33 = vsub.f32 %v3711_v62, %v3729_v48 }
 0x803   :  { %v3731_v5 = vpop.xlane.xlu0 %3730 }
 0x804   :  { %11943 = vpow2.f32 %v3774_v3  ;;  %v3760_v50 = vsub.f32 %v3712_v35, %v3731_v5  ;;  %v3776_v37 = vmul.f32 1.442695, %v3759_v33 }
 0x805   :  { %v3733_v60 = vpop.xlane.xlu1 %3732 }
 0x806   :  { %v3778_v47 = vmul.f32 1.442695, %v3760_v50  ;;  %v3761_v55 = vsub.f32 %v3713_v28, %v3733_v60 }
 0x807   :  { %v3735_v13 = vpop.xlane.xlu0 %3734 }
 0x808   :  { %11945 = vpow2.f32 %v3778_v47  ;;  %v3780_v39 = vmul.f32 1.442695, %v3761_v55  ;;  %v3762_v22 = vsub.f32 %v14792_v51, %v3735_v13 }
 0x809   :  { %v3737_v40 = vpop.xlane.xlu1 %3736 }
 0x80a   :  { %11947 = vpow2.f32 %v3780_v39  ;;  %v3763_v62 = vsub.f32 %v14794_v43, %v3737_v40  ;;  %v3782_v28 = vmul.f32 1.442695, %v3762_v22 }
 0x80b   :  { %v3739_v27 = vpop.xlane.xlu0 %3738  ;;  %11949 = vpow2.f32 %v3776_v37 }
 0x80c   :  { %v3764_v34 = vsub.f32 %v3716_v32, %v3739_v27  ;;  %v3784_v33 = vmul.f32 1.442695, %v3763_v62 }
 0x80d   :  { %v3741_v56 = vpop.xlane.xlu1 %3740 }
 0x80e   :  { %v14827_v42 = vpop.eup %11943  ;;  %v3786_v35 = vmul.f32 1.442695, %v3764_v34  ;;  %v3765_v21 = vsub.f32 %v3717_v10, %v3741_v56 }
 0x80f   :  { %v3743_v38 = vpop.xlane.xlu0 %3742  ;;  %3806 = vadd.xlane.f32.xlu1 %v14827_v42 }
 0x810   :  { %11951 = vpow2.f32 %v3786_v35  ;;  %v3788_v48 = vmul.f32 1.442695, %v3765_v21  ;;  %v3766_v43 = vsub.f32 %v14798_v2, %v3743_v38 }
 0x811   :  { %v3745_v3 = vpop.xlane.xlu1 %3744 }
 0x812   :  { %v14831_v5 = vpop.eup %11945  ;;  %11953 = vpow2.f32 %v3788_v48  ;;  %v3767_v47 = vsub.f32 %v14800_v4, %v3745_v3  ;;  %v3790_v39 = vmul.f32 1.442695, %v3766_v43 }
 0x813   :  { %v3747_v51 = vpop.xlane.xlu0 %3746  ;;  %3810 = vadd.xlane.f32.xlu0 %v14831_v5  ;;  %11955 = vpow2.f32 %v3782_v28 }
 0x814   :  { %v14834_v32 = vpop.eup %11947  ;;  %v3768_v10 = vsub.f32 %v14803_v0, %v3747_v51  ;;  %11957 = vpow2.f32 %v3784_v33  ;;  %v3792_v0 = vmul.f32 1.442695, %v3767_v47 }
 0x815   :  { %v3749_v50 = vpop.xlane.xlu1 %3748  ;;  %3812 = vadd.xlane.f32.xlu1 %v14834_v32  ;;  %v14839_v60 = vpop.eup %11949 }
 0x816   :  { %v3794_v55 = vmul.f32 1.442695, %v3768_v10  ;;  %v3769_v13 = vsub.f32 %v14806_v24, %v3749_v50 }
 0x817   :  { %3808 = vadd.xlane.f32.xlu0 %v14839_v60  ;;  %v3751_v37 = vpop.xlane.xlu0 %3750 }
 0x818   :  { %11959 = vpow2.f32 %v3794_v55  ;;  %v3796_v40 = vmul.f32 1.442695, %v3769_v13  ;;  %v3770_v4 = vsub.f32 %v14809_v59, %v3751_v37  ;;  %v14911_v13 = vld [vmem:[%s18393_s1 + $0x28] sm:$0xff]  }
 0x819   :  { %v3753_v2 = vpop.xlane.xlu1 %3752 }
 0x81a   :  { %v14844_v27 = vpop.eup %11951  ;;  %11961 = vpow2.f32 %v3796_v40  ;;  %v3771_v35 = vsub.f32 %v14812_v52, %v3753_v2  ;;  %v3798_v59 = vmul.f32 1.442695, %v3770_v4 }
 0x81b   :  { %3818 = vadd.xlane.f32.xlu0 %v14844_v27  ;;  %v3755_v22 = vpop.xlane.xlu0 %3754  ;;  %11963 = vpow2.f32 %v3790_v39 }
 0x81c   :  { %v14847_v34 = vpop.eup %11953  ;;  %v3772_v24 = vsub.f32 %v14815_v49, %v3755_v22  ;;  %11965 = vpow2.f32 %v3792_v0 }
 0x81d   :  { %3820 = vadd.xlane.f32.xlu1 %v14847_v34  ;;  %v3757_v56 = vpop.xlane.xlu1 %3756  ;;  %v14852_v62 = vpop.eup %11955 }
 0x81e   :  { %v3802_v21 = vmul.f32 1.442695, %v3772_v24  ;;  %v3773_v38 = vsub.f32 %v14818_v44, %v3757_v56  ;;  %v14859_v48 = vpop.eup %11957  ;;  %v3800_v44 = vmul.f32 1.442695, %v3771_v35 }
 0x81f   :  { %3814 = vadd.xlane.f32.xlu0 %v14852_v62  ;;  %v14857_v28 = vpop.permute.xlu0 %4100 }
 0x820   :  { %11967 = vpow2.f32 %v3802_v21  ;;  %v3804_v49 = vmul.f32 1.442695, %v3773_v38  ;;  %10981 = vmatprep.subr.bf16.mxu1 %v14857_v28 }
 0x821   :  { %10982 = vmatpush3.bf16.msra.mxu1 %v14857_v28  ;;  %3816 = vadd.xlane.f32.xlu1 %v14859_v48  ;;  %v14864_v3 = vpop.permute.xlu1 %4102 }
 0x822   :  { %v14866_v52 = vpop.eup %11959  ;;  %11969 = vpow2.f32 %v3804_v49  ;;  %10983 = vmatprep.subr.bf16.mxu1 %v14864_v3 }
 0x823   :  { %3826 = vadd.xlane.f32.xlu0 %v14866_v52  ;;  %11971 = vpow2.f32 %v3798_v59 }
 0x824   :  { %v14870_v33 = vpop.eup %11961  ;;  %11973 = vpow2.f32 %v3800_v44 }
 0x825   :  { %3828 = vadd.xlane.f32.xlu1 %v14870_v33  ;;  %10984 = vmatpush3.bf16.msra.mxu1 %v14864_v3  ;;  %v14874_v51 = vpop.eup %11963 }
 0x826   :  { %v14877_v43 = vpop.eup %11965 }
 0x827   :  { %3822 = vadd.xlane.f32.xlu0 %v14874_v51 }
 0x828   :  { %10986 = vmatmul.mubr.msk.bf16.vlgmr.msra.gmra.mrb[112].mxu1 %vm2363_vm3, %v14502_v61 }
 0x829   :  { %3824 = vadd.xlane.f32.xlu1 %v14877_v43  ;;  %10989 = vmatprep.mubr.msk.bf16.mxu1 %vm2363_vm3, %v14530_v58 }
 0x82a   :  { %v14884_v10 = vpop.eup %11967 }
 0x82b   :  { %3834 = vadd.xlane.f32.xlu0 %v14884_v10 }
 0x82c   :  { %v14887_v50 = vpop.eup %11969 }
 0x82d   :  { %3836 = vadd.xlane.f32.xlu1 %v14887_v50  ;;  %v14890_v47 = vpop.eup %11971 }
 0x82e   :  { %v14893_v55 = vpop.eup %11973 }
 0x82f   :  { %3830 = vadd.xlane.f32.xlu0 %v14890_v47 }
 0x830   :  { %10990 = vmatmul.mubr.msk.bf16.gmra.mrb[116].mxu1 %vm2363_vm3, %v14534_v46 }
 0x831   :  { %3832 = vadd.xlane.f32.xlu1 %v14893_v55  ;;  %10993 = vmatprep.mubr.msk.bf16.mxu1 %vm2363_vm3, %v14554_v36 }
 0x838   :  { %10994 = vmatmul.mubr.msk.bf16.gmra.mrb[120].mxu1 %vm2363_vm3, %v14558_v12 }
 0x839   :  { %10997 = vmatprep.mubr.msk.bf16.mxu1 %vm2363_vm3, %v14578_v1 }
 0x840   :  { %10998 = vmatmul.mubr.msk.bf16.gmra.mrb[124].mxu1 %vm2363_vm3, %v14582_v26 }
 0x842   :  { %3995 = vrot.lane.b32.xlu1 %v14440_v63, %s12451_s14 }
 0x845   :  { %3993 = vrot.lane.b32.xlu0 %v14911_v13, %s12451_s14 }
 0x846   :  { %4107 = vrot.lane.b32.xlu1 %v14728_v14, %s12451_s14 }
 0x849   :  { %4207 = vrot.lane.b32.xlu0 %v14427_v23, %s12451_s14 }
 0x84a   :  { %4000 = vrot.lane.b32.xlu1 %v14643_v41, %s12451_s14 }
 0x84e   :  { %4209 = vrot.lane.b32.xlu1 %v14445_v18, %s12451_s14 }
 0x89c   :  { %v3807_v63 = vpop.xlane.xlu1 %3806 }
 0x89d   :  { %11975 = vrcp.f32 %v3807_v63 }
 0x8a0   :  { %v3811_v37 = vpop.xlane.xlu0 %3810 }
 0x8a2   :  { %v3813_v39 = vpop.xlane.xlu1 %3812 }
 0x8a3   :  { %11977 = vrcp.f32 %v3813_v39 }
 0x8a4   :  { %11979 = vrcp.f32 %v3811_v37  ;;  %v3809_v40 = vpop.xlane.xlu0 %3808 }
 0x8a5   :  { %11981 = vrcp.f32 %v3809_v40 }
 0x8a7   :  { %v11976_v14 = vpop.eup %11975 }
 0x8a8   :  { %v3819_v2 = vpop.xlane.xlu0 %3818  ;;  %v3854_v35 = vmul.f32 %v11976_v14, %v14827_v42 }
 0x8aa   :  { %v3821_v0 = vpop.xlane.xlu1 %3820 }
 0x8ab   :  { %11983 = vrcp.f32 %v3821_v0 }
 0x8ac   :  { %v3815_v22 = vpop.xlane.xlu0 %3814 }
 0x8ad   :  { %v11978_v23 = vpop.eup %11977  ;;  %11985 = vrcp.f32 %v3815_v22 }
 0x8ae   :  { %v11980_v4 = vpop.eup %11979  ;;  %11987 = vrcp.f32 %v3819_v2  ;;  %v3817_v41 = vpop.xlane.xlu1 %3816  ;;  %v3857_v18 = vmul.f32 %v11978_v23, %v14834_v32 }
 0x8af   :  { %v11982_v24 = vpop.eup %11981  ;;  %11989 = vrcp.f32 %v3817_v41  ;;  %v3856_v38 = vmul.f32 %v11980_v4, %v14831_v5 }
 0x8b0   :  { %v3827_v56 = vpop.xlane.xlu0 %3826  ;;  %v3855_v21 = vmul.f32 %v11982_v24, %v14839_v60 }
 0x8b1   :  { %v3871_v44 = vpack.c.bf16 %v3857_v18, %v3856_v38 }
 0x8b2   :  { %v3829_v59 = vpop.xlane.xlu1 %3828  ;;  %v3870_v49 = vpack.c.bf16 %v3855_v21, %v3854_v35 }
 0x8b3   :  { %11991 = vrcp.f32 %v3829_v59 }
 0x8b4   :  { %v3823_v63 = vpop.xlane.xlu0 %3822  ;;  %10945 = vmatprep.mubr.bf16.mxu0 %v3870_v49 }
 0x8b5   :  { %11993 = vrcp.f32 %v3823_v63  ;;  %10946 = vmatmul.mubr.bf16.vlgmr.msra.gmra.mrb[80].mxu0 %v3871_v44  ;;  %v11984_v37 = vpop.eup %11983 }
 0x8b6   :  { %11995 = vrcp.f32 %v3827_v56  ;;  %v3825_v39 = vpop.xlane.xlu1 %3824  ;;  %v3861_v60 = vmul.f32 %v11984_v37, %v14847_v34 }
 0x8b7   :  { %v11986_v32 = vpop.eup %11985  ;;  %11997 = vrcp.f32 %v3825_v39 }
 0x8b8   :  { %v11988_v40 = vpop.eup %11987  ;;  %v3835_v2 = vpop.xlane.xlu0 %3834  ;;  %v3858_v5 = vmul.f32 %v11986_v32, %v14852_v62 }
 0x8b9   :  { %v11990_v42 = vpop.eup %11989  ;;  %v3860_v22 = vmul.f32 %v11988_v40, %v14844_v27 }
 0x8ba   :  { %v3837_v0 = vpop.xlane.xlu1 %3836  ;;  %v3859_v14 = vmul.f32 %v11990_v42, %v14859_v48 }
 0x8bb   :  { %11999 = vrcp.f32 %v3837_v0  ;;  %v3873_v41 = vpack.c.bf16 %v3861_v60, %v3860_v22 }
 0x8bc   :  { %v3831_v23 = vpop.xlane.xlu0 %3830  ;;  %v3872_v4 = vpack.c.bf16 %v3859_v14, %v3858_v5 }
 0x8bd   :  { %12001 = vrcp.f32 %v3831_v23  ;;  %v11992_v24 = vpop.eup %11991 }
 0x8be   :  { %12003 = vrcp.f32 %v3835_v2  ;;  %10949 = vmatprep.mubr.bf16.mxu0 %v3872_v4  ;;  %v3833_v18 = vpop.xlane.xlu1 %3832  ;;  %v3865_v27 = vmul.f32 %v11992_v24, %v14870_v33 }
 0x8bf   :  { %v11994_v56 = vpop.eup %11993  ;;  %12005 = vrcp.f32 %v3833_v18  ;;  %10950 = vmatmul.mubr.bf16.gmra.mrb[84].mxu0 %v3873_v41 }
 0x8c0   :  { %v11996_v34 = vpop.eup %11995  ;;  %v14931_v35 = vpop.permute.xlu0 %3993  ;;  %v3862_v48 = vmul.f32 %v11994_v56, %v14874_v51 }
 0x8c1   :  { %18580 = vst [vmem:[#allocation21_spill] sm:$0xff] %v14931_v35  ;;  %v11998_v62 = vpop.eup %11997  ;;  %10961 = vmatprep.subr.bf16.mxu0 %v14931_v35  ;;  %v3864_v59 = vmul.f32 %v11996_v34, %v14866_v52 }
 0x8c2   :  { %10962 = vmatpush3.bf16.msra.mxu0 %v14931_v35  ;;  %v3863_v21 = vmul.f32 %v11998_v62, %v14877_v43  ;;  %v14938_v38 = vpop.permute.xlu1 %3995 }
 0x8c3   :  { %18581 = vst [vmem:[#allocation22_spill] sm:$0xff] %v14938_v38  ;;  %10963 = vmatprep.subr.bf16.mxu0 %v14938_v38  ;;  %v3875_v63 = vpack.c.bf16 %v3865_v27, %v3864_v59 }
 0x8c4   :  { %v3874_v49 = vpack.c.bf16 %v3863_v21, %v3862_v48  ;;  %v14942_v44 = vpop.permute.xlu0 %4207 }
 0x8c5   :  { %18582 = vst [vmem:[#allocation23_spill] sm:$0xff] %v14942_v44  ;;  %v12000_v37 = vpop.eup %11999 }
 0x8c6   :  { %10953 = vmatprep.mubr.bf16.mxu0 %v3874_v49  ;;  %10964 = vmatpush3.bf16.msra.mxu0 %v14938_v38  ;;  %v3869_v39 = vmul.f32 %v12000_v37, %v14887_v50  ;;  %v14949_v40 = vpop.permute.xlu1 %4107 }
 0x8c7   :  { %v12002_v33 = vpop.eup %12001  ;;  %10954 = vmatmul.mubr.bf16.gmra.mrb[88].mxu0 %v3875_v63  ;;  %11001 = vmatprep.subr.bf16.mxu0 %v14942_v44  ;;  %18583 = vst [vmem:[#allocation24_spill] sm:$0xff] %v14949_v40 }
 0x8c8   :  { %v12004_v51 = vpop.eup %12003  ;;  %v3866_v52 = vmul.f32 %v12002_v33, %v14890_v47 }
 0x8c9   :  { %v12006_v43 = vpop.eup %12005  ;;  %v3868_v2 = vmul.f32 %v12004_v51, %v14884_v10 }
 0x8ca   :  { %v3867_v32 = vmul.f32 %v12006_v43, %v14893_v55  ;;  %v14954_v0 = vpop.permute.xlu1 %4000 }
 0x8cb   :  { %v3877_v60 = vpack.c.bf16 %v3869_v39, %v3868_v2  ;;  %18584 = vst [vmem:[#allocation25_spill] sm:$0xff] %v14954_v0 }
 0x8cc   :  { %v3876_v42 = vpack.c.bf16 %v3867_v32, %v3866_v52 }
 0x8ce   :  { %10957 = vmatprep.mubr.bf16.mxu0 %v3876_v42  ;;  %v14956_v5 = vpop.permute.xlu1 %4209 }
 0x8cf   :  { %10958 = vmatmul.mubr.bf16.gmra.mrb[92].mxu0 %v3877_v60  ;;  %18585 = vst [vmem:[#allocation26_spill] sm:$0xff] %v14956_v5 }
 0x8d0   :  { %10965 = vmatprep.mubr.msk.bf16.mxu0 %vm2363_vm3, %v14498_v9 }
 0x8d7   :  { %10966 = vmatmul.mubr.msk.bf16.vlgmr.msra.gmra.mrb[96].mxu0 %vm2363_vm3, %v14502_v61 }
 0x8d8   :  { %10969 = vmatprep.mubr.msk.bf16.mxu0 %vm2363_vm3, %v14530_v58  ;;  %11002 = vmatpush3.bf16.msra.mxu0 %v14942_v44 }
 0x8d9   :  { %11003 = vmatprep.subr.bf16.mxu0 %v14956_v5 }
 0x8dc   :  { %11004 = vmatpush3.bf16.msra.mxu0 %v14956_v5 }
 0x8df   :  { %10970 = vmatmul.mubr.msk.bf16.gmra.mrb[100].mxu0 %vm2363_vm3, %v14534_v46 }
 0x8e0   :  { %10973 = vmatprep.mubr.msk.bf16.mxu0 %vm2363_vm3, %v14554_v36 }
 0x8e7   :  { %10974 = vmatmul.mubr.msk.bf16.gmra.mrb[104].mxu0 %vm2363_vm3, %v14558_v12 }
 0x8e8   :  { %10977 = vmatprep.mubr.msk.bf16.mxu0 %vm2363_vm3, %v14578_v1 }
 0x8ef   :  { %10978 = vmatmul.mubr.msk.bf16.gmra.mrb[108].mxu0 %vm2363_vm3, %v14582_v26 }
 0x8f0   :  { %11005 = vmatprep.mubr.msk.bf16.mxu0 %vm2363_vm3, %v14498_v9 }
 0x8f7   :  { %11006 = vmatmul.mubr.msk.bf16.vlgmr.msra.gmra.mrb[112].mxu0 %vm2363_vm3, %v14502_v61 }
 0x8f8   :  { %11009 = vmatprep.mubr.msk.bf16.mxu0 %vm2363_vm3, %v14530_v58 }
 0x8fb   :  { %v10987_v10 = vpop.f32.mrb[112].mxu1 }
 0x8fc   :  { %v4144_v50 = vpop.f32.mrb[113].mxu1  ;;  %v4153_v55 = vadd.f32 %v10987_v10, %v14949_v40 }
 0x8fd   :  { %v10988_v47 = vpop.f32.mrb[114].mxu1  ;;  %v4145_v23 = vadd.f32 %v4144_v50, %v14949_v40 }
 0x8fe   :  { %v4156_v14 = vadd.f32 %v10988_v47, %v14949_v40  ;;  %v4147_v22 = vpop.f32.mrb[115].mxu1 }
 0x8ff   :  { %v4148_v4 = vadd.f32 %v4147_v22, %v14949_v40  ;;  %11010 = vmatmul.mubr.msk.bf16.gmra.mrb[116].mxu0 %vm2363_vm3, %v14534_v46 }
 0x900   :  { %v4323_v9 = vpack.c.bf16 %v4156_v14, %v4153_v55  ;;  %11013 = vmatprep.mubr.msk.bf16.mxu0 %vm2363_vm3, %v14554_v36 }
 0x901   :  { %v4322_v61 = vpack.c.bf16 %v4148_v4, %v4145_v23 }
 0x902   :  { %v4358_v59 = vsel %vm50_vm0, %v4323_v9, 0 }
 0x903   :  { %v10991_v58 = vpop.f32.mrb[116].mxu1  ;;  %11631 = vmatprep.subr.msk.bf16.mxu1 %vm50_vm0, %v4322_v61  ;;  %v4355_v41 = vsel %vm50_vm0, %v4322_v61, 0 }
 0x904   :  { %v4160_v24 = vpop.f32.mrb[117].mxu1  ;;  %11022 = vmatpush3.bf16.xpose.msra.mxu1 %v4355_v41  ;;  %v4169_v56 = vadd.f32 %v10991_v58, %v14949_v40 }
 0x905   :  { %v10992_v18 = vpop.f32.mrb[118].mxu1  ;;  %11632 = vmatprep.subr.msk.bf16.mxu1 %vm50_vm0, %v4323_v9  ;;  %v4161_v62 = vadd.f32 %v4160_v24, %v14949_v40 }
 0x906   :  { %v4172_v34 = vadd.f32 %v10992_v18, %v14949_v40  ;;  %v4163_v46 = vpop.f32.mrb[119].mxu1 }
 0x907   :  { %v4164_v36 = vadd.f32 %v4163_v46, %v14949_v40  ;;  %11014 = vmatmul.mubr.msk.bf16.gmra.mrb[120].mxu0 %vm2363_vm3, %v14558_v12 }
 0x908   :  { %v4325_v27 = vpack.c.bf16 %v4172_v34, %v4169_v56  ;;  %11017 = vmatprep.mubr.msk.bf16.mxu0 %vm2363_vm3, %v14578_v1 }
 0x909   :  { %v4324_v48 = vpack.c.bf16 %v4164_v36, %v4161_v62 }
 0x90a   :  { %v4364_v22 = vsel %vm50_vm0, %v4325_v27, 0 }
 0x90b   :  { %v10995_v21 = vpop.f32.mrb[120].mxu1  ;;  %v4361_v32 = vsel %vm50_vm0, %v4324_v48, 0 }
 0x90c   :  { %v4176_v49 = vpop.f32.mrb[121].mxu1  ;;  %11024 = vmatpush3.bf16.xpose.msra.mxu1 %v4358_v59  ;;  %v4185_v37 = vadd.f32 %v10995_v21, %v14949_v40 }
 0x90d   :  { %v10996_v63 = vpop.f32.mrb[122].mxu1  ;;  %11633 = vmatprep.subr.msk.bf16.mxu1 %vm50_vm0, %v4324_v48  ;;  %v4177_v12 = vadd.f32 %v4176_v49, %v14949_v40 }
 0x90e   :  { %v4188_v33 = vadd.f32 %v10996_v63, %v14949_v40  ;;  %v4179_v51 = vpop.f32.mrb[123].mxu1 }
 0x90f   :  { %v4180_v43 = vadd.f32 %v4179_v51, %v14949_v40  ;;  %11018 = vmatmul.mubr.msk.bf16.gmra.mrb[124].mxu0 %vm2363_vm3, %v14582_v26 }
 0x910   :  { %v4327_v1 = vpack.c.bf16 %v4188_v33, %v4185_v37 }
 0x911   :  { %v4326_v39 = vpack.c.bf16 %v4180_v43, %v4177_v12 }
 0x912   :  { %v4370_v4 = vsel %vm50_vm0, %v4327_v1, 0 }
 0x913   :  { %v10999_v52 = vpop.f32.mrb[124].mxu1  ;;  %v4367_v23 = vsel %vm50_vm0, %v4326_v39, 0 }
 0x914   :  { %v4192_v2 = vpop.f32.mrb[125].mxu1  ;;  %11026 = vmatpush3.bf16.xpose.msra.mxu1 %v4361_v32  ;;  %v4201_v60 = vadd.f32 %v10999_v52, %v14949_v40 }
 0x915   :  { %v11000_v42 = vpop.f32.mrb[126].mxu1  ;;  %11634 = vmatprep.subr.msk.bf16.mxu1 %vm50_vm0, %v4325_v27  ;;  %v4193_v47 = vadd.f32 %v4192_v2, %v14949_v40 }
 0x916   :  { %v4204_v10 = vadd.f32 %v11000_v42, %v14949_v40  ;;  %v4195_v50 = vpop.f32.mrb[127].mxu1 }
 0x917   :  { %v4196_v55 = vadd.f32 %v4195_v50, %v14949_v40 }
 0x918   :  { %v4329_v26 = vpack.c.bf16 %v4204_v10, %v4201_v60 }
 0x919   :  { %v4328_v14 = vpack.c.bf16 %v4196_v55, %v4193_v47 }
 0x91a   :  { %v4376_v61 = vsel %vm50_vm0, %v4329_v26, 0 }
 0x91b   :  { %v4373_v9 = vsel %vm50_vm0, %v4328_v14, 0 }
 0x91c   :  { %11028 = vmatpush3.bf16.xpose.msra.mxu1 %v4364_v22 }
 0x91d   :  { %11635 = vmatprep.subr.msk.bf16.mxu1 %vm50_vm0, %v4326_v39 }
 0x924   :  { %11030 = vmatpush3.bf16.xpose.msra.mxu1 %v4367_v23 }
 0x925   :  { %11636 = vmatprep.subr.msk.bf16.mxu1 %vm50_vm0, %v4327_v1 }
 0x92c   :  { %11032 = vmatpush3.bf16.xpose.msra.mxu1 %v4370_v4 }
 0x92d   :  { %11637 = vmatprep.subr.msk.bf16.mxu1 %vm50_vm0, %v4328_v14 }
 0x934   :  { %11034 = vmatpush3.bf16.xpose.msra.mxu1 %v4373_v9 }
 0x935   :  { %11638 = vmatprep.subr.msk.bf16.mxu1 %vm50_vm0, %v4329_v26 }
 0x93c   :  { %11036 = vmatpush3.bf16.xpose.msra.mxu1 %v4376_v61 }
 0x93d   :  { %11121 = vmatprep.subr.bf16.mxu1 %v14911_v13 }
 0x988   :  { %v15024_v58 = vpop.f32.mrb[80].mxu0 }
 0x989   :  { %18586 = vst [vmem:[#allocation27_spill] sm:$0xff] %v15024_v58  ;;  %v15026_v41 = vpop.f32.mrb[81].mxu0 }
 0x98a   :  { %18587 = vst [vmem:[#allocation28_spill] sm:$0xff] %v15026_v41  ;;  %v15028_v24 = vpop.f32.mrb[82].mxu0 }
 0x98b   :  { %18588 = vst [vmem:[#allocation29_spill] sm:$0xff] %v15028_v24  ;;  %v15032_v56 = vpop.f32.mrb[83].mxu0 }
 0x98c   :  { %18589 = vst [vmem:[#allocation30_spill] sm:$0xff] %v15032_v56 }
 0x992   :  { %v15036_v46 = vpop.f32.mrb[84].mxu0 }
 0x993   :  { %18590 = vst [vmem:[#allocation31_spill] sm:$0xff] %v15036_v46  ;;  %v15038_v62 = vpop.f32.mrb[85].mxu0 }
 0x994   :  { %18591 = vst [vmem:[#allocation32_spill] sm:$0xff] %v15038_v62  ;;  %v15040_v36 = vpop.f32.mrb[86].mxu0 }
 0x995   :  { %18592 = vst [vmem:[#allocation33_spill] sm:$0xff] %v15040_v36  ;;  %v15044_v48 = vpop.f32.mrb[87].mxu0 }
 0x996   :  { %18593 = vst [vmem:[#allocation34_spill] sm:$0xff] %v15044_v48 }
 0x99a   :  { %v15048_v59 = vpop.f32.mrb[88].mxu0 }
 0x99b   :  { %18594 = vst [vmem:[#allocation35_spill] sm:$0xff] %v15048_v59  ;;  %v15050_v49 = vpop.f32.mrb[89].mxu0 }
 0x99c   :  { %18595 = vst [vmem:[#allocation36_spill] sm:$0xff] %v15050_v49  ;;  %v15052_v63 = vpop.f32.mrb[90].mxu0 }
 0x99d   :  { %18596 = vst [vmem:[#allocation37_spill] sm:$0xff] %v15052_v63  ;;  %v15056_v33 = vpop.f32.mrb[91].mxu0 }
 0x99e   :  { %18597 = vst [vmem:[#allocation38_spill] sm:$0xff] %v15056_v33 }
 0x9a2   :  { %v15060_v12 = vpop.f32.mrb[92].mxu0 }
 0x9a3   :  { %18598 = vst [vmem:[#allocation39_spill] sm:$0xff] %v15060_v12  ;;  %v15062_v43 = vpop.f32.mrb[93].mxu0 }
 0x9a4   :  { %18599 = vst [vmem:[#allocation40_spill] sm:$0xff] %v15062_v43  ;;  %v15064_v1 = vpop.f32.mrb[94].mxu0 }
 0x9a5   :  { %18600 = vst [vmem:[#allocation41_spill] sm:$0xff] %v15064_v1  ;;  %v15068_v52 = vpop.f32.mrb[95].mxu0 }
 0x9a6   :  { %18601 = vst [vmem:[#allocation42_spill] sm:$0xff] %v15068_v52 }
 0x9aa   :  { %v10967_v2 = vpop.f32.mrb[96].mxu0 }
 0x9ab   :  { %v4037_v42 = vpop.f32.mrb[97].mxu0  ;;  %v4046_v10 = vadd.f32 %v10967_v2, %v14954_v0 }
 0x9ac   :  { %v10968_v60 = vpop.f32.mrb[98].mxu0  ;;  %v4038_v55 = vadd.f32 %v4037_v42, %v14954_v0  ;;  %v12393_v42 = vld [vmem:[%s18393_s1 + $0x30] sm:$0xff]  }
 0x9ad   :  { %v4049_v50 = vadd.f32 %v10968_v60, %v14954_v0  ;;  %v4040_v47 = vpop.f32.mrb[99].mxu0 }
 0x9ae   :  { %v4041_v26 = vadd.f32 %v4040_v47, %v14954_v0 }
 0x9af   :  { %v4315_v14 = vpack.c.bf16 %v4049_v50, %v4046_v10 }
 0x9b0   :  { %v4314_v22 = vpack.c.bf16 %v4041_v26, %v4038_v55 }
 0x9b2   :  { %v10971_v23 = vpop.f32.mrb[100].mxu0  ;;  %11037 = vmatprep.mubr.msk.bf16.mxu1 %vm50_vm0, %v4314_v22 }
 0x9b3   :  { %v4053_v4 = vpop.f32.mrb[101].mxu0  ;;  %11038 = vmatmul.mubr.msk.bf16.vlgmr.msra.gmra.mrb[128].mxu1 %vm50_vm0, %v4315_v14  ;;  %v4062_v61 = vadd.f32 %v10971_v23, %v14954_v0 }
 0x9b4   :  { %v10972_v9 = vpop.f32.mrb[102].mxu0  ;;  %11122 = vmatpush3.bf16.msra.mxu1 %v14911_v13  ;;  %v4054_v10 = vadd.f32 %v4053_v4, %v14954_v0  ;;  %v12394_v13 = vld [vmem:[%s18393_s1 + $0x38] sm:$0xff]  }
 0x9b5   :  { %v4065_v2 = vadd.f32 %v10972_v9, %v14954_v0  ;;  %v4056_v60 = vpop.f32.mrb[103].mxu0  ;;  %11123 = vmatprep.subr.bf16.mxu1 %v12393_v42 }
 0x9b6   :  { %v4057_v50 = vadd.f32 %v4056_v60, %v14954_v0 }
 0x9b7   :  { %v4317_v47 = vpack.c.bf16 %v4065_v2, %v4062_v61 }
 0x9b8   :  { %v4316_v55 = vpack.c.bf16 %v4057_v50, %v4054_v10  ;;  %11124 = vmatpush3.bf16.msra.mxu1 %v12393_v42 }
 0x9b9   :  { %11141 = vmatprep.subr.bf16.mxu1 %v12394_v13 }
 0x9ba   :  { %v10975_v26 = vpop.f32.mrb[104].mxu0  ;;  %11041 = vmatprep.mubr.msk.bf16.mxu1 %vm50_vm0, %v4316_v55 }
 0x9bb   :  { %v4069_v14 = vpop.f32.mrb[105].mxu0  ;;  %11042 = vmatmul.mubr.msk.bf16.gmra.mrb[132].mxu1 %vm50_vm0, %v4317_v47  ;;  %v4078_v23 = vadd.f32 %v10975_v26, %v14954_v0 }
 0x9bc   :  { %v10976_v22 = vpop.f32.mrb[106].mxu0  ;;  %v4070_v61 = vadd.f32 %v4069_v14, %v14954_v0  ;;  %v12395_v14 = vld [vmem:[%s18394_s2 + $0x4] ss:$0 sm:$0xff] }
 0x9bd   :  { %v4081_v4 = vadd.f32 %v10976_v22, %v14954_v0  ;;  %v4072_v9 = vpop.f32.mrb[107].mxu0  ;;  %v15103_v22 = vadd.f32 %v12395_v14, %v14604_v19  ;;  %v15168_v32 = vadd.f32 %v12395_v14, %v14610_v54  ;;  %v15171_v37 = vadd.f32 %v12395_v14, %v14626_v57 }
 0x9be   :  { %v4073_v2 = vadd.f32 %v4072_v9, %v14954_v0  ;;  %v15192_v57 = vadd.f32 %v12395_v14, %v14628_v29  ;;  %v15200_v21 = vadd.f32 %v12395_v14, %v14624_v7  ;;  %v15203_v18 = vadd.f32 %v12395_v14, %v14634_v17 }
 0x9bf   :  { %v4319_v60 = vpack.c.bf16 %v4081_v4, %v4078_v23  ;;  %18602 = vst [vmem:[#allocation43_spill] sm:$0xff] %v15103_v22  ;;  %18611 = vst [vmem:[#allocation52_spill] sm:$0xff] %v15168_v32  ;;  %v15224_v17 = vadd.f32 %v12395_v14, %v14636_v30 }
 0x9c0   :  { %v4318_v42 = vpack.c.bf16 %v4073_v2, %v4070_v61  ;;  %v15108_v61 = vadd.f32 %v12395_v14, %v14598_v25  ;;  %v15125_v25 = vadd.f32 %v12395_v14, %v14602_v16  ;;  %18612 = vst [vmem:[#allocation53_spill] sm:$0xff] %v15171_v37  ;;  %18616 = vst [vmem:[#allocation57_spill] sm:$0xff] %v15192_v57 }
 0x9c1   :  { %18619 = vst [vmem:[#allocation60_spill] sm:$0xff] %v15200_v21  ;;  %18620 = vst [vmem:[#allocation61_spill] sm:$0xff] %v15203_v18  ;;  %v15207_v34 = vpack.c.bf16 %v15192_v57, %v15200_v21 }
 0x9c2   :  { %v10979_v10 = vpop.f32.mrb[108].mxu0  ;;  %11045 = vmatprep.mubr.msk.bf16.mxu1 %vm50_vm0, %v4318_v42  ;;  %18603 = vst [vmem:[#allocation44_spill] sm:$0xff] %v15108_v61  ;;  %18604 = vst [vmem:[#allocation45_spill] sm:$0xff] %v15125_v25 }
 0x9c3   :  { %v4085_v50 = vpop.f32.mrb[109].mxu0  ;;  %11046 = vmatmul.mubr.msk.bf16.gmra.mrb[136].mxu1 %vm50_vm0, %v4319_v60  ;;  %v4094_v47 = vadd.f32 %v10979_v10, %v14954_v0  ;;  %v15112_v60 = vpack.c.bf16 %v15103_v22, %v15108_v61  ;;  %18625 = vst [vmem:[#allocation66_spill] sm:$0xff] %v15224_v17 }
 0x9c4   :  { %v10980_v55 = vpop.f32.mrb[110].mxu0  ;;  %v4086_v23 = vadd.f32 %v4085_v50, %v14954_v0  ;;  %v15130_v50 = vadd.f32 %v12395_v14, %v14620_v11 }
 0x9c5   :  { %v4097_v26 = vadd.f32 %v10980_v55, %v14954_v0  ;;  %v4088_v39 = vpop.f32.mrb[111].mxu0  ;;  %v15133_v55 = vadd.f32 %v12395_v14, %v14594_v45 }
 0x9c6   :  { %v4089_v4 = vadd.f32 %v4088_v39, %v14954_v0  ;;  %18605 = vst [vmem:[#allocation46_spill] sm:$0xff] %v15130_v50 }
 0x9c7   :  { %v4321_v9 = vpack.c.bf16 %v4097_v26, %v4094_v47  ;;  %18606 = vst [vmem:[#allocation47_spill] sm:$0xff] %v15133_v55  ;;  %v15136_v47 = vadd.f32 %v12395_v14, %v14614_v8  ;;  %v15140_v26 = vpack.c.bf16 %v15125_v25, %v15133_v55  ;;  %v15157_v8 = vadd.f32 %v12395_v14, %v14618_v53 }
 0x9c8   :  { %v4320_v2 = vpack.c.bf16 %v4089_v4, %v4086_v23 }
 0x9c9   :  { %18607 = vst [vmem:[#allocation48_spill] sm:$0xff] %v15136_v47  ;;  %v15144_v23 = vpack.c.bf16 %v15130_v50, %v15136_v47  ;;  %18609 = vst [vmem:[#allocation50_spill] sm:$0xff] %v15157_v8  ;;  %v15175_v53 = vpack.c.bf16 %v15157_v8, %v15168_v32 }
 0x9ca   :  { %v15114_v42 = vpop.f32.mrb[112].mxu0  ;;  %11049 = vmatprep.mubr.msk.bf16.mxu1 %vm50_vm0, %v4320_v2  ;;  %v15165_v2 = vadd.f32 %v12395_v14, %v14630_v31 }
 0x9cb   :  { %v15117_v10 = vpop.f32.mrb[113].mxu0  ;;  %11050 = vmatmul.mubr.msk.bf16.gmra.mrb[140].mxu1 %vm50_vm0, %v4321_v9  ;;  %v12396_v9 = vld [vmem:[%s18393_s1 + $0x40] sm:$0xff]  }
 0x9cc   :  { %v15120_v19 = vpop.f32.mrb[114].mxu0  ;;  %11125 = vmatprep.mubr.msk.bf16.mxu1 %vm2363_vm3, %v15112_v60  ;;  %18610 = vst [vmem:[#allocation51_spill] sm:$0xff] %v15165_v2 }
 0x9cd   :  { %v15127_v39 = vpop.f32.mrb[115].mxu0 }
 0x9d2   :  { %v15146_v16 = vpop.f32.mrb[116].mxu0 }
 0x9d3   :  { %v15148_v4 = vpop.f32.mrb[117].mxu0  ;;  %11126 = vmatmul.mubr.msk.bf16.vlgmr.msra.gmra.mrb[144].mxu1 %vm2363_vm3, %v15140_v26 }
 0x9d4   :  { %v15152_v45 = vpop.f32.mrb[118].mxu0  ;;  %11129 = vmatprep.mubr.msk.bf16.mxu1 %vm2363_vm3, %v15144_v23  ;;  %11142 = vmatpush3.bf16.msra.mxu1 %v12394_v13  ;;  %v15179_v13 = vpack.c.bf16 %v15165_v2, %v15171_v37 }
 0x9d5   :  { %18608 = vst [vmem:[#allocation49_spill] sm:$0xff] %v15152_v45  ;;  %v15159_v11 = vpop.f32.mrb[119].mxu0  ;;  %11143 = vmatprep.subr.bf16.mxu1 %v12396_v9 }
 0x9d8   :  { %11144 = vmatpush3.bf16.msra.mxu1 %v12396_v9  ;;  %v15197_v9 = vadd.f32 %v12395_v14, %v14638_v20 }
 0x9da   :  { %v15181_v51 = vpop.f32.mrb[120].mxu0  ;;  %18618 = vst [vmem:[#allocation59_spill] sm:$0xff] %v15197_v9  ;;  %v15211_v2 = vpack.c.bf16 %v15197_v9, %v15203_v18  ;;  %v15229_v9 = vadd.f32 %v12395_v14, %v14632_v6 }
 0x9db   :  { %18613 = vst [vmem:[#allocation54_spill] sm:$0xff] %v15181_v51  ;;  %v15183_v27 = vpop.f32.mrb[121].mxu0  ;;  %11130 = vmatmul.mubr.msk.bf16.gmra.mrb[148].mxu1 %vm2363_vm3, %v15175_v53 }
 0x9dc   :  { %18614 = vst [vmem:[#allocation55_spill] sm:$0xff] %v15183_v27  ;;  %v15187_v54 = vpop.f32.mrb[122].mxu0  ;;  %11133 = vmatprep.mubr.msk.bf16.mxu1 %vm2363_vm3, %v15179_v13  ;;  %18621 = vst [vmem:[#allocation62_spill] sm:$0xff] %v15211_v2  ;;  %v15233_v18 = vpack.c.bf16 %v15224_v17, %v15229_v9 }
 0x9dd   :  { %18615 = vst [vmem:[#allocation56_spill] sm:$0xff] %v15187_v54  ;;  %v15194_v31 = vpop.f32.mrb[123].mxu0  ;;  %18627 = vst [vmem:[#allocation68_spill] sm:$0xff] %v15229_v9 }
 0x9de   :  { %18617 = vst [vmem:[#allocation58_spill] sm:$0xff] %v15194_v31  ;;  %18628 = vst [vmem:[#allocation69_spill] sm:$0xff] %v15233_v18 }
 0x9e2   :  { %v15213_v29 = vpop.f32.mrb[124].mxu0 }
 0x9e3   :  { %18622 = vst [vmem:[#allocation63_spill] sm:$0xff] %v15213_v29  ;;  %v15215_v37 = vpop.f32.mrb[125].mxu0  ;;  %11134 = vmatmul.mubr.msk.bf16.gmra.mrb[152].mxu1 %vm2363_vm3, %v15207_v34 }
 0x9e4   :  { %18623 = vst [vmem:[#allocation64_spill] sm:$0xff] %v15215_v37  ;;  %v15219_v7 = vpop.f32.mrb[126].mxu0  ;;  %11137 = vmatprep.mubr.msk.bf16.mxu1 %vm2363_vm3, %v15211_v2 }
 0x9e5   :  { %18624 = vst [vmem:[#allocation65_spill] sm:$0xff] %v15219_v7  ;;  %v15226_v20 = vpop.f32.mrb[127].mxu0 }
 0x9e6   :  { %18626 = vst [vmem:[#allocation67_spill] sm:$0xff] %v15226_v20 }
 0x9eb   :  { %11138 = vmatmul.mubr.msk.bf16.gmra.mrb[156].mxu1 %vm2363_vm3, %v15233_v18 }
 0x9ec   :  { %11145 = vmatprep.mubr.msk.bf16.mxu1 %vm2363_vm3, %v15112_v60 }
 0x9f3   :  { %11146 = vmatmul.mubr.msk.bf16.vlgmr.msra.gmra.mrb[160].mxu1 %vm2363_vm3, %v15140_v26 }
 0x9f4   :  { %11149 = vmatprep.mubr.msk.bf16.mxu1 %vm2363_vm3, %v15144_v23 }
 0x9fb   :  { %11150 = vmatmul.mubr.msk.bf16.gmra.mrb[164].mxu1 %vm2363_vm3, %v15175_v53 }
 0x9fc   :  { %11153 = vmatprep.mubr.msk.bf16.mxu1 %vm2363_vm3, %v15179_v13 }
 0xa03   :  { %11154 = vmatmul.mubr.msk.bf16.gmra.mrb[168].mxu1 %vm2363_vm3, %v15207_v34 }
 0xa04   :  { %11157 = vmatprep.mubr.msk.bf16.mxu1 %vm2363_vm3, %v15211_v2 }
 0xa0b   :  { %11158 = vmatmul.mubr.msk.bf16.gmra.mrb[172].mxu1 %vm2363_vm3, %v15233_v18 }
 0xa86   :  { %v11039_v6 = vpop.f32.mrb[128].mxu1 }
 0xa87   :  { %v4412_v30 = vpop.f32.mrb[129].mxu1  ;;  %v15258_v21 = vmul.f32 0.25, %v11039_v6 }
 0xa88   :  { %v15253_v14 = vmul.f32 0.25, %v4412_v30  ;;  %v11040_v17 = vpop.f32.mrb[130].mxu1 }
 0xa89   :  { %v4415_v9 = vpop.f32.mrb[131].mxu1  ;;  %v15262_v8 = vmul.f32 0.25, %v11040_v17 }
 0xa8a   :  { %v15255_v57 = vmul.f32 0.25, %v4415_v9  ;;  %4491 = vmax.xlane.f32.xlu0 %v15253_v14 }
 0xa8c   :  { %4493 = vmax.xlane.f32.xlu1 %v15255_v57 }
 0xa8e   :  { %4495 = vmax.xlane.f32.xlu0 %v15258_v21  ;;  %v11043_v50 = vpop.f32.mrb[132].mxu1 }
 0xa8f   :  { %v4428_v47 = vpop.f32.mrb[133].mxu1  ;;  %v15273_v55 = vmul.f32 0.25, %v11043_v50 }
 0xa90   :  { %v11044_v32 = vpop.f32.mrb[134].mxu1  ;;  %v15267_v9 = vmul.f32 0.25, %v4428_v47 }
 0xa91   :  { %v4431_v22 = vpop.f32.mrb[135].mxu1  ;;  %v15270_v6 = vmul.f32 0.25, %v11044_v32 }
 0xa92   :  { %v15264_v30 = vmul.f32 0.25, %v4431_v22  ;;  %4497 = vmax.xlane.f32.xlu0 %v15262_v8 }
 0xa94   :  { %4501 = vmax.xlane.f32.xlu1 %v15264_v30 }
 0xa96   :  { %4499 = vmax.xlane.f32.xlu0 %v15267_v9  ;;  %v11047_v25 = vpop.f32.mrb[136].mxu1 }
 0xa97   :  { %v4444_v61 = vpop.f32.mrb[137].mxu1  ;;  %v15285_v50 = vmul.f32 0.25, %v11047_v25 }
 0xa98   :  { %4505 = vmax.xlane.f32.xlu1 %v15270_v6  ;;  %v11048_v17 = vpop.f32.mrb[138].mxu1  ;;  %v15279_v47 = vmul.f32 0.25, %v4444_v61 }
 0xa99   :  { %v4447_v15 = vpop.f32.mrb[139].mxu1  ;;  %v15282_v32 = vmul.f32 0.25, %v11048_v17 }
 0xa9a   :  { %v15276_v22 = vmul.f32 0.25, %v4447_v15  ;;  %4503 = vmax.xlane.f32.xlu0 %v15273_v55 }
 0xa9c   :  { %4509 = vmax.xlane.f32.xlu1 %v15276_v22 }
 0xa9e   :  { %4507 = vmax.xlane.f32.xlu0 %v15279_v47  ;;  %v11051_v0 = vpop.f32.mrb[140].mxu1 }
 0xa9f   :  { %v4460_v5 = vpop.f32.mrb[141].mxu1  ;;  %v15297_v25 = vmul.f32 0.25, %v11051_v0 }
 0xaa0   :  { %4513 = vmax.xlane.f32.xlu1 %v15282_v32  ;;  %v11052_v44 = vpop.f32.mrb[142].mxu1  ;;  %v15291_v61 = vmul.f32 0.25, %v4460_v5 }
 0xaa1   :  { %v4463_v38 = vpop.f32.mrb[143].mxu1  ;;  %v15294_v17 = vmul.f32 0.25, %v11052_v44  ;;  %18631 = vst [vmem:[#allocation72_spill] sm:$0xff] %v15297_v25 }
 0xaa2   :  { %v15288_v15 = vmul.f32 0.25, %v4463_v38  ;;  %4511 = vmax.xlane.f32.xlu0 %v15285_v50  ;;  %18630 = vst [vmem:[#allocation71_spill] sm:$0xff] %v15291_v61  ;;  %v12397_v38 = vld [vmem:[%s18394_s2 + $0x5] ss:$0 sm:$0xff] }
 0xaa4   :  { %18629 = vst [vmem:[#allocation70_spill] sm:$0xff] %v15288_v15  ;;  %4517 = vmax.xlane.f32.xlu1 %v15288_v15 }
 0xaa6   :  { %4515 = vmax.xlane.f32.xlu0 %v15291_v61  ;;  %v11127_v35 = vpop.f32.mrb[144].mxu1 }
 0xaa7   :  { %v5078_v12 = vpop.f32.mrb[145].mxu1  ;;  %v15303_v43 = vadd.f32 %v12397_v38, %v11127_v35 }
 0xaa8   :  { %v11128_v1 = vpop.f32.mrb[146].mxu1  ;;  %4521 = vmax.xlane.f32.xlu1 %v15294_v17  ;;  %v5079_v44 = vadd.f32 %v12397_v38, %v5078_v12 }
 0xaa9   :  { %v15305_v5 = vadd.f32 %v12397_v38, %v11128_v1  ;;  %v5081_v52 = vpop.f32.mrb[147].mxu1 }
 0xaaa   :  { %v5082_v59 = vadd.f32 %v12397_v38, %v5081_v52  ;;  %4519 = vmax.xlane.f32.xlu0 %v15297_v25 }
 0xaac   :  { %v5335_v63 = vpack.c.bf16 %v5082_v59, %v5079_v44 }
 0xaae   :  { %v11131_v49 = vpop.f32.mrb[148].mxu1  ;;  %11197 = vmatprep.mubr.msk.bf16.mxu1 %vm50_vm0, %v5335_v63 }
 0xaaf   :  { %v5094_v33 = vpop.f32.mrb[149].mxu1  ;;  %v15311_v36 = vadd.f32 %v12397_v38, %v11131_v49 }
 0xab0   :  { %v11132_v46 = vpop.f32.mrb[150].mxu1  ;;  %v15315_v62 = vadd.f32 %v12397_v38, %v5094_v33 }
 0xab1   :  { %v15313_v35 = vadd.f32 %v12397_v38, %v11132_v46  ;;  %v5097_v1 = vpop.f32.mrb[151].mxu1 }
 0xab2   :  { %v15317_v12 = vadd.f32 %v12397_v38, %v5097_v1 }
 0xab6   :  { %v11135_v44 = vpop.f32.mrb[152].mxu1 }
 0xab7   :  { %v5110_v0 = vpop.f32.mrb[153].mxu1  ;;  %v15323_v48 = vadd.f32 %v12397_v38, %v11135_v44  ;;  %v12398_v44 = vld [vmem:[%s18394_s2 + $0x7] ss:$0 sm:$0xff] }
 0xab8   :  { %v11136_v63 = vpop.f32.mrb[154].mxu1  ;;  %v15327_v58 = vadd.f32 %v12397_v38, %v5110_v0 }
 0xab9   :  { %v15325_v49 = vadd.f32 %v12397_v38, %v11136_v63  ;;  %v5113_v46 = vpop.f32.mrb[155].mxu1 }
 0xaba   :  { %v15329_v33 = vadd.f32 %v12397_v38, %v5113_v46 }
 0xabe   :  { %v11139_v24 = vpop.f32.mrb[156].mxu1 }
 0xabf   :  { %v5126_v59 = vpop.f32.mrb[157].mxu1  ;;  %v15339_v63 = vadd.f32 %v12397_v38, %v11139_v24  ;;  %v12399_v24 = vld [vmem:[%s18394_s2 + $0x6] ss:$0 sm:$0xff] }
 0xac0   :  { %v11140_v41 = vpop.f32.mrb[158].mxu1  ;;  %4214 = vrot.lane.b32.xlu0 %v12398_v44, %s12451_s14  ;;  %v15343_v56 = vadd.f32 %v12397_v38, %v5126_v59 }
 0xac1   :  { %v15341_v0 = vadd.f32 %v12397_v38, %v11140_v41  ;;  %v5129_v46 = vpop.f32.mrb[159].mxu1 }
 0xac2   :  { %v15345_v1 = vadd.f32 %v12397_v38, %v5129_v46 }
 0xac6   :  { %v11147_v25 = vpop.f32.mrb[160].mxu1 }
 0xac7   :  { %v5175_v15 = vpop.f32.mrb[161].mxu1  ;;  %v5184_v41 = vadd.f32 %v12399_v24, %v11147_v25 }
 0xac8   :  { %v11148_v18 = vpop.f32.mrb[162].mxu1  ;;  %v5176_v59 = vadd.f32 %v12399_v24, %v5175_v15 }
 0xac9   :  { %v5187_v44 = vadd.f32 %v12399_v24, %v11148_v18  ;;  %v5178_v61 = vpop.f32.mrb[163].mxu1 }
 0xaca   :  { %v5179_v7 = vadd.f32 %v12399_v24, %v5178_v61 }
 0xacb   :  { %v5344_v38 = vpack.c.bf16 %v5187_v44, %v5184_v41 }
 0xacc   :  { %v5343_v46 = vpack.c.bf16 %v5179_v7, %v5176_v59 }
 0xacd   :  { %v5379_v7 = vsel %vm50_vm0, %v5344_v38, 0 }
 0xace   :  { %v11151_v29 = vpop.f32.mrb[164].mxu1  ;;  %11639 = vmatprep.subr.msk.bf16.mxu1 %vm50_vm0, %v5343_v46  ;;  %v5376_v52 = vsel %vm50_vm0, %v5343_v46, 0 }
 0xacf   :  { %v5191_v40 = vpop.f32.mrb[165].mxu1  ;;  %11182 = vmatpush3.bf16.xpose.msra.mxu1 %v5376_v52  ;;  %v5200_v37 = vadd.f32 %v12399_v24, %v11151_v29 }
 0xad0   :  { %v11152_v20 = vpop.f32.mrb[166].mxu1  ;;  %11640 = vmatprep.subr.msk.bf16.mxu1 %vm50_vm0, %v5344_v38  ;;  %v5192_v25 = vadd.f32 %v12399_v24, %v5191_v40 }
 0xad1   :  { %v5203_v54 = vadd.f32 %v12399_v24, %v11152_v20  ;;  %v5194_v51 = vpop.f32.mrb[167].mxu1 }
 0xad2   :  { %v5195_v18 = vadd.f32 %v12399_v24, %v5194_v51 }
 0xad3   :  { %v5346_v2 = vpack.c.bf16 %v5203_v54, %v5200_v37 }
 0xad4   :  { %v5345_v15 = vpack.c.bf16 %v5195_v18, %v5192_v25 }
 0xad6   :  { %v11155_v61 = vpop.f32.mrb[168].mxu1  ;;  %v5382_v40 = vsel %vm50_vm0, %v5345_v15, 0 }
 0xad7   :  { %v5207_v41 = vpop.f32.mrb[169].mxu1  ;;  %11184 = vmatpush3.bf16.xpose.msra.mxu1 %v5379_v7  ;;  %v5216_v59 = vadd.f32 %v12399_v24, %v11155_v61 }
 0xad8   :  { %v11156_v44 = vpop.f32.mrb[170].mxu1  ;;  %11641 = vmatprep.subr.msk.bf16.mxu1 %vm50_vm0, %v5345_v15  ;;  %v5208_v31 = vadd.f32 %v12399_v24, %v5207_v41  ;;  %v5385_v41 = vsel %vm50_vm0, %v5346_v2, 0  ;;  %v18633_v15 = vpack.c.bf16 %v15317_v12, %v15315_v62 }
 0xad9   :  { %v5219_v52 = vadd.f32 %v12399_v24, %v11156_v44  ;;  %v5210_v46 = vpop.f32.mrb[171].mxu1 }
 0xada   :  { %v5211_v27 = vadd.f32 %v12399_v24, %v5210_v46 }
 0xadb   :  { %v5348_v29 = vpack.c.bf16 %v5219_v52, %v5216_v59  ;;  %v18634_v59 = vpack.c.bf16 %v15313_v35, %v15311_v36  ;;  %v18637_v35 = vpack.c.bf16 %v15345_v1, %v15343_v56 }
 0xadc   :  { %v5347_v20 = vpack.c.bf16 %v5211_v27, %v5208_v31 }
 0xadd   :  { %v5391_v31 = vsel %vm50_vm0, %v5348_v29, 0 }
 0xade   :  { %v11159_v45 = vpop.f32.mrb[172].mxu1  ;;  %v5388_v27 = vsel %vm50_vm0, %v5347_v20, 0 }
 0xadf   :  { %v5223_v37 = vpop.f32.mrb[173].mxu1  ;;  %11186 = vmatpush3.bf16.xpose.msra.mxu1 %v5382_v40  ;;  %v5232_v54 = vadd.f32 %v12399_v24, %v11159_v45 }
 0xae0   :  { %v11160_v51 = vpop.f32.mrb[174].mxu1  ;;  %11642 = vmatprep.subr.msk.bf16.mxu1 %vm50_vm0, %v5346_v2  ;;  %v5224_v18 = vadd.f32 %v12399_v24, %v5223_v37 }
 0xae1   :  { %v5235_v38 = vadd.f32 %v12399_v24, %v11160_v51  ;;  %v5226_v25 = vpop.f32.mrb[175].mxu1 }
 0xae2   :  { %v5227_v7 = vadd.f32 %v12399_v24, %v5226_v25  ;;  %v18632_v24 = vpack.c.bf16 %v15305_v5, %v15303_v43  ;;  %v18635_v43 = vpack.c.bf16 %v15329_v33, %v15327_v58 }
 0xae3   :  { %v5350_v61 = vpack.c.bf16 %v5235_v38, %v5232_v54 }
 0xae4   :  { %v5349_v44 = vpack.c.bf16 %v5227_v7, %v5224_v18 }
 0xae5   :  { %v5397_v2 = vsel %vm50_vm0, %v5350_v61, 0 }
 0xae6   :  { %v5394_v45 = vsel %vm50_vm0, %v5349_v44, 0 }
 0xae7   :  { %11188 = vmatpush3.bf16.xpose.msra.mxu1 %v5385_v41 }
 0xae8   :  { %11643 = vmatprep.subr.msk.bf16.mxu1 %vm50_vm0, %v5347_v20 }
 0xaef   :  { %11190 = vmatpush3.bf16.xpose.msra.mxu1 %v5388_v27 }
 0xaf0   :  { %11644 = vmatprep.subr.msk.bf16.mxu1 %vm50_vm0, %v5348_v29 }
 0xaf7   :  { %11192 = vmatpush3.bf16.xpose.msra.mxu1 %v5391_v31 }
 0xaf8   :  { %11645 = vmatprep.subr.msk.bf16.mxu1 %vm50_vm0, %v5349_v44 }
 0xaff   :  { %11194 = vmatpush3.bf16.xpose.msra.mxu1 %v5394_v45 }
 0xb00   :  { %11646 = vmatprep.subr.msk.bf16.mxu1 %vm50_vm0, %v5350_v61 }
 0xb07   :  { %11196 = vmatpush3.bf16.xpose.msra.mxu1 %v5397_v2 }
 0xb08   :  { %11265 = vmatprep.subr.bf16.mxu1 %v14857_v28 }
 0xb0e   :  { %11198 = vmatmul.mubr.msk.bf16.vlgmr.msra.gmra.mrb[176].mxu1 %vm50_vm0, %v18632_v24 }
 0xb0f   :  { %11201 = vmatprep.mubr.msk.bf16.mxu1 %vm50_vm0, %v18633_v15  ;;  %11266 = vmatpush3.bf16.msra.mxu1 %v14857_v28 }
 0xb10   :  { %11267 = vmatprep.subr.bf16.mxu1 %v14864_v3 }
 0xb13   :  { %11268 = vmatpush3.bf16.msra.mxu1 %v14864_v3  ;;  %v18636_v3 = vpack.c.bf16 %v15325_v49, %v15323_v48  ;;  %v18638_v48 = vpack.c.bf16 %v15341_v0, %v15339_v63 }
 0xb16   :  { %11202 = vmatmul.mubr.msk.bf16.gmra.mrb[180].mxu1 %vm50_vm0, %v18634_v59 }
 0xb17   :  { %v4492_v52 = vpop.xlane.xlu0 %4491  ;;  %11205 = vmatprep.mubr.msk.bf16.mxu1 %vm50_vm0, %v18635_v43 }
 0xb18   :  { %v4523_v5 = vsub.f32 %v15253_v14, %v4492_v52 }
 0xb19   :  { %v4494_v12 = vpop.xlane.xlu1 %4493 }
 0xb1a   :  { %v4539_v58 = vmul.f32 1.442695, %v4523_v5 }
 0xb1b   :  { %v4496_v62 = vpop.xlane.xlu0 %4495 }
 0xb1c   :  { %v4525_v28 = vsub.f32 %v15258_v21, %v4496_v62  ;;  %v4524_v21 = vsub.f32 %v15255_v57, %v4494_v12 }
 0xb1e   :  { %v4543_v46 = vmul.f32 1.442695, %v4525_v28  ;;  %11206 = vmatmul.mubr.msk.bf16.gmra.mrb[184].mxu1 %vm50_vm0, %v18636_v3  ;;  %v4541_v49 = vmul.f32 1.442695, %v4524_v21 }
 0xb1f   :  { %v4498_v36 = vpop.xlane.xlu0 %4497  ;;  %11209 = vmatprep.mubr.msk.bf16.mxu1 %vm50_vm0, %v18637_v35 }
 0xb20   :  { %12007 = vpow2.f32 %v4543_v46  ;;  %v4526_v33 = vsub.f32 %v15262_v8, %v4498_v36 }
 0xb21   :  { %v4502_v14 = vpop.xlane.xlu1 %4501  ;;  %12009 = vpow2.f32 %v4539_v58 }
 0xb22   :  { %v4545_v20 = vmul.f32 1.442695, %v4526_v33 }
 0xb23   :  { %v4500_v29 = vpop.xlane.xlu0 %4499 }
 0xb24   :  { %12011 = vpow2.f32 %v4545_v20  ;;  %v4527_v8 = vsub.f32 %v15267_v9, %v4500_v29  ;;  %v4528_v9 = vsub.f32 %v15264_v30, %v4502_v14  ;;  %v18643_v14 = vld [vmem:[#allocation54_spill] sm:$0xff] }
 0xb25   :  { %v4506_v40 = vpop.xlane.xlu1 %4505  ;;  %12013 = vpow2.f32 %v4541_v49  ;;  %v18645_v49 = vld [vmem:[#allocation64_spill] sm:$0xff] }
 0xb26   :  { %11210 = vmatmul.mubr.msk.bf16.gmra.mrb[188].mxu1 %vm50_vm0, %v18638_v48  ;;  %v4547_v63 = vmul.f32 1.442695, %v4527_v8  ;;  %v4530_v0 = vsub.f32 %v15270_v6, %v4506_v40  ;;  %v4549_v41 = vmul.f32 1.442695, %v4528_v9  ;;  %v18644_v40 = vld [vmem:[#allocation56_spill] sm:$0xff]  ;;  %v18646_v8 = vld [vmem:[#allocation67_spill] sm:$0xff] }
 0xb27   :  { %v4504_v56 = vpop.xlane.xlu0 %4503  ;;  %11269 = vmatprep.mubr.msk.bf16.mxu1 %vm2363_vm3, %v15112_v60 }
 0xb28   :  { %v4529_v1 = vsub.f32 %v15273_v55, %v4504_v56  ;;  %v4553_v18 = vmul.f32 1.442695, %v4530_v0 }
 0xb29   :  { %v15410_v57 = vpop.xlane.xlu1 %4509 }
 0xb2a   :  { %v15412_v37 = vpop.eup %12007  ;;  %v4551_v51 = vmul.f32 1.442695, %v4529_v1 }
 0xb2b   :  { %v4508_v54 = vpop.xlane.xlu0 %4507  ;;  %4575 = vadd.xlane.f32.xlu1 %v15412_v37  ;;  %v15416_v25 = vpop.eup %12009 }
 0xb2c   :  { %12015 = vpow2.f32 %v4551_v51  ;;  %v4531_v61 = vsub.f32 %v15279_v47, %v4508_v54  ;;  %v18648_v54 = vld [vmem:[#allocation65_spill] sm:$0xff] }
 0xb2d   :  { %v4514_v38 = vpop.xlane.xlu1 %4513  ;;  %12017 = vpow2.f32 %v4547_v63 }
 0xb2e   :  { %11270 = vmatmul.mubr.msk.bf16.vlgmr.msra.gmra.mrb[192].mxu1 %vm2363_vm3, %v15140_v26  ;;  %v15426_v6 = vpop.eup %12011  ;;  %12019 = vpow2.f32 %v4553_v18  ;;  %v4555_v24 = vmul.f32 1.442695, %v4531_v61  ;;  %v4534_v52 = vsub.f32 %v15282_v32, %v4514_v38 }
 0xb2f   :  { %v4512_v55 = vpop.xlane.xlu0 %4511  ;;  %4571 = vadd.xlane.f32.xlu1 %v15416_v25  ;;  %11273 = vmatprep.mubr.msk.bf16.mxu1 %vm2363_vm3, %v15144_v23  ;;  %v15433_v31 = vpop.eup %12013  ;;  %12021 = vpow2.f32 %v4549_v41  ;;  %v18649_v41 = vld [vmem:[#allocation71_spill] sm:$0xff] }
 0xb30   :  { %v4533_v27 = vsub.f32 %v15285_v50, %v4512_v55  ;;  %v4561_v58 = vmul.f32 1.442695, %v4534_v52  ;;  %v18652_v52 = vld [vmem:[#allocation72_spill] sm:$0xff] }
 0xb31   :  { %v15424_v7 = vpop.xlane.xlu1 %4517 }
 0xb32   :  { %v4559_v15 = vmul.f32 1.442695, %v4533_v27 }
 0xb33   :  { %v15429_v44 = vpop.xlane.xlu0 %4515  ;;  %4577 = vadd.xlane.f32.xlu1 %v15426_v6 }
 0xb34   :  { %v4535_v27 = vsub.f32 %v18649_v41, %v15429_v44 }
 0xb35   :  { %v4522_v45 = vpop.xlane.xlu1 %4521 }
 0xb36   :  { %v15435_v30 = vpop.eup %12015  ;;  %v4538_v2 = vsub.f32 %v15294_v17, %v4522_v45  ;;  %11274 = vmatmul.mubr.msk.bf16.gmra.mrb[196].mxu1 %vm2363_vm3, %v15175_v53  ;;  %v4532_v17 = vsub.f32 %v15276_v22, %v15410_v57  ;;  %v18647_v57 = vld [vmem:[#allocation63_spill] sm:$0xff] }
 0xb37   :  { %4583 = vadd.xlane.f32.xlu0 %v15435_v30  ;;  %v15441_v47 = vpop.xlane.xlu0 %4519  ;;  %4573 = vadd.xlane.f32.xlu1 %v15433_v31  ;;  %v15446_v59 = vpop.eup %12017 }
 0xb38   :  { %v4569_v50 = vmul.f32 1.442695, %v4538_v2  ;;  %11277 = vmatprep.mubr.msk.bf16.mxu1 %vm2363_vm3, %v15179_v13  ;;  %v15468_v3 = vpop.eup %12019  ;;  %v4557_v61 = vmul.f32 1.442695, %v4532_v17  ;;  %v4563_v17 = vmul.f32 1.442695, %v4535_v27 }
 0xb39   :  { %v15493_v0 = vpop.eup %12021 }
 0xb3a   :  { %12023 = vpow2.f32 %v4569_v50 }
 0xb3b   :  { %12025 = vpow2.f32 %v4555_v24  ;;  %v15451_v43 = vpop.permute.xlu0 %4214  ;;  %4579 = vadd.xlane.f32.xlu1 %v15446_v59  ;;  %v18650_v24 = vld [vmem:[#allocation69_spill] sm:$0xff] }
 0xb3c   :  { %12027 = vpow2.f32 %v4559_v15  ;;  %v4252_v62 = vadd.f32 %v15117_v10, %v15451_v43  ;;  %v4255_v5 = vadd.f32 %v15127_v39, %v15451_v43  ;;  %v4260_v28 = vadd.f32 %v15114_v42, %v15451_v43  ;;  %v18639_v42 = vld [vmem:[#allocation49_spill] sm:$0xff]  ;;  %v18651_v15 = vld [vmem:[#allocation70_spill] sm:$0xff] }
 0xb3d   :  { %v4263_v22 = vadd.f32 %v15120_v19, %v15451_v43  ;;  %v4268_v32 = vadd.f32 %v15148_v4, %v15451_v43  ;;  %v4271_v12 = vadd.f32 %v15159_v11, %v15451_v43  ;;  %v4276_v46 = vadd.f32 %v15146_v16, %v15451_v43  ;;  %v18640_v19 = vld [vmem:[#allocation55_spill] sm:$0xff]  ;;  %v18641_v4 = vld [vmem:[#allocation58_spill] sm:$0xff] }
 0xb3e   :  { %11278 = vmatmul.mubr.msk.bf16.gmra.mrb[200].mxu1 %vm2363_vm3, %v15207_v34  ;;  %v4643_v10 = vpack.c.bf16 %v4255_v5, %v4252_v62  ;;  %v4279_v39 = vadd.f32 %v18639_v42, %v15451_v43  ;;  %v4284_v36 = vadd.f32 %v18640_v19, %v15451_v43  ;;  %v4287_v35 = vadd.f32 %v18641_v4, %v15451_v43  ;;  %v18642_v11 = vld [vmem:[#allocation62_spill] sm:$0xff] }
 0xb3f   :  { %4585 = vadd.xlane.f32.xlu1 %v15468_v3  ;;  %11281 = vmatprep.mubr.msk.bf16.mxu1 %vm2363_vm3, %v18642_v11  ;;  %v4644_v16 = vpack.c.bf16 %v4263_v22, %v4260_v28  ;;  %v4645_v33 = vpack.c.bf16 %v4271_v12, %v4268_v32  ;;  %v4292_v21 = vadd.f32 %v18643_v14, %v15451_v43  ;;  %12029 = vpow2.f32 %v4561_v58 }
 0xb40   :  { %11053 = vmatprep.subr.bf16.mxu0 %v4643_v10  ;;  %v4646_v29 = vpack.c.bf16 %v4279_v39, %v4276_v46  ;;  %v4647_v20 = vpack.c.bf16 %v4287_v35, %v4284_v36  ;;  %v4295_v48 = vadd.f32 %v18644_v40, %v15451_v43  ;;  %v4300_v56 = vadd.f32 %v18645_v49, %v15451_v43 }
 0xb41   :  { %11054 = vmatpush3.bf16.msra.mxu0 %v4643_v10  ;;  %v4303_v1 = vadd.f32 %v18646_v8, %v15451_v43  ;;  %v4308_v51 = vadd.f32 %v18647_v57, %v15451_v43  ;;  %v4311_v63 = vadd.f32 %v18648_v54, %v15451_v43  ;;  %12031 = vpow2.f32 %v4557_v61 }
 0xb42   :  { %11055 = vmatprep.subr.bf16.mxu0 %v4644_v16  ;;  %v4648_v38 = vpack.c.bf16 %v4295_v48, %v4292_v21  ;;  %v4536_v50 = vsub.f32 %v18651_v15, %v15424_v7  ;;  %12033 = vpow2.f32 %v4563_v17  ;;  %v4537_v62 = vsub.f32 %v18652_v52, %v15441_v47 }
 0xb43   :  { %4581 = vadd.xlane.f32.xlu1 %v15493_v0  ;;  %v4649_v55 = vpack.c.bf16 %v4303_v1, %v4300_v56  ;;  %v4650_v9 = vpack.c.bf16 %v4311_v63, %v4308_v51 }
 0xb44   :  { %v15496_v18 = vpop.eup %12023  ;;  %v4565_v44 = vmul.f32 1.442695, %v4536_v50  ;;  %v4567_v28 = vmul.f32 1.442695, %v4537_v62 }
 0xb45   :  { %v15500_v45 = vpop.eup %12025  ;;  %11056 = vmatpush3.bf16.msra.mxu0 %v4644_v16  ;;  %4601 = vadd.xlane.f32.xlu0 %v15496_v18 }
 0xb46   :  { %v15503_v2 = vpop.eup %12027  ;;  %11057 = vmatprep.subr.bf16.mxu0 %v4645_v33  ;;  %11282 = vmatmul.mubr.msk.bf16.gmra.mrb[204].mxu1 %vm2363_vm3, %v18650_v24  ;;  %12035 = vpow2.f32 %v4565_v44 }
 0xb47   :  { %4591 = vadd.xlane.f32.xlu1 %v15503_v2  ;;  %12037 = vpow2.f32 %v4567_v28 }
 0xb49   :  { %11058 = vmatpush3.bf16.msra.mxu0 %v4645_v33  ;;  %v15513_v5 = vpop.eup %12029 }
 0xb4a   :  { %11059 = vmatprep.subr.bf16.mxu0 %v4646_v29 }
 0xb4b   :  { %4587 = vadd.xlane.f32.xlu1 %v15500_v45  ;;  %v15516_v7 = vpop.eup %12031 }
 0xb4c   :  { %v15519_v22 = vpop.eup %12033 }
 0xb4d   :  { %11060 = vmatpush3.bf16.msra.mxu0 %v4646_v29 }
 0xb4e   :  { %11061 = vmatprep.subr.bf16.mxu0 %v4647_v20 }
 0xb4f   :  { %4593 = vadd.xlane.f32.xlu1 %v15513_v5 }
 0xb50   :  { %v15522_v47 = vpop.eup %12035 }
 0xb51   :  { %11062 = vmatpush3.bf16.msra.mxu0 %v4647_v20  ;;  %v15525_v32 = vpop.eup %12037 }
 0xb52   :  { %11063 = vmatprep.subr.bf16.mxu0 %v4648_v38 }
 0xb53   :  { %4589 = vadd.xlane.f32.xlu1 %v15516_v7 }
 0xb55   :  { %11064 = vmatpush3.bf16.msra.mxu0 %v4648_v38 }
 0xb56   :  { %11065 = vmatprep.subr.bf16.mxu0 %v4649_v55 }
 0xb57   :  { %4595 = vadd.xlane.f32.xlu1 %v15519_v22 }
 0xb59   :  { %11066 = vmatpush3.bf16.msra.mxu0 %v4649_v55 }
 0xb5a   :  { %11067 = vmatprep.subr.bf16.mxu0 %v4650_v9 }
 0xb5b   :  { %4597 = vadd.xlane.f32.xlu1 %v15522_v47 }
 0xb5d   :  { %11068 = vmatpush3.bf16.msra.mxu0 %v4650_v9 }
 0xb5f   :  { %4599 = vadd.xlane.f32.xlu1 %v15525_v32 }
 0xbb8   :  { %v4576_v12 = vpop.xlane.xlu1 %4575 }
 0xbbc   :  { %v4572_v46 = vpop.xlane.xlu1 %4571 }
 0xbc0   :  { %v4578_v10 = vpop.xlane.xlu1 %4577 }
 0xbc1   :  { %12039 = vrcp.f32 %v4578_v10 }
 0xbc2   :  { %12041 = vrcp.f32 %v4572_v46 }
 0xbc3   :  { %12043 = vrcp.f32 %v4576_v12 }
 0xbc4   :  { %v4574_v42 = vpop.xlane.xlu1 %4573  ;;  %v4584_v4 = vpop.xlane.xlu0 %4583 }
 0xbc5   :  { %12045 = vrcp.f32 %v4574_v42 }
 0xbc8   :  { %v4580_v39 = vpop.xlane.xlu1 %4579 }
 0xbcb   :  { %v12040_v36 = vpop.eup %12039 }
 0xbcc   :  { %v4586_v19 = vpop.xlane.xlu1 %4585  ;;  %v12042_v35 = vpop.eup %12041  ;;  %v4622_v33 = vmul.f32 %v12040_v36, %v15426_v6 }
 0xbcd   :  { %12047 = vrcp.f32 %v4586_v19  ;;  %v12044_v58 = vpop.eup %12043  ;;  %v4619_v21 = vmul.f32 %v12042_v35, %v15416_v25 }
 0xbce   :  { %12049 = vrcp.f32 %v4580_v39  ;;  %v4621_v20 = vmul.f32 %v12044_v58, %v15412_v37 }
 0xbcf   :  { %v12046_v16 = vpop.eup %12045  ;;  %12051 = vrcp.f32 %v4584_v4 }
 0xbd0   :  { %v4582_v14 = vpop.xlane.xlu1 %4581  ;;  %v4620_v29 = vmul.f32 %v12046_v16, %v15433_v31  ;;  %v4636_v49 = vpack.c.bf16 %v4622_v33, %v4621_v20 }
 0xbd1   :  { %12053 = vrcp.f32 %v4582_v14 }
 0xbd2   :  { %v4635_v40 = vpack.c.bf16 %v4620_v29, %v4619_v21  ;;  %v4602_v50 = vpop.xlane.xlu0 %4601 }
 0xbd4   :  { %v4592_v48 = vpop.xlane.xlu1 %4591  ;;  %11069 = vmatprep.mubr.bf16.mxu0 %v4635_v40 }
 0xbd5   :  { %11070 = vmatmul.mubr.bf16.vlgmr.msra.gmra.mrb[128].mxu0 %v4636_v49 }
 0xbd7   :  { %v12048_v56 = vpop.eup %12047 }
 0xbd8   :  { %v4588_v8 = vpop.xlane.xlu1 %4587  ;;  %v12050_v1 = vpop.eup %12049  ;;  %v4626_v6 = vmul.f32 %v12048_v56, %v15468_v3 }
 0xbd9   :  { %v12052_v57 = vpop.eup %12051  ;;  %v4623_v63 = vmul.f32 %v12050_v1, %v15446_v59 }
 0xbda   :  { %v4625_v31 = vmul.f32 %v12052_v57, %v15435_v30 }
 0xbdb   :  { %v12054_v51 = vpop.eup %12053 }
 0xbdc   :  { %v4594_v54 = vpop.xlane.xlu1 %4593  ;;  %v4624_v25 = vmul.f32 %v12054_v51, %v15493_v0  ;;  %v4638_v38 = vpack.c.bf16 %v4626_v6, %v4625_v31 }
 0xbdd   :  { %12055 = vrcp.f32 %v4594_v54 }
 0xbde   :  { %v4637_v37 = vpack.c.bf16 %v4624_v25, %v4623_v63  ;;  %12057 = vrcp.f32 %v4588_v8 }
 0xbdf   :  { %12059 = vrcp.f32 %v4592_v48 }
 0xbe0   :  { %11073 = vmatprep.mubr.bf16.mxu0 %v4637_v37  ;;  %v4590_v55 = vpop.xlane.xlu1 %4589 }
 0xbe1   :  { %12061 = vrcp.f32 %v4590_v55  ;;  %11074 = vmatmul.mubr.bf16.gmra.mrb[132].mxu0 %v4638_v38  ;;  %v11199_v9 = vpop.f32.mrb[176].mxu1 }
 0xbe2   :  { %v5433_v61 = vpop.f32.mrb[177].mxu1  ;;  %v15541_v30 = vmul.f32 0.25, %v11199_v9 }
 0xbe3   :  { %v15536_v41 = vmul.f32 0.25, %v5433_v61  ;;  %v11200_v3 = vpop.f32.mrb[178].mxu1 }
 0xbe4   :  { %v4596_v27 = vpop.xlane.xlu1 %4595  ;;  %v5436_v59 = vpop.f32.mrb[179].mxu1  ;;  %v15544_v52 = vmul.f32 0.25, %v11200_v3 }
 0xbe5   :  { %v15538_v15 = vmul.f32 0.25, %v5436_v59  ;;  %5512 = vmax.xlane.f32.xlu1 %v15536_v41  ;;  %12063 = vrcp.f32 %v4596_v27  ;;  %v18653_v59 = vld [vmem:[#allocation24_spill] sm:$0xff] }
 0xbe7   :  { %5514 = vmax.xlane.f32.xlu0 %v15538_v15  ;;  %v12056_v0 = vpop.eup %12055 }
 0xbe8   :  { %v4598_v17 = vpop.xlane.xlu1 %4597  ;;  %v12058_v44 = vpop.eup %12057  ;;  %v4630_v39 = vmul.f32 %v12056_v0, %v15513_v5 }
 0xbe9   :  { %12065 = vrcp.f32 %v4598_v17  ;;  %5516 = vmax.xlane.f32.xlu1 %v15541_v30  ;;  %v11203_v62 = vpop.f32.mrb[180].mxu1  ;;  %v12060_v28 = vpop.eup %12059  ;;  %v4627_v4 = vmul.f32 %v12058_v44, %v15500_v45 }
 0xbea   :  { %v5449_v12 = vpop.f32.mrb[181].mxu1  ;;  %12067 = vrcp.f32 %v4602_v50  ;;  %v4629_v16 = vmul.f32 %v12060_v28, %v15503_v2  ;;  %v15557_v14 = vmul.f32 0.25, %v11203_v62 }
 0xbeb   :  { %v12062_v46 = vpop.eup %12061  ;;  %v15547_v10 = vmul.f32 0.25, %v5449_v12  ;;  %5518 = vmax.xlane.f32.xlu0 %v15544_v52  ;;  %v11204_v42 = vpop.f32.mrb[182].mxu1 }
 0xbec   :  { %v4600_v19 = vpop.xlane.xlu1 %4599  ;;  %v5452_v36 = vpop.f32.mrb[183].mxu1  ;;  %v4628_v35 = vmul.f32 %v12062_v46, %v15516_v7  ;;  %v4640_v21 = vpack.c.bf16 %v4630_v39, %v4629_v16  ;;  %v15560_v29 = vmul.f32 0.25, %v11204_v42 }
 0xbed   :  { %12069 = vrcp.f32 %v4600_v19  ;;  %v15553_v58 = vmul.f32 0.25, %v5452_v36  ;;  %5520 = vmax.xlane.f32.xlu1 %v15547_v10 }
 0xbee   :  { %v4639_v33 = vpack.c.bf16 %v4628_v35, %v4627_v4 }
 0xbef   :  { %5522 = vmax.xlane.f32.xlu0 %v15553_v58  ;;  %v12064_v5 = vpop.eup %12063 }
 0xbf0   :  { %11077 = vmatprep.mubr.bf16.mxu0 %v4639_v33  ;;  %v4631_v49 = vmul.f32 %v12064_v5, %v15519_v22 }
 0xbf1   :  { %11078 = vmatmul.mubr.bf16.gmra.mrb[136].mxu0 %v4640_v21  ;;  %5524 = vmax.xlane.f32.xlu1 %v15557_v14  ;;  %v11207_v45 = vpop.f32.mrb[184].mxu1 }
 0xbf2   :  { %v5465_v7 = vpop.f32.mrb[185].mxu1  ;;  %v15571_v6 = vmul.f32 0.25, %v11207_v45 }
 0xbf3   :  { %v12066_v20 = vpop.eup %12065  ;;  %v15563_v40 = vmul.f32 0.25, %v5465_v7  ;;  %5526 = vmax.xlane.f32.xlu0 %v15560_v29  ;;  %v11208_v2 = vpop.f32.mrb[186].mxu1 }
 0xbf4   :  { %v5468_v48 = vpop.f32.mrb[187].mxu1  ;;  %v4632_v56 = vmul.f32 %v12066_v20, %v15522_v47  ;;  %v12068_v8 = vpop.eup %12067  ;;  %v15576_v25 = vmul.f32 0.25, %v11208_v2 }
 0xbf5   :  { %v15568_v1 = vmul.f32 0.25, %v5468_v48  ;;  %5528 = vmax.xlane.f32.xlu1 %v15563_v40  ;;  %v4634_v63 = vmul.f32 %v12068_v8, %v15496_v18 }
 0xbf6   :  { %v4641_v57 = vpack.c.bf16 %v4632_v56, %v4631_v49 }
 0xbf7   :  { %v12070_v51 = vpop.eup %12069  ;;  %5530 = vmax.xlane.f32.xlu0 %v15568_v1 }
 0xbf8   :  { %11081 = vmatprep.mubr.bf16.mxu0 %v4641_v57  ;;  %v4633_v54 = vmul.f32 %v12070_v51, %v15525_v32 }
 0xbf9   :  { %5532 = vmax.xlane.f32.xlu1 %v15571_v6  ;;  %v11211_v22 = vpop.f32.mrb[188].mxu1 }
 0xbfa   :  { %v5481_v47 = vpop.f32.mrb[189].mxu1  ;;  %v4642_v31 = vpack.c.bf16 %v4634_v63, %v4633_v54  ;;  %v15585_v32 = vmul.f32 0.25, %v11211_v22 }
 0xbfb   :  { %v15579_v37 = vmul.f32 0.25, %v5481_v47  ;;  %5534 = vmax.xlane.f32.xlu0 %v15576_v25  ;;  %v11212_v38 = vpop.f32.mrb[190].mxu1 }
 0xbfc   :  { %11082 = vmatmul.mubr.bf16.gmra.mrb[140].mxu0 %v4642_v31  ;;  %v5484_v55 = vpop.f32.mrb[191].mxu1  ;;  %v15588_v18 = vmul.f32 0.25, %v11212_v38 }
 0xbfd   :  { %v15582_v9 = vmul.f32 0.25, %v5484_v55  ;;  %5536 = vmax.xlane.f32.xlu1 %v15579_v37 }
 0xbff   :  { %5538 = vmax.xlane.f32.xlu0 %v15582_v9 }
 0xc01   :  { %5540 = vmax.xlane.f32.xlu1 %v15585_v32  ;;  %v11271_v61 = vpop.f32.mrb[192].mxu1 }
 0xc02   :  { %v5908_v3 = vpop.f32.mrb[193].mxu1  ;;  %v5917_v0 = vadd.f32 %v11271_v61, %v18653_v59 }
 0xc03   :  { %v11272_v27 = vpop.f32.mrb[194].mxu1  ;;  %5542 = vmax.xlane.f32.xlu0 %v15588_v18  ;;  %v5909_v44 = vadd.f32 %v5908_v3, %v18653_v59 }
 0xc04   :  { %v5920_v50 = vadd.f32 %v11272_v27, %v18653_v59  ;;  %v5911_v17 = vpop.f32.mrb[195].mxu1 }
 0xc05   :  { %v5912_v62 = vadd.f32 %v5911_v17, %v18653_v59 }
 0xc06   :  { %v6077_v28 = vpack.c.bf16 %v5920_v50, %v5917_v0 }
 0xc07   :  { %v6076_v12 = vpack.c.bf16 %v5912_v62, %v5909_v44  ;;  %v15621_v62 = vld [vmem:[%s18393_s1 + $0x60] sm:$0xff]  }
 0xc08   :  { %v6112_v7 = vsel %vm50_vm0, %v6077_v28, 0  ;;  %11085 = vmatprep.subr.bf16.mxu0 %v15621_v62 }
 0xc09   :  { %v11275_v46 = vpop.f32.mrb[196].mxu1  ;;  %11647 = vmatprep.subr.msk.bf16.mxu1 %vm50_vm0, %v6076_v12  ;;  %v6109_v42 = vsel %vm50_vm0, %v6076_v12, 0  ;;  %11086 = vmatpush3.bf16.msra.mxu0 %v15621_v62 }
 0xc0a   :  { %v5924_v39 = vpop.f32.mrb[197].mxu1  ;;  %11306 = vmatpush3.bf16.xpose.msra.mxu1 %v6109_v42  ;;  %v5933_v36 = vadd.f32 %v11275_v46, %v18653_v59  ;;  %v15634_v46 = vld [vmem:[%s18393_s1 + $0x58] sm:$0xff]  }
 0xc0b   :  { %v11276_v19 = vpop.f32.mrb[198].mxu1  ;;  %11648 = vmatprep.subr.msk.bf16.mxu1 %vm50_vm0, %v6077_v28  ;;  %v5925_v16 = vadd.f32 %v5924_v39, %v18653_v59  ;;  %11103 = vmatprep.subr.bf16.mxu0 %v15634_v46 }
 0xc0c   :  { %v5936_v4 = vadd.f32 %v11276_v19, %v18653_v59  ;;  %v5927_v35 = vpop.f32.mrb[199].mxu1 }
 0xc0d   :  { %v5928_v33 = vadd.f32 %v5927_v35, %v18653_v59 }
 0xc0e   :  { %v6079_v21 = vpack.c.bf16 %v5936_v4, %v5933_v36 }
 0xc0f   :  { %v6078_v5 = vpack.c.bf16 %v5928_v33, %v5925_v16 }
 0xc10   :  { %v6118_v17 = vsel %vm50_vm0, %v6079_v21, 0 }
 0xc11   :  { %v11279_v45 = vpop.f32.mrb[200].mxu1  ;;  %v6115_v22 = vsel %vm50_vm0, %v6078_v5, 0 }
 0xc12   :  { %v5940_v20 = vpop.f32.mrb[201].mxu1  ;;  %11308 = vmatpush3.bf16.xpose.msra.mxu1 %v6112_v7  ;;  %v5949_v48 = vadd.f32 %v11279_v45, %v18653_v59 }
 0xc13   :  { %v11280_v2 = vpop.f32.mrb[202].mxu1  ;;  %11649 = vmatprep.subr.msk.bf16.mxu1 %vm50_vm0, %v6078_v5  ;;  %v5941_v8 = vadd.f32 %v5940_v20, %v18653_v59 }
 0xc14   :  { %v5952_v49 = vadd.f32 %v11280_v2, %v18653_v59  ;;  %v5943_v56 = vpop.f32.mrb[203].mxu1 }
 0xc15   :  { %v5944_v57 = vadd.f32 %v5943_v56, %v18653_v59 }
 0xc16   :  { %v6081_v51 = vpack.c.bf16 %v5952_v49, %v5949_v48 }
 0xc17   :  { %v6080_v54 = vpack.c.bf16 %v5944_v57, %v5941_v8 }
 0xc19   :  { %v11283_v63 = vpop.f32.mrb[204].mxu1  ;;  %v6121_v44 = vsel %vm50_vm0, %v6080_v54, 0 }
 0xc1a   :  { %v5956_v47 = vpop.f32.mrb[205].mxu1  ;;  %11310 = vmatpush3.bf16.xpose.msra.mxu1 %v6115_v22  ;;  %v5965_v38 = vadd.f32 %v11283_v63, %v18653_v59 }
 0xc1b   :  { %v11284_v31 = vpop.f32.mrb[206].mxu1  ;;  %11650 = vmatprep.subr.msk.bf16.mxu1 %vm50_vm0, %v6079_v21  ;;  %v5957_v3 = vadd.f32 %v5956_v47, %v18653_v59 }
 0xc1c   :  { %v5968_v55 = vadd.f32 %v11284_v31, %v18653_v59  ;;  %v5959_v61 = vpop.f32.mrb[207].mxu1 }
 0xc1d   :  { %v5960_v27 = vadd.f32 %v5959_v61, %v18653_v59  ;;  %v6124_v59 = vsel %vm50_vm0, %v6081_v51, 0 }
 0xc1e   :  { %v6083_v0 = vpack.c.bf16 %v5968_v55, %v5965_v38 }
 0xc1f   :  { %v6082_v50 = vpack.c.bf16 %v5960_v27, %v5957_v3 }
 0xc20   :  { %v6130_v12 = vsel %vm50_vm0, %v6083_v0, 0 }
 0xc21   :  { %v6127_v28 = vsel %vm50_vm0, %v6082_v50, 0 }
 0xc22   :  { %11312 = vmatpush3.bf16.xpose.msra.mxu1 %v6118_v17 }
 0xc23   :  { %11651 = vmatprep.subr.msk.bf16.mxu1 %vm50_vm0, %v6080_v54 }
 0xc2a   :  { %11314 = vmatpush3.bf16.xpose.msra.mxu1 %v6121_v44 }
 0xc2b   :  { %11652 = vmatprep.subr.msk.bf16.mxu1 %vm50_vm0, %v6081_v51 }
 0xc32   :  { %11316 = vmatpush3.bf16.xpose.msra.mxu1 %v6124_v59 }
 0xc33   :  { %11653 = vmatprep.subr.msk.bf16.mxu1 %vm50_vm0, %v6082_v50 }
 0xc3a   :  { %11318 = vmatpush3.bf16.xpose.msra.mxu1 %v6127_v28 }
 0xc3b   :  { %11654 = vmatprep.subr.msk.bf16.mxu1 %vm50_vm0, %v6083_v0 }
 0xc42   :  { %11320 = vmatpush3.bf16.xpose.msra.mxu1 %v6130_v12 }
 0xc72   :  { %v5513_v42 = vpop.xlane.xlu1 %5512 }
 0xc73   :  { %v5544_v39 = vsub.f32 %v15536_v41, %v5513_v42 }
 0xc74   :  { %v5515_v19 = vpop.xlane.xlu0 %5514 }
 0xc75   :  { %v5560_v36 = vmul.f32 1.442695, %v5544_v39  ;;  %v5545_v4 = vsub.f32 %v15538_v15, %v5515_v19 }
 0xc76   :  { %v5517_v35 = vpop.xlane.xlu1 %5516 }
 0xc77   :  { %12071 = vpow2.f32 %v5560_v36  ;;  %v5562_v16 = vmul.f32 1.442695, %v5545_v4  ;;  %v5546_v33 = vsub.f32 %v15541_v30, %v5517_v35 }
 0xc78   :  { %v5519_v21 = vpop.xlane.xlu0 %5518 }
 0xc79   :  { %12073 = vpow2.f32 %v5562_v16  ;;  %v5564_v5 = vmul.f32 1.442695, %v5546_v33  ;;  %v5547_v45 = vsub.f32 %v15544_v52, %v5519_v21 }
 0xc7a   :  { %v5521_v7 = vpop.xlane.xlu1 %5520 }
 0xc7b   :  { %12075 = vpow2.f32 %v5564_v5  ;;  %v5566_v20 = vmul.f32 1.442695, %v5547_v45  ;;  %v5548_v2 = vsub.f32 %v15547_v10, %v5521_v7 }
 0xc7c   :  { %v5523_v41 = vpop.xlane.xlu0 %5522 }
 0xc7d   :  { %12077 = vpow2.f32 %v5566_v20  ;;  %v5568_v48 = vmul.f32 1.442695, %v5548_v2  ;;  %v5549_v15 = vsub.f32 %v15553_v58, %v5523_v41 }
 0xc7e   :  { %v5525_v49 = vpop.xlane.xlu1 %5524 }
 0xc7f   :  { %12079 = vpow2.f32 %v5568_v48  ;;  %v5570_v56 = vmul.f32 1.442695, %v5549_v15  ;;  %v5550_v30 = vsub.f32 %v15557_v14, %v5525_v49  ;;  %v12400_v49 = vld [vmem:[%s18393_s1 + $0x48] sm:$0xff]  }
 0xc80   :  { %v5527_v8 = vpop.xlane.xlu0 %5526 }
 0xc81   :  { %v15644_v57 = vpop.eup %12071  ;;  %12081 = vpow2.f32 %v5570_v56  ;;  %v5572_v52 = vmul.f32 1.442695, %v5550_v30  ;;  %v5551_v51 = vsub.f32 %v15560_v29, %v5527_v8 }
 0xc82   :  { %v5529_v54 = vpop.xlane.xlu1 %5528  ;;  %5592 = vadd.xlane.f32.xlu1 %v15644_v57 }
 0xc83   :  { %v15648_v10 = vpop.eup %12073  ;;  %12083 = vpow2.f32 %v5572_v52  ;;  %v5574_v63 = vmul.f32 1.442695, %v5551_v51  ;;  %v5552_v58 = vsub.f32 %v15563_v40, %v5529_v54 }
 0xc84   :  { %v5531_v22 = vpop.xlane.xlu0 %5530  ;;  %5594 = vadd.xlane.f32.xlu0 %v15648_v10 }
 0xc85   :  { %v15652_v14 = vpop.eup %12075  ;;  %12085 = vpow2.f32 %v5574_v63  ;;  %v5576_v47 = vmul.f32 1.442695, %v5552_v58  ;;  %v5553_v31 = vsub.f32 %v15568_v1, %v5531_v22 }
 0xc86   :  { %v5533_v38 = vpop.xlane.xlu1 %5532  ;;  %5596 = vadd.xlane.f32.xlu1 %v15652_v14 }
 0xc87   :  { %v15656_v29 = vpop.eup %12077  ;;  %12087 = vpow2.f32 %v5576_v47  ;;  %v5578_v55 = vmul.f32 1.442695, %v5553_v31  ;;  %v5554_v61 = vsub.f32 %v15571_v6, %v5533_v38 }
 0xc88   :  { %v5535_v3 = vpop.xlane.xlu0 %5534  ;;  %5598 = vadd.xlane.f32.xlu0 %v15656_v29 }
 0xc89   :  { %v15660_v40 = vpop.eup %12079  ;;  %12089 = vpow2.f32 %v5578_v55  ;;  %v5580_v27 = vmul.f32 1.442695, %v5554_v61  ;;  %v5555_v0 = vsub.f32 %v15576_v25, %v5535_v3 }
 0xc8a   :  { %5600 = vadd.xlane.f32.xlu1 %v15660_v40  ;;  %v5537_v1 = vpop.xlane.xlu1 %5536 }
 0xc8b   :  { %v15664_v50 = vpop.eup %12081  ;;  %12091 = vpow2.f32 %v5580_v27  ;;  %v5582_v17 = vmul.f32 1.442695, %v5555_v0  ;;  %v5556_v44 = vsub.f32 %v15579_v37, %v5537_v1  ;;  %v18654_v1 = vld [vmem:[#allocation30_spill] sm:$0xff] }
 0xc8c   :  { %5602 = vadd.xlane.f32.xlu0 %v15664_v50  ;;  %v5539_v6 = vpop.xlane.xlu0 %5538 }
 0xc8d   :  { %v15668_v59 = vpop.eup %12083  ;;  %12093 = vpow2.f32 %v5582_v17  ;;  %v5584_v28 = vmul.f32 1.442695, %v5556_v44  ;;  %v5557_v12 = vsub.f32 %v15582_v9, %v5539_v6  ;;  %v18655_v17 = vld [vmem:[#allocation28_spill] sm:$0xff]  ;;  %v18657_v6 = vld [vmem:[#allocation29_spill] sm:$0xff] }
 0xc8e   :  { %5604 = vadd.xlane.f32.xlu1 %v15668_v59  ;;  %v5541_v25 = vpop.xlane.xlu1 %5540  ;;  %v18656_v44 = vpack.c.bf16 %v18654_v1, %v18655_v17 }
 0xc8f   :  { %v15672_v42 = vpop.eup %12085  ;;  %12095 = vpow2.f32 %v5584_v28  ;;  %v5586_v39 = vmul.f32 1.442695, %v5557_v12  ;;  %v5558_v19 = vsub.f32 %v15585_v32, %v5541_v25  ;;  %v18658_v28 = vld [vmem:[#allocation27_spill] sm:$0xff]  ;;  %v18660_v25 = vld [vmem:[#allocation34_spill] sm:$0xff] }
 0xc90   :  { %5606 = vadd.xlane.f32.xlu0 %v15672_v42  ;;  %v5543_v37 = vpop.xlane.xlu0 %5542  ;;  %v18659_v12 = vpack.c.bf16 %v18657_v6, %v18658_v28 }
 0xc91   :  { %v15676_v36 = vpop.eup %12087  ;;  %12097 = vpow2.f32 %v5586_v39  ;;  %v5588_v4 = vmul.f32 1.442695, %v5558_v19  ;;  %v5559_v35 = vsub.f32 %v15588_v18, %v5543_v37  ;;  %v18661_v39 = vld [vmem:[#allocation32_spill] sm:$0xff]  ;;  %v12401_v37 = vld [vmem:[%s18393_s1 + $0x50] sm:$0xff]  }
 0xc92   :  { %5608 = vadd.xlane.f32.xlu1 %v15676_v36  ;;  %v18662_v19 = vpack.c.bf16 %v18660_v25, %v18661_v39 }
 0xc93   :  { %v15680_v9 = vpop.eup %12089  ;;  %12099 = vpow2.f32 %v5588_v4  ;;  %v5590_v16 = vmul.f32 1.442695, %v5559_v35  ;;  %v18663_v4 = vld [vmem:[#allocation33_spill] sm:$0xff]  ;;  %v18664_v35 = vld [vmem:[#allocation31_spill] sm:$0xff] }
 0xc94   :  { %5610 = vadd.xlane.f32.xlu0 %v15680_v9 }
 0xc95   :  { %v15683_v33 = vpop.eup %12091  ;;  %12101 = vpow2.f32 %v5590_v16  ;;  %v18665_v16 = vpack.c.bf16 %v18663_v4, %v18664_v35  ;;  %v12402_v35 = vld [vmem:[%s18394_s2 + $0x7] ss:$0 sm:$0xff] }
 0xc96   :  { %5612 = vadd.xlane.f32.xlu1 %v15683_v33 }
 0xc97   :  { %v15686_v32 = vpop.eup %12093 }
 0xc98   :  { %5614 = vadd.xlane.f32.xlu0 %v15686_v32 }
 0xc99   :  { %v15689_v21 = vpop.eup %12095 }
 0xc9a   :  { %5616 = vadd.xlane.f32.xlu1 %v15689_v21 }
 0xc9b   :  { %v15692_v18 = vpop.eup %12097 }
 0xc9c   :  { %5618 = vadd.xlane.f32.xlu0 %v15692_v18 }
 0xc9d   :  { %v15695_v5 = vpop.eup %12099 }
 0xc9e   :  { %5620 = vadd.xlane.f32.xlu1 %v15695_v5 }
 0xc9f   :  { %v15698_v45 = vpop.eup %12101 }
 0xca0   :  { %5622 = vadd.xlane.f32.xlu0 %v15698_v45 }
 0xca8   :  { %v11071_v7 = vpop.f32.mrb[128].mxu0 }
 0xca9   :  { %v4685_v20 = vpop.f32.mrb[129].mxu0 }
 0xcaa   :  { %v11072_v2 = vpop.f32.mrb[130].mxu0 }
 0xcab   :  { %v4751_v41 = vpack.c.bf16 %v11072_v2, %v11071_v7  ;;  %v4688_v48 = vpop.f32.mrb[131].mxu0  ;;  %v18666_v7 = vld [vmem:[#allocation38_spill] sm:$0xff] }
 0xcac   :  { %v4750_v15 = vpack.c.bf16 %v4688_v48, %v4685_v20  ;;  %v18667_v20 = vld [vmem:[#allocation36_spill] sm:$0xff]  ;;  %v18670_v48 = vld [vmem:[#allocation35_spill] sm:$0xff] }
 0xcad   :  { %v18668_v2 = vpack.c.bf16 %v18666_v7, %v18667_v20 }
 0xcae   :  { %11087 = vmatprep.mubr.msk.bf16.mxu0 %vm50_vm0, %v4750_v15 }
 0xcaf   :  { %11088 = vmatmul.mubr.msk.bf16.vlgmr.msra.gmra.mrb[144].mxu0 %vm50_vm0, %v4751_v41  ;;  %v18669_v41 = vld [vmem:[#allocation37_spill] sm:$0xff] }
 0xcb0   :  { %11104 = vmatpush3.bf16.msra.mxu0 %v15634_v46  ;;  %v18671_v15 = vpack.c.bf16 %v18669_v41, %v18670_v48 }
 0xcb1   :  { %11161 = vmatprep.subr.bf16.mxu0 %v12400_v49 }
 0xcb4   :  { %v11075_v56 = vpop.f32.mrb[132].mxu0 }
 0xcb5   :  { %v4701_v30 = vpop.f32.mrb[133].mxu0 }
 0xcb6   :  { %v11076_v8 = vpop.f32.mrb[134].mxu0 }
 0xcb7   :  { %v4753_v52 = vpack.c.bf16 %v11076_v8, %v11075_v56  ;;  %v4704_v51 = vpop.f32.mrb[135].mxu0  ;;  %v18673_v56 = vld [vmem:[#allocation40_spill] sm:$0xff]  ;;  %v18675_v8 = vld [vmem:[#allocation41_spill] sm:$0xff] }
 0xcb8   :  { %v4752_v54 = vpack.c.bf16 %v4704_v51, %v4701_v30 }
 0xcba   :  { %11091 = vmatprep.mubr.msk.bf16.mxu0 %vm50_vm0, %v4752_v54 }
 0xcbb   :  { %11092 = vmatmul.mubr.msk.bf16.gmra.mrb[148].mxu0 %vm50_vm0, %v4753_v52  ;;  %v18676_v52 = vld [vmem:[#allocation39_spill] sm:$0xff] }
 0xcbc   :  { %v18677_v51 = vpack.c.bf16 %v18675_v8, %v18676_v52 }
 0xcc4   :  { %v11079_v63 = vpop.f32.mrb[136].mxu0 }
 0xcc5   :  { %v4717_v58 = vpop.f32.mrb[137].mxu0 }
 0xcc6   :  { %v11080_v22 = vpop.f32.mrb[138].mxu0 }
 0xcc7   :  { %v4755_v47 = vpack.c.bf16 %v11080_v22, %v11079_v63  ;;  %v4720_v46 = vpop.f32.mrb[139].mxu0 }
 0xcc8   :  { %v4754_v31 = vpack.c.bf16 %v4720_v46, %v4717_v58 }
 0xcca   :  { %11095 = vmatprep.mubr.msk.bf16.mxu0 %vm50_vm0, %v4754_v31 }
 0xccb   :  { %11096 = vmatmul.mubr.msk.bf16.gmra.mrb[152].mxu0 %vm50_vm0, %v4755_v47 }
 0xccf   :  { %v11083_v38 = vpop.f32.mrb[140].mxu0 }
 0xcd0   :  { %v4733_v55 = vpop.f32.mrb[141].mxu0 }
 0xcd1   :  { %v11084_v61 = vpop.f32.mrb[142].mxu0 }
 0xcd2   :  { %v4757_v3 = vpack.c.bf16 %v11084_v61, %v11083_v38  ;;  %v4736_v27 = vpop.f32.mrb[143].mxu0 }
 0xcd3   :  { %v4756_v0 = vpack.c.bf16 %v4736_v27, %v4733_v55 }
 0xcd5   :  { %11099 = vmatprep.mubr.msk.bf16.mxu0 %vm50_vm0, %v4756_v0 }
 0xcd6   :  { %11100 = vmatmul.mubr.msk.bf16.gmra.mrb[156].mxu0 %vm50_vm0, %v4757_v3 }
 0xcd7   :  { %11105 = vmatprep.mubr.msk.bf16.mxu0 %vm50_vm0, %v18656_v44 }
 0xcde   :  { %11106 = vmatmul.mubr.msk.bf16.vlgmr.msra.gmra.mrb[144].mxu0 %vm50_vm0, %v18659_v12 }
 0xcdf   :  { %11109 = vmatprep.mubr.msk.bf16.mxu0 %vm50_vm0, %v18662_v19  ;;  %11162 = vmatpush3.bf16.msra.mxu0 %v12400_v49  ;;  %v18672_v49 = vld [vmem:[#allocation42_spill] sm:$0xff] }
 0xce0   :  { %11163 = vmatprep.subr.bf16.mxu0 %v12401_v37  ;;  %v18674_v30 = vpack.c.bf16 %v18672_v49, %v18673_v56 }
 0xce3   :  { %11164 = vmatpush3.bf16.msra.mxu0 %v12401_v37 }
 0xce6   :  { %11110 = vmatmul.mubr.msk.bf16.gmra.mrb[148].mxu0 %vm50_vm0, %v18665_v16 }
 0xce7   :  { %11113 = vmatprep.mubr.msk.bf16.mxu0 %vm50_vm0, %v18668_v2 }
 0xcee   :  { %11114 = vmatmul.mubr.msk.bf16.gmra.mrb[152].mxu0 %vm50_vm0, %v18671_v15 }
 0xcef   :  { %11117 = vmatprep.mubr.msk.bf16.mxu0 %vm50_vm0, %v18674_v30 }
 0xcf6   :  { %11118 = vmatmul.mubr.msk.bf16.gmra.mrb[156].mxu0 %vm50_vm0, %v18677_v51 }
 0xcf7   :  { %11165 = vmatprep.mubr.msk.bf16.mxu0 %vm2363_vm3, %v15112_v60 }
 0xcfe   :  { %11166 = vmatmul.mubr.msk.bf16.vlgmr.msra.gmra.mrb[160].mxu0 %vm2363_vm3, %v15140_v26 }
 0xcff   :  { %11169 = vmatprep.mubr.msk.bf16.mxu0 %vm2363_vm3, %v15144_v23 }
 0xd06   :  { %11170 = vmatmul.mubr.msk.bf16.gmra.mrb[164].mxu0 %vm2363_vm3, %v15175_v53 }
 0xd07   :  { %11173 = vmatprep.mubr.msk.bf16.mxu0 %vm2363_vm3, %v15179_v13 }
 0xd0e   :  { %11174 = vmatmul.mubr.msk.bf16.gmra.mrb[168].mxu0 %vm2363_vm3, %v15207_v34 }
 0xd0f   :  { %11177 = vmatprep.mubr.msk.bf16.mxu0 %vm2363_vm3, %v18642_v11  ;;  %v5593_v54 = vpop.xlane.xlu1 %5592 }
 0xd10   :  { %12103 = vrcp.f32 %v5593_v54 }
 0xd11   :  { %v5595_v63 = vpop.xlane.xlu0 %5594 }
 0xd12   :  { %12105 = vrcp.f32 %v5595_v63 }
 0xd13   :  { %v5597_v56 = vpop.xlane.xlu1 %5596 }
 0xd15   :  { %v5599_v48 = vpop.xlane.xlu0 %5598 }
 0xd16   :  { %11178 = vmatmul.mubr.msk.bf16.gmra.mrb[172].mxu0 %vm2363_vm3, %v18650_v24  ;;  %12107 = vrcp.f32 %v5599_v48 }
 0xd19   :  { %v5603_v51 = vpop.xlane.xlu0 %5602 }
 0xd1a   :  { %v12104_v58 = vpop.eup %12103  ;;  %12109 = vrcp.f32 %v5603_v51 }
 0xd1b   :  { %v5640_v47 = vmul.f32 %v12104_v58, %v15644_v57  ;;  %12111 = vrcp.f32 %v5597_v56 }
 0xd1c   :  { %v12106_v22 = vpop.eup %12105 }
 0xd1d   :  { %v5641_v46 = vmul.f32 %v12106_v22, %v15648_v10 }
 0xd1f   :  { %v5656_v31 = vpack.c.bf16 %v5641_v46, %v5640_v47  ;;  %v5601_v46 = vpop.xlane.xlu1 %5600 }
 0xd20   :  { %12113 = vrcp.f32 %v5601_v46  ;;  %v12108_v51 = vpop.eup %12107 }
 0xd21   :  { %11229 = vmatprep.mubr.bf16.mxu0 %v5656_v31 }
 0xdb1   :  { %v15766_v38 = vpop.f32.mrb[144].mxu0 }
 0xdb2   :  { %v15768_v55 = vpop.f32.mrb[145].mxu0 }
 0xdb3   :  { %v15770_v61 = vpop.f32.mrb[146].mxu0 }
 0xdb4   :  { %v15772_v3 = vpop.f32.mrb[147].mxu0 }
 0xdb9   :  { %v15774_v27 = vpop.f32.mrb[148].mxu0 }
 0xdba   :  { %v15776_v0 = vpop.f32.mrb[149].mxu0 }
 0xdbb   :  { %v15778_v1 = vpop.f32.mrb[150].mxu0 }
 0xdbc   :  { %v15780_v17 = vpop.f32.mrb[151].mxu0 }
 0xdc1   :  { %v15782_v57 = vpop.f32.mrb[152].mxu0 }
 0xdc2   :  { %v15784_v10 = vpop.f32.mrb[153].mxu0 }
 0xdc3   :  { %v15786_v44 = vpop.f32.mrb[154].mxu0 }
 0xdc4   :  { %v15788_v6 = vpop.f32.mrb[155].mxu0 }
 0xdc9   :  { %v15790_v28 = vpop.f32.mrb[156].mxu0 }
 0xdca   :  { %v15792_v12 = vpop.f32.mrb[157].mxu0 }
 0xdcb   :  { %v15794_v25 = vpop.f32.mrb[158].mxu0 }
 0xdcc   :  { %v15796_v39 = vpop.f32.mrb[159].mxu0 }
 0xdd1   :  { %v11167_v19 = vpop.f32.mrb[160].mxu0 }
 0xdd2   :  { %v5272_v37 = vpop.f32.mrb[161].mxu0  ;;  %v5281_v16 = vadd.f32 %v12402_v35, %v11167_v19 }
 0xdd3   :  { %v11168_v4 = vpop.f32.mrb[162].mxu0  ;;  %v5273_v2 = vadd.f32 %v12402_v35, %v5272_v37 }
 0xdd4   :  { %v5284_v7 = vadd.f32 %v12402_v35, %v11168_v4  ;;  %v5275_v20 = vpop.f32.mrb[163].mxu0  ;;  %v5607_v4 = vpop.xlane.xlu0 %5606 }
 0xdd5   :  { %v5276_v41 = vadd.f32 %v12402_v35, %v5275_v20  ;;  %v5605_v20 = vpop.xlane.xlu1 %5604  ;;  %12115 = vrcp.f32 %v5607_v4 }
 0xdd6   :  { %v5665_v15 = vpack.c.bf16 %v5284_v7, %v5281_v16 }
 0xdd7   :  { %v5664_v49 = vpack.c.bf16 %v5276_v41, %v5273_v2 }
 0xdd9   :  { %v11171_v30 = vpop.f32.mrb[164].mxu0  ;;  %11213 = vmatprep.subr.bf16.mxu0 %v5664_v49 }
 0xdda   :  { %v5288_v8 = vpop.f32.mrb[165].mxu0  ;;  %11214 = vmatpush3.bf16.msra.mxu0 %v5664_v49  ;;  %v5297_v54 = vadd.f32 %v12402_v35, %v11171_v30 }
 0xddb   :  { %v11172_v52 = vpop.f32.mrb[166].mxu0  ;;  %11215 = vmatprep.subr.bf16.mxu0 %v5665_v15  ;;  %v5289_v22 = vadd.f32 %v12402_v35, %v5288_v8 }
 0xddc   :  { %v5300_v63 = vadd.f32 %v12402_v35, %v11172_v52  ;;  %v5291_v58 = vpop.f32.mrb[167].mxu0 }
 0xddd   :  { %v5292_v47 = vadd.f32 %v12402_v35, %v5291_v58  ;;  %v5609_v58 = vpop.xlane.xlu1 %5608 }
 0xdde   :  { %v5667_v31 = vpack.c.bf16 %v5300_v63, %v5297_v54  ;;  %11216 = vmatpush3.bf16.msra.mxu0 %v5665_v15  ;;  %v5611_v15 = vpop.xlane.xlu0 %5610 }
 0xddf   :  { %v5666_v19 = vpack.c.bf16 %v5292_v47, %v5289_v22  ;;  %12117 = vrcp.f32 %v5611_v15  ;;  %v18678_v15 = vld [vmem:[#allocation21_spill] sm:$0xff] }
 0xde0   :  { %12119 = vrcp.f32 %v5605_v20 }
 0xde1   :  { %v11175_v37 = vpop.f32.mrb[168].mxu0  ;;  %11217 = vmatprep.subr.bf16.mxu0 %v5666_v19  ;;  %v5613_v46 = vpop.xlane.xlu1 %5612  ;;  %12121 = vrcp.f32 %v5609_v58 }
 0xde2   :  { %v5304_v16 = vpop.f32.mrb[169].mxu0  ;;  %11218 = vmatpush3.bf16.msra.mxu0 %v5666_v19  ;;  %v5313_v2 = vadd.f32 %v12402_v35, %v11175_v37  ;;  %v5615_v48 = vpop.xlane.xlu0 %5614 }
 0xde3   :  { %v11176_v7 = vpop.f32.mrb[170].mxu0  ;;  %11219 = vmatprep.subr.bf16.mxu0 %v5667_v31  ;;  %v5305_v30 = vadd.f32 %v12402_v35, %v5304_v16  ;;  %12123 = vrcp.f32 %v5615_v48  ;;  %v18680_v48 = vld [vmem:[#allocation23_spill] sm:$0xff] }
 0xde4   :  { %v5316_v41 = vadd.f32 %v12402_v35, %v11176_v7  ;;  %v5307_v49 = vpop.f32.mrb[171].mxu0 }
 0xde5   :  { %v5308_v52 = vadd.f32 %v12402_v35, %v5307_v49 }
 0xde6   :  { %v5669_v8 = vpack.c.bf16 %v5316_v41, %v5313_v2  ;;  %11220 = vmatpush3.bf16.msra.mxu0 %v5667_v31  ;;  %v12110_v2 = vpop.eup %12109 }
 0xde7   :  { %v5668_v54 = vpack.c.bf16 %v5308_v52, %v5305_v30  ;;  %v12112_v41 = vpop.eup %12111  ;;  %v5643_v52 = vmul.f32 %v12108_v51, %v15656_v29 }
 0xde8   :  { %v12114_v30 = vpop.eup %12113  ;;  %v5642_v4 = vmul.f32 %v12112_v41, %v15652_v14 }
 0xde9   :  { %v11179_v63 = vpop.f32.mrb[172].mxu0  ;;  %11221 = vmatprep.subr.bf16.mxu0 %v5668_v54  ;;  %v5644_v20 = vmul.f32 %v12114_v30, %v15660_v40  ;;  %v12116_v58 = vpop.eup %12115 }
 0xdea   :  { %v5320_v22 = vpop.f32.mrb[173].mxu0  ;;  %11222 = vmatpush3.bf16.msra.mxu0 %v5668_v54  ;;  %v5329_v19 = vadd.f32 %v12402_v35, %v11179_v63  ;;  %v5619_v54 = vpop.xlane.xlu0 %5618  ;;  %v5657_v63 = vpack.c.bf16 %v5643_v52, %v5642_v4  ;;  %v5647_v40 = vmul.f32 %v12116_v58, %v15672_v42 }
 0xdeb   :  { %v11180_v47 = vpop.f32.mrb[174].mxu0  ;;  %11223 = vmatprep.subr.bf16.mxu0 %v5669_v8  ;;  %v5321_v16 = vadd.f32 %v12402_v35, %v5320_v22  ;;  %12125 = vrcp.f32 %v5619_v54 }
 0xdec   :  { %v5332_v37 = vadd.f32 %v12402_v35, %v11180_v47  ;;  %v5323_v7 = vpop.f32.mrb[175].mxu0  ;;  %12127 = vrcp.f32 %v5613_v46  ;;  %v12118_v47 = vpop.eup %12117 }
 0xded   :  { %v5324_v49 = vadd.f32 %v12402_v35, %v5323_v7  ;;  %v5645_v35 = vmul.f32 %v12110_v2, %v15664_v50  ;;  %v12120_v29 = vpop.eup %12119 }
 0xdee   :  { %v5671_v31 = vpack.c.bf16 %v5332_v37, %v5329_v19  ;;  %11224 = vmatpush3.bf16.msra.mxu0 %v5669_v8  ;;  %v5617_v8 = vpop.xlane.xlu1 %5616  ;;  %v12122_v14 = vpop.eup %12121  ;;  %v18679_v19 = vld [vmem:[#allocation22_spill] sm:$0xff]  ;;  %v5649_v37 = vmul.f32 %v12118_v47, %v15680_v9 }
 0xdef   :  { %v5670_v56 = vpack.c.bf16 %v5324_v49, %v5321_v16  ;;  %v5658_v22 = vpack.c.bf16 %v5645_v35, %v5644_v20  ;;  %12129 = vrcp.f32 %v5617_v8  ;;  %v5623_v50 = vpop.xlane.xlu0 %5622  ;;  %v5646_v16 = vmul.f32 %v12120_v29, %v15668_v59 }
 0xdf0   :  { %12131 = vrcp.f32 %v5623_v50  ;;  %v5648_v49 = vmul.f32 %v12122_v14, %v15676_v36 }
 0xdf1   :  { %11225 = vmatprep.subr.bf16.mxu0 %v5670_v56 }
 0xdf2   :  { %11226 = vmatpush3.bf16.msra.mxu0 %v5670_v56  ;;  %v5621_v7 = vpop.xlane.xlu1 %5620  ;;  %v12124_v56 = vpop.eup %12123  ;;  %v5660_v51 = vpack.c.bf16 %v5649_v37, %v5648_v49 }
 0xdf3   :  { %11227 = vmatprep.subr.bf16.mxu0 %v5671_v31  ;;  %12133 = vrcp.f32 %v5621_v7  ;;  %v5651_v9 = vmul.f32 %v12124_v56, %v15686_v32 }
 0xdf5   :  { %v12126_v46 = vpop.eup %12125 }
 0xdf6   :  { %11228 = vmatpush3.bf16.msra.mxu0 %v5671_v31  ;;  %v5659_v31 = vpack.c.bf16 %v5647_v40, %v5646_v16  ;;  %v12128_v2 = vpop.eup %12127  ;;  %v5653_v59 = vmul.f32 %v12126_v46, %v15692_v18 }
 0xdf7   :  { %11245 = vmatprep.subr.bf16.mxu0 %v18678_v15  ;;  %v5650_v41 = vmul.f32 %v12128_v2, %v15683_v33  ;;  %v18681_v33 = vld [vmem:[#allocation26_spill] sm:$0xff] }
 0xdf9   :  { %11230 = vmatmul.mubr.bf16.vlgmr.msra.gmra.mrb[176].mxu0 %v5657_v63  ;;  %v12130_v42 = vpop.eup %12129  ;;  %v5661_v36 = vpack.c.bf16 %v5651_v9, %v5650_v41 }
 0xdfa   :  { %11233 = vmatprep.mubr.bf16.mxu0 %v5658_v22  ;;  %11246 = vmatpush3.bf16.msra.mxu0 %v18678_v15  ;;  %v5652_v30 = vmul.f32 %v12130_v42, %v15689_v21  ;;  %v12132_v52 = vpop.eup %12131 }
 0xdfb   :  { %11247 = vmatprep.subr.bf16.mxu0 %v18679_v19  ;;  %v5655_v4 = vmul.f32 %v12132_v52, %v15698_v45 }
 0xdfc   :  { %v5662_v54 = vpack.c.bf16 %v5653_v59, %v5652_v30 }
 0xdfd   :  { %v12134_v35 = vpop.eup %12133 }
 0xdfe   :  { %11248 = vmatpush3.bf16.msra.mxu0 %v18679_v19  ;;  %v5654_v8 = vmul.f32 %v12134_v35, %v15695_v5 }
 0xdff   :  { %11285 = vmatprep.subr.bf16.mxu0 %v18680_v48 }
 0xe00   :  { %v5663_v20 = vpack.c.bf16 %v5655_v4, %v5654_v8 }
 0xe01   :  { %11234 = vmatmul.mubr.bf16.gmra.mrb[180].mxu0 %v5659_v31 }
 0xe02   :  { %11237 = vmatprep.mubr.bf16.mxu0 %v5660_v51 }
 0xe09   :  { %11238 = vmatmul.mubr.bf16.gmra.mrb[184].mxu0 %v5661_v36 }
 0xe0a   :  { %11241 = vmatprep.mubr.bf16.mxu0 %v5662_v54 }
 0xe11   :  { %11242 = vmatmul.mubr.bf16.gmra.mrb[188].mxu0 %v5663_v20 }
 0xe12   :  { %11249 = vmatprep.mubr.msk.bf16.mxu0 %vm2363_vm3, %v15112_v60 }
 0xe19   :  { %11250 = vmatmul.mubr.msk.bf16.vlgmr.msra.gmra.mrb[192].mxu0 %vm2363_vm3, %v15140_v26 }
 0xe1a   :  { %11286 = vmatpush3.bf16.msra.mxu0 %v18680_v48  ;;  %11253 = vmatprep.mubr.msk.bf16.mxu0 %vm2363_vm3, %v15144_v23  ;;  %v18683_v48 = vld [vmem:[#allocation25_spill] sm:$0xff] }
 0xe1b   :  { %11287 = vmatprep.subr.bf16.mxu0 %v18681_v33 }
 0xe1e   :  { %11288 = vmatpush3.bf16.msra.mxu0 %v18681_v33 }
 0xe21   :  { %11254 = vmatmul.mubr.msk.bf16.gmra.mrb[196].mxu0 %vm2363_vm3, %v15175_v53 }
 0xe22   :  { %11257 = vmatprep.mubr.msk.bf16.mxu0 %vm2363_vm3, %v15179_v13 }
 0xe29   :  { %11258 = vmatmul.mubr.msk.bf16.gmra.mrb[200].mxu0 %vm2363_vm3, %v15207_v34 }
 0xe2a   :  { %11261 = vmatprep.mubr.msk.bf16.mxu0 %vm2363_vm3, %v18642_v11 }
 0xe31   :  { %11262 = vmatmul.mubr.msk.bf16.gmra.mrb[204].mxu0 %vm2363_vm3, %v18650_v24 }
 0xe32   :  { %11289 = vmatprep.mubr.msk.bf16.mxu0 %vm2363_vm3, %v15112_v60 }
 0xe39   :  { %11290 = vmatmul.mubr.msk.bf16.vlgmr.msra.gmra.mrb[208].mxu0 %vm2363_vm3, %v15140_v26 }
 0xe3a   :  { %11293 = vmatprep.mubr.msk.bf16.mxu0 %vm2363_vm3, %v15144_v23 }
 0xe41   :  { %11294 = vmatmul.mubr.msk.bf16.gmra.mrb[212].mxu0 %vm2363_vm3, %v15175_v53 }
 0xe42   :  { %11297 = vmatprep.mubr.msk.bf16.mxu0 %vm2363_vm3, %v15179_v13 }
 0xe49   :  { %11298 = vmatmul.mubr.msk.bf16.gmra.mrb[216].mxu0 %vm2363_vm3, %v15207_v34 }
 0xe4a   :  { %11301 = vmatprep.mubr.msk.bf16.mxu0 %vm2363_vm3, %v18642_v11 }
 0xe51   :  { %11302 = vmatmul.mubr.msk.bf16.gmra.mrb[220].mxu0 %vm2363_vm3, %v18650_v24 }
 0xecc   :  { %v15855_v60 = vpop.f32.mrb[176].mxu0 }
 0xecd   :  { %v15857_v26 = vpop.f32.mrb[177].mxu0 }
 0xece   :  { %v15859_v23 = vpop.f32.mrb[178].mxu0 }
 0xecf   :  { %v15863_v32 = vpop.f32.mrb[179].mxu0 }
 0xed4   :  { %v15867_v13 = vpop.f32.mrb[180].mxu0 }
 0xed5   :  { %v15869_v11 = vpop.f32.mrb[181].mxu0 }
 0xed6   :  { %v15871_v21 = vpop.f32.mrb[182].mxu0 }
 0xed7   :  { %v15875_v18 = vpop.f32.mrb[183].mxu0 }
 0xedc   :  { %v15879_v45 = vpop.f32.mrb[184].mxu0 }
 0xedd   :  { %v15881_v15 = vpop.f32.mrb[185].mxu0 }
 0xede   :  { %v15883_v63 = vpop.f32.mrb[186].mxu0 }
 0xedf   :  { %v15887_v22 = vpop.f32.mrb[187].mxu0 }
 0xee4   :  { %v15891_v29 = vpop.f32.mrb[188].mxu0 }
 0xee5   :  { %18682 = vst [vmem:[#allocation49_spill] sm:$0xff] %v15891_v29  ;;  %v15893_v14 = vpop.f32.mrb[189].mxu0 }
 0xee6   :  { %v15895_v50 = vpop.f32.mrb[190].mxu0 }
 0xee7   :  { %v15899_v40 = vpop.f32.mrb[191].mxu0 }
 0xeec   :  { %v11251_v7 = vpop.f32.mrb[192].mxu0 }
 0xeed   :  { %v5811_v16 = vpop.f32.mrb[193].mxu0  ;;  %v5820_v31 = vadd.f32 %v11251_v7, %v18683_v48 }
 0xeee   :  { %v11252_v49 = vpop.f32.mrb[194].mxu0  ;;  %v5812_v46 = vadd.f32 %v5811_v16, %v18683_v48 }
 0xeef   :  { %v5823_v56 = vadd.f32 %v11252_v49, %v18683_v48  ;;  %v5814_v51 = vpop.f32.mrb[195].mxu0 }
 0xef0   :  { %v5815_v2 = vadd.f32 %v5814_v51, %v18683_v48 }
 0xef1   :  { %v6069_v42 = vpack.c.bf16 %v5823_v56, %v5820_v31 }
 0xef2   :  { %v6068_v9 = vpack.c.bf16 %v5815_v2, %v5812_v46 }
 0xef4   :  { %v11255_v59 = vpop.f32.mrb[196].mxu0  ;;  %11321 = vmatprep.mubr.msk.bf16.mxu1 %vm50_vm0, %v6068_v9 }
 0xef5   :  { %v5827_v41 = vpop.f32.mrb[197].mxu0  ;;  %11322 = vmatmul.mubr.msk.bf16.vlgmr.msra.gmra.mrb[208].mxu1 %vm50_vm0, %v6069_v42  ;;  %v5836_v36 = vadd.f32 %v11255_v59, %v18683_v48 }
 0xef6   :  { %v11256_v30 = vpop.f32.mrb[198].mxu0  ;;  %v5828_v35 = vadd.f32 %v5827_v41, %v18683_v48 }
 0xef7   :  { %v5839_v52 = vadd.f32 %v11256_v30, %v18683_v48  ;;  %v5830_v54 = vpop.f32.mrb[199].mxu0 }
 0xef8   :  { %v5831_v4 = vadd.f32 %v5830_v54, %v18683_v48 }
 0xef9   :  { %v6071_v8 = vpack.c.bf16 %v5839_v52, %v5836_v36 }
 0xefa   :  { %v6070_v20 = vpack.c.bf16 %v5831_v4, %v5828_v35 }
 0xefc   :  { %v11259_v33 = vpop.f32.mrb[200].mxu0  ;;  %11325 = vmatprep.mubr.msk.bf16.mxu1 %vm50_vm0, %v6070_v20 }
 0xefd   :  { %v5843_v7 = vpop.f32.mrb[201].mxu0  ;;  %11326 = vmatmul.mubr.msk.bf16.gmra.mrb[212].mxu1 %vm50_vm0, %v6071_v8  ;;  %v5852_v49 = vadd.f32 %v11259_v33, %v18683_v48 }
 0xefe   :  { %v11260_v16 = vpop.f32.mrb[202].mxu0  ;;  %v5844_v51 = vadd.f32 %v5843_v7, %v18683_v48 }
 0xeff   :  { %v5855_v31 = vadd.f32 %v11260_v16, %v18683_v48  ;;  %v5846_v56 = vpop.f32.mrb[203].mxu0 }
 0xf00   :  { %v5847_v46 = vadd.f32 %v5846_v56, %v18683_v48 }
 0xf01   :  { %v6073_v2 = vpack.c.bf16 %v5855_v31, %v5852_v49 }
 0xf02   :  { %v6072_v42 = vpack.c.bf16 %v5847_v46, %v5844_v51 }
 0xf04   :  { %v11263_v9 = vpop.f32.mrb[204].mxu0  ;;  %11329 = vmatprep.mubr.msk.bf16.mxu1 %vm50_vm0, %v6072_v42 }
 0xf05   :  { %v5859_v59 = vpop.f32.mrb[205].mxu0  ;;  %11330 = vmatmul.mubr.msk.bf16.gmra.mrb[216].mxu1 %vm50_vm0, %v6073_v2  ;;  %v5868_v30 = vadd.f32 %v11263_v9, %v18683_v48 }
 0xf06   :  { %v11264_v41 = vpop.f32.mrb[206].mxu0  ;;  %v5860_v54 = vadd.f32 %v5859_v59, %v18683_v48 }
 0xf07   :  { %v5871_v36 = vadd.f32 %v11264_v41, %v18683_v48  ;;  %v5862_v52 = vpop.f32.mrb[207].mxu0 }
 0xf08   :  { %v5863_v35 = vadd.f32 %v5862_v52, %v18683_v48 }
 0xf09   :  { %v6075_v4 = vpack.c.bf16 %v5871_v36, %v5868_v30 }
 0xf0a   :  { %v6074_v8 = vpack.c.bf16 %v5863_v35, %v5860_v54 }
 0xf0c   :  { %v11291_v20 = vpop.f32.mrb[208].mxu0  ;;  %11333 = vmatprep.mubr.msk.bf16.mxu1 %vm50_vm0, %v6074_v8 }
 0xf0d   :  { %v6005_v33 = vpop.f32.mrb[209].mxu0  ;;  %11334 = vmatmul.mubr.msk.bf16.gmra.mrb[220].mxu1 %vm50_vm0, %v6075_v4  ;;  %v6014_v16 = vadd.f32 %v11291_v20, %v15451_v43 }
 0xf0e   :  { %v11292_v7 = vpop.f32.mrb[210].mxu0  ;;  %v6006_v56 = vadd.f32 %v6005_v33, %v15451_v43 }
 0xf0f   :  { %v6017_v49 = vadd.f32 %v11292_v7, %v15451_v43  ;;  %v6008_v31 = vpop.f32.mrb[211].mxu0 }
 0xf10   :  { %v6009_v51 = vadd.f32 %v6008_v31, %v15451_v43 }
 0xf11   :  { %v6398_v46 = vpack.c.bf16 %v6017_v49, %v6014_v16 }
 0xf12   :  { %v6397_v48 = vpack.c.bf16 %v6009_v51, %v6006_v56 }
 0xf14   :  { %v11295_v2 = vpop.f32.mrb[212].mxu0  ;;  %11337 = vmatprep.subr.bf16.mxu0 %v6397_v48 }
 0xf15   :  { %v6021_v42 = vpop.f32.mrb[213].mxu0  ;;  %11338 = vmatpush3.bf16.msra.mxu0 %v6397_v48  ;;  %v6030_v59 = vadd.f32 %v11295_v2, %v15451_v43 }
 0xf16   :  { %v11296_v9 = vpop.f32.mrb[214].mxu0  ;;  %11339 = vmatprep.subr.bf16.mxu0 %v6398_v46  ;;  %v6022_v36 = vadd.f32 %v6021_v42, %v15451_v43 }
 0xf17   :  { %v6033_v41 = vadd.f32 %v11296_v9, %v15451_v43  ;;  %v6024_v30 = vpop.f32.mrb[215].mxu0 }
 0xf18   :  { %v6025_v52 = vadd.f32 %v6024_v30, %v15451_v43 }
 0xf19   :  { %v6400_v54 = vpack.c.bf16 %v6033_v41, %v6030_v59  ;;  %11340 = vmatpush3.bf16.msra.mxu0 %v6398_v46 }
 0xf1a   :  { %v6399_v35 = vpack.c.bf16 %v6025_v52, %v6022_v36 }
 0xf1c   :  { %v11299_v4 = vpop.f32.mrb[216].mxu0  ;;  %11341 = vmatprep.subr.bf16.mxu0 %v6399_v35 }
 0xf1d   :  { %v6037_v8 = vpop.f32.mrb[217].mxu0  ;;  %11342 = vmatpush3.bf16.msra.mxu0 %v6399_v35  ;;  %v6046_v33 = vadd.f32 %v11299_v4, %v15451_v43 }
 0xf1e   :  { %v11300_v20 = vpop.f32.mrb[218].mxu0  ;;  %11343 = vmatprep.subr.bf16.mxu0 %v6400_v54  ;;  %v6038_v49 = vadd.f32 %v6037_v8, %v15451_v43 }
 0xf1f   :  { %v6049_v7 = vadd.f32 %v11300_v20, %v15451_v43  ;;  %v6040_v16 = vpop.f32.mrb[219].mxu0 }
 0xf20   :  { %v6041_v31 = vadd.f32 %v6040_v16, %v15451_v43 }
 0xf21   :  { %v6402_v56 = vpack.c.bf16 %v6049_v7, %v6046_v33  ;;  %11344 = vmatpush3.bf16.msra.mxu0 %v6400_v54 }
 0xf22   :  { %v6401_v51 = vpack.c.bf16 %v6041_v31, %v6038_v49 }
 0xf24   :  { %v11303_v46 = vpop.f32.mrb[220].mxu0  ;;  %11345 = vmatprep.subr.bf16.mxu0 %v6401_v51 }
 0xf25   :  { %v6053_v48 = vpop.f32.mrb[221].mxu0  ;;  %11346 = vmatpush3.bf16.msra.mxu0 %v6401_v51  ;;  %v6062_v42 = vadd.f32 %v11303_v46, %v15451_v43 }
 0xf26   :  { %v11304_v2 = vpop.f32.mrb[222].mxu0  ;;  %11347 = vmatprep.subr.bf16.mxu0 %v6402_v56  ;;  %v6054_v41 = vadd.f32 %v6053_v48, %v15451_v43 }
 0xf27   :  { %v6065_v9 = vadd.f32 %v11304_v2, %v15451_v43  ;;  %v6056_v59 = vpop.f32.mrb[223].mxu0 }
 0xf28   :  { %v6057_v30 = vadd.f32 %v6056_v59, %v15451_v43 }
 0xf29   :  { %v6404_v36 = vpack.c.bf16 %v6065_v9, %v6062_v42  ;;  %11348 = vmatpush3.bf16.msra.mxu0 %v6402_v56 }
 0xf2a   :  { %v6403_v52 = vpack.c.bf16 %v6057_v30, %v6054_v41 }
 0xf2c   :  { %11349 = vmatprep.subr.bf16.mxu0 %v6403_v52 }
 0xf2d   :  { %11350 = vmatpush3.bf16.msra.mxu0 %v6403_v52 }
 0xf2e   :  { %11351 = vmatprep.subr.bf16.mxu0 %v6404_v36 }
 0xf31   :  { %11352 = vmatpush3.bf16.msra.mxu0 %v6404_v36 }
 0xf32   :  { %11369 = vmatprep.subr.bf16.mxu0 %v15621_v62 }
 0xfc8   :  { %v11323_v54 = vpop.f32.mrb[208].mxu1 }
 0xfc9   :  { %v6166_v35 = vpop.f32.mrb[209].mxu1  ;;  %v6231_v7 = vmul.f32 0.25, %v11323_v54 }
 0xfca   :  { %v6229_v4 = vmul.f32 0.25, %v6166_v35  ;;  %v11324_v8 = vpop.f32.mrb[210].mxu1 }
 0xfcb   :  { %v6169_v20 = vpop.f32.mrb[211].mxu1  ;;  %v6232_v16 = vmul.f32 0.25, %v11324_v8 }
 0xfcc   :  { %v6230_v33 = vmul.f32 0.25, %v6169_v20  ;;  %6245 = vmax.xlane.f32.xlu1 %v6229_v4 }
 0xfce   :  { %6247 = vmax.xlane.f32.xlu0 %v6230_v33 }
 0xfd0   :  { %6249 = vmax.xlane.f32.xlu1 %v6231_v7  ;;  %v11327_v43 = vpop.f32.mrb[212].mxu1 }
 0xfd1   :  { %v6182_v49 = vpop.f32.mrb[213].mxu1  ;;  %v6235_v62 = vmul.f32 0.25, %v11327_v43 }
 0xfd2   :  { %v6233_v31 = vmul.f32 0.25, %v6182_v49  ;;  %6251 = vmax.xlane.f32.xlu0 %v6232_v16  ;;  %v11328_v56 = vpop.f32.mrb[214].mxu1 }
 0xfd3   :  { %v6185_v51 = vpop.f32.mrb[215].mxu1  ;;  %v6236_v48 = vmul.f32 0.25, %v11328_v56 }
 0xfd4   :  { %v6234_v46 = vmul.f32 0.25, %v6185_v51  ;;  %6253 = vmax.xlane.f32.xlu1 %v6233_v31 }
 0xfd6   :  { %6255 = vmax.xlane.f32.xlu0 %v6234_v46 }
 0xfd8   :  { %6257 = vmax.xlane.f32.xlu1 %v6235_v62  ;;  %v11331_v2 = vpop.f32.mrb[216].mxu1 }
 0xfd9   :  { %v6198_v42 = vpop.f32.mrb[217].mxu1  ;;  %v15949_v36 = vmul.f32 0.25, %v11331_v2 }
 0xfda   :  { %v15944_v9 = vmul.f32 0.25, %v6198_v42  ;;  %6259 = vmax.xlane.f32.xlu0 %v6236_v48  ;;  %v11332_v59 = vpop.f32.mrb[218].mxu1 }
 0xfdb   :  { %v6201_v41 = vpop.f32.mrb[219].mxu1  ;;  %v15952_v52 = vmul.f32 0.25, %v11332_v59 }
 0xfdc   :  { %v15946_v30 = vmul.f32 0.25, %v6201_v41  ;;  %6261 = vmax.xlane.f32.xlu1 %v15944_v9 }
 0xfde   :  { %6263 = vmax.xlane.f32.xlu0 %v15946_v30 }
 0xfe0   :  { %6265 = vmax.xlane.f32.xlu1 %v15949_v36  ;;  %v11335_v54 = vpop.f32.mrb[220].mxu1 }
 0xfe1   :  { %v6214_v35 = vpop.f32.mrb[221].mxu1  ;;  %v15961_v56 = vmul.f32 0.25, %v11335_v54 }
 0xfe2   :  { %v15955_v8 = vmul.f32 0.25, %v6214_v35  ;;  %6267 = vmax.xlane.f32.xlu0 %v15952_v52  ;;  %v11336_v20 = vpop.f32.mrb[222].mxu1 }
 0xfe3   :  { %v6217_v43 = vpop.f32.mrb[223].mxu1  ;;  %v15964_v51 = vmul.f32 0.25, %v11336_v20 }
 0xfe4   :  { %v15958_v49 = vmul.f32 0.25, %v6217_v43  ;;  %6269 = vmax.xlane.f32.xlu1 %v15955_v8 }
 0xfe6   :  { %6271 = vmax.xlane.f32.xlu0 %v15958_v49 }
 0xfe8   :  { %6273 = vmax.xlane.f32.xlu1 %v15961_v56 }
 0xfea   :  { %6275 = vmax.xlane.f32.xlu0 %v15964_v51 }
0x1059   :  { %v6246_v2 = vpop.xlane.xlu1 %6245 }
0x105a   :  { %v6277_v42 = vsub.f32 %v6229_v4, %v6246_v2 }
0x105b   :  { %v6248_v59 = vpop.xlane.xlu0 %6247 }
0x105c   :  { %v6293_v41 = vmul.f32 1.442695, %v6277_v42  ;;  %v6278_v35 = vsub.f32 %v6230_v33, %v6248_v59 }
0x105d   :  { %v6250_v19 = vpop.xlane.xlu1 %6249 }
0x105e   :  { %12135 = vpow2.f32 %v6293_v41  ;;  %v6295_v43 = vmul.f32 1.442695, %v6278_v35  ;;  %v6279_v37 = vsub.f32 %v6231_v7, %v6250_v19 }
0x105f   :  { %v6252_v58 = vpop.xlane.xlu0 %6251 }
0x1060   :  { %12137 = vpow2.f32 %v6295_v43  ;;  %v6297_v54 = vmul.f32 1.442695, %v6279_v37  ;;  %v6280_v47 = vsub.f32 %v6232_v16, %v6252_v58 }
0x1061   :  { %v6254_v24 = vpop.xlane.xlu1 %6253 }
0x1062   :  { %12139 = vpow2.f32 %v6297_v54  ;;  %v6299_v20 = vmul.f32 1.442695, %v6280_v47  ;;  %v6281_v5 = vsub.f32 %v6233_v31, %v6254_v24 }
0x1063   :  { %v6256_v53 = vpop.xlane.xlu0 %6255 }
0x1064   :  { %12141 = vpow2.f32 %v6299_v20  ;;  %v6301_v34 = vmul.f32 1.442695, %v6281_v5  ;;  %v6282_v29 = vsub.f32 %v6234_v46, %v6256_v53 }
0x1065   :  { %v6258_v4 = vpop.xlane.xlu1 %6257 }
0x1066   :  { %12143 = vpow2.f32 %v6301_v34  ;;  %v6303_v2 = vmul.f32 1.442695, %v6282_v29  ;;  %v6283_v33 = vsub.f32 %v6235_v62, %v6258_v4 }
0x1067   :  { %v6260_v42 = vpop.xlane.xlu0 %6259 }
0x1068   :  { %v15968_v59 = vpop.eup %12135  ;;  %12145 = vpow2.f32 %v6303_v2  ;;  %v6305_v19 = vmul.f32 1.442695, %v6283_v33  ;;  %v6284_v7 = vsub.f32 %v6236_v48, %v6260_v42 }
0x1069   :  { %v6262_v37 = vpop.xlane.xlu1 %6261  ;;  %6325 = vadd.xlane.f32.xlu1 %v15968_v59 }
0x106a   :  { %v15971_v58 = vpop.eup %12137  ;;  %12147 = vpow2.f32 %v6305_v19  ;;  %v6307_v24 = vmul.f32 1.442695, %v6284_v7  ;;  %v6285_v5 = vsub.f32 %v15944_v9, %v6262_v37 }
0x106b   :  { %v6264_v53 = vpop.xlane.xlu0 %6263  ;;  %6327 = vadd.xlane.f32.xlu0 %v15971_v58 }
0x106c   :  { %v15975_v34 = vpop.eup %12139  ;;  %12149 = vpow2.f32 %v6307_v24  ;;  %v6309_v47 = vmul.f32 1.442695, %v6285_v5  ;;  %v6286_v29 = vsub.f32 %v15946_v30, %v6264_v53 }
0x106d   :  { %v6266_v16 = vpop.xlane.xlu1 %6265  ;;  %6329 = vadd.xlane.f32.xlu1 %v15975_v34 }
0x106e   :  { %v15979_v31 = vpop.eup %12141  ;;  %12151 = vpow2.f32 %v6309_v47  ;;  %v6311_v46 = vmul.f32 1.442695, %v6286_v29  ;;  %v6287_v62 = vsub.f32 %v15949_v36, %v6266_v16 }
0x106f   :  { %v6268_v48 = vpop.xlane.xlu0 %6267  ;;  %6331 = vadd.xlane.f32.xlu0 %v15979_v31 }
0x1070   :  { %v15983_v9 = vpop.eup %12143  ;;  %12153 = vpow2.f32 %v6311_v46  ;;  %v6313_v41 = vmul.f32 1.442695, %v6287_v62  ;;  %v6288_v35 = vsub.f32 %v15952_v52, %v6268_v48 }
0x1071   :  { %6333 = vadd.xlane.f32.xlu1 %v15983_v9  ;;  %v6270_v30 = vpop.xlane.xlu1 %6269 }
0x1072   :  { %v15987_v43 = vpop.eup %12145  ;;  %12155 = vpow2.f32 %v6313_v41  ;;  %v6315_v54 = vmul.f32 1.442695, %v6288_v35  ;;  %v6289_v20 = vsub.f32 %v15955_v8, %v6270_v30  ;;  %v18684_v35 = vld [vmem:[#allocation5_spill] sm:$0xff] }
0x1073   :  { %6335 = vadd.xlane.f32.xlu0 %v15987_v43  ;;  %v6272_v36 = vpop.xlane.xlu0 %6271 }
0x1074   :  { %v15991_v4 = vpop.eup %12147  ;;  %12157 = vpow2.f32 %v6315_v54  ;;  %v6317_v2 = vmul.f32 1.442695, %v6289_v20  ;;  %v6290_v33 = vsub.f32 %v15958_v49, %v6272_v36  ;;  %v18685_v20 = vld [vmem:[#allocation10_spill] sm:$0xff] }
0x1075   :  { %6337 = vadd.xlane.f32.xlu1 %v15991_v4  ;;  %v6274_v52 = vpop.xlane.xlu1 %6273 }
0x1076   :  { %v15995_v42 = vpop.eup %12149  ;;  %12159 = vpow2.f32 %v6317_v2  ;;  %v6319_v19 = vmul.f32 1.442695, %v6290_v33  ;;  %v6291_v7 = vsub.f32 %v15961_v56, %v6274_v52  ;;  %v16011_v56 = vld [vmem:[%s18394_s2 + $0x8] ss:$0 sm:$0xff]  ;;  %v18687_v33 = vld [vmem:[#allocation8_spill] sm:$0xff] }
0x1077   :  { %6339 = vadd.xlane.f32.xlu0 %v15995_v42  ;;  %v6276_v8 = vpop.xlane.xlu0 %6275  ;;  %v6757_v16 = vadd.f32 %v16011_v56, %v15768_v55  ;;  %v6758_v62 = vadd.f32 %v16011_v56, %v15772_v3  ;;  %v6759_v41 = vadd.f32 %v15766_v38, %v16011_v56  ;;  %v6760_v54 = vadd.f32 %v15770_v61, %v16011_v56  ;;  %v18686_v3 = vld [vmem:[#allocation7_spill] sm:$0xff] }
0x1078   :  { %v15999_v37 = vpop.eup %12151  ;;  %12161 = vpow2.f32 %v6319_v19  ;;  %v6321_v24 = vmul.f32 1.442695, %v6291_v7  ;;  %v6292_v5 = vsub.f32 %v15964_v51, %v6276_v8 }
0x1079   :  { %6341 = vadd.xlane.f32.xlu1 %v15999_v37  ;;  %v16032_v30 = vadd.f32 %v6757_v16, %v18684_v35  ;;  %v16040_v36 = vadd.f32 %v6758_v62, %v18685_v20  ;;  %v16044_v2 = vadd.f32 %v6759_v41, %v18686_v3  ;;  %v16049_v52 = vadd.f32 %v6760_v54, %v18687_v33  ;;  %v18688_v20 = vld [vmem:[#allocation9_spill] sm:$0xff]  ;;  %v18689_v33 = vld [vmem:[#allocation14_spill] sm:$0xff] }
0x107a   :  { %v16003_v49 = vpop.eup %12153  ;;  %12163 = vpow2.f32 %v6321_v24  ;;  %v6323_v53 = vmul.f32 1.442695, %v6292_v5  ;;  %v6761_v5 = vadd.f32 %v16011_v56, %v15776_v0  ;;  %v6762_v62 = vadd.f32 %v16011_v56, %v15780_v17 }
0x107b   :  { %6343 = vadd.xlane.f32.xlu0 %v16003_v49  ;;  %v6823_v38 = vsel %vm2363_vm3, %v16032_v30, 0.0  ;;  %v6826_v19 = vsel %vm2363_vm3, %v16040_v36, 0.0  ;;  %v6829_v61 = vsel %vm2363_vm3, %v16044_v2, 0.0  ;;  %v6951_v7 = vmul.f32 %v16032_v30, %v16032_v30 }
0x107c   :  { %v16006_v47 = vpop.eup %12155  ;;  %12165 = vpow2.f32 %v6323_v53  ;;  %v6832_v8 = vsel %vm2363_vm3, %v16049_v52, 0.0  ;;  %v6952_v24 = vmul.f32 %v16040_v36, %v16040_v36  ;;  %v6953_v16 = vmul.f32 %v16044_v2, %v16044_v2 }
0x107d   :  { %6345 = vadd.xlane.f32.xlu1 %v16006_v47  ;;  %v6983_v53 = vsel %vm2363_vm3, %v6951_v7, 0.0  ;;  %v6954_v35 = vmul.f32 %v16049_v52, %v16049_v52  ;;  %v6763_v54 = vadd.f32 %v15774_v27, %v16011_v56  ;;  %v16074_v0 = vadd.f32 %v6761_v5, %v18688_v20 }
0x107e   :  { %v16014_v29 = vpop.eup %12157  ;;  %v6986_v41 = vsel %vm2363_vm3, %v6952_v24, 0.0  ;;  %v6989_v3 = vsel %vm2363_vm3, %v6953_v16, 0.0  ;;  %v16080_v17 = vadd.f32 %v6762_v62, %v18689_v33  ;;  %v6766_v20 = vadd.f32 %v16011_v56, %v15788_v6 }
0x107f   :  { %6347 = vadd.xlane.f32.xlu0 %v16014_v29  ;;  %v6835_v27 = vsel %vm2363_vm3, %v16074_v0, 0.0  ;;  %v6767_v33 = vadd.f32 %v15782_v57, %v16011_v56 }
0x1080   :  { %v16017_v51 = vpop.eup %12159  ;;  %v6838_v5 = vsel %vm2363_vm3, %v16080_v17, 0.0  ;;  %v6956_v62 = vmul.f32 %v16080_v17, %v16080_v17 }
0x1081   :  { %6349 = vadd.xlane.f32.xlu1 %v16017_v51 }
0x1082   :  { %v16022_v46 = vpop.eup %12161 }
0x1083   :  { %6351 = vadd.xlane.f32.xlu0 %v16022_v46 }
0x1084   :  { %v16027_v48 = vpop.eup %12163 }
0x1085   :  { %6353 = vadd.xlane.f32.xlu1 %v16027_v48 }
0x1086   :  { %v16035_v55 = vpop.eup %12165 }
0x1087   :  { %6355 = vadd.xlane.f32.xlu0 %v16035_v55 }
0x1089   :  { %6824 = vadd.xlane.f32.xlu1 %v6823_v38  ;;  %v6764_v38 = vadd.f32 %v15778_v1, %v16011_v56 }
0x108b   :  { %6827 = vadd.xlane.f32.xlu0 %v6826_v19  ;;  %v6992_v19 = vsel %vm2363_vm3, %v6954_v35, 0.0 }
0x108d   :  { %6830 = vadd.xlane.f32.xlu1 %v6829_v61  ;;  %v18690_v61 = vld [vmem:[#allocation13_spill] sm:$0xff] }
0x108e   :  { %v16084_v7 = vadd.f32 %v6763_v54, %v18690_v61 }
0x108f   :  { %6833 = vadd.xlane.f32.xlu0 %v6832_v8  ;;  %v18691_v8 = vld [vmem:[#allocation6_spill] sm:$0xff] }
0x1090   :  { %v16089_v24 = vadd.f32 %v6764_v38, %v18691_v8  ;;  %v6841_v1 = vsel %vm2363_vm3, %v16084_v7, 0.0  ;;  %v6957_v54 = vmul.f32 %v16084_v7, %v16084_v7  ;;  %v18693_v8 = vld [vmem:[#allocation15_spill] sm:$0xff] }
0x1091   :  { %6984 = vadd.xlane.f32.xlu1 %v6983_v53  ;;  %v6955_v53 = vmul.f32 %v16074_v0, %v16074_v0  ;;  %v16120_v6 = vadd.f32 %v6766_v20, %v18693_v8  ;;  %v6771_v8 = vadd.f32 %v15790_v28, %v16011_v56 }
0x1092   :  { %v6844_v16 = vsel %vm2363_vm3, %v16089_v24, 0.0  ;;  %v6958_v38 = vmul.f32 %v16089_v24, %v16089_v24  ;;  %v7001_v61 = vsel %vm2363_vm3, %v6957_v54, 0.0 }
0x1093   :  { %6987 = vadd.xlane.f32.xlu0 %v6986_v41  ;;  %v6765_v41 = vadd.f32 %v16011_v56, %v15784_v10  ;;  %v6995_v35 = vsel %vm2363_vm3, %v6955_v53, 0.0  ;;  %v6960_v20 = vmul.f32 %v16120_v6, %v16120_v6 }
0x1095   :  { %6990 = vadd.xlane.f32.xlu1 %v6989_v3  ;;  %v6998_v3 = vsel %vm2363_vm3, %v6956_v62, 0.0 }
0x1097   :  { %6993 = vadd.xlane.f32.xlu0 %v6992_v19  ;;  %v18692_v19 = vld [vmem:[#allocation11_spill] sm:$0xff] }
0x1098   :  { %v16114_v10 = vadd.f32 %v6765_v41, %v18692_v19  ;;  %v6850_v41 = vsel %vm2363_vm3, %v16120_v6, 0.0  ;;  %v6770_v19 = vadd.f32 %v16011_v56, %v15796_v39 }
0x1099   :  { %6836 = vadd.xlane.f32.xlu1 %v6835_v27  ;;  %v6768_v27 = vadd.f32 %v15786_v44, %v16011_v56 }
0x109a   :  { %v6847_v57 = vsel %vm2363_vm3, %v16114_v10, 0.0 }
0x109b   :  { %6839 = vadd.xlane.f32.xlu0 %v6838_v5  ;;  %v7004_v5 = vsel %vm2363_vm3, %v6958_v38, 0.0 }
0x109d   :  { %6842 = vadd.xlane.f32.xlu1 %v6841_v1  ;;  %v18694_v1 = vld [vmem:[#allocation16_spill] sm:$0xff] }
0x109e   :  { %v16124_v53 = vadd.f32 %v6767_v33, %v18694_v1 }
0x109f   :  { %6845 = vadd.xlane.f32.xlu0 %v6844_v16  ;;  %v18695_v16 = vld [vmem:[#allocation12_spill] sm:$0xff] }
0x10a0   :  { %v16129_v62 = vadd.f32 %v6768_v27, %v18695_v16  ;;  %v6853_v44 = vsel %vm2363_vm3, %v16124_v53, 0.0  ;;  %v6961_v33 = vmul.f32 %v16124_v53, %v16124_v53  ;;  %v18697_v16 = vld [vmem:[#allocation19_spill] sm:$0xff] }
0x10a1   :  { %6996 = vadd.xlane.f32.xlu1 %v6995_v35  ;;  %v6959_v35 = vmul.f32 %v16114_v10, %v16114_v10  ;;  %v16160_v39 = vadd.f32 %v6770_v19, %v18697_v16 }
0x10a2   :  { %v6856_v54 = vsel %vm2363_vm3, %v16129_v62, 0.0  ;;  %v6962_v27 = vmul.f32 %v16129_v62, %v16129_v62  ;;  %v7013_v1 = vsel %vm2363_vm3, %v6961_v33, 0.0  ;;  %v11676_v33 = vld [vmem:[%s18393_s1 + $0x70] sm:$0xff]  }
0x10a3   :  { %6999 = vadd.xlane.f32.xlu0 %v6998_v3  ;;  %v6769_v3 = vadd.f32 %v16011_v56, %v15792_v12  ;;  %v7007_v38 = vsel %vm2363_vm3, %v6959_v35, 0.0 }
0x10a5   :  { %7002 = vadd.xlane.f32.xlu1 %v7001_v61  ;;  %v7010_v61 = vsel %vm2363_vm3, %v6960_v20, 0.0 }
0x10a7   :  { %7005 = vadd.xlane.f32.xlu0 %v7004_v5  ;;  %v18696_v5 = vld [vmem:[#allocation18_spill] sm:$0xff] }
0x10a8   :  { %v16154_v12 = vadd.f32 %v6769_v3, %v18696_v5  ;;  %v6862_v3 = vsel %vm2363_vm3, %v16160_v39, 0.0 }
0x10a9   :  { %6848 = vadd.xlane.f32.xlu1 %v6847_v57  ;;  %v6772_v57 = vadd.f32 %v15794_v25, %v16011_v56  ;;  %v11675_v25 = vld [vmem:[%s18393_s1 + $0x68] sm:$0xff]  }
0x10aa   :  { %v6859_v28 = vsel %vm2363_vm3, %v16154_v12, 0.0  ;;  %11405 = vmatprep.subr.bf16.mxu1 %v11675_v25 }
0x10ab   :  { %6851 = vadd.xlane.f32.xlu0 %v6850_v41  ;;  %v7016_v41 = vsel %vm2363_vm3, %v6962_v27, 0.0  ;;  %11406 = vmatpush3.bf16.msra.mxu1 %v11675_v25 }
0x10ac   :  { %11407 = vmatprep.subr.bf16.mxu1 %v11676_v33 }
0x10ad   :  { %6854 = vadd.xlane.f32.xlu1 %v6853_v44  ;;  %v18698_v44 = vld [vmem:[#allocation20_spill] sm:$0xff] }
0x10ae   :  { %v16164_v35 = vadd.f32 %v6771_v8, %v18698_v44 }
0x10af   :  { %6857 = vadd.xlane.f32.xlu0 %v6856_v54  ;;  %v18699_v54 = vld [vmem:[#allocation17_spill] sm:$0xff]  ;;  %11408 = vmatpush3.bf16.msra.mxu1 %v11676_v33 }
0x10b0   :  { %v16169_v20 = vadd.f32 %v6772_v57, %v18699_v54  ;;  %v6865_v56 = vsel %vm2363_vm3, %v16164_v35, 0.0  ;;  %v6965_v8 = vmul.f32 %v16164_v35, %v16164_v35 }
0x10b1   :  { %7008 = vadd.xlane.f32.xlu1 %v7007_v38  ;;  %v6963_v38 = vmul.f32 %v16154_v12, %v16154_v12 }
0x10b2   :  { %v6868_v19 = vsel %vm2363_vm3, %v16169_v20, 0.0  ;;  %v7025_v57 = vsel %vm2363_vm3, %v6965_v8, 0.0 }
0x10b3   :  { %7011 = vadd.xlane.f32.xlu0 %v7010_v61  ;;  %v6964_v61 = vmul.f32 %v16160_v39, %v16160_v39  ;;  %v7019_v27 = vsel %vm2363_vm3, %v6963_v38, 0.0 }
0x10b5   :  { %7014 = vadd.xlane.f32.xlu1 %v7013_v1  ;;  %v7022_v5 = vsel %vm2363_vm3, %v6964_v61, 0.0  ;;  %v6966_v1 = vmul.f32 %v16169_v20, %v16169_v20 }
0x10b7   :  { %7017 = vadd.xlane.f32.xlu0 %v7016_v41  ;;  %v7028_v16 = vsel %vm2363_vm3, %v6966_v1, 0.0 }
0x10b9   :  { %6860 = vadd.xlane.f32.xlu1 %v6859_v28 }
0x10bb   :  { %6863 = vadd.xlane.f32.xlu0 %v6862_v3 }
0x10bd   :  { %6866 = vadd.xlane.f32.xlu1 %v6865_v56 }
0x10bf   :  { %6869 = vadd.xlane.f32.xlu0 %v6868_v19 }
0x10c1   :  { %7020 = vadd.xlane.f32.xlu1 %v7019_v27 }
0x10c3   :  { %7023 = vadd.xlane.f32.xlu0 %v7022_v5 }
0x10c5   :  { %7026 = vadd.xlane.f32.xlu1 %v7025_v57 }
0x10c7   :  { %7029 = vadd.xlane.f32.xlu0 %v7028_v16 }
0x10f6   :  { %v6326_v41 = vpop.xlane.xlu1 %6325 }
0x10f7   :  { %12167 = vrcp.f32 %v6326_v41 }
0x10f8   :  { %v6328_v44 = vpop.xlane.xlu0 %6327 }
0x10f9   :  { %12169 = vrcp.f32 %v6328_v44 }
0x10fa   :  { %v6330_v28 = vpop.xlane.xlu1 %6329 }
0x10fb   :  { %12171 = vrcp.f32 %v6330_v28 }
0x10fc   :  { %v6332_v54 = vpop.xlane.xlu0 %6331 }
0x10fd   :  { %12173 = vrcp.f32 %v6332_v54 }
0x10fe   :  { %v6334_v3 = vpop.xlane.xlu1 %6333 }
0x10ff   :  { %12175 = vrcp.f32 %v6334_v3 }
0x1100   :  { %v6336_v25 = vpop.xlane.xlu0 %6335 }
0x1101   :  { %v12168_v56 = vpop.eup %12167  ;;  %12177 = vrcp.f32 %v6336_v25 }
0x1102   :  { %v6338_v38 = vpop.xlane.xlu1 %6337  ;;  %v6373_v61 = vmul.f32 %v12168_v56, %v15968_v59 }
0x1103   :  { %v12170_v33 = vpop.eup %12169  ;;  %12179 = vrcp.f32 %v6338_v38 }
0x1104   :  { %v6340_v19 = vpop.xlane.xlu0 %6339  ;;  %v6374_v27 = vmul.f32 %v12170_v33, %v15971_v58 }
0x1105   :  { %v12172_v8 = vpop.eup %12171  ;;  %12181 = vrcp.f32 %v6340_v19  ;;  %v16207_v19 = vld [vmem:[%s18393_s1 + $0x58] sm:$0xff]  }
0x1106   :  { %v6342_v5 = vpop.xlane.xlu1 %6341  ;;  %v6389_v1 = vpack.c.bf16 %v6374_v27, %v6373_v61  ;;  %v6375_v16 = vmul.f32 %v12172_v8, %v15975_v34  ;;  %v12403_v34 = vld [vmem:[%s18393_s1 + $0x60] sm:$0xff]  }
0x1107   :  { %v12174_v57 = vpop.eup %12173  ;;  %12183 = vrcp.f32 %v6342_v5 }
0x1108   :  { %v6376_v41 = vmul.f32 %v12174_v57, %v15979_v31  ;;  %11353 = vmatprep.mubr.bf16.mxu0 %v6389_v1  ;;  %v6344_v44 = vpop.xlane.xlu0 %6343 }
0x1109   :  { %v12176_v28 = vpop.eup %12175  ;;  %12185 = vrcp.f32 %v6344_v44 }
0x110a   :  { %v6346_v54 = vpop.xlane.xlu1 %6345  ;;  %v6390_v3 = vpack.c.bf16 %v6376_v41, %v6375_v16  ;;  %v6377_v58 = vmul.f32 %v12176_v28, %v15983_v9 }
0x110b   :  { %v12178_v25 = vpop.eup %12177  ;;  %12187 = vrcp.f32 %v6346_v54 }
0x110c   :  { %11354 = vmatmul.mubr.bf16.vlgmr.msra.gmra.mrb[224].mxu0 %v6390_v3  ;;  %v6348_v59 = vpop.xlane.xlu0 %6347  ;;  %v6378_v56 = vmul.f32 %v12178_v25, %v15987_v43 }
0x110d   :  { %v12180_v38 = vpop.eup %12179  ;;  %12189 = vrcp.f32 %v6348_v59  ;;  %11370 = vmatpush3.bf16.msra.mxu0 %v12403_v34 }
0x110e   :  { %v6350_v31 = vpop.xlane.xlu1 %6349  ;;  %v6391_v33 = vpack.c.bf16 %v6378_v56, %v6377_v58  ;;  %11387 = vmatprep.subr.bf16.mxu0 %v16207_v19  ;;  %v6379_v43 = vmul.f32 %v12180_v38, %v15991_v4 }
0x110f   :  { %v12182_v61 = vpop.eup %12181  ;;  %12191 = vrcp.f32 %v6350_v31 }
0x1110   :  { %11357 = vmatprep.mubr.bf16.mxu0 %v6391_v33  ;;  %v6352_v9 = vpop.xlane.xlu0 %6351  ;;  %v6380_v27 = vmul.f32 %v12182_v61, %v15995_v42 }
0x1111   :  { %v12184_v8 = vpop.eup %12183  ;;  %12193 = vrcp.f32 %v6352_v9 }
0x1112   :  { %v6354_v5 = vpop.xlane.xlu1 %6353  ;;  %v6392_v1 = vpack.c.bf16 %v6380_v27, %v6379_v43  ;;  %v6381_v41 = vmul.f32 %v12184_v8, %v15999_v37 }
0x1113   :  { %v12186_v57 = vpop.eup %12185  ;;  %12195 = vrcp.f32 %v6354_v5 }
0x1114   :  { %11358 = vmatmul.mubr.bf16.gmra.mrb[228].mxu0 %v6392_v1  ;;  %v6356_v16 = vpop.xlane.xlu0 %6355  ;;  %v6382_v44 = vmul.f32 %v12186_v57, %v16003_v49 }
0x1115   :  { %v12188_v28 = vpop.eup %12187  ;;  %12197 = vrcp.f32 %v6356_v16 }
0x1116   :  { %v6825_v54 = vpop.xlane.xlu1 %6824  ;;  %v6393_v3 = vpack.c.bf16 %v6382_v44, %v6381_v41  ;;  %v6383_v42 = vmul.f32 %v12188_v28, %v16006_v47 }
0x1117   :  { %v12190_v25 = vpop.eup %12189  ;;  %v6919_v31 = vmul.f32 0.03125, %v6825_v54 }
0x1118   :  { %11361 = vmatprep.mubr.bf16.mxu0 %v6393_v3  ;;  %v6828_v4 = vpop.xlane.xlu0 %6827  ;;  %v6384_v59 = vmul.f32 %v12190_v25, %v16014_v29 }
0x1119   :  { %v12192_v58 = vpop.eup %12191  ;;  %v6920_v9 = vmul.f32 0.03125, %v6828_v4  ;;  %v7143_v5 = vmul.f32 %v6919_v31, %v6919_v31 }
0x111a   :  { %v6831_v56 = vpop.xlane.xlu1 %6830  ;;  %v6394_v38 = vpack.c.bf16 %v6384_v59, %v6383_v42  ;;  %v6385_v49 = vmul.f32 %v12192_v58, %v16017_v51 }
0x111b   :  { %v12194_v34 = vpop.eup %12193  ;;  %v6921_v47 = vmul.f32 0.03125, %v6831_v56  ;;  %v7144_v44 = vmul.f32 %v6920_v9, %v6920_v9 }
0x111c   :  { %11362 = vmatmul.mubr.bf16.gmra.mrb[232].mxu0 %v6394_v38  ;;  %v6834_v37 = vpop.xlane.xlu0 %6833  ;;  %v6386_v33 = vmul.f32 %v12194_v34, %v16022_v46 }
0x111d   :  { %v12196_v61 = vpop.eup %12195  ;;  %v16218_v29 = vmul.f32 0.03125, %v6834_v37  ;;  %v7145_v3 = vmul.f32 %v6921_v47, %v6921_v47 }
0x111e   :  { %v6985_v43 = vpop.xlane.xlu1 %6984  ;;  %v6395_v27 = vpack.c.bf16 %v6386_v33, %v6385_v49  ;;  %v6387_v16 = vmul.f32 %v12196_v61, %v16027_v48 }
0x111f   :  { %v12198_v8 = vpop.eup %12197  ;;  %v7079_v1 = vmul.f32 0.03125, %v6985_v43  ;;  %v7146_v59 = vmul.f32 %v16218_v29, %v16218_v29 }
0x1120   :  { %11365 = vmatprep.mubr.bf16.mxu0 %v6395_v27  ;;  %v6988_v57 = vpop.xlane.xlu0 %6987  ;;  %v6388_v41 = vmul.f32 %v12198_v8, %v16035_v55 }
0x1121   :  { %v7175_v51 = vsub.f32 %v7079_v1, %v7143_v5  ;;  %v7080_v28 = vmul.f32 0.03125, %v6988_v57  ;;  %v7111_v5 = vsub.f32 %v16032_v30, %v6919_v31 }
0x1122   :  { %v6991_v46 = vpop.xlane.xlu1 %6990  ;;  %v6396_v54 = vpack.c.bf16 %v6388_v41, %v6387_v16  ;;  %v16232_v16 = vld [vmem:[%s18394_s2 + $0x9] ss:$0 sm:$0xff] }
0x1123   :  { %v7207_v25 = vadd.f32 1e-05, %v7175_v51  ;;  %v7176_v4 = vsub.f32 %v7080_v28, %v7144_v44  ;;  %v7081_v42 = vmul.f32 0.03125, %v6991_v46  ;;  %v7112_v28 = vsub.f32 %v16040_v36, %v6920_v9 }
0x1124   :  { %11366 = vmatmul.mubr.bf16.gmra.mrb[236].mxu0 %v6396_v54  ;;  %v6994_v58 = vpop.xlane.xlu0 %6993 }
0x1125   :  { %12199 = vrsqrt.f32 %v7207_v25  ;;  %v7208_v56 = vadd.f32 1e-05, %v7176_v4  ;;  %v7177_v38 = vsub.f32 %v7081_v42, %v7145_v3  ;;  %v7082_v48 = vmul.f32 0.03125, %v6994_v58 }
0x1126   :  { %v6837_v34 = vpop.xlane.xlu1 %6836  ;;  %v7113_v42 = vsub.f32 %v16044_v2, %v6921_v47 }
0x1127   :  { %12201 = vrsqrt.f32 %v7208_v56  ;;  %v7209_v55 = vadd.f32 1e-05, %v7177_v38  ;;  %v7178_v37 = vsub.f32 %v7082_v48, %v7146_v59  ;;  %v16224_v43 = vmul.f32 0.03125, %v6837_v34 }
0x1128   :  { %v6840_v49 = vpop.xlane.xlu0 %6839 }
0x1129   :  { %12203 = vrsqrt.f32 %v7209_v55  ;;  %v7210_v33 = vadd.f32 1e-05, %v7178_v37  ;;  %v16226_v8 = vmul.f32 0.03125, %v6840_v49  ;;  %v7147_v41 = vmul.f32 %v16224_v43, %v16224_v43  ;;  %v16250_v55 = vld [vmem:[%s18394_s2 + $0xa] ss:$0 sm:$0xff] }
0x112a   :  { %v6843_v61 = vpop.xlane.xlu1 %6842  ;;  %v7114_v37 = vsub.f32 %v16049_v52, %v16218_v29 }
0x112b   :  { %12205 = vrsqrt.f32 %v7210_v33  ;;  %v16236_v44 = vmul.f32 0.03125, %v6843_v61  ;;  %v7148_v31 = vmul.f32 %v16226_v8, %v16226_v8 }
0x112c   :  { %v6846_v27 = vpop.xlane.xlu0 %6845 }
0x112d   :  { %v16239_v46 = vmul.f32 0.03125, %v6846_v27  ;;  %v7149_v36 = vmul.f32 %v16236_v44, %v16236_v44 }
0x112e   :  { %v6997_v1 = vpop.xlane.xlu1 %6996 }
0x112f   :  { %v12200_v57 = vpop.eup %12199  ;;  %v7083_v51 = vmul.f32 0.03125, %v6997_v1  ;;  %v7150_v47 = vmul.f32 %v16239_v46, %v16239_v46 }
0x1130   :  { %v7000_v54 = vpop.xlane.xlu0 %6999  ;;  %v7271_v3 = vmul.f32 %v12200_v57, %v7111_v5 }
0x1131   :  { %v12202_v30 = vpop.eup %12201  ;;  %v7179_v25 = vsub.f32 %v7083_v51, %v7147_v41  ;;  %v7084_v4 = vmul.f32 0.03125, %v7000_v54 }
0x1132   :  { %v7003_v59 = vpop.xlane.xlu1 %7002  ;;  %v7272_v58 = vmul.f32 %v12202_v30, %v7112_v28  ;;  %v7307_v56 = vmul.f32 %v16232_v16, %v7271_v3 }
0x1133   :  { %v12204_v38 = vpop.eup %12203  ;;  %v7211_v9 = vadd.f32 1e-05, %v7179_v25  ;;  %v7180_v48 = vsub.f32 %v7084_v4, %v7148_v31  ;;  %v7085_v34 = vmul.f32 0.03125, %v7003_v59 }
0x1134   :  { %v7273_v2 = vmul.f32 %v12204_v38, %v7113_v42  ;;  %v7006_v49 = vpop.xlane.xlu0 %7005  ;;  %v7308_v33 = vmul.f32 %v16232_v16, %v7272_v58  ;;  %v16259_v28 = vadd.f32 %v16250_v55, %v7307_v56 }
0x1135   :  { %v12206_v61 = vpop.eup %12205  ;;  %12207 = vrsqrt.f32 %v7211_v9  ;;  %v7212_v27 = vadd.f32 1e-05, %v7180_v48  ;;  %v7181_v5 = vsub.f32 %v7085_v34, %v7149_v36  ;;  %v7086_v1 = vmul.f32 0.03125, %v7006_v49 }
0x1136   :  { %v7309_v57 = vmul.f32 %v16232_v16, %v7273_v2  ;;  %v7274_v41 = vmul.f32 %v12206_v61, %v7114_v37  ;;  %v6849_v51 = vpop.xlane.xlu1 %6848  ;;  %v16262_v52 = vadd.f32 %v16250_v55, %v7308_v33  ;;  %v7115_v9 = vsub.f32 %v16074_v0, %v16224_v43 }
0x1137   :  { %12209 = vrsqrt.f32 %v7212_v27  ;;  %v7213_v29 = vadd.f32 1e-05, %v7181_v5  ;;  %v7182_v54 = vsub.f32 %v7086_v1, %v7150_v47  ;;  %v16274_v58 = vmul.f32 0.03125, %v6849_v51 }
0x1138   :  { %v7310_v3 = vmul.f32 %v16232_v16, %v7274_v41  ;;  %v6852_v30 = vpop.xlane.xlu0 %6851  ;;  %v7379_v31 = vpack.c.bf16 %v16262_v52, %v16259_v28  ;;  %v16269_v42 = vadd.f32 %v16250_v55, %v7309_v57  ;;  %v7116_v49 = vsub.f32 %v16080_v17, %v16226_v8 }
0x1139   :  { %12211 = vrsqrt.f32 %v7213_v29  ;;  %v7214_v25 = vadd.f32 1e-05, %v7182_v54  ;;  %v16278_v36 = vmul.f32 0.03125, %v6852_v30  ;;  %v7151_v37 = vmul.f32 %v16274_v58, %v16274_v58 }
0x113a   :  { %v6855_v4 = vpop.xlane.xlu1 %6854  ;;  %11409 = vmatprep.mubr.msk.bf16.mxu1 %vm2363_vm3, %v7379_v31  ;;  %v16272_v59 = vadd.f32 %v16250_v55, %v7310_v3  ;;  %v7117_v57 = vsub.f32 %v16084_v7, %v16236_v44  ;;  %v7118_v31 = vsub.f32 %v16089_v24, %v16239_v46 }
0x113b   :  { %12213 = vrsqrt.f32 %v7214_v25  ;;  %v16285_v2 = vmul.f32 0.03125, %v6855_v4  ;;  %v7152_v0 = vmul.f32 %v16278_v36, %v16278_v36 }
0x113c   :  { %v6858_v56 = vpop.xlane.xlu0 %6857  ;;  %v7380_v38 = vpack.c.bf16 %v16272_v59, %v16269_v42 }
0x113d   :  { %v16289_v33 = vmul.f32 0.03125, %v6858_v56  ;;  %v7153_v17 = vmul.f32 %v16285_v2, %v16285_v2 }
0x113e   :  { %v7009_v48 = vpop.xlane.xlu1 %7008  ;;  %11410 = vmatmul.mubr.msk.bf16.vlgmr.msra.gmra.mrb[224].mxu1 %vm2363_vm3, %v7380_v38 }
0x113f   :  { %v12208_v34 = vpop.eup %12207  ;;  %v7087_v47 = vmul.f32 0.03125, %v7009_v48  ;;  %v7154_v25 = vmul.f32 %v16289_v33, %v16289_v33 }
0x1140   :  { %v7012_v61 = vpop.xlane.xlu0 %7011  ;;  %v7275_v27 = vmul.f32 %v12208_v34, %v7115_v9 }
0x1141   :  { %v12210_v5 = vpop.eup %12209  ;;  %v7183_v43 = vsub.f32 %v7087_v47, %v7151_v37  ;;  %v7088_v1 = vmul.f32 0.03125, %v7012_v61 }
0x1142   :  { %v7015_v41 = vpop.xlane.xlu1 %7014  ;;  %v7276_v51 = vmul.f32 %v12210_v5, %v7116_v49  ;;  %v7311_v29 = vmul.f32 %v16232_v16, %v7275_v27 }
0x1143   :  { %v12212_v54 = vpop.eup %12211  ;;  %v7215_v8 = vadd.f32 1e-05, %v7183_v43  ;;  %v7184_v3 = vsub.f32 %v7088_v1, %v7152_v0  ;;  %v7089_v30 = vmul.f32 0.03125, %v7015_v41 }
0x1144   :  { %v7018_v4 = vpop.xlane.xlu0 %7017  ;;  %v7312_v7 = vmul.f32 %v16232_v16, %v7276_v51  ;;  %v7277_v44 = vmul.f32 %v12212_v54, %v7117_v57  ;;  %v16304_v37 = vadd.f32 %v16250_v55, %v7311_v29 }
0x1145   :  { %v12214_v56 = vpop.eup %12213  ;;  %12215 = vrsqrt.f32 %v7215_v8  ;;  %v7216_v38 = vadd.f32 1e-05, %v7184_v3  ;;  %v7185_v9 = vsub.f32 %v7089_v30, %v7153_v17  ;;  %v7090_v48 = vmul.f32 0.03125, %v7018_v4 }
0x1146   :  { %v6861_v34 = vpop.xlane.xlu1 %6860  ;;  %v16307_v47 = vadd.f32 %v16250_v55, %v7312_v7  ;;  %v7278_v24 = vmul.f32 %v12214_v56, %v7118_v31  ;;  %v7313_v46 = vmul.f32 %v16232_v16, %v7277_v44  ;;  %v7119_v8 = vsub.f32 %v16114_v10, %v16274_v58 }
0x1147   :  { %12217 = vrsqrt.f32 %v7216_v38  ;;  %v7217_v49 = vadd.f32 1e-05, %v7185_v9  ;;  %v7186_v61 = vsub.f32 %v7090_v48, %v7154_v25  ;;  %v6931_v51 = vmul.f32 0.03125, %v6861_v34 }
0x1148   :  { %v6864_v27 = vpop.xlane.xlu0 %6863  ;;  %v7381_v5 = vpack.c.bf16 %v16307_v47, %v16304_v37  ;;  %v7314_v0 = vmul.f32 %v16232_v16, %v7278_v24  ;;  %v16315_v57 = vadd.f32 %v16250_v55, %v7313_v46  ;;  %v7120_v7 = vsub.f32 %v16120_v6, %v16278_v36 }
0x1149   :  { %12219 = vrsqrt.f32 %v7217_v49  ;;  %v7218_v43 = vadd.f32 1e-05, %v7186_v61  ;;  %v6932_v17 = vmul.f32 0.03125, %v6864_v27  ;;  %v7155_v31 = vmul.f32 %v6931_v51, %v6931_v51 }
0x114a   :  { %v6867_v1 = vpop.xlane.xlu1 %6866  ;;  %11413 = vmatprep.mubr.msk.bf16.mxu1 %vm2363_vm3, %v7381_v5  ;;  %v16318_v41 = vadd.f32 %v16250_v55, %v7314_v0  ;;  %v7121_v10 = vsub.f32 %v16124_v53, %v16285_v2  ;;  %v7122_v6 = vsub.f32 %v16129_v62, %v16289_v33 }
0x114b   :  { %12221 = vrsqrt.f32 %v7218_v43  ;;  %v6933_v25 = vmul.f32 0.03125, %v6867_v1  ;;  %v7156_v48 = vmul.f32 %v6932_v17, %v6932_v17 }
0x114c   :  { %v6870_v29 = vpop.xlane.xlu0 %6869  ;;  %v7382_v54 = vpack.c.bf16 %v16318_v41, %v16315_v57 }
0x114d   :  { %v6934_v44 = vmul.f32 0.03125, %v6870_v29  ;;  %v7157_v27 = vmul.f32 %v6933_v25, %v6933_v25 }
0x114e   :  { %v7021_v3 = vpop.xlane.xlu1 %7020  ;;  %11414 = vmatmul.mubr.msk.bf16.gmra.mrb[228].mxu1 %vm2363_vm3, %v7382_v54 }
0x114f   :  { %v12216_v30 = vpop.eup %12215  ;;  %v7091_v4 = vmul.f32 0.03125, %v7021_v3  ;;  %v7158_v36 = vmul.f32 %v6934_v44, %v6934_v44 }
0x1150   :  { %v7024_v56 = vpop.xlane.xlu0 %7023  ;;  %v7279_v38 = vmul.f32 %v12216_v30, %v7119_v8 }
0x1151   :  { %v12218_v9 = vpop.eup %12217  ;;  %v7187_v34 = vsub.f32 %v7091_v4, %v7155_v31  ;;  %v7092_v24 = vmul.f32 0.03125, %v7024_v56 }
0x1152   :  { %v7027_v58 = vpop.xlane.xlu1 %7026  ;;  %v7280_v46 = vmul.f32 %v12218_v9, %v7120_v7  ;;  %v7315_v49 = vmul.f32 %v16232_v16, %v7279_v38 }
0x1153   :  { %v12220_v61 = vpop.eup %12219  ;;  %v7219_v5 = vadd.f32 1e-05, %v7187_v34  ;;  %v7188_v0 = vsub.f32 %v7092_v24, %v7156_v48  ;;  %v7093_v43 = vmul.f32 0.03125, %v7027_v58 }
0x1154   :  { %v7030_v1 = vpop.xlane.xlu0 %7029  ;;  %v7316_v29 = vmul.f32 %v16232_v16, %v7280_v46  ;;  %v7281_v54 = vmul.f32 %v12220_v61, %v7121_v10  ;;  %v16334_v30 = vadd.f32 %v16250_v55, %v7315_v49  ;;  %v7123_v10 = vsub.f32 %v16154_v12, %v6931_v51 }
0x1155   :  { %v12222_v8 = vpop.eup %12221  ;;  %12223 = vrsqrt.f32 %v7219_v5  ;;  %v7220_v53 = vadd.f32 1e-05, %v7188_v0  ;;  %v7189_v2 = vsub.f32 %v7093_v43, %v7157_v27  ;;  %v7094_v3 = vmul.f32 0.03125, %v7030_v1 }
0x1156   :  { %v16337_v31 = vadd.f32 %v16250_v55, %v7316_v29  ;;  %v7282_v4 = vmul.f32 %v12222_v8, %v7122_v6  ;;  %v7317_v7 = vmul.f32 %v16232_v16, %v7281_v54  ;;  %v7124_v46 = vsub.f32 %v16160_v39, %v6932_v17 }
0x1157   :  { %12225 = vrsqrt.f32 %v7220_v53  ;;  %v7221_v62 = vadd.f32 1e-05, %v7189_v2  ;;  %v7190_v33 = vsub.f32 %v7094_v3, %v7158_v36  ;;  %v7125_v27 = vsub.f32 %v16164_v35, %v6933_v25 }
0x1158   :  { %v7383_v56 = vpack.c.bf16 %v16337_v31, %v16334_v30  ;;  %v7318_v38 = vmul.f32 %v16232_v16, %v7282_v4  ;;  %v16345_v48 = vadd.f32 %v16250_v55, %v7317_v7  ;;  %v7126_v6 = vsub.f32 %v16169_v20, %v6934_v44 }
0x1159   :  { %12227 = vrsqrt.f32 %v7221_v62  ;;  %v7222_v9 = vadd.f32 1e-05, %v7190_v33 }
0x115a   :  { %11417 = vmatprep.mubr.msk.bf16.mxu1 %vm2363_vm3, %v7383_v56  ;;  %v16348_v34 = vadd.f32 %v16250_v55, %v7318_v38 }
0x115b   :  { %12229 = vrsqrt.f32 %v7222_v9 }
0x115c   :  { %v7384_v24 = vpack.c.bf16 %v16348_v34, %v16345_v48 }
0x115e   :  { %11418 = vmatmul.mubr.msk.bf16.gmra.mrb[232].mxu1 %vm2363_vm3, %v7384_v24 }
0x115f   :  { %v12224_v58 = vpop.eup %12223 }
0x1160   :  { %v7283_v49 = vmul.f32 %v12224_v58, %v7123_v10 }
0x1161   :  { %v12226_v61 = vpop.eup %12225 }
0x1162   :  { %v7284_v5 = vmul.f32 %v12226_v61, %v7124_v46  ;;  %v7319_v0 = vmul.f32 %v16232_v16, %v7283_v49 }
0x1163   :  { %v12228_v43 = vpop.eup %12227 }
0x1164   :  { %v7320_v36 = vmul.f32 %v16232_v16, %v7284_v5  ;;  %v7285_v1 = vmul.f32 %v12228_v43, %v7125_v27  ;;  %v16360_v12 = vadd.f32 %v16250_v55, %v7319_v0 }
0x1165   :  { %v12230_v29 = vpop.eup %12229 }
0x1166   :  { %v16363_v51 = vadd.f32 %v16250_v55, %v7320_v36  ;;  %v7286_v39 = vmul.f32 %v12230_v29, %v7126_v6  ;;  %v7321_v17 = vmul.f32 %v16232_v16, %v7285_v1  ;;  %v18700_v36 = vpack.c.bf16 %v15863_v32, %v15857_v26  ;;  %v11678_v1 = vld [vmem:[%s18393_s1 + $0x80] sm:$0xff]   ;;  %v11679_v26 = vld [vmem:[%s18393_s1 + $0x88] sm:$0xff]   ;;  %v11680_v32 = vld [vmem:[%s18393_s1 + $0x90] sm:$0xff]  }
0x1167   :  { %v18701_v29 = vpack.c.bf16 %v15859_v23, %v15855_v60  ;;  %v18703_v60 = vpack.c.bf16 %v15871_v21, %v15867_v13  ;;  %v18704_v23 = vpack.c.bf16 %v15887_v22, %v15881_v15 }
0x1168   :  { %v7385_v35 = vpack.c.bf16 %v16363_v51, %v16360_v12  ;;  %v7322_v25 = vmul.f32 %v16232_v16, %v7286_v39  ;;  %v16371_v20 = vadd.f32 %v16250_v55, %v7321_v17  ;;  %v11677_v16 = vld [vmem:[%s18393_s1 + $0x78] sm:$0xff]   ;;  %v18702_v39 = vpack.c.bf16 %v15875_v18, %v15869_v11  ;;  %v16423_v11 = vld [vmem:[%s18394_s2 + $0xb] ss:$0 sm:$0xff] }
0x116a   :  { %11421 = vmatprep.mubr.msk.bf16.mxu1 %vm2363_vm3, %v7385_v35  ;;  %v16374_v44 = vadd.f32 %v16250_v55, %v7322_v25 }
0x116c   :  { %v7386_v54 = vpack.c.bf16 %v16374_v44, %v16371_v20 }
0x116e   :  { %11422 = vmatmul.mubr.msk.bf16.gmra.mrb[236].mxu1 %vm2363_vm3, %v7386_v54 }
0x11df   :  { %v11355_v8 = vpop.f32.mrb[224].mxu0 }
0x11e0   :  { %v6439_v53 = vpop.f32.mrb[225].mxu0 }
0x11e1   :  { %v11356_v2 = vpop.f32.mrb[226].mxu0 }
0x11e2   :  { %v6503_v3 = vpack.c.bf16 %v11356_v2, %v11355_v8  ;;  %v6442_v4 = vpop.f32.mrb[227].mxu0 }
0x11e3   :  { %v6502_v7 = vpack.c.bf16 %v6442_v4, %v6439_v53 }
0x11e5   :  { %11371 = vmatprep.mubr.msk.bf16.mxu0 %vm50_vm0, %v6502_v7 }
0x11e6   :  { %11372 = vmatmul.mubr.msk.bf16.vlgmr.msra.gmra.mrb[240].mxu0 %vm50_vm0, %v6503_v3  ;;  %v18705_v3 = vpack.c.bf16 %v15883_v63, %v15879_v45 }
0x11e7   :  { %v11359_v55 = vpop.f32.mrb[228].mxu0  ;;  %11388 = vmatpush3.bf16.msra.mxu0 %v16207_v19 }
0x11e8   :  { %v6455_v62 = vpop.f32.mrb[229].mxu0  ;;  %11441 = vmatprep.subr.bf16.mxu0 %v11677_v16 }
0x11e9   :  { %v11360_v33 = vpop.f32.mrb[230].mxu0 }
0x11ea   :  { %v6505_v56 = vpack.c.bf16 %v11360_v33, %v11359_v55  ;;  %v6458_v38 = vpop.f32.mrb[231].mxu0 }
0x11eb   :  { %v6504_v9 = vpack.c.bf16 %v6458_v38, %v6455_v62 }
0x11ed   :  { %11375 = vmatprep.mubr.msk.bf16.mxu0 %vm50_vm0, %v6504_v9 }
0x11ee   :  { %11376 = vmatmul.mubr.msk.bf16.gmra.mrb[244].mxu0 %vm50_vm0, %v6505_v56 }
0x11ef   :  { %v11363_v24 = vpop.f32.mrb[232].mxu0 }
0x11f0   :  { %v6471_v10 = vpop.f32.mrb[233].mxu0 }
0x11f1   :  { %v11364_v58 = vpop.f32.mrb[234].mxu0 }
0x11f2   :  { %v6507_v46 = vpack.c.bf16 %v11364_v58, %v11363_v24  ;;  %v6474_v49 = vpop.f32.mrb[235].mxu0 }
0x11f3   :  { %v6506_v61 = vpack.c.bf16 %v6474_v49, %v6471_v10 }
0x11f5   :  { %11379 = vmatprep.mubr.msk.bf16.mxu0 %vm50_vm0, %v6506_v61 }
0x11f6   :  { %11380 = vmatmul.mubr.msk.bf16.gmra.mrb[248].mxu0 %vm50_vm0, %v6507_v46  ;;  %v18707_v46 = vld [vmem:[#allocation49_spill] sm:$0xff] }
0x11f7   :  { %v11367_v19 = vpop.f32.mrb[236].mxu0  ;;  %v18708_v49 = vpack.c.bf16 %v15895_v50, %v18707_v46 }
0x11f8   :  { %v6487_v27 = vpop.f32.mrb[237].mxu0 }
0x11f9   :  { %v11368_v5 = vpop.f32.mrb[238].mxu0 }
0x11fa   :  { %v6509_v0 = vpack.c.bf16 %v11368_v5, %v11367_v19  ;;  %v6490_v43 = vpop.f32.mrb[239].mxu0 }
0x11fb   :  { %v6508_v6 = vpack.c.bf16 %v6490_v43, %v6487_v27 }
0x11fd   :  { %11383 = vmatprep.mubr.msk.bf16.mxu0 %vm50_vm0, %v6508_v6 }
0x11fe   :  { %11384 = vmatmul.mubr.msk.bf16.gmra.mrb[252].mxu0 %vm50_vm0, %v6509_v0 }
0x11ff   :  { %11389 = vmatprep.mubr.msk.bf16.mxu0 %vm50_vm0, %v18700_v36 }
0x1206   :  { %11390 = vmatmul.mubr.msk.bf16.vlgmr.msra.gmra.mrb[240].mxu0 %vm50_vm0, %v18701_v29 }
0x1207   :  { %11393 = vmatprep.mubr.msk.bf16.mxu0 %vm50_vm0, %v18702_v39  ;;  %11442 = vmatpush3.bf16.msra.mxu0 %v11677_v16  ;;  %v18706_v16 = vpack.c.bf16 %v15899_v40, %v15893_v14 }
0x1208   :  { %11443 = vmatprep.subr.bf16.mxu0 %v11678_v1 }
0x120b   :  { %11444 = vmatpush3.bf16.msra.mxu0 %v11678_v1 }
0x120c   :  { %11445 = vmatprep.subr.bf16.mxu0 %v11679_v26 }
0x120e   :  { %11394 = vmatmul.mubr.msk.bf16.gmra.mrb[244].mxu0 %vm50_vm0, %v18703_v60 }
0x120f   :  { %11397 = vmatprep.mubr.msk.bf16.mxu0 %vm50_vm0, %v18704_v23  ;;  %11446 = vmatpush3.bf16.msra.mxu0 %v11679_v26 }
0x1210   :  { %11447 = vmatprep.subr.bf16.mxu0 %v11680_v32 }
0x1211   :  { %v11411_v18 = vpop.f32.mrb[224].mxu1 }
0x1212   :  { %v16426_v17 = vadd.f32 %v11411_v18, %v16423_v11  ;;  %v7494_v35 = vpop.f32.mrb[225].mxu1 }
0x1213   :  { %v16429_v13 = vadd.f32 %v16423_v11, %v7494_v35  ;;  %v11412_v21 = vpop.f32.mrb[226].mxu1  ;;  %11448 = vmatpush3.bf16.msra.mxu0 %v11680_v32 }
0x1214   :  { %v7623_v15 = vmul.f32 %v16426_v17, %v16426_v17  ;;  %v16434_v22 = vadd.f32 %v11412_v21, %v16423_v11  ;;  %v7497_v25 = vpop.f32.mrb[227].mxu1 }
0x1215   :  { %v7621_v54 = vmul.f32 %v16429_v13, %v16429_v13  ;;  %v16439_v8 = vadd.f32 %v16423_v11, %v7497_v25 }
0x1216   :  { %v7655_v53 = vmul.f32 %v7623_v15, %v16426_v17  ;;  %v7624_v2 = vmul.f32 %v16434_v22, %v16434_v22  ;;  %11398 = vmatmul.mubr.msk.bf16.gmra.mrb[248].mxu0 %vm50_vm0, %v18705_v3 }
0x1217   :  { %v7653_v4 = vmul.f32 %v7621_v54, %v16429_v13  ;;  %v7622_v7 = vmul.f32 %v16439_v8, %v16439_v8  ;;  %11401 = vmatprep.mubr.msk.bf16.mxu0 %vm50_vm0, %v18706_v16 }
0x1218   :  { %v7687_v55 = vmul.f32 0.044715, %v7655_v53  ;;  %v7656_v62 = vmul.f32 %v7624_v2, %v16434_v22 }
0x1219   :  { %v7685_v33 = vmul.f32 0.044715, %v7653_v4  ;;  %v7654_v56 = vmul.f32 %v7622_v7, %v16439_v8 }
0x121a   :  { %v7719_v45 = vadd.f32 %v7687_v55, %v16426_v17  ;;  %v7688_v63 = vmul.f32 0.044715, %v7656_v62 }
0x121b   :  { %v7717_v38 = vadd.f32 %v7685_v33, %v16429_v13  ;;  %v7686_v9 = vmul.f32 0.044715, %v7654_v56 }
0x121c   :  { %v7751_v24 = vmul.f32 0.7978846, %v7719_v45  ;;  %v7720_v10 = vadd.f32 %v7688_v63, %v16434_v22 }
0x121d   :  { %v7749_v58 = vmul.f32 0.7978846, %v7717_v38  ;;  %v7718_v14 = vadd.f32 %v7686_v9, %v16439_v8 }
0x121e   :  { %12231 = vtanh.f32 %v7751_v24  ;;  %v7752_v40 = vmul.f32 0.7978846, %v7720_v10  ;;  %11402 = vmatmul.mubr.msk.bf16.gmra.mrb[252].mxu0 %vm50_vm0, %v18708_v49 }
0x121f   :  { %12233 = vtanh.f32 %v7749_v58  ;;  %v7750_v61 = vmul.f32 0.7978846, %v7718_v14 }
0x1220   :  { %12235 = vtanh.f32 %v7752_v40 }
0x1221   :  { %12237 = vtanh.f32 %v7750_v61  ;;  %v11415_v19 = vpop.f32.mrb[228].mxu1 }
0x1222   :  { %v16466_v27 = vadd.f32 %v11415_v19, %v16423_v11  ;;  %v7510_v5 = vpop.f32.mrb[229].mxu1 }
0x1223   :  { %v16469_v0 = vadd.f32 %v16423_v11, %v7510_v5  ;;  %v11416_v43 = vpop.f32.mrb[230].mxu1 }
0x1224   :  { %v7627_v6 = vmul.f32 %v16466_v27, %v16466_v27  ;;  %v16474_v50 = vadd.f32 %v11416_v43, %v16423_v11  ;;  %v7513_v36 = vpop.f32.mrb[231].mxu1 }
0x1225   :  { %v7625_v1 = vmul.f32 %v16469_v0, %v16469_v0  ;;  %v16479_v29 = vadd.f32 %v16423_v11, %v7513_v36 }
0x1226   :  { %v7659_v39 = vmul.f32 %v7627_v6, %v16466_v27  ;;  %v7628_v26 = vmul.f32 %v16474_v50, %v16474_v50 }
0x1227   :  { %v7657_v32 = vmul.f32 %v7625_v1, %v16469_v0  ;;  %v7626_v60 = vmul.f32 %v16479_v29, %v16479_v29 }
0x1228   :  { %v12232_v23 = vpop.eup %12231  ;;  %v7691_v18 = vmul.f32 0.044715, %v7659_v39  ;;  %v7660_v35 = vmul.f32 %v7628_v26, %v16474_v50 }
0x1229   :  { %v12234_v21 = vpop.eup %12233  ;;  %v7815_v15 = vadd.f32 1.0, %v12232_v23  ;;  %v7689_v25 = vmul.f32 0.044715, %v7657_v32  ;;  %v7658_v54 = vmul.f32 %v7626_v60, %v16479_v29 }
0x122a   :  { %v12236_v53 = vpop.eup %12235  ;;  %v7813_v2 = vadd.f32 1.0, %v12234_v21  ;;  %v7723_v3 = vadd.f32 %v7691_v18, %v16466_v27  ;;  %v7692_v4 = vmul.f32 0.044715, %v7660_v35 }
0x122b   :  { %v12238_v7 = vpop.eup %12237  ;;  %v7847_v16 = vmul.f32 0.5, %v7815_v15  ;;  %v7816_v55 = vadd.f32 1.0, %v12236_v53  ;;  %v7721_v62 = vadd.f32 %v7689_v25, %v16469_v0  ;;  %v7690_v33 = vmul.f32 0.044715, %v7658_v54 }
0x122c   :  { %v7845_v56 = vmul.f32 0.5, %v7813_v2  ;;  %v7814_v45 = vadd.f32 1.0, %v12238_v7  ;;  %v7755_v63 = vmul.f32 0.7978846, %v7723_v3  ;;  %v7724_v38 = vadd.f32 %v7692_v4, %v16474_v50 }
0x122d   :  { %v7848_v9 = vmul.f32 0.5, %v7816_v55  ;;  %v7753_v24 = vmul.f32 0.7978846, %v7721_v62  ;;  %v7722_v10 = vadd.f32 %v7690_v33, %v16479_v29  ;;  %v7879_v40 = vmul.f32 %v7847_v16, %v16426_v17 }
0x122e   :  { %v7846_v58 = vmul.f32 0.5, %v7814_v45  ;;  %12239 = vtanh.f32 %v7755_v63  ;;  %v7756_v14 = vmul.f32 0.7978846, %v7724_v38  ;;  %v7877_v61 = vmul.f32 %v7845_v56, %v16429_v13 }
0x122f   :  { %v7880_v46 = vmul.f32 %v7848_v9, %v16434_v22  ;;  %12241 = vtanh.f32 %v7753_v24  ;;  %v7754_v49 = vmul.f32 0.7978846, %v7722_v10 }
0x1230   :  { %v7878_v19 = vmul.f32 %v7846_v58, %v16439_v8  ;;  %12243 = vtanh.f32 %v7756_v14 }
0x1231   :  { %v7918_v5 = vpack.c.bf16 %v7880_v46, %v7879_v40  ;;  %12245 = vtanh.f32 %v7754_v49  ;;  %v11419_v43 = vpop.f32.mrb[232].mxu1 }
0x1232   :  { %v16498_v6 = vadd.f32 %v11419_v43, %v16423_v11  ;;  %v7526_v36 = vpop.f32.mrb[233].mxu1  ;;  %v7917_v1 = vpack.c.bf16 %v7878_v19, %v7877_v61 }
0x1233   :  { %v16501_v17 = vadd.f32 %v16423_v11, %v7526_v36  ;;  %v11420_v22 = vpop.f32.mrb[234].mxu1 }
0x1234   :  { %v7631_v39 = vmul.f32 %v16498_v6, %v16498_v6  ;;  %v16506_v13 = vadd.f32 %v11420_v22, %v16423_v11  ;;  %v7529_v8 = vpop.f32.mrb[235].mxu1  ;;  %11449 = vmatprep.mubr.msk.bf16.mxu0 %vm7962_vm4, %v7917_v1 }
0x1235   :  { %v7629_v26 = vmul.f32 %v16501_v17, %v16501_v17  ;;  %v16512_v32 = vadd.f32 %v16423_v11, %v7529_v8  ;;  %11450 = vmatmul.mubr.msk.bf16.vlgmr.msra.gmra.mrb[0].mxu0 %vm7962_vm4, %v7918_v5 }
0x1236   :  { %v7663_v60 = vmul.f32 %v7631_v39, %v16498_v6  ;;  %v7632_v23 = vmul.f32 %v16506_v13, %v16506_v13 }
0x1237   :  { %v7661_v18 = vmul.f32 %v7629_v26, %v16501_v17  ;;  %v7630_v35 = vmul.f32 %v16512_v32, %v16512_v32 }
0x1238   :  { %v12240_v21 = vpop.eup %12239  ;;  %v7695_v15 = vmul.f32 0.044715, %v7663_v60  ;;  %v7664_v25 = vmul.f32 %v7632_v23, %v16506_v13 }
0x1239   :  { %v12242_v54 = vpop.eup %12241  ;;  %v7819_v53 = vadd.f32 1.0, %v12240_v21  ;;  %v7693_v2 = vmul.f32 0.044715, %v7661_v18  ;;  %v7662_v3 = vmul.f32 %v7630_v35, %v16512_v32 }
0x123a   :  { %v12244_v4 = vpop.eup %12243  ;;  %v7817_v7 = vadd.f32 1.0, %v12242_v54  ;;  %v7727_v16 = vadd.f32 %v7695_v15, %v16498_v6  ;;  %v7696_v55 = vmul.f32 0.044715, %v7664_v25 }
0x123b   :  { %v12246_v62 = vpop.eup %12245  ;;  %v7851_v33 = vmul.f32 0.5, %v7819_v53  ;;  %v7820_v56 = vadd.f32 1.0, %v12244_v4  ;;  %v7725_v45 = vadd.f32 %v7693_v2, %v16501_v17  ;;  %v7694_v63 = vmul.f32 0.044715, %v7662_v3 }
0x123c   :  { %v7849_v38 = vmul.f32 0.5, %v7817_v7  ;;  %v7818_v9 = vadd.f32 1.0, %v12246_v62  ;;  %v7759_v24 = vmul.f32 0.7978846, %v7727_v16  ;;  %v7728_v10 = vadd.f32 %v7696_v55, %v16506_v13 }
0x123d   :  { %v7852_v58 = vmul.f32 0.5, %v7820_v56  ;;  %v7757_v14 = vmul.f32 0.7978846, %v7725_v45  ;;  %v7726_v40 = vadd.f32 %v7694_v63, %v16512_v32  ;;  %v7883_v61 = vmul.f32 %v7851_v33, %v16466_v27 }
0x123e   :  { %v7850_v46 = vmul.f32 0.5, %v7818_v9  ;;  %12247 = vtanh.f32 %v7759_v24  ;;  %v7760_v49 = vmul.f32 0.7978846, %v7728_v10  ;;  %v7881_v43 = vmul.f32 %v7849_v38, %v16469_v0 }
0x123f   :  { %v7884_v19 = vmul.f32 %v7852_v58, %v16474_v50  ;;  %12249 = vtanh.f32 %v7757_v14  ;;  %v7758_v5 = vmul.f32 0.7978846, %v7726_v40 }
0x1240   :  { %v7882_v36 = vmul.f32 %v7850_v46, %v16479_v29  ;;  %12251 = vtanh.f32 %v7760_v49 }
0x1241   :  { %v7920_v1 = vpack.c.bf16 %v7884_v19, %v7883_v61  ;;  %12253 = vtanh.f32 %v7758_v5  ;;  %v11423_v22 = vpop.f32.mrb[236].mxu1 }
0x1242   :  { %v16532_v39 = vadd.f32 %v11423_v22, %v16423_v11  ;;  %v7542_v8 = vpop.f32.mrb[237].mxu1  ;;  %v7919_v26 = vpack.c.bf16 %v7882_v36, %v7881_v43 }
0x1243   :  { %v16535_v60 = vadd.f32 %v16423_v11, %v7542_v8  ;;  %v11424_v27 = vpop.f32.mrb[238].mxu1 }
0x1244   :  { %v7635_v50 = vmul.f32 %v16532_v39, %v16532_v39  ;;  %v7554_v0 = vadd.f32 %v11424_v27, %v16423_v11  ;;  %v7545_v23 = vpop.f32.mrb[239].mxu1  ;;  %11453 = vmatprep.mubr.msk.bf16.mxu0 %vm7962_vm4, %v7919_v26 }
0x1245   :  { %v7633_v29 = vmul.f32 %v16535_v60, %v16535_v60  ;;  %v7546_v18 = vadd.f32 %v16423_v11, %v7545_v23  ;;  %11454 = vmatmul.mubr.msk.bf16.gmra.mrb[4].mxu0 %vm7962_vm4, %v7920_v1 }
0x1246   :  { %v7667_v35 = vmul.f32 %v7635_v50, %v16532_v39  ;;  %v7636_v21 = vmul.f32 %v7554_v0, %v7554_v0 }
0x1247   :  { %v7665_v15 = vmul.f32 %v7633_v29, %v16535_v60  ;;  %v7634_v25 = vmul.f32 %v7546_v18, %v7546_v18 }
0x1248   :  { %v12248_v54 = vpop.eup %12247  ;;  %v7699_v53 = vmul.f32 0.044715, %v7667_v35  ;;  %v7668_v2 = vmul.f32 %v7636_v21, %v7554_v0 }
0x1249   :  { %v12250_v3 = vpop.eup %12249  ;;  %v7823_v4 = vadd.f32 1.0, %v12248_v54  ;;  %v7697_v7 = vmul.f32 0.044715, %v7665_v15  ;;  %v7666_v16 = vmul.f32 %v7634_v25, %v7546_v18 }
0x124a   :  { %v12252_v55 = vpop.eup %12251  ;;  %v7821_v62 = vadd.f32 1.0, %v12250_v3  ;;  %v7731_v33 = vadd.f32 %v7699_v53, %v16532_v39  ;;  %v7700_v11 = vmul.f32 0.044715, %v7668_v2 }
0x124b   :  { %v12254_v56 = vpop.eup %12253  ;;  %v7855_v45 = vmul.f32 0.5, %v7823_v4  ;;  %v7824_v63 = vadd.f32 1.0, %v12252_v55  ;;  %v7729_v38 = vadd.f32 %v7697_v7, %v16535_v60  ;;  %v7698_v9 = vmul.f32 0.044715, %v7666_v16  ;;  %v16562_v55 = vld [vmem:[%s18394_s2 + $0x8] ss:$0 sm:$0xff] }
0x124c   :  { %v7853_v24 = vmul.f32 0.5, %v7821_v62  ;;  %v7822_v10 = vadd.f32 1.0, %v12254_v56  ;;  %v7763_v58 = vmul.f32 0.7978846, %v7731_v33  ;;  %v7732_v14 = vadd.f32 %v7700_v11, %v7554_v0 }
0x124d   :  { %v7856_v40 = vmul.f32 0.5, %v7824_v63  ;;  %v7761_v46 = vmul.f32 0.7978846, %v7729_v38  ;;  %v7730_v49 = vadd.f32 %v7698_v9, %v7546_v18  ;;  %v7887_v5 = vmul.f32 %v7855_v45, %v16498_v6  ;;  %v18710_v63 = vld [vmem:[#allocation44_spill] sm:$0xff]  ;;  %v18711_v9 = vld [vmem:[#allocation45_spill] sm:$0xff] }
0x124e   :  { %v7854_v61 = vmul.f32 0.5, %v7822_v10  ;;  %12255 = vtanh.f32 %v7763_v58  ;;  %v7764_v19 = vmul.f32 0.7978846, %v7732_v14  ;;  %v7885_v1 = vmul.f32 %v7853_v24, %v16501_v17  ;;  %v18712_v58 = vld [vmem:[#allocation43_spill] sm:$0xff] }
0x124f   :  { %v7888_v43 = vmul.f32 %v7856_v40, %v16506_v13  ;;  %12257 = vtanh.f32 %v7761_v46  ;;  %v7762_v36 = vmul.f32 0.7978846, %v7730_v49 }
0x1250   :  { %v7886_v22 = vmul.f32 %v7854_v61, %v16512_v32  ;;  %12259 = vtanh.f32 %v7764_v19 }
0x1251   :  { %v7922_v8 = vpack.c.bf16 %v7888_v43, %v7887_v5  ;;  %12261 = vtanh.f32 %v7762_v36 }
0x1252   :  { %v7921_v26 = vpack.c.bf16 %v7886_v22, %v7885_v1 }
0x1254   :  { %11457 = vmatprep.mubr.msk.bf16.mxu0 %vm7962_vm4, %v7921_v26 }
0x1255   :  { %11458 = vmatmul.mubr.msk.bf16.gmra.mrb[8].mxu0 %vm7962_vm4, %v7922_v8 }
0x1258   :  { %v12256_v27 = vpop.eup %12255 }
0x1259   :  { %v12258_v50 = vpop.eup %12257  ;;  %v7827_v23 = vadd.f32 1.0, %v12256_v27 }
0x125a   :  { %v12260_v6 = vpop.eup %12259  ;;  %v7825_v29 = vadd.f32 1.0, %v12258_v50 }
0x125b   :  { %v12262_v13 = vpop.eup %12261  ;;  %v7859_v35 = vmul.f32 0.5, %v7827_v23  ;;  %v7828_v21 = vadd.f32 1.0, %v12260_v6 }
0x125c   :  { %v7857_v15 = vmul.f32 0.5, %v7825_v29  ;;  %v7826_v17 = vadd.f32 1.0, %v12262_v13  ;;  %v18713_v29 = vld [vmem:[#allocation52_spill] sm:$0xff] }
0x125d   :  { %v7860_v25 = vmul.f32 0.5, %v7828_v21  ;;  %v7891_v54 = vmul.f32 %v7859_v35, %v16532_v39 }
0x125e   :  { %v7858_v32 = vmul.f32 0.5, %v7826_v17  ;;  %v7889_v2 = vmul.f32 %v7857_v15, %v16535_v60  ;;  %v18709_v60 = vld [vmem:[#allocation47_spill] sm:$0xff] }
0x125f   :  { %v7892_v53 = vmul.f32 %v7860_v25, %v7554_v0  ;;  %v18714_v25 = vld [vmem:[#allocation50_spill] sm:$0xff] }
0x1260   :  { %v7890_v3 = vmul.f32 %v7858_v32, %v7546_v18 }
0x1261   :  { %v7924_v4 = vpack.c.bf16 %v7892_v53, %v7891_v54 }
0x1262   :  { %v7923_v7 = vpack.c.bf16 %v7890_v3, %v7889_v2  ;;  %v18715_v3 = vld [vmem:[#allocation48_spill] sm:$0xff] }
0x1264   :  { %11461 = vmatprep.mubr.msk.bf16.mxu0 %vm7962_vm4, %v7923_v7 }
0x1265   :  { %11462 = vmatmul.mubr.msk.bf16.gmra.mrb[12].mxu0 %vm7962_vm4, %v7924_v4 }
0x12d9   :  { %v11391_v16 = vpop.f32.mrb[240].mxu0 }
0x12da   :  { %v6775_v62 = vadd.f32 %v16562_v55, %v11391_v16  ;;  %v6689_v33 = vpop.f32.mrb[241].mxu0  ;;  %v18716_v16 = vld [vmem:[#allocation46_spill] sm:$0xff] }
0x12db   :  { %v6773_v39 = vadd.f32 %v16562_v55, %v6689_v33  ;;  %v11392_v0 = vpop.f32.mrb[242].mxu0 }
0x12dc   :  { %v16567_v18 = vadd.f32 %v6775_v62, %v18709_v60  ;;  %v6776_v11 = vadd.f32 %v16562_v55, %v11392_v0  ;;  %v6692_v56 = vpop.f32.mrb[243].mxu0 }
0x12dd   :  { %v6774_v45 = vadd.f32 %v16562_v55, %v6692_v56  ;;  %v16572_v38 = vadd.f32 %v6773_v39, %v18710_v63 }
0x12de   :  { %v16575_v24 = vadd.f32 %v6776_v11, %v18711_v9  ;;  %v6877_v10 = vsel %vm2363_vm3, %v16567_v18, 0.0  ;;  %v6969_v26 = vmul.f32 %v16567_v18, %v16567_v18 }
0x12df   :  { %6878 = vadd.xlane.f32.xlu1 %v6877_v10  ;;  %v16580_v14 = vadd.f32 %v6774_v45, %v18712_v58  ;;  %v6871_v61 = vsel %vm2363_vm3, %v16572_v38, 0.0  ;;  %v6967_v19 = vmul.f32 %v16572_v38, %v16572_v38 }
0x12e0   :  { %v6880_v40 = vsel %vm2363_vm3, %v16575_v24, 0.0  ;;  %v6970_v23 = vmul.f32 %v16575_v24, %v16575_v24  ;;  %v7037_v15 = vsel %vm2363_vm3, %v6969_v26, 0.0 }
0x12e1   :  { %6881 = vadd.xlane.f32.xlu0 %v6880_v40  ;;  %v11395_v46 = vpop.f32.mrb[244].mxu0  ;;  %v6874_v36 = vsel %vm2363_vm3, %v16580_v14, 0.0  ;;  %v6968_v1 = vmul.f32 %v16580_v14, %v16580_v14  ;;  %v7031_v8 = vsel %vm2363_vm3, %v6967_v19, 0.0  ;;  %v18717_v19 = vld [vmem:[#allocation60_spill] sm:$0xff] }
0x12e2   :  { %v6705_v49 = vpop.f32.mrb[245].mxu0  ;;  %v6779_v22 = vadd.f32 %v16562_v55, %v11395_v46  ;;  %v7040_v2 = vsel %vm2363_vm3, %v6970_v23, 0.0 }
0x12e3   :  { %6872 = vadd.xlane.f32.xlu1 %v6871_v61  ;;  %v11396_v5 = vpop.f32.mrb[246].mxu0  ;;  %v7034_v50 = vsel %vm2363_vm3, %v6968_v1, 0.0  ;;  %v6777_v35 = vadd.f32 %v16562_v55, %v6705_v49  ;;  %v18718_v1 = vld [vmem:[#allocation57_spill] sm:$0xff] }
0x12e4   :  { %v6708_v43 = vpop.f32.mrb[247].mxu0  ;;  %v6780_v27 = vadd.f32 %v16562_v55, %v11396_v5  ;;  %v16601_v13 = vadd.f32 %v6779_v22, %v18713_v29 }
0x12e5   :  { %6875 = vadd.xlane.f32.xlu0 %v6874_v36  ;;  %v6778_v54 = vadd.f32 %v16562_v55, %v6708_v43  ;;  %v16611_v4 = vadd.f32 %v6777_v35, %v18715_v3 }
0x12e6   :  { %v16606_v32 = vadd.f32 %v6780_v27, %v18714_v25  ;;  %v6889_v7 = vsel %vm2363_vm3, %v16601_v13, 0.0  ;;  %v6973_v40 = vmul.f32 %v16601_v13, %v16601_v13  ;;  %v18719_v27 = vld [vmem:[#allocation53_spill] sm:$0xff] }
0x12e7   :  { %7032 = vadd.xlane.f32.xlu1 %v7031_v8  ;;  %v16616_v62 = vadd.f32 %v6778_v54, %v18716_v16  ;;  %v6883_v60 = vsel %vm2363_vm3, %v16611_v4, 0.0  ;;  %v6971_v11 = vmul.f32 %v16611_v4, %v16611_v4 }
0x12e8   :  { %v6892_v33 = vsel %vm2363_vm3, %v16606_v32, 0.0  ;;  %v6974_v61 = vmul.f32 %v16606_v32, %v16606_v32  ;;  %v7049_v36 = vsel %vm2363_vm3, %v6973_v40, 0.0  ;;  %v18722_v40 = vld [vmem:[#allocation66_spill] sm:$0xff] }
0x12e9   :  { %7035 = vadd.xlane.f32.xlu0 %v7034_v50  ;;  %v11399_v6 = vpop.f32.mrb[248].mxu0  ;;  %v6886_v63 = vsel %vm2363_vm3, %v16616_v62, 0.0  ;;  %v6972_v9 = vmul.f32 %v16616_v62, %v16616_v62  ;;  %v7043_v58 = vsel %vm2363_vm3, %v6971_v11, 0.0  ;;  %v18721_v11 = vld [vmem:[#allocation68_spill] sm:$0xff] }
0x12ea   :  { %v6721_v21 = vpop.f32.mrb[249].mxu0  ;;  %v6783_v10 = vadd.f32 %v16562_v55, %v11399_v6  ;;  %v7052_v26 = vsel %vm2363_vm3, %v6974_v61, 0.0  ;;  %v18720_v6 = vld [vmem:[#allocation51_spill] sm:$0xff]  ;;  %v18723_v61 = vld [vmem:[#allocation61_spill] sm:$0xff] }
0x12eb   :  { %7038 = vadd.xlane.f32.xlu1 %v7037_v15  ;;  %v11400_v17 = vpop.f32.mrb[250].mxu0  ;;  %v7046_v49 = vsel %vm2363_vm3, %v6972_v9, 0.0  ;;  %v6781_v43 = vadd.f32 %v16562_v55, %v6721_v21 }
0x12ec   :  { %v6724_v53 = vpop.f32.mrb[251].mxu0  ;;  %v6784_v46 = vadd.f32 %v16562_v55, %v11400_v17  ;;  %v16637_v5 = vadd.f32 %v6783_v10, %v18717_v19 }
0x12ed   :  { %7041 = vadd.xlane.f32.xlu0 %v7040_v2  ;;  %v6782_v8 = vadd.f32 %v16562_v55, %v6724_v53  ;;  %v16647_v50 = vadd.f32 %v6781_v43, %v18719_v27 }
0x12ee   :  { %v16642_v22 = vadd.f32 %v6784_v46, %v18718_v1  ;;  %v6901_v23 = vsel %vm2363_vm3, %v16637_v5, 0.0  ;;  %v6977_v2 = vmul.f32 %v16637_v5, %v16637_v5 }
0x12ef   :  { %6890 = vadd.xlane.f32.xlu1 %v6889_v7  ;;  %v16652_v29 = vadd.f32 %v6782_v8, %v18720_v6  ;;  %v6895_v21 = vsel %vm2363_vm3, %v16647_v50, 0.0  ;;  %v6975_v15 = vmul.f32 %v16647_v50, %v16647_v50  ;;  %v16699_v8 = vld [vmem:[%s18394_s2 + $0xc] ss:$0 sm:$0xff] }
0x12f0   :  { %v6904_v35 = vsel %vm2363_vm3, %v16642_v22, 0.0  ;;  %v7061_v10 = vsel %vm2363_vm3, %v6977_v2, 0.0 }
0x12f1   :  { %6893 = vadd.xlane.f32.xlu0 %v6892_v33  ;;  %v11403_v39 = vpop.f32.mrb[252].mxu0  ;;  %v6898_v17 = vsel %vm2363_vm3, %v16652_v29, 0.0  ;;  %v6976_v25 = vmul.f32 %v16652_v29, %v16652_v29  ;;  %v7055_v53 = vsel %vm2363_vm3, %v6975_v15, 0.0  ;;  %v6978_v33 = vmul.f32 %v16642_v22, %v16642_v22 }
0x12f2   :  { %v6737_v0 = vpop.f32.mrb[253].mxu0  ;;  %v6787_v54 = vadd.f32 %v16562_v55, %v11403_v39 }
0x12f3   :  { %6884 = vadd.xlane.f32.xlu1 %v6883_v60  ;;  %v11404_v56 = vpop.f32.mrb[254].mxu0  ;;  %v7058_v16 = vsel %vm2363_vm3, %v6976_v25, 0.0  ;;  %v6785_v39 = vadd.f32 %v16562_v55, %v6737_v0  ;;  %v18724_v0 = vld [vmem:[#allocation59_spill] sm:$0xff] }
0x12f4   :  { %v6740_v45 = vpop.f32.mrb[255].mxu0  ;;  %v6788_v3 = vadd.f32 %v16562_v55, %v11404_v56 }
0x12f5   :  { %6887 = vadd.xlane.f32.xlu0 %v6886_v63  ;;  %v16673_v63 = vadd.f32 %v6787_v54, %v18721_v11  ;;  %v6786_v46 = vadd.f32 %v16562_v55, %v6740_v45  ;;  %v16683_v19 = vadd.f32 %v6785_v39, %v18723_v61 }
0x12f6   :  { %v16678_v56 = vadd.f32 %v6788_v3, %v18722_v40 }
0x12f7   :  { %7044 = vadd.xlane.f32.xlu1 %v7043_v58  ;;  %v6913_v43 = vsel %vm2363_vm3, %v16673_v63, 0.0  ;;  %v6907_v55 = vsel %vm2363_vm3, %v16683_v19, 0.0  ;;  %v6979_v45 = vmul.f32 %v16683_v19, %v16683_v19 }
0x12f8   :  { %v6916_v1 = vsel %vm2363_vm3, %v16678_v56, 0.0  ;;  %v6982_v25 = vmul.f32 %v16678_v56, %v16678_v56 }
0x12f9   :  { %7047 = vadd.xlane.f32.xlu0 %v7046_v49  ;;  %v7064_v49 = vsel %vm2363_vm3, %v6978_v33, 0.0  ;;  %v7067_v6 = vsel %vm2363_vm3, %v6979_v45, 0.0 }
0x12fa   :  { %v7076_v39 = vsel %vm2363_vm3, %v6982_v25, 0.0 }
0x12fb   :  { %7050 = vadd.xlane.f32.xlu1 %v7049_v36  ;;  %v16688_v36 = vadd.f32 %v6786_v46, %v18724_v0 }
0x12fd   :  { %7053 = vadd.xlane.f32.xlu0 %v7052_v26  ;;  %v6910_v26 = vsel %vm2363_vm3, %v16688_v36, 0.0  ;;  %v6980_v27 = vmul.f32 %v16688_v36, %v16688_v36 }
0x12ff   :  { %6902 = vadd.xlane.f32.xlu1 %v6901_v23 }
0x1301   :  { %6905 = vadd.xlane.f32.xlu0 %v6904_v35  ;;  %v6981_v35 = vmul.f32 %v16673_v63, %v16673_v63 }
0x1303   :  { %6896 = vadd.xlane.f32.xlu1 %v6895_v21 }
0x1305   :  { %6899 = vadd.xlane.f32.xlu0 %v6898_v17  ;;  %v7070_v17 = vsel %vm2363_vm3, %v6980_v27, 0.0 }
0x1307   :  { %7056 = vadd.xlane.f32.xlu1 %v7055_v53 }
0x1308   :  { %v11451_v7 = vpop.f32.mrb[0].mxu0 }
0x1309   :  { %7059 = vadd.xlane.f32.xlu0 %v7058_v16  ;;  %v8045_v60 = vpop.f32.mrb[1].mxu0  ;;  %v8054_v23 = vadd.f32 %v11451_v7, %v16699_v8  ;;  %v7073_v7 = vsel %vm2363_vm3, %v6981_v35, 0.0 }
0x130a   :  { %v11452_v9 = vpop.f32.mrb[2].mxu0  ;;  %v8046_v2 = vadd.f32 %v16699_v8, %v8045_v60 }
0x130b   :  { %7062 = vadd.xlane.f32.xlu1 %v7061_v10  ;;  %v8048_v58 = vpop.f32.mrb[3].mxu0  ;;  %v8057_v21 = vadd.f32 %v11452_v9, %v16699_v8  ;;  %v16714_v53 = vadd.f32 %v8054_v23, %v16269_v42 }
0x130c   :  { %v8049_v11 = vadd.f32 %v16699_v8, %v8048_v58  ;;  %v16724_v9 = vadd.f32 %v8046_v2, %v16259_v28 }
0x130d   :  { %7065 = vadd.xlane.f32.xlu0 %v7064_v49  ;;  %v16719_v33 = vadd.f32 %v8057_v21, %v16272_v59  ;;  %v8212_v42 = vsel %vm2363_vm3, %v16714_v53, 0.0  ;;  %v8336_v58 = vmul.f32 %v16714_v53, %v16714_v53 }
0x130e   :  { %v16729_v60 = vadd.f32 %v8049_v11, %v16262_v52  ;;  %v8206_v59 = vsel %vm2363_vm3, %v16724_v9, 0.0  ;;  %v8334_v49 = vmul.f32 %v16724_v9, %v16724_v9 }
0x130f   :  { %6914 = vadd.xlane.f32.xlu1 %v6913_v43  ;;  %v8215_v10 = vsel %vm2363_vm3, %v16719_v33, 0.0  ;;  %v8337_v40 = vmul.f32 %v16719_v33, %v16719_v33  ;;  %v8372_v46 = vsel %vm2363_vm3, %v8336_v58, 0.0 }
0x1310   :  { %v8209_v28 = vsel %vm2363_vm3, %v16729_v60, 0.0  ;;  %v8366_v23 = vsel %vm2363_vm3, %v8334_v49, 0.0 }
0x1311   :  { %6917 = vadd.xlane.f32.xlu0 %v6916_v1  ;;  %v8375_v0 = vsel %vm2363_vm3, %v8337_v40, 0.0  ;;  %v8335_v1 = vmul.f32 %v16729_v60, %v16729_v60 }
0x1313   :  { %6908 = vadd.xlane.f32.xlu1 %v6907_v55 }
0x1315   :  { %6911 = vadd.xlane.f32.xlu0 %v6910_v26 }
0x1317   :  { %7068 = vadd.xlane.f32.xlu1 %v7067_v6 }
0x1318   :  { %v11455_v15 = vpop.f32.mrb[4].mxu0 }
0x1319   :  { %v8061_v54 = vpop.f32.mrb[5].mxu0  ;;  %7071 = vadd.xlane.f32.xlu0 %v7070_v17  ;;  %v8070_v52 = vadd.f32 %v11455_v15, %v16699_v8  ;;  %v8369_v15 = vsel %vm2363_vm3, %v8335_v1, 0.0 }
0x131a   :  { %v11456_v3 = vpop.f32.mrb[6].mxu0  ;;  %v8062_v26 = vadd.f32 %v16699_v8, %v8061_v54 }
0x131b   :  { %7074 = vadd.xlane.f32.xlu1 %v7073_v7  ;;  %v8064_v16 = vpop.f32.mrb[7].mxu0  ;;  %v8073_v61 = vadd.f32 %v11456_v3, %v16699_v8  ;;  %v16750_v45 = vadd.f32 %v8070_v52, %v16315_v57 }
0x131c   :  { %v8065_v21 = vadd.f32 %v16699_v8, %v8064_v16  ;;  %v16760_v17 = vadd.f32 %v8062_v26, %v16304_v37 }
0x131d   :  { %7077 = vadd.xlane.f32.xlu0 %v7076_v39  ;;  %v16755_v35 = vadd.f32 %v8073_v61, %v16318_v41  ;;  %v8224_v57 = vsel %vm2363_vm3, %v16750_v45, 0.0  ;;  %v8340_v2 = vmul.f32 %v16750_v45, %v16750_v45 }
0x131e   :  { %v16765_v25 = vadd.f32 %v8065_v21, %v16307_v47  ;;  %v8218_v41 = vsel %vm2363_vm3, %v16760_v17, 0.0  ;;  %v8338_v16 = vmul.f32 %v16760_v17, %v16760_v17 }
0x131f   :  { %8213 = vadd.xlane.f32.xlu1 %v8212_v42  ;;  %v8227_v54 = vsel %vm2363_vm3, %v16755_v35, 0.0  ;;  %v8341_v3 = vmul.f32 %v16755_v35, %v16755_v35  ;;  %v8384_v7 = vsel %vm2363_vm3, %v8340_v2, 0.0 }
0x1320   :  { %v8221_v37 = vsel %vm2363_vm3, %v16765_v25, 0.0  ;;  %v8378_v52 = vsel %vm2363_vm3, %v8338_v16, 0.0 }
0x1321   :  { %8216 = vadd.xlane.f32.xlu0 %v8215_v10  ;;  %v8387_v42 = vsel %vm2363_vm3, %v8341_v3, 0.0  ;;  %v8339_v10 = vmul.f32 %v16765_v25, %v16765_v25 }
0x1323   :  { %8207 = vadd.xlane.f32.xlu1 %v8206_v59 }
0x1325   :  { %8210 = vadd.xlane.f32.xlu0 %v8209_v28 }
0x1327   :  { %8373 = vadd.xlane.f32.xlu1 %v8372_v46 }
0x1328   :  { %v11459_v43 = vpop.f32.mrb[8].mxu0 }
0x1329   :  { %v8077_v55 = vpop.f32.mrb[9].mxu0  ;;  %8376 = vadd.xlane.f32.xlu0 %v8375_v0  ;;  %v8086_v47 = vadd.f32 %v11459_v43, %v16699_v8  ;;  %v8381_v43 = vsel %vm2363_vm3, %v8339_v10, 0.0 }
0x132a   :  { %v11460_v27 = vpop.f32.mrb[10].mxu0  ;;  %v8078_v28 = vadd.f32 %v16699_v8, %v8077_v55 }
0x132b   :  { %v8080_v6 = vpop.f32.mrb[11].mxu0  ;;  %8367 = vadd.xlane.f32.xlu1 %v8366_v23  ;;  %v8089_v11 = vadd.f32 %v11460_v27, %v16699_v8  ;;  %v16786_v58 = vadd.f32 %v8086_v47, %v16345_v48 }
0x132c   :  { %v8081_v61 = vadd.f32 %v16699_v8, %v8080_v6  ;;  %v16796_v0 = vadd.f32 %v8078_v28, %v16334_v30 }
0x132d   :  { %8370 = vadd.xlane.f32.xlu0 %v8369_v15  ;;  %v16791_v49 = vadd.f32 %v8089_v11, %v16348_v34  ;;  %v8236_v48 = vsel %vm2363_vm3, %v16786_v58, 0.0  ;;  %v8344_v26 = vmul.f32 %v16786_v58, %v16786_v58 }
0x132e   :  { %v16801_v1 = vadd.f32 %v8081_v61, %v16337_v31  ;;  %v8230_v34 = vsel %vm2363_vm3, %v16796_v0, 0.0  ;;  %v8342_v6 = vmul.f32 %v16796_v0, %v16796_v0 }
0x132f   :  { %8225 = vadd.xlane.f32.xlu1 %v8224_v57  ;;  %v8239_v55 = vsel %vm2363_vm3, %v16791_v49, 0.0  ;;  %v8345_v27 = vmul.f32 %v16791_v49, %v16791_v49  ;;  %v8396_v23 = vsel %vm2363_vm3, %v8344_v26, 0.0 }
0x1330   :  { %v8233_v30 = vsel %vm2363_vm3, %v16801_v1, 0.0  ;;  %v8343_v57 = vmul.f32 %v16801_v1, %v16801_v1  ;;  %v8390_v2 = vsel %vm2363_vm3, %v8342_v6, 0.0 }
0x1331   :  { %8228 = vadd.xlane.f32.xlu0 %v8227_v54  ;;  %v8399_v15 = vsel %vm2363_vm3, %v8345_v27, 0.0 }
0x1332   :  { %v8393_v47 = vsel %vm2363_vm3, %v8343_v57, 0.0 }
0x1333   :  { %8219 = vadd.xlane.f32.xlu1 %v8218_v41 }
0x1335   :  { %8222 = vadd.xlane.f32.xlu0 %v8221_v37 }
0x1337   :  { %8385 = vadd.xlane.f32.xlu1 %v8384_v7 }
0x1338   :  { %v11463_v39 = vpop.f32.mrb[12].mxu0 }
0x1339   :  { %v8093_v59 = vpop.f32.mrb[13].mxu0  ;;  %8388 = vadd.xlane.f32.xlu0 %v8387_v42  ;;  %v8102_v31 = vadd.f32 %v11463_v39, %v16699_v8 }
0x133a   :  { %v11464_v40 = vpop.f32.mrb[14].mxu0  ;;  %v8094_v41 = vadd.f32 %v16699_v8, %v8093_v59 }
0x133b   :  { %v8096_v46 = vpop.f32.mrb[15].mxu0  ;;  %8379 = vadd.xlane.f32.xlu1 %v8378_v52  ;;  %v8105_v21 = vadd.f32 %v11464_v40, %v16699_v8  ;;  %v16822_v54 = vadd.f32 %v8102_v31, %v16371_v20  ;;  %v11681_v52 = vld [vmem:[%s18393_s1 + $0x98] sm:$0xff]  }
0x133c   :  { %v8097_v3 = vadd.f32 %v16699_v8, %v8096_v46  ;;  %v16832_v7 = vadd.f32 %v8094_v41, %v16360_v12  ;;  %v11682_v46 = vld [vmem:[%s18393_s1 + $0xa0] sm:$0xff]   ;;  %11481 = vmatprep.subr.bf16.mxu1 %v11681_v52 }
0x133d   :  { %8382 = vadd.xlane.f32.xlu0 %v8381_v43  ;;  %v16827_v37 = vadd.f32 %v8105_v21, %v16374_v44  ;;  %v8248_v20 = vsel %vm2363_vm3, %v16822_v54, 0.0  ;;  %v8348_v8 = vmul.f32 %v16822_v54, %v16822_v54  ;;  %11482 = vmatpush3.bf16.msra.mxu1 %v11681_v52 }
0x133e   :  { %v16837_v16 = vadd.f32 %v8097_v3, %v16363_v51  ;;  %v8242_v44 = vsel %vm2363_vm3, %v16832_v7, 0.0  ;;  %v8346_v42 = vmul.f32 %v16832_v7, %v16832_v7  ;;  %11483 = vmatprep.subr.bf16.mxu1 %v11682_v46 }
0x133f   :  { %8237 = vadd.xlane.f32.xlu1 %v8236_v48  ;;  %v8251_v11 = vsel %vm2363_vm3, %v16827_v37, 0.0  ;;  %v8349_v39 = vmul.f32 %v16827_v37, %v16827_v37  ;;  %v8408_v51 = vsel %vm2363_vm3, %v8348_v8, 0.0 }
0x1340   :  { %v8245_v12 = vsel %vm2363_vm3, %v16837_v16, 0.0  ;;  %v8347_v59 = vmul.f32 %v16837_v16, %v16837_v16  ;;  %v8402_v28 = vsel %vm2363_vm3, %v8346_v42, 0.0 }
0x1341   :  { %8240 = vadd.xlane.f32.xlu0 %v8239_v55  ;;  %v8411_v10 = vsel %vm2363_vm3, %v8349_v39, 0.0  ;;  %11484 = vmatpush3.bf16.msra.mxu1 %v11682_v46 }
0x1342   :  { %v8405_v40 = vsel %vm2363_vm3, %v8347_v59, 0.0 }
0x1343   :  { %8231 = vadd.xlane.f32.xlu1 %v8230_v34 }
0x1345   :  { %8234 = vadd.xlane.f32.xlu0 %v8233_v30 }
0x1347   :  { %8397 = vadd.xlane.f32.xlu1 %v8396_v23 }
0x1349   :  { %8400 = vadd.xlane.f32.xlu0 %v8399_v15 }
0x134b   :  { %8391 = vadd.xlane.f32.xlu1 %v8390_v2 }
0x134d   :  { %8394 = vadd.xlane.f32.xlu0 %v8393_v47 }
0x134f   :  { %8249 = vadd.xlane.f32.xlu1 %v8248_v20 }
0x1351   :  { %8252 = vadd.xlane.f32.xlu0 %v8251_v11 }
0x1353   :  { %8243 = vadd.xlane.f32.xlu1 %v8242_v44 }
0x1355   :  { %8246 = vadd.xlane.f32.xlu0 %v8245_v12 }
0x1357   :  { %8409 = vadd.xlane.f32.xlu1 %v8408_v51 }
0x1359   :  { %8412 = vadd.xlane.f32.xlu0 %v8411_v10 }
0x135b   :  { %8403 = vadd.xlane.f32.xlu1 %v8402_v28 }
0x135d   :  { %8406 = vadd.xlane.f32.xlu0 %v8405_v40 }
0x136c   :  { %v6879_v61 = vpop.xlane.xlu1 %6878 }
0x136d   :  { %v6937_v27 = vmul.f32 0.03125, %v6879_v61 }
0x136e   :  { %v6882_v43 = vpop.xlane.xlu0 %6881 }
0x136f   :  { %v16863_v6 = vmul.f32 0.03125, %v6882_v43  ;;  %v7161_v3 = vmul.f32 %v6937_v27, %v6937_v27 }
0x1370   :  { %v6873_v48 = vpop.xlane.xlu1 %6872 }
0x1371   :  { %v6935_v55 = vmul.f32 0.03125, %v6873_v48  ;;  %v7162_v44 = vmul.f32 %v16863_v6, %v16863_v6 }
0x1372   :  { %v6876_v34 = vpop.xlane.xlu0 %6875 }
0x1373   :  { %v6936_v26 = vmul.f32 0.03125, %v6876_v34  ;;  %v7159_v31 = vmul.f32 %v6935_v55, %v6935_v55  ;;  %v7127_v48 = vsub.f32 %v16572_v38, %v6935_v55  ;;  %v7129_v55 = vsub.f32 %v16567_v18, %v6937_v27 }
0x1374   :  { %v7033_v30 = vpop.xlane.xlu1 %7032 }
0x1375   :  { %v7095_v23 = vmul.f32 0.03125, %v7033_v30  ;;  %v7160_v15 = vmul.f32 %v6936_v26, %v6936_v26 }
0x1376   :  { %v7036_v21 = vpop.xlane.xlu0 %7035 }
0x1377   :  { %v7191_v57 = vsub.f32 %v7095_v23, %v7159_v31  ;;  %v7096_v41 = vmul.f32 0.03125, %v7036_v21 }
0x1378   :  { %v7039_v2 = vpop.xlane.xlu1 %7038 }
0x1379   :  { %v7223_v47 = vadd.f32 1e-05, %v7191_v57  ;;  %v7192_v20 = vsub.f32 %v7096_v41, %v7160_v15  ;;  %v7097_v11 = vmul.f32 0.03125, %v7039_v2  ;;  %v7128_v15 = vsub.f32 %v16580_v14, %v6936_v26 }
0x137a   :  { %v7042_v8 = vpop.xlane.xlu0 %7041 }
0x137b   :  { %12263 = vrsqrt.f32 %v7223_v47  ;;  %v7224_v12 = vadd.f32 1e-05, %v7192_v20  ;;  %v7193_v39 = vsub.f32 %v7097_v11, %v7161_v3  ;;  %v7098_v51 = vmul.f32 0.03125, %v7042_v8  ;;  %v16885_v8 = vld [vmem:[%s18394_s2 + $0x9] ss:$0 sm:$0xff] }
0x137c   :  { %v6891_v42 = vpop.xlane.xlu1 %6890 }
0x137d   :  { %12265 = vrsqrt.f32 %v7224_v12  ;;  %v7225_v10 = vadd.f32 1e-05, %v7193_v39  ;;  %v7194_v59 = vsub.f32 %v7098_v51, %v7162_v44  ;;  %v16872_v31 = vmul.f32 0.03125, %v6891_v42 }
0x137e   :  { %v6894_v28 = vpop.xlane.xlu0 %6893 }
0x137f   :  { %12267 = vrsqrt.f32 %v7225_v10  ;;  %v7226_v40 = vadd.f32 1e-05, %v7194_v59  ;;  %v16877_v57 = vmul.f32 0.03125, %v6894_v28  ;;  %v7165_v12 = vmul.f32 %v16872_v31, %v16872_v31 }
0x1380   :  { %v6885_v52 = vpop.xlane.xlu1 %6884  ;;  %v7130_v10 = vsub.f32 %v16575_v24, %v16863_v6 }
0x1381   :  { %12269 = vrsqrt.f32 %v7226_v40  ;;  %v16867_v46 = vmul.f32 0.03125, %v6885_v52  ;;  %v7166_v18 = vmul.f32 %v16877_v57, %v16877_v57 }
0x1382   :  { %v6888_v61 = vpop.xlane.xlu0 %6887 }
0x1383   :  { %v16869_v43 = vmul.f32 0.03125, %v6888_v61  ;;  %v7163_v23 = vmul.f32 %v16867_v46, %v16867_v46 }
0x1384   :  { %v7045_v34 = vpop.xlane.xlu1 %7044 }
0x1385   :  { %v12264_v30 = vpop.eup %12263  ;;  %v7099_v21 = vmul.f32 0.03125, %v7045_v34  ;;  %v7164_v47 = vmul.f32 %v16869_v43, %v16869_v43 }
0x1386   :  { %v7048_v41 = vpop.xlane.xlu0 %7047  ;;  %v7287_v2 = vmul.f32 %v12264_v30, %v7127_v48  ;;  %v16898_v30 = vld [vmem:[%s18394_s2 + $0xa] ss:$0 sm:$0xff] }
0x1387   :  { %v12266_v3 = vpop.eup %12265  ;;  %v7195_v20 = vsub.f32 %v7099_v21, %v7163_v23  ;;  %v7100_v38 = vmul.f32 0.03125, %v7048_v41 }
0x1388   :  { %v7051_v11 = vpop.xlane.xlu1 %7050  ;;  %v7288_v44 = vmul.f32 %v12266_v3, %v7128_v15  ;;  %v7323_v14 = vmul.f32 %v16885_v8, %v7287_v2 }
0x1389   :  { %v12268_v26 = vpop.eup %12267  ;;  %v7227_v39 = vadd.f32 1e-05, %v7195_v20  ;;  %v7196_v51 = vsub.f32 %v7100_v38, %v7164_v47  ;;  %v7101_v42 = vmul.f32 0.03125, %v7051_v11 }
0x138a   :  { %v7054_v27 = vpop.xlane.xlu0 %7053  ;;  %v7324_v59 = vmul.f32 %v16885_v8, %v7288_v44  ;;  %v7289_v28 = vmul.f32 %v12268_v26, %v7129_v55  ;;  %v16901_v24 = vadd.f32 %v16898_v30, %v7323_v14 }
0x138b   :  { %v12270_v40 = vpop.eup %12269  ;;  %12271 = vrsqrt.f32 %v7227_v39  ;;  %v7228_v52 = vadd.f32 1e-05, %v7196_v51  ;;  %v7197_v61 = vsub.f32 %v7101_v42, %v7165_v12  ;;  %v7102_v48 = vmul.f32 0.03125, %v7054_v27 }
0x138c   :  { %v6903_v34 = vpop.xlane.xlu1 %6902  ;;  %v16904_v6 = vadd.f32 %v16898_v30, %v7324_v59  ;;  %v7290_v23 = vmul.f32 %v12270_v40, %v7130_v10  ;;  %v7325_v21 = vmul.f32 %v16885_v8, %v7289_v28  ;;  %v7131_v39 = vsub.f32 %v16611_v4, %v16867_v46 }
0x138d   :  { %12273 = vrsqrt.f32 %v7228_v52  ;;  %v7229_v15 = vadd.f32 1e-05, %v7197_v61  ;;  %v7198_v41 = vsub.f32 %v7102_v48, %v7166_v18  ;;  %v16926_v10 = vmul.f32 0.03125, %v6903_v34 }
0x138e   :  { %v6906_v2 = vpop.xlane.xlu0 %6905  ;;  %v7387_v3 = vpack.c.bf16 %v16904_v6, %v16901_v24  ;;  %v7326_v47 = vmul.f32 %v16885_v8, %v7290_v23  ;;  %v16912_v55 = vadd.f32 %v16898_v30, %v7325_v21  ;;  %v7132_v59 = vsub.f32 %v16616_v62, %v16869_v43 }
0x138f   :  { %12275 = vrsqrt.f32 %v7229_v15  ;;  %v7230_v20 = vadd.f32 1e-05, %v7198_v41  ;;  %v16932_v28 = vmul.f32 0.03125, %v6906_v2  ;;  %v7133_v34 = vsub.f32 %v16601_v13, %v16872_v31 }
0x1390   :  { %v6897_v38 = vpop.xlane.xlu1 %6896  ;;  %11425 = vmatprep.mubr.msk.bf16.mxu1 %vm2363_vm3, %v7387_v3  ;;  %v16915_v11 = vadd.f32 %v16898_v30, %v7326_v47  ;;  %v7169_v62 = vmul.f32 %v16926_v10, %v16926_v10  ;;  %v7134_v47 = vsub.f32 %v16606_v32, %v16877_v57 }
0x1391   :  { %12277 = vrsqrt.f32 %v7230_v20  ;;  %v16917_v44 = vmul.f32 0.03125, %v6897_v38  ;;  %v7170_v20 = vmul.f32 %v16932_v28, %v16932_v28 }
0x1392   :  { %v6900_v14 = vpop.xlane.xlu0 %6899  ;;  %v7388_v26 = vpack.c.bf16 %v16915_v11, %v16912_v55 }
0x1393   :  { %v16921_v12 = vmul.f32 0.03125, %v6900_v14  ;;  %v7167_v18 = vmul.f32 %v16917_v44, %v16917_v44 }
0x1394   :  { %v7057_v51 = vpop.xlane.xlu1 %7056  ;;  %11426 = vmatmul.mubr.msk.bf16.gmra.mrb[240].mxu1 %vm2363_vm3, %v7388_v26 }
0x1395   :  { %v12272_v42 = vpop.eup %12271  ;;  %v7103_v27 = vmul.f32 0.03125, %v7057_v51  ;;  %v7168_v4 = vmul.f32 %v16921_v12, %v16921_v12 }
0x1396   :  { %v7060_v40 = vpop.xlane.xlu0 %7059  ;;  %v7291_v52 = vmul.f32 %v12272_v42, %v7131_v39 }
0x1397   :  { %v12274_v61 = vpop.eup %12273  ;;  %v7199_v46 = vsub.f32 %v7103_v27, %v7167_v18  ;;  %v7104_v48 = vmul.f32 0.03125, %v7060_v40 }
0x1398   :  { %v7063_v23 = vpop.xlane.xlu1 %7062  ;;  %v7292_v21 = vmul.f32 %v12274_v61, %v7132_v59  ;;  %v7327_v15 = vmul.f32 %v16885_v8, %v7291_v52 }
0x1399   :  { %v12276_v41 = vpop.eup %12275  ;;  %v7231_v43 = vadd.f32 1e-05, %v7199_v46  ;;  %v7200_v2 = vsub.f32 %v7104_v48, %v7168_v4  ;;  %v7105_v3 = vmul.f32 0.03125, %v7063_v23 }
0x139a   :  { %v7066_v38 = vpop.xlane.xlu0 %7065  ;;  %v7328_v13 = vmul.f32 %v16885_v8, %v7292_v21  ;;  %v7293_v31 = vmul.f32 %v12276_v41, %v7133_v34  ;;  %v16947_v18 = vadd.f32 %v16898_v30, %v7327_v15 }
0x139b   :  { %v12278_v14 = vpop.eup %12277  ;;  %12279 = vrsqrt.f32 %v7231_v43  ;;  %v7232_v26 = vadd.f32 1e-05, %v7200_v2  ;;  %v7201_v39 = vsub.f32 %v7105_v3, %v7169_v62  ;;  %v7106_v51 = vmul.f32 0.03125, %v7066_v38 }
0x139c   :  { %v6915_v42 = vpop.xlane.xlu1 %6914  ;;  %v16950_v27 = vadd.f32 %v16898_v30, %v7328_v13  ;;  %v7294_v32 = vmul.f32 %v12278_v14, %v7134_v47  ;;  %v7329_v57 = vmul.f32 %v16885_v8, %v7293_v31  ;;  %v7135_v43 = vsub.f32 %v16647_v50, %v16917_v44 }
0x139d   :  { %12281 = vrsqrt.f32 %v7232_v26  ;;  %v7233_v59 = vadd.f32 1e-05, %v7201_v39  ;;  %v7202_v40 = vsub.f32 %v7106_v51, %v7170_v20  ;;  %v16972_v47 = vmul.f32 0.03125, %v6915_v42 }
0x139e   :  { %v6918_v52 = vpop.xlane.xlu0 %6917  ;;  %v7389_v61 = vpack.c.bf16 %v16950_v27, %v16947_v18  ;;  %v7330_v4 = vmul.f32 %v16885_v8, %v7294_v32  ;;  %v16958_v34 = vadd.f32 %v16898_v30, %v7329_v57  ;;  %v7136_v13 = vsub.f32 %v16652_v29, %v16921_v12 }
0x139f   :  { %12283 = vrsqrt.f32 %v7233_v59  ;;  %v7234_v46 = vadd.f32 1e-05, %v7202_v40  ;;  %v16978_v31 = vmul.f32 0.03125, %v6918_v52  ;;  %v7137_v42 = vsub.f32 %v16637_v5, %v16926_v10 }
0x13a0   :  { %11429 = vmatprep.mubr.msk.bf16.mxu1 %vm2363_vm3, %v7389_v61  ;;  %v6909_v48 = vpop.xlane.xlu1 %6908  ;;  %v16961_v23 = vadd.f32 %v16898_v30, %v7330_v4  ;;  %v7173_v29 = vmul.f32 %v16972_v47, %v16972_v47  ;;  %v7138_v4 = vsub.f32 %v16642_v22, %v16932_v28 }
0x13a1   :  { %12285 = vrsqrt.f32 %v7234_v46  ;;  %v16963_v21 = vmul.f32 0.03125, %v6909_v48  ;;  %v7174_v46 = vmul.f32 %v16978_v31, %v16978_v31 }
0x13a2   :  { %v6912_v15 = vpop.xlane.xlu0 %6911  ;;  %v7390_v41 = vpack.c.bf16 %v16961_v23, %v16958_v34 }
0x13a3   :  { %v16967_v62 = vmul.f32 0.03125, %v6912_v15  ;;  %v7171_v20 = vmul.f32 %v16963_v21, %v16963_v21 }
0x13a4   :  { %11430 = vmatmul.mubr.msk.bf16.gmra.mrb[244].mxu1 %vm2363_vm3, %v7390_v41  ;;  %v7069_v2 = vpop.xlane.xlu1 %7068 }
0x13a5   :  { %v12280_v3 = vpop.eup %12279  ;;  %v7107_v38 = vmul.f32 0.03125, %v7069_v2  ;;  %v7172_v50 = vmul.f32 %v16967_v62, %v16967_v62 }
0x13a6   :  { %v7072_v14 = vpop.xlane.xlu0 %7071  ;;  %v7295_v26 = vmul.f32 %v12280_v3, %v7135_v43 }
0x13a7   :  { %v12282_v39 = vpop.eup %12281  ;;  %v7203_v44 = vsub.f32 %v7107_v38, %v7171_v20  ;;  %v7108_v51 = vmul.f32 0.03125, %v7072_v14 }
0x13a8   :  { %v7075_v32 = vpop.xlane.xlu1 %7074  ;;  %v7296_v57 = vmul.f32 %v12282_v39, %v7136_v13  ;;  %v7331_v59 = vmul.f32 %v16885_v8, %v7295_v26 }
0x13a9   :  { %v12284_v40 = vpop.eup %12283  ;;  %v7235_v12 = vadd.f32 1e-05, %v7203_v44  ;;  %v7204_v52 = vsub.f32 %v7108_v51, %v7172_v50  ;;  %v7109_v61 = vmul.f32 0.03125, %v7075_v32 }
0x13aa   :  { %v7078_v48 = vpop.xlane.xlu0 %7077  ;;  %v7332_v5 = vmul.f32 %v16885_v8, %v7296_v57  ;;  %v7297_v10 = vmul.f32 %v12284_v40, %v7137_v42  ;;  %v16993_v20 = vadd.f32 %v16898_v30, %v7331_v59 }
0x13ab   :  { %v12286_v15 = vpop.eup %12285  ;;  %12287 = vrsqrt.f32 %v7235_v12  ;;  %v7236_v41 = vadd.f32 1e-05, %v7204_v52  ;;  %v7205_v43 = vsub.f32 %v7109_v61, %v7173_v29  ;;  %v7110_v2 = vmul.f32 0.03125, %v7078_v48 }
0x13ac   :  { %v8214_v3 = vpop.xlane.xlu1 %8213  ;;  %v16996_v38 = vadd.f32 %v16898_v30, %v7332_v5  ;;  %v7298_v22 = vmul.f32 %v12286_v15, %v7138_v4  ;;  %v7333_v28 = vmul.f32 %v16885_v8, %v7297_v10  ;;  %v7139_v12 = vsub.f32 %v16683_v19, %v16963_v21 }
0x13ad   :  { %12289 = vrsqrt.f32 %v7236_v41  ;;  %v7237_v13 = vadd.f32 1e-05, %v7205_v43  ;;  %v7206_v14 = vsub.f32 %v7110_v2, %v7174_v46  ;;  %v17009_v57 = vmul.f32 0.03125, %v8214_v3 }
0x13ae   :  { %v8217_v26 = vpop.xlane.xlu0 %8216  ;;  %v7391_v39 = vpack.c.bf16 %v16996_v38, %v16993_v20  ;;  %v7334_v50 = vmul.f32 %v16885_v8, %v7298_v22  ;;  %v17004_v42 = vadd.f32 %v16898_v30, %v7333_v28  ;;  %v7140_v5 = vsub.f32 %v16688_v36, %v16967_v62 }
0x13af   :  { %12291 = vrsqrt.f32 %v7237_v13  ;;  %v7238_v44 = vadd.f32 1e-05, %v7206_v14  ;;  %v17013_v29 = vmul.f32 0.03125, %v8217_v26  ;;  %v8528_v4 = vmul.f32 %v17009_v57, %v17009_v57 }
0x13b0   :  { %11433 = vmatprep.mubr.msk.bf16.mxu1 %vm2363_vm3, %v7391_v39  ;;  %v8208_v51 = vpop.xlane.xlu1 %8207  ;;  %v17007_v32 = vadd.f32 %v16898_v30, %v7334_v50  ;;  %v7141_v3 = vsub.f32 %v16673_v63, %v16972_v47  ;;  %v7142_v50 = vsub.f32 %v16678_v56, %v16978_v31 }
0x13b1   :  { %12293 = vrsqrt.f32 %v7238_v44  ;;  %v17020_v46 = vmul.f32 0.03125, %v8208_v51  ;;  %v8529_v19 = vmul.f32 %v17013_v29, %v17013_v29 }
0x13b2   :  { %v8211_v59 = vpop.xlane.xlu0 %8210  ;;  %v7392_v40 = vpack.c.bf16 %v17007_v32, %v17004_v42 }
0x13b3   :  { %v17024_v10 = vmul.f32 0.03125, %v8211_v59  ;;  %v8526_v36 = vmul.f32 %v17020_v46, %v17020_v46 }
0x13b4   :  { %11434 = vmatmul.mubr.msk.bf16.gmra.mrb[248].mxu1 %vm2363_vm3, %v7392_v40  ;;  %v8374_v52 = vpop.xlane.xlu1 %8373 }
0x13b5   :  { %v12288_v61 = vpop.eup %12287  ;;  %v8464_v48 = vmul.f32 0.03125, %v8374_v52  ;;  %v8527_v44 = vmul.f32 %v17024_v10, %v17024_v10 }
0x13b6   :  { %v8377_v15 = vpop.xlane.xlu0 %8376  ;;  %v7299_v41 = vmul.f32 %v12288_v61, %v7139_v12 }
0x13b7   :  { %v12290_v43 = vpop.eup %12289  ;;  %v8560_v21 = vsub.f32 %v8464_v48, %v8528_v4  ;;  %v8465_v2 = vmul.f32 0.03125, %v8377_v15 }
0x13b8   :  { %v8368_v22 = vpop.xlane.xlu1 %8367  ;;  %v7300_v28 = vmul.f32 %v12290_v43, %v7140_v5  ;;  %v7335_v13 = vmul.f32 %v16885_v8, %v7299_v41 }
0x13b9   :  { %v12292_v14 = vpop.eup %12291  ;;  %v8592_v62 = vadd.f32 1e-05, %v8560_v21  ;;  %v8561_v26 = vsub.f32 %v8465_v2, %v8529_v19  ;;  %v8462_v39 = vmul.f32 0.03125, %v8368_v22 }
0x13ba   :  { %v8371_v51 = vpop.xlane.xlu0 %8370  ;;  %v7336_v63 = vmul.f32 %v16885_v8, %v7300_v28  ;;  %v7301_v47 = vmul.f32 %v12292_v14, %v7141_v3  ;;  %v17039_v61 = vadd.f32 %v16898_v30, %v7335_v13 }
0x13bb   :  { %v12294_v59 = vpop.eup %12293  ;;  %v8593_v40 = vadd.f32 1e-05, %v8561_v26  ;;  %v8558_v12 = vsub.f32 %v8462_v39, %v8526_v36  ;;  %v8463_v52 = vmul.f32 0.03125, %v8371_v51  ;;  %12295 = vrsqrt.f32 %v8592_v62 }
0x13bc   :  { %v8226_v4 = vpop.xlane.xlu1 %8225  ;;  %v17042_v48 = vadd.f32 %v16898_v30, %v7336_v63  ;;  %v7302_v56 = vmul.f32 %v12294_v59, %v7142_v50  ;;  %v7337_v31 = vmul.f32 %v16885_v8, %v7301_v47  ;;  %v8497_v50 = vsub.f32 %v16719_v33, %v17013_v29 }
0x13bd   :  { %12297 = vrsqrt.f32 %v8593_v40  ;;  %v8590_v5 = vadd.f32 1e-05, %v8558_v12  ;;  %v8559_v15 = vsub.f32 %v8463_v52, %v8527_v44  ;;  %v17055_v28 = vmul.f32 0.03125, %v8226_v4 }
0x13be   :  { %v8229_v41 = vpop.xlane.xlu0 %8228  ;;  %v7393_v43 = vpack.c.bf16 %v17042_v48, %v17039_v61  ;;  %v7338_v19 = vmul.f32 %v16885_v8, %v7302_v56  ;;  %v17050_v3 = vadd.f32 %v16898_v30, %v7337_v31  ;;  %v8496_v47 = vsub.f32 %v16714_v53, %v17009_v57  ;;  %v17083_v57 = vld [vmem:[%s18394_s2 + $0xd] ss:$0 sm:$0xff] }
0x13bf   :  { %12299 = vrsqrt.f32 %v8590_v5  ;;  %v8591_v21 = vadd.f32 1e-05, %v8559_v15  ;;  %v17059_v36 = vmul.f32 0.03125, %v8229_v41  ;;  %v8532_v26 = vmul.f32 %v17055_v28, %v17055_v28 }
0x13c0   :  { %v8220_v2 = vpop.xlane.xlu1 %8219  ;;  %11437 = vmatprep.mubr.msk.bf16.mxu1 %vm2363_vm3, %v7393_v43  ;;  %v17053_v22 = vadd.f32 %v16898_v30, %v7338_v19  ;;  %v8494_v52 = vsub.f32 %v16724_v9, %v17020_v46  ;;  %v8495_v53 = vsub.f32 %v16729_v60, %v17024_v10 }
0x13c1   :  { %12301 = vrsqrt.f32 %v8591_v21  ;;  %v17061_v8 = vmul.f32 0.03125, %v8220_v2  ;;  %v8533_v59 = vmul.f32 %v17059_v36, %v17059_v36 }
0x13c2   :  { %v8223_v13 = vpop.xlane.xlu0 %8222  ;;  %v7394_v14 = vpack.c.bf16 %v17053_v22, %v17050_v3 }
0x13c3   :  { %v17068_v44 = vmul.f32 0.03125, %v8223_v13  ;;  %v8530_v56 = vmul.f32 %v17061_v8, %v17061_v8 }
0x13c4   :  { %v8386_v62 = vpop.xlane.xlu1 %8385  ;;  %11438 = vmatmul.mubr.msk.bf16.gmra.mrb[252].mxu1 %vm2363_vm3, %v7394_v14 }
0x13c5   :  { %v8468_v39 = vmul.f32 0.03125, %v8386_v62  ;;  %v12296_v30 = vpop.eup %12295  ;;  %v8531_v9 = vmul.f32 %v17068_v44, %v17068_v44 }
0x13c6   :  { %v8389_v51 = vpop.xlane.xlu0 %8388  ;;  %v8656_v31 = vmul.f32 %v12296_v30, %v8496_v47 }
0x13c7   :  { %v12298_v63 = vpop.eup %12297  ;;  %v8564_v40 = vsub.f32 %v8468_v39, %v8532_v26  ;;  %v8469_v12 = vmul.f32 0.03125, %v8389_v51 }
0x13c8   :  { %v8657_v4 = vmul.f32 %v12298_v63, %v8497_v50  ;;  %v8380_v33 = vpop.xlane.xlu1 %8379  ;;  %v8692_v10 = vmul.f32 %v17083_v57, %v8656_v31  ;;  %v17093_v50 = vld [vmem:[%s18394_s2 + $0xe] ss:$0 sm:$0xff] }
0x13c9   :  { %v12300_v29 = vpop.eup %12299  ;;  %v8596_v5 = vadd.f32 1e-05, %v8564_v40  ;;  %v8565_v15 = vsub.f32 %v8469_v12, %v8533_v59  ;;  %v8466_v41 = vmul.f32 0.03125, %v8380_v33 }
0x13ca   :  { %v8383_v46 = vpop.xlane.xlu0 %8382  ;;  %v8654_v43 = vmul.f32 %v12300_v29, %v8494_v52  ;;  %v8693_v21 = vmul.f32 %v17083_v57, %v8657_v4  ;;  %v8728_v4 = vadd.f32 %v17093_v50, %v8692_v10 }
0x13cb   :  { %v12302_v19 = vpop.eup %12301  ;;  %v8597_v2 = vadd.f32 1e-05, %v8565_v15  ;;  %v8562_v13 = vsub.f32 %v8466_v41, %v8530_v56  ;;  %v8467_v14 = vmul.f32 0.03125, %v8383_v46  ;;  %12303 = vrsqrt.f32 %v8596_v5 }
0x13cc   :  { %v8238_v62 = vpop.xlane.xlu1 %8237  ;;  %v8655_v26 = vmul.f32 %v12302_v19, %v8495_v53  ;;  %v8690_v60 = vmul.f32 %v17083_v57, %v8654_v43  ;;  %v8729_v47 = vadd.f32 %v17093_v50, %v8693_v21  ;;  %v8501_v43 = vsub.f32 %v16755_v35, %v17059_v36 }
0x13cd   :  { %12305 = vrsqrt.f32 %v8597_v2  ;;  %v8594_v39 = vadd.f32 1e-05, %v8562_v13  ;;  %v8563_v30 = vsub.f32 %v8467_v14, %v8531_v9  ;;  %v17100_v56 = vmul.f32 0.03125, %v8238_v62 }
0x13ce   :  { %v8241_v51 = vpop.xlane.xlu0 %8240  ;;  %v8691_v63 = vmul.f32 %v17083_v57, %v8655_v26  ;;  %v8726_v12 = vadd.f32 %v17093_v50, %v8690_v60  ;;  %v8763_v31 = vpack.c.bf16 %v8729_v47, %v8728_v4  ;;  %v8500_v13 = vsub.f32 %v16750_v45, %v17055_v28 }
0x13cf   :  { %12307 = vrsqrt.f32 %v8594_v39  ;;  %v8595_v59 = vadd.f32 1e-05, %v8563_v30  ;;  %v17102_v5 = vmul.f32 0.03125, %v8241_v51  ;;  %v8536_v53 = vmul.f32 %v17100_v56, %v17100_v56 }
0x13d0   :  { %v8232_v40 = vpop.xlane.xlu1 %8231  ;;  %v8727_v52 = vadd.f32 %v17093_v50, %v8691_v63  ;;  %v8498_v60 = vsub.f32 %v16760_v17, %v17061_v8  ;;  %v8499_v45 = vsub.f32 %v16765_v25, %v17068_v44 }
0x13d1   :  { %12309 = vrsqrt.f32 %v8595_v59  ;;  %v17104_v15 = vmul.f32 0.03125, %v8232_v40  ;;  %v8537_v14 = vmul.f32 %v17102_v5, %v17102_v5 }
0x13d2   :  { %v8235_v33 = vpop.xlane.xlu0 %8234  ;;  %v8762_v29 = vpack.c.bf16 %v8727_v52, %v8726_v12 }
0x13d3   :  { %v17112_v19 = vmul.f32 0.03125, %v8235_v33  ;;  %v8534_v39 = vmul.f32 %v17104_v15, %v17104_v15 }
0x13d4   :  { %v8398_v41 = vpop.xlane.xlu1 %8397  ;;  %11485 = vmatprep.mubr.msk.bf16.mxu1 %vm2363_vm3, %v8762_v29 }
0x13d5   :  { %v8472_v9 = vmul.f32 0.03125, %v8398_v41  ;;  %11486 = vmatmul.mubr.msk.bf16.vlgmr.msra.gmra.mrb[0].mxu1 %vm2363_vm3, %v8763_v31  ;;  %v12304_v46 = vpop.eup %12303  ;;  %v8535_v28 = vmul.f32 %v17112_v19, %v17112_v19 }
0x13d6   :  { %v8401_v21 = vpop.xlane.xlu0 %8400  ;;  %v8660_v30 = vmul.f32 %v12304_v46, %v8500_v13 }
0x13d7   :  { %v12306_v2 = vpop.eup %12305  ;;  %v8568_v62 = vsub.f32 %v8472_v9, %v8536_v53  ;;  %v8473_v26 = vmul.f32 0.03125, %v8401_v21 }
0x13d8   :  { %v8661_v10 = vmul.f32 %v12306_v2, %v8501_v43  ;;  %v8392_v35 = vpop.xlane.xlu1 %8391  ;;  %v8696_v41 = vmul.f32 %v17083_v57, %v8660_v30 }
0x13d9   :  { %v12308_v36 = vpop.eup %12307  ;;  %v8600_v51 = vadd.f32 1e-05, %v8568_v62  ;;  %v8569_v63 = vsub.f32 %v8473_v26, %v8537_v14  ;;  %v8470_v47 = vmul.f32 0.03125, %v8392_v35 }
0x13da   :  { %v8395_v59 = vpop.xlane.xlu0 %8394  ;;  %v8658_v40 = vmul.f32 %v12308_v36, %v8498_v60  ;;  %v8697_v17 = vmul.f32 %v17083_v57, %v8661_v10  ;;  %v8732_v14 = vadd.f32 %v17093_v50, %v8696_v41 }
0x13db   :  { %v12310_v12 = vpop.eup %12309  ;;  %v8601_v8 = vadd.f32 1e-05, %v8569_v63  ;;  %v8566_v52 = vsub.f32 %v8470_v47, %v8534_v39  ;;  %v8471_v4 = vmul.f32 0.03125, %v8395_v59  ;;  %12311 = vrsqrt.f32 %v8600_v51 }
0x13dc   :  { %v8250_v33 = vpop.xlane.xlu1 %8249  ;;  %v8659_v29 = vmul.f32 %v12310_v12, %v8499_v45  ;;  %v8694_v31 = vmul.f32 %v17083_v57, %v8658_v40  ;;  %v8733_v46 = vadd.f32 %v17093_v50, %v8697_v17  ;;  %v8505_v47 = vsub.f32 %v16791_v49, %v17102_v5 }
0x13dd   :  { %12313 = vrsqrt.f32 %v8601_v8  ;;  %v8598_v25 = vadd.f32 1e-05, %v8566_v52  ;;  %v8567_v44 = vsub.f32 %v8471_v4, %v8535_v28  ;;  %v17134_v62 = vmul.f32 0.03125, %v8250_v33 }
0x13de   :  { %v8253_v53 = vpop.xlane.xlu0 %8252  ;;  %v8695_v9 = vmul.f32 %v17083_v57, %v8659_v29  ;;  %v8730_v2 = vadd.f32 %v17093_v50, %v8694_v31  ;;  %v8765_v10 = vpack.c.bf16 %v8733_v46, %v8732_v14  ;;  %v8504_v40 = vsub.f32 %v16786_v58, %v17100_v56 }
0x13df   :  { %12315 = vrsqrt.f32 %v8598_v25  ;;  %v8599_v43 = vadd.f32 1e-05, %v8567_v44  ;;  %v8317_v39 = vmul.f32 0.03125, %v8253_v53  ;;  %v8540_v30 = vmul.f32 %v17134_v62, %v17134_v62 }
0x13e0   :  { %v8244_v21 = vpop.xlane.xlu1 %8243  ;;  %v8731_v13 = vadd.f32 %v17093_v50, %v8695_v9  ;;  %v8502_v52 = vsub.f32 %v16796_v0, %v17104_v15  ;;  %v8503_v5 = vsub.f32 %v16801_v1, %v17112_v19 }
0x13e1   :  { %12317 = vrsqrt.f32 %v8599_v43  ;;  %v8314_v35 = vmul.f32 0.03125, %v8244_v21  ;;  %v8541_v12 = vmul.f32 %v8317_v39, %v8317_v39 }
0x13e2   :  { %v8247_v26 = vpop.xlane.xlu0 %8246  ;;  %v8764_v60 = vpack.c.bf16 %v8731_v13, %v8730_v2 }
0x13e3   :  { %v8315_v45 = vmul.f32 0.03125, %v8247_v26  ;;  %v8538_v33 = vmul.f32 %v8314_v35, %v8314_v35 }
0x13e4   :  { %v8410_v36 = vpop.xlane.xlu1 %8409  ;;  %11489 = vmatprep.mubr.msk.bf16.mxu1 %vm2363_vm3, %v8764_v60 }
0x13e5   :  { %v8476_v51 = vmul.f32 0.03125, %v8410_v36  ;;  %11490 = vmatmul.mubr.msk.bf16.gmra.mrb[4].mxu1 %vm2363_vm3, %v8765_v10  ;;  %v12312_v63 = vpop.eup %12311  ;;  %v8539_v53 = vmul.f32 %v8315_v45, %v8315_v45 }
0x13e6   :  { %v8413_v28 = vpop.xlane.xlu0 %8412  ;;  %v8664_v41 = vmul.f32 %v12312_v63, %v8504_v40  ;;  %v8508_v40 = vsub.f32 %v16822_v54, %v17134_v62 }
0x13e7   :  { %v12314_v59 = vpop.eup %12313  ;;  %v8572_v17 = vsub.f32 %v8476_v51, %v8540_v30  ;;  %v8477_v8 = vmul.f32 0.03125, %v8413_v28  ;;  %v8509_v28 = vsub.f32 %v16827_v37, %v8317_v39 }
0x13e8   :  { %v8665_v4 = vmul.f32 %v12314_v59, %v8505_v47  ;;  %v8404_v29 = vpop.xlane.xlu1 %8403  ;;  %v8700_v13 = vmul.f32 %v17083_v57, %v8664_v41 }
0x13e9   :  { %v12316_v31 = vpop.eup %12315  ;;  %v8604_v25 = vadd.f32 1e-05, %v8572_v17  ;;  %v8573_v44 = vsub.f32 %v8477_v8, %v8541_v12  ;;  %v8474_v49 = vmul.f32 0.03125, %v8404_v29  ;;  %v8506_v12 = vsub.f32 %v16832_v7, %v8314_v35 }
0x13ea   :  { %v8407_v9 = vpop.xlane.xlu0 %8406  ;;  %v8662_v58 = vmul.f32 %v12316_v31, %v8502_v52  ;;  %v8701_v46 = vmul.f32 %v17083_v57, %v8665_v4  ;;  %v8736_v30 = vadd.f32 %v17093_v50, %v8700_v13  ;;  %v8507_v4 = vsub.f32 %v16837_v16, %v8315_v45 }
0x13eb   :  { %v12318_v56 = vpop.eup %12317  ;;  %v8605_v43 = vadd.f32 1e-05, %v8573_v44  ;;  %v8570_v21 = vsub.f32 %v8474_v49, %v8538_v33  ;;  %v8475_v0 = vmul.f32 0.03125, %v8407_v9  ;;  %12319 = vrsqrt.f32 %v8604_v25  ;;  %v17176_v49 = vld [vmem:[%s18394_s2 + $0xb] ss:$0 sm:$0xff] }
0x13ec   :  { %v8663_v15 = vmul.f32 %v12318_v56, %v8503_v5  ;;  %v8698_v2 = vmul.f32 %v17083_v57, %v8662_v58  ;;  %v8737_v19 = vadd.f32 %v17093_v50, %v8701_v46 }
0x13ed   :  { %12321 = vrsqrt.f32 %v8605_v43  ;;  %v8602_v14 = vadd.f32 1e-05, %v8570_v21  ;;  %v8571_v26 = vsub.f32 %v8475_v0, %v8539_v53 }
0x13ee   :  { %v8699_v1 = vmul.f32 %v17083_v57, %v8663_v15  ;;  %v8734_v10 = vadd.f32 %v17093_v50, %v8698_v2  ;;  %v8767_v63 = vpack.c.bf16 %v8737_v19, %v8736_v30 }
0x13ef   :  { %12323 = vrsqrt.f32 %v8602_v14  ;;  %v8603_v60 = vadd.f32 1e-05, %v8571_v26 }
0x13f0   :  { %v8735_v36 = vadd.f32 %v17093_v50, %v8699_v1 }
0x13f1   :  { %12325 = vrsqrt.f32 %v8603_v60 }
0x13f2   :  { %v8766_v51 = vpack.c.bf16 %v8735_v36, %v8734_v10 }
0x13f4   :  { %11493 = vmatprep.mubr.msk.bf16.mxu1 %vm2363_vm3, %v8766_v51 }
0x13f5   :  { %11494 = vmatmul.mubr.msk.bf16.gmra.mrb[8].mxu1 %vm2363_vm3, %v8767_v63  ;;  %v12320_v47 = vpop.eup %12319 }
0x13f6   :  { %v8668_v52 = vmul.f32 %v12320_v47, %v8508_v40 }
0x13f7   :  { %v12322_v59 = vpop.eup %12321 }
0x13f8   :  { %v8669_v17 = vmul.f32 %v12322_v59, %v8509_v28  ;;  %v8704_v37 = vmul.f32 %v17083_v57, %v8668_v52 }
0x13f9   :  { %v12324_v8 = vpop.eup %12323 }
0x13fa   :  { %v8666_v33 = vmul.f32 %v12324_v8, %v8506_v12  ;;  %v8705_v31 = vmul.f32 %v17083_v57, %v8669_v17  ;;  %v8740_v35 = vadd.f32 %v17093_v50, %v8704_v37 }
0x13fb   :  { %v12326_v29 = vpop.eup %12325 }
0x13fc   :  { %v8667_v41 = vmul.f32 %v12326_v29, %v8507_v4  ;;  %v8702_v25 = vmul.f32 %v17083_v57, %v8666_v33  ;;  %v8741_v54 = vadd.f32 %v17093_v50, %v8705_v31 }
0x13fe   :  { %v8703_v39 = vmul.f32 %v17083_v57, %v8667_v41  ;;  %v8738_v7 = vadd.f32 %v17093_v50, %v8702_v25  ;;  %v8769_v45 = vpack.c.bf16 %v8741_v54, %v8740_v35 }
0x1400   :  { %v8739_v62 = vadd.f32 %v17093_v50, %v8703_v39 }
0x1402   :  { %v8768_v16 = vpack.c.bf16 %v8739_v62, %v8738_v7 }
0x1404   :  { %11497 = vmatprep.mubr.msk.bf16.mxu1 %vm2363_vm3, %v8768_v16 }
0x1405   :  { %11498 = vmatmul.mubr.msk.bf16.gmra.mrb[12].mxu1 %vm2363_vm3, %v8769_v45 }
0x1467   :  { %v11427_v44 = vpop.f32.mrb[240].mxu1 }
0x1468   :  { %v17179_v57 = vadd.f32 %v17176_v49, %v11427_v44  ;;  %v7558_v5 = vpop.f32.mrb[241].mxu1 }
0x1469   :  { %v17182_v53 = vadd.f32 %v17176_v49, %v7558_v5  ;;  %v11428_v50 = vpop.f32.mrb[242].mxu1 }
0x146a   :  { %v7639_v9 = vmul.f32 %v17179_v57, %v17179_v57  ;;  %v17187_v58 = vadd.f32 %v17176_v49, %v11428_v50  ;;  %v7561_v56 = vpop.f32.mrb[243].mxu1 }
0x146b   :  { %v7637_v46 = vmul.f32 %v17182_v53, %v17182_v53  ;;  %v17192_v43 = vadd.f32 %v17176_v49, %v7561_v56 }
0x146c   :  { %v7671_v21 = vmul.f32 %v7639_v9, %v17179_v57  ;;  %v7640_v0 = vmul.f32 %v17187_v58, %v17187_v58 }
0x146d   :  { %v7669_v15 = vmul.f32 %v7637_v46, %v17182_v53  ;;  %v7638_v2 = vmul.f32 %v17192_v43, %v17192_v43 }
0x146e   :  { %v7703_v13 = vmul.f32 0.044715, %v7671_v21  ;;  %v7672_v14 = vmul.f32 %v7640_v0, %v17187_v58 }
0x146f   :  { %v7701_v26 = vmul.f32 0.044715, %v7669_v15  ;;  %v7670_v1 = vmul.f32 %v7638_v2, %v17192_v43 }
0x1470   :  { %v7735_v19 = vadd.f32 %v7703_v13, %v17179_v57  ;;  %v7704_v60 = vmul.f32 0.044715, %v7672_v14 }
0x1471   :  { %v7733_v10 = vadd.f32 %v7701_v26, %v17182_v53  ;;  %v7702_v36 = vmul.f32 0.044715, %v7670_v1 }
0x1472   :  { %v7767_v30 = vmul.f32 0.7978846, %v7735_v19  ;;  %v7736_v51 = vadd.f32 %v7704_v60, %v17187_v58 }
0x1473   :  { %v7765_v63 = vmul.f32 0.7978846, %v7733_v10  ;;  %v7734_v47 = vadd.f32 %v7702_v36, %v17192_v43 }
0x1474   :  { %12327 = vtanh.f32 %v7767_v30  ;;  %v7768_v28 = vmul.f32 0.7978846, %v7736_v51 }
0x1475   :  { %12329 = vtanh.f32 %v7765_v63  ;;  %v7766_v59 = vmul.f32 0.7978846, %v7734_v47 }
0x1476   :  { %12331 = vtanh.f32 %v7768_v28 }
0x1477   :  { %12333 = vtanh.f32 %v7766_v59  ;;  %v11431_v40 = vpop.f32.mrb[244].mxu1 }
0x1478   :  { %v17207_v12 = vadd.f32 %v17176_v49, %v11431_v40  ;;  %v7574_v17 = vpop.f32.mrb[245].mxu1 }
0x1479   :  { %v17210_v8 = vadd.f32 %v17176_v49, %v7574_v17  ;;  %v11432_v52 = vpop.f32.mrb[246].mxu1 }
0x147a   :  { %v7643_v4 = vmul.f32 %v17207_v12, %v17207_v12  ;;  %v17215_v33 = vadd.f32 %v17176_v49, %v11432_v52  ;;  %v7577_v29 = vpop.f32.mrb[247].mxu1 }
0x147b   :  { %v7641_v31 = vmul.f32 %v17210_v8, %v17210_v8  ;;  %v17220_v41 = vadd.f32 %v17176_v49, %v7577_v29 }
0x147c   :  { %v7675_v25 = vmul.f32 %v7643_v4, %v17207_v12  ;;  %v7644_v37 = vmul.f32 %v17215_v33, %v17215_v33 }
0x147d   :  { %v7673_v39 = vmul.f32 %v7641_v31, %v17210_v8  ;;  %v7642_v54 = vmul.f32 %v17220_v41, %v17220_v41 }
0x147e   :  { %v12328_v7 = vpop.eup %12327  ;;  %v7707_v62 = vmul.f32 0.044715, %v7675_v25  ;;  %v7676_v35 = vmul.f32 %v7644_v37, %v17215_v33 }
0x147f   :  { %v12330_v16 = vpop.eup %12329  ;;  %v7831_v45 = vadd.f32 1.0, %v12328_v7  ;;  %v7705_v44 = vmul.f32 0.044715, %v7673_v39  ;;  %v7674_v5 = vmul.f32 %v7642_v54, %v17220_v41 }
0x1480   :  { %v12332_v50 = vpop.eup %12331  ;;  %v7829_v9 = vadd.f32 1.0, %v12330_v16  ;;  %v7739_v56 = vadd.f32 %v7707_v62, %v17207_v12  ;;  %v7708_v46 = vmul.f32 0.044715, %v7676_v35 }
0x1481   :  { %v12334_v21 = vpop.eup %12333  ;;  %v7863_v0 = vmul.f32 0.5, %v7831_v45  ;;  %v7832_v15 = vadd.f32 1.0, %v12332_v50  ;;  %v7737_v2 = vadd.f32 %v7705_v44, %v17210_v8  ;;  %v7706_v13 = vmul.f32 0.044715, %v7674_v5 }
0x1482   :  { %v7861_v14 = vmul.f32 0.5, %v7829_v9  ;;  %v7830_v26 = vadd.f32 1.0, %v12334_v21  ;;  %v7771_v1 = vmul.f32 0.7978846, %v7739_v56  ;;  %v7740_v19 = vadd.f32 %v7708_v46, %v17215_v33 }
0x1483   :  { %v7864_v60 = vmul.f32 0.5, %v7832_v15  ;;  %v7769_v10 = vmul.f32 0.7978846, %v7737_v2  ;;  %v7738_v36 = vadd.f32 %v7706_v13, %v17220_v41  ;;  %v7895_v63 = vmul.f32 %v7863_v0, %v17179_v57 }
0x1484   :  { %v7862_v30 = vmul.f32 0.5, %v7830_v26  ;;  %12335 = vtanh.f32 %v7771_v1  ;;  %v7772_v51 = vmul.f32 0.7978846, %v7740_v19  ;;  %v7893_v59 = vmul.f32 %v7861_v14, %v17182_v53 }
0x1485   :  { %v7896_v47 = vmul.f32 %v7864_v60, %v17187_v58  ;;  %12337 = vtanh.f32 %v7769_v10  ;;  %v7770_v28 = vmul.f32 0.7978846, %v7738_v36 }
0x1486   :  { %v7894_v40 = vmul.f32 %v7862_v30, %v17192_v43  ;;  %12339 = vtanh.f32 %v7772_v51 }
0x1487   :  { %v7926_v17 = vpack.c.bf16 %v7896_v47, %v7895_v63  ;;  %12341 = vtanh.f32 %v7770_v28  ;;  %v11435_v52 = vpop.f32.mrb[248].mxu1 }
0x1488   :  { %v17239_v4 = vadd.f32 %v17176_v49, %v11435_v52  ;;  %v7590_v29 = vpop.f32.mrb[249].mxu1  ;;  %v7925_v31 = vpack.c.bf16 %v7894_v40, %v7893_v59 }
0x1489   :  { %v17242_v25 = vadd.f32 %v17176_v49, %v7590_v29  ;;  %v11436_v57 = vpop.f32.mrb[250].mxu1 }
0x148a   :  { %v7647_v58 = vmul.f32 %v17239_v4, %v17239_v4  ;;  %v17247_v53 = vadd.f32 %v17176_v49, %v11436_v57  ;;  %v7593_v43 = vpop.f32.mrb[251].mxu1  ;;  %11465 = vmatprep.mubr.msk.bf16.mxu0 %vm7962_vm4, %v7925_v31 }
0x148b   :  { %v7645_v37 = vmul.f32 %v17242_v25, %v17242_v25  ;;  %v17253_v39 = vadd.f32 %v17176_v49, %v7593_v43  ;;  %11466 = vmatmul.mubr.msk.bf16.gmra.mrb[16].mxu0 %vm7962_vm4, %v7926_v17 }
0x148c   :  { %v7679_v54 = vmul.f32 %v7647_v58, %v17239_v4  ;;  %v7648_v7 = vmul.f32 %v17247_v53, %v17247_v53 }
0x148d   :  { %v7677_v62 = vmul.f32 %v7645_v37, %v17242_v25  ;;  %v7646_v35 = vmul.f32 %v17253_v39, %v17253_v39 }
0x148e   :  { %v12336_v16 = vpop.eup %12335  ;;  %v7711_v45 = vmul.f32 0.044715, %v7679_v54  ;;  %v7680_v44 = vmul.f32 %v7648_v7, %v17247_v53 }
0x148f   :  { %v12338_v5 = vpop.eup %12337  ;;  %v7835_v50 = vadd.f32 1.0, %v12336_v16  ;;  %v7709_v9 = vmul.f32 0.044715, %v7677_v62  ;;  %v7678_v56 = vmul.f32 %v7646_v35, %v17253_v39 }
0x1490   :  { %v12340_v46 = vpop.eup %12339  ;;  %v7833_v21 = vadd.f32 1.0, %v12338_v5  ;;  %v7743_v0 = vadd.f32 %v7711_v45, %v17239_v4  ;;  %v7712_v15 = vmul.f32 0.044715, %v7680_v44 }
0x1491   :  { %v12342_v2 = vpop.eup %12341  ;;  %v7867_v13 = vmul.f32 0.5, %v7835_v50  ;;  %v7836_v14 = vadd.f32 1.0, %v12340_v46  ;;  %v7741_v26 = vadd.f32 %v7709_v9, %v17242_v25  ;;  %v7710_v1 = vmul.f32 0.044715, %v7678_v56 }
0x1492   :  { %v7865_v19 = vmul.f32 0.5, %v7833_v21  ;;  %v7834_v60 = vadd.f32 1.0, %v12342_v2  ;;  %v7775_v10 = vmul.f32 0.7978846, %v7743_v0  ;;  %v7744_v36 = vadd.f32 %v7712_v15, %v17247_v53 }
0x1493   :  { %v7868_v30 = vmul.f32 0.5, %v7836_v14  ;;  %v7773_v51 = vmul.f32 0.7978846, %v7741_v26  ;;  %v7742_v63 = vadd.f32 %v7710_v1, %v17253_v39  ;;  %v7899_v59 = vmul.f32 %v7867_v13, %v17207_v12 }
0x1494   :  { %v7866_v47 = vmul.f32 0.5, %v7834_v60  ;;  %12343 = vtanh.f32 %v7775_v10  ;;  %v7776_v28 = vmul.f32 0.7978846, %v7744_v36  ;;  %v7897_v52 = vmul.f32 %v7865_v19, %v17210_v8 }
0x1495   :  { %v7900_v40 = vmul.f32 %v7868_v30, %v17215_v33  ;;  %12345 = vtanh.f32 %v7773_v51  ;;  %v7774_v17 = vmul.f32 0.7978846, %v7742_v63 }
0x1496   :  { %v7898_v29 = vmul.f32 %v7866_v47, %v17220_v41  ;;  %12347 = vtanh.f32 %v7776_v28 }
0x1497   :  { %v7928_v31 = vpack.c.bf16 %v7900_v40, %v7899_v59  ;;  %12349 = vtanh.f32 %v7774_v17  ;;  %v11439_v57 = vpop.f32.mrb[252].mxu1 }
0x1498   :  { %v17273_v58 = vadd.f32 %v17176_v49, %v11439_v57  ;;  %v7606_v43 = vpop.f32.mrb[253].mxu1  ;;  %v7927_v37 = vpack.c.bf16 %v7898_v29, %v7897_v52 }
0x1499   :  { %v17276_v54 = vadd.f32 %v17176_v49, %v7606_v43  ;;  %v11440_v12 = vpop.f32.mrb[254].mxu1  ;;  %v17309_v43 = vld [vmem:[%s18394_s2 + $0xf] ss:$0 sm:$0xff] }
0x149a   :  { %v7651_v33 = vmul.f32 %v17273_v58, %v17273_v58  ;;  %v17281_v8 = vadd.f32 %v17176_v49, %v11440_v12  ;;  %v7609_v41 = vpop.f32.mrb[255].mxu1  ;;  %11469 = vmatprep.mubr.msk.bf16.mxu0 %vm7962_vm4, %v7927_v37 }
0x149b   :  { %v7649_v7 = vmul.f32 %v17276_v54, %v17276_v54  ;;  %v17287_v62 = vadd.f32 %v17176_v49, %v7609_v41  ;;  %11470 = vmatmul.mubr.msk.bf16.gmra.mrb[20].mxu0 %vm7962_vm4, %v7928_v31 }
0x149c   :  { %v7683_v35 = vmul.f32 %v7651_v33, %v17273_v58  ;;  %v7652_v16 = vmul.f32 %v17281_v8, %v17281_v8 }
0x149d   :  { %v7681_v45 = vmul.f32 %v7649_v7, %v17276_v54  ;;  %v7650_v44 = vmul.f32 %v17287_v62, %v17287_v62 }
0x149e   :  { %v12344_v5 = vpop.eup %12343  ;;  %v7715_v50 = vmul.f32 0.044715, %v7683_v35  ;;  %v7684_v9 = vmul.f32 %v7652_v16, %v17281_v8 }
0x149f   :  { %v12346_v56 = vpop.eup %12345  ;;  %v7839_v46 = vadd.f32 1.0, %v12344_v5  ;;  %v7713_v49 = vmul.f32 0.044715, %v7681_v45  ;;  %v7682_v21 = vmul.f32 %v7650_v44, %v17287_v62 }
0x14a0   :  { %v12348_v0 = vpop.eup %12347  ;;  %v7837_v15 = vadd.f32 1.0, %v12346_v56  ;;  %v7747_v2 = vadd.f32 %v7715_v50, %v17273_v58  ;;  %v7716_v13 = vmul.f32 0.044715, %v7684_v9 }
0x14a1   :  { %v12350_v14 = vpop.eup %12349  ;;  %v7871_v26 = vmul.f32 0.5, %v7839_v46  ;;  %v7840_v1 = vadd.f32 1.0, %v12348_v0  ;;  %v7745_v19 = vadd.f32 %v7713_v49, %v17276_v54  ;;  %v7714_v60 = vmul.f32 0.044715, %v7682_v21 }
0x14a2   :  { %v7869_v10 = vmul.f32 0.5, %v7837_v15  ;;  %v7838_v36 = vadd.f32 1.0, %v12350_v14  ;;  %v7779_v30 = vmul.f32 0.7978846, %v7747_v2  ;;  %v7748_v51 = vadd.f32 %v7716_v13, %v17281_v8 }
0x14a3   :  { %v7872_v63 = vmul.f32 0.5, %v7840_v1  ;;  %v7777_v47 = vmul.f32 0.7978846, %v7745_v19  ;;  %v7746_v28 = vadd.f32 %v7714_v60, %v17287_v62  ;;  %v7903_v17 = vmul.f32 %v7871_v26, %v17239_v4 }
0x14a4   :  { %v7870_v59 = vmul.f32 0.5, %v7838_v36  ;;  %12351 = vtanh.f32 %v7779_v30  ;;  %v7780_v40 = vmul.f32 0.7978846, %v7748_v51  ;;  %v7901_v31 = vmul.f32 %v7869_v10, %v17242_v25 }
0x14a5   :  { %v7904_v52 = vmul.f32 %v7872_v63, %v17247_v53  ;;  %12353 = vtanh.f32 %v7777_v47  ;;  %v7778_v29 = vmul.f32 0.7978846, %v7746_v28 }
0x14a6   :  { %v7902_v57 = vmul.f32 %v7870_v59, %v17253_v39  ;;  %12355 = vtanh.f32 %v7780_v40 }
0x14a7   :  { %v7930_v37 = vpack.c.bf16 %v7904_v52, %v7903_v17  ;;  %12357 = vtanh.f32 %v7778_v29 }
0x14a8   :  { %v11487_v12 = vpop.f32.mrb[0].mxu1  ;;  %v7929_v33 = vpack.c.bf16 %v7902_v57, %v7901_v31 }
0x14a9   :  { %v17312_v4 = vadd.f32 %v11487_v12, %v17309_v43  ;;  %v8877_v53 = vpop.f32.mrb[1].mxu1 }
0x14aa   :  { %v17315_v41 = vadd.f32 %v17309_v43, %v8877_v53  ;;  %11473 = vmatprep.mubr.msk.bf16.mxu0 %vm7962_vm4, %v7929_v33  ;;  %v11488_v25 = vpop.f32.mrb[2].mxu1 }
0x14ab   :  { %9006 = vst [vmem:[%s18395_s3 + $0x10] sm:$0xff] %v17312_v4  ;;  %v17323_v39 = vadd.f32 %v11488_v25, %v17309_v43  ;;  %11474 = vmatmul.mubr.msk.bf16.gmra.mrb[24].mxu0 %vm7962_vm4, %v7930_v37  ;;  %v8880_v7 = vpop.f32.mrb[3].mxu1 }
0x14ac   :  { %9004 = vst [vmem:[%s18395_s3] sm:$0xff] %v17315_v41  ;;  %v17331_v35 = vadd.f32 %v17309_v43, %v8880_v7 }
0x14ad   :  { %9007 = vst [vmem:[%s18395_s3 + $0x18] sm:$0xff] %v17323_v39 }
0x14ae   :  { %v12352_v16 = vpop.eup %12351  ;;  %9005 = vst [vmem:[%s18395_s3 + $0x8] sm:$0xff] %v17331_v35 }
0x14af   :  { %v12354_v45 = vpop.eup %12353  ;;  %v7843_v44 = vadd.f32 1.0, %v12352_v16  ;;  %v17434_v16 = vld [vmem:[%s18394_s2 + $0xc] ss:$0 sm:$0xff] }
0x14b0   :  { %v12356_v5 = vpop.eup %12355  ;;  %v7841_v50 = vadd.f32 1.0, %v12354_v45 }
0x14b1   :  { %v12358_v9 = vpop.eup %12357  ;;  %v7875_v56 = vmul.f32 0.5, %v7843_v44  ;;  %v7844_v46 = vadd.f32 1.0, %v12356_v5 }
0x14b2   :  { %v7873_v49 = vmul.f32 0.5, %v7841_v50  ;;  %v7842_v21 = vadd.f32 1.0, %v12358_v9 }
0x14b3   :  { %v7876_v0 = vmul.f32 0.5, %v7844_v46  ;;  %v7907_v2 = vmul.f32 %v7875_v56, %v17273_v58 }
0x14b4   :  { %v7874_v15 = vmul.f32 0.5, %v7842_v21  ;;  %v7905_v14 = vmul.f32 %v7873_v49, %v17276_v54 }
0x14b5   :  { %v7908_v13 = vmul.f32 %v7876_v0, %v17281_v8 }
0x14b6   :  { %v7906_v26 = vmul.f32 %v7874_v15, %v17287_v62 }
0x14b7   :  { %v7932_v1 = vpack.c.bf16 %v7908_v13, %v7907_v2 }
0x14b8   :  { %v11491_v19 = vpop.f32.mrb[4].mxu1  ;;  %v7931_v60 = vpack.c.bf16 %v7906_v26, %v7905_v14 }
0x14b9   :  { %v17346_v10 = vadd.f32 %v11491_v19, %v17309_v43  ;;  %v8893_v36 = vpop.f32.mrb[5].mxu1 }
0x14ba   :  { %v17349_v30 = vadd.f32 %v17309_v43, %v8893_v36  ;;  %11477 = vmatprep.mubr.msk.bf16.mxu0 %vm7962_vm4, %v7931_v60  ;;  %v11492_v51 = vpop.f32.mrb[6].mxu1 }
0x14bb   :  { %9010 = vst [vmem:[%s18395_s3 + $0x30] sm:$0xff] %v17346_v10  ;;  %v17357_v58 = vadd.f32 %v11492_v51, %v17309_v43  ;;  %11478 = vmatmul.mubr.msk.bf16.gmra.mrb[28].mxu0 %vm7962_vm4, %v7932_v1  ;;  %v8896_v54 = vpop.f32.mrb[7].mxu1 }
0x14bc   :  { %9008 = vst [vmem:[%s18395_s3 + $0x20] sm:$0xff] %v17349_v30  ;;  %v17365_v8 = vadd.f32 %v17309_v43, %v8896_v54 }
0x14bd   :  { %9011 = vst [vmem:[%s18395_s3 + $0x38] sm:$0xff] %v17357_v58 }
0x14be   :  { %9009 = vst [vmem:[%s18395_s3 + $0x28] sm:$0xff] %v17365_v8 }
0x14c8   :  { %v11495_v62 = vpop.f32.mrb[8].mxu1 }
0x14c9   :  { %v17376_v63 = vadd.f32 %v11495_v62, %v17309_v43  ;;  %v8909_v47 = vpop.f32.mrb[9].mxu1 }
0x14ca   :  { %v17379_v28 = vadd.f32 %v17309_v43, %v8909_v47  ;;  %v11496_v59 = vpop.f32.mrb[10].mxu1 }
0x14cb   :  { %9014 = vst [vmem:[%s18395_s3 + $0x50] sm:$0xff] %v17376_v63  ;;  %v17386_v40 = vadd.f32 %v11496_v59, %v17309_v43  ;;  %v8912_v17 = vpop.f32.mrb[11].mxu1 }
0x14cc   :  { %9012 = vst [vmem:[%s18395_s3 + $0x40] sm:$0xff] %v17379_v28  ;;  %v17393_v52 = vadd.f32 %v17309_v43, %v8912_v17 }
0x14cd   :  { %9015 = vst [vmem:[%s18395_s3 + $0x58] sm:$0xff] %v17386_v40 }
0x14ce   :  { %9013 = vst [vmem:[%s18395_s3 + $0x48] sm:$0xff] %v17393_v52 }
0x14d8   :  { %v11499_v29 = vpop.f32.mrb[12].mxu1 }
0x14d9   :  { %v17404_v31 = vadd.f32 %v11499_v29, %v17309_v43  ;;  %v8925_v57 = vpop.f32.mrb[13].mxu1 }
0x14da   :  { %v17407_v37 = vadd.f32 %v17309_v43, %v8925_v57  ;;  %v11500_v12 = vpop.f32.mrb[14].mxu1 }
0x14db   :  { %9018 = vst [vmem:[%s18395_s3 + $0x70] sm:$0xff] %v17404_v31  ;;  %v17414_v33 = vadd.f32 %v11500_v12, %v17309_v43  ;;  %v8928_v53 = vpop.f32.mrb[15].mxu1 }
0x14dc   :  { %9016 = vst [vmem:[%s18395_s3 + $0x60] sm:$0xff] %v17407_v37  ;;  %v17421_v25 = vadd.f32 %v17309_v43, %v8928_v53 }
0x14dd   :  { %9019 = vst [vmem:[%s18395_s3 + $0x78] sm:$0xff] %v17414_v33 }
0x14de   :  { %9017 = vst [vmem:[%s18395_s3 + $0x68] sm:$0xff] %v17421_v25 }
0x155e   :  { %v11467_v7 = vpop.f32.mrb[16].mxu0 }
0x155f   :  { %v8118_v45 = vadd.f32 %v17434_v16, %v11467_v7  ;;  %v8109_v44 = vpop.f32.mrb[17].mxu0 }
0x1560   :  { %v8110_v5 = vadd.f32 %v17434_v16, %v8109_v44  ;;  %v11468_v50 = vpop.f32.mrb[18].mxu0 }
0x1561   :  { %v17439_v9 = vadd.f32 %v8118_v45, %v16912_v55  ;;  %v8121_v56 = vadd.f32 %v17434_v16, %v11468_v50  ;;  %v8112_v46 = vpop.f32.mrb[19].mxu0 }
0x1562   :  { %v8113_v49 = vadd.f32 %v17434_v16, %v8112_v46  ;;  %v17444_v21 = vadd.f32 %v8110_v5, %v16901_v24 }
0x1563   :  { %v17447_v0 = vadd.f32 %v8121_v56, %v16915_v11  ;;  %v8260_v15 = vsel %vm2363_vm3, %v17439_v9, 0.0  ;;  %v8352_v26 = vmul.f32 %v17439_v9, %v17439_v9 }
0x1564   :  { %8261 = vadd.xlane.f32.xlu1 %v8260_v15  ;;  %v17452_v2 = vadd.f32 %v8113_v49, %v16904_v6  ;;  %v8254_v13 = vsel %vm2363_vm3, %v17444_v21, 0.0  ;;  %v8350_v24 = vmul.f32 %v17444_v21, %v17444_v21 }
0x1565   :  { %v8263_v55 = vsel %vm2363_vm3, %v17447_v0, 0.0  ;;  %v8353_v19 = vmul.f32 %v17447_v0, %v17447_v0  ;;  %v8420_v54 = vsel %vm2363_vm3, %v8352_v26, 0.0 }
0x1566   :  { %8264 = vadd.xlane.f32.xlu0 %v8263_v55  ;;  %v8257_v11 = vsel %vm2363_vm3, %v17452_v2, 0.0  ;;  %v8351_v14 = vmul.f32 %v17452_v2, %v17452_v2  ;;  %v8414_v6 = vsel %vm2363_vm3, %v8350_v24, 0.0 }
0x1567   :  { %v8423_v57 = vsel %vm2363_vm3, %v8353_v19, 0.0 }
0x1568   :  { %8255 = vadd.xlane.f32.xlu1 %v8254_v13  ;;  %v8417_v1 = vsel %vm2363_vm3, %v8351_v14, 0.0 }
0x156a   :  { %8258 = vadd.xlane.f32.xlu0 %v8257_v11 }
0x156c   :  { %8415 = vadd.xlane.f32.xlu1 %v8414_v6 }
0x156e   :  { %v11471_v60 = vpop.f32.mrb[20].mxu0  ;;  %8418 = vadd.xlane.f32.xlu0 %v8417_v1 }
0x156f   :  { %v8134_v36 = vadd.f32 %v17434_v16, %v11471_v60  ;;  %v8125_v51 = vpop.f32.mrb[21].mxu0 }
0x1570   :  { %v8126_v62 = vadd.f32 %v17434_v16, %v8125_v51  ;;  %v11472_v47 = vpop.f32.mrb[22].mxu0  ;;  %8421 = vadd.xlane.f32.xlu1 %v8420_v54 }
0x1571   :  { %v17474_v59 = vadd.f32 %v8134_v36, %v16958_v34  ;;  %v8137_v17 = vadd.f32 %v17434_v16, %v11472_v47  ;;  %v8128_v29 = vpop.f32.mrb[23].mxu0 }
0x1572   :  { %v8129_v12 = vadd.f32 %v17434_v16, %v8128_v29  ;;  %8424 = vadd.xlane.f32.xlu0 %v8423_v57  ;;  %v17480_v53 = vadd.f32 %v8126_v62, %v16947_v18 }
0x1573   :  { %v17483_v7 = vadd.f32 %v8137_v17, %v16961_v23  ;;  %v8272_v45 = vsel %vm2363_vm3, %v17474_v59, 0.0  ;;  %v8356_v56 = vmul.f32 %v17474_v59, %v17474_v59 }
0x1574   :  { %8273 = vadd.xlane.f32.xlu1 %v8272_v45  ;;  %v17488_v34 = vadd.f32 %v8129_v12, %v16950_v27  ;;  %v8266_v5 = vsel %vm2363_vm3, %v17480_v53, 0.0  ;;  %v8354_v18 = vmul.f32 %v17480_v53, %v17480_v53 }
0x1575   :  { %v8275_v44 = vsel %vm2363_vm3, %v17483_v7, 0.0  ;;  %v8357_v49 = vmul.f32 %v17483_v7, %v17483_v7  ;;  %v8432_v24 = vsel %vm2363_vm3, %v8356_v56, 0.0 }
0x1576   :  { %8276 = vadd.xlane.f32.xlu0 %v8275_v44  ;;  %v8269_v23 = vsel %vm2363_vm3, %v17488_v34, 0.0  ;;  %v8355_v50 = vmul.f32 %v17488_v34, %v17488_v34  ;;  %v8426_v27 = vsel %vm2363_vm3, %v8354_v18, 0.0 }
0x1577   :  { %v8435_v19 = vsel %vm2363_vm3, %v8357_v49, 0.0 }
0x1578   :  { %8267 = vadd.xlane.f32.xlu1 %v8266_v5  ;;  %v8429_v46 = vsel %vm2363_vm3, %v8355_v50, 0.0 }
0x157a   :  { %8270 = vadd.xlane.f32.xlu0 %v8269_v23 }
0x157c   :  { %8427 = vadd.xlane.f32.xlu1 %v8426_v27 }
0x157e   :  { %v11475_v15 = vpop.f32.mrb[24].mxu0  ;;  %8430 = vadd.xlane.f32.xlu0 %v8429_v46 }
0x157f   :  { %v8150_v55 = vadd.f32 %v17434_v16, %v11475_v15  ;;  %v8141_v13 = vpop.f32.mrb[25].mxu0 }
0x1580   :  { %v8142_v11 = vadd.f32 %v17434_v16, %v8141_v13  ;;  %v11476_v14 = vpop.f32.mrb[26].mxu0  ;;  %8433 = vadd.xlane.f32.xlu1 %v8432_v24 }
0x1581   :  { %v17510_v6 = vadd.f32 %v8150_v55, %v17004_v42  ;;  %v8153_v26 = vadd.f32 %v17434_v16, %v11476_v14  ;;  %v8144_v1 = vpop.f32.mrb[27].mxu0 }
0x1582   :  { %v8145_v60 = vadd.f32 %v17434_v16, %v8144_v1  ;;  %8436 = vadd.xlane.f32.xlu0 %v8435_v19  ;;  %v17516_v36 = vadd.f32 %v8142_v11, %v16993_v20 }
0x1583   :  { %v17519_v51 = vadd.f32 %v8153_v26, %v17007_v32  ;;  %v8284_v54 = vsel %vm2363_vm3, %v17510_v6, 0.0  ;;  %v8360_v29 = vmul.f32 %v17510_v6, %v17510_v6 }
0x1584   :  { %8285 = vadd.xlane.f32.xlu1 %v8284_v54  ;;  %v17524_v42 = vadd.f32 %v8145_v60, %v16996_v38  ;;  %v8278_v47 = vsel %vm2363_vm3, %v17516_v36, 0.0  ;;  %v8358_v20 = vmul.f32 %v17516_v36, %v17516_v36 }
0x1585   :  { %v8287_v62 = vsel %vm2363_vm3, %v17519_v51, 0.0  ;;  %v8361_v12 = vmul.f32 %v17519_v51, %v17519_v51  ;;  %v8444_v18 = vsel %vm2363_vm3, %v8360_v29, 0.0 }
0x1586   :  { %8288 = vadd.xlane.f32.xlu0 %v8287_v62  ;;  %v8281_v32 = vsel %vm2363_vm3, %v17524_v42, 0.0  ;;  %v8359_v17 = vmul.f32 %v17524_v42, %v17524_v42  ;;  %v8438_v38 = vsel %vm2363_vm3, %v8358_v20, 0.0 }
0x1587   :  { %v8447_v49 = vsel %vm2363_vm3, %v8361_v12, 0.0 }
0x1588   :  { %8279 = vadd.xlane.f32.xlu1 %v8278_v47  ;;  %v8441_v57 = vsel %vm2363_vm3, %v8359_v17, 0.0 }
0x158a   :  { %8282 = vadd.xlane.f32.xlu0 %v8281_v32 }
0x158c   :  { %8439 = vadd.xlane.f32.xlu1 %v8438_v38 }
0x158e   :  { %8442 = vadd.xlane.f32.xlu0 %v8441_v57  ;;  %v11479_v45 = vpop.f32.mrb[28].mxu0 }
0x158f   :  { %v8166_v44 = vadd.f32 %v17434_v16, %v11479_v45  ;;  %v8157_v5 = vpop.f32.mrb[29].mxu0 }
0x1590   :  { %v8158_v23 = vadd.f32 %v17434_v16, %v8157_v5  ;;  %8445 = vadd.xlane.f32.xlu1 %v8444_v18  ;;  %v11480_v50 = vpop.f32.mrb[30].mxu0 }
0x1591   :  { %v17546_v27 = vadd.f32 %v8166_v44, %v17050_v3  ;;  %v8169_v56 = vadd.f32 %v17434_v16, %v11480_v50  ;;  %v8160_v46 = vpop.f32.mrb[31].mxu0 }
0x1592   :  { %v8161_v15 = vadd.f32 %v17434_v16, %v8160_v46  ;;  %8448 = vadd.xlane.f32.xlu0 %v8447_v49  ;;  %v17552_v55 = vadd.f32 %v8158_v23, %v17039_v61 }
0x1593   :  { %v17555_v13 = vadd.f32 %v8169_v56, %v17053_v22  ;;  %v8296_v24 = vsel %vm2363_vm3, %v17546_v27, 0.0  ;;  %v8364_v26 = vmul.f32 %v17546_v27, %v17546_v27 }
0x1594   :  { %8297 = vadd.xlane.f32.xlu1 %v8296_v24  ;;  %v17560_v3 = vadd.f32 %v8161_v15, %v17042_v48  ;;  %v8290_v16 = vsel %vm2363_vm3, %v17552_v55, 0.0  ;;  %v8362_v61 = vmul.f32 %v17552_v55, %v17552_v55 }
0x1595   :  { %v8299_v11 = vsel %vm2363_vm3, %v17555_v13, 0.0  ;;  %v8365_v19 = vmul.f32 %v17555_v13, %v17555_v13  ;;  %v8456_v60 = vsel %vm2363_vm3, %v8364_v26, 0.0 }
0x1596   :  { %8300 = vadd.xlane.f32.xlu0 %v8299_v11  ;;  %v8293_v22 = vsel %vm2363_vm3, %v17560_v3, 0.0  ;;  %v8363_v14 = vmul.f32 %v17560_v3, %v17560_v3  ;;  %v8450_v48 = vsel %vm2363_vm3, %v8362_v61, 0.0 }
0x1597   :  { %v8459_v54 = vsel %vm2363_vm3, %v8365_v19, 0.0 }
0x1598   :  { %8291 = vadd.xlane.f32.xlu1 %v8290_v16  ;;  %v8453_v1 = vsel %vm2363_vm3, %v8363_v14, 0.0 }
0x159a   :  { %8294 = vadd.xlane.f32.xlu0 %v8293_v22 }
0x159c   :  { %8451 = vadd.xlane.f32.xlu1 %v8450_v48 }
0x159e   :  { %8454 = vadd.xlane.f32.xlu0 %v8453_v1 }
0x15a0   :  { %8457 = vadd.xlane.f32.xlu1 %v8456_v60 }
0x15a2   :  { %8460 = vadd.xlane.f32.xlu0 %v8459_v54 }
0x15f1   :  { %v8262_v62 = vpop.xlane.xlu1 %8261 }
0x15f2   :  { %v8320_v57 = vmul.f32 0.03125, %v8262_v62 }
0x15f3   :  { %v8265_v47 = vpop.xlane.xlu0 %8264 }
0x15f4   :  { %v17580_v44 = vmul.f32 0.03125, %v8265_v47  ;;  %v8544_v46 = vmul.f32 %v8320_v57, %v8320_v57 }
0x15f5   :  { %v8256_v20 = vpop.xlane.xlu1 %8255 }
0x15f6   :  { %v8318_v32 = vmul.f32 0.03125, %v8256_v20  ;;  %v8545_v11 = vmul.f32 %v17580_v44, %v17580_v44 }
0x15f7   :  { %v8259_v17 = vpop.xlane.xlu0 %8258 }
0x15f8   :  { %v8319_v38 = vmul.f32 0.03125, %v8259_v17  ;;  %v8542_v12 = vmul.f32 %v8318_v32, %v8318_v32  ;;  %v8510_v17 = vsub.f32 %v17444_v21, %v8318_v32  ;;  %v8512_v32 = vsub.f32 %v17439_v9, %v8320_v57 }
0x15f9   :  { %v8416_v29 = vpop.xlane.xlu1 %8415 }
0x15fa   :  { %v8478_v45 = vmul.f32 0.03125, %v8416_v29  ;;  %v8543_v18 = vmul.f32 %v8319_v38, %v8319_v38 }
0x15fb   :  { %v8419_v5 = vpop.xlane.xlu0 %8418 }
0x15fc   :  { %v8574_v23 = vsub.f32 %v8478_v45, %v8542_v12  ;;  %v8479_v50 = vmul.f32 0.03125, %v8419_v5 }
0x15fd   :  { %v8422_v56 = vpop.xlane.xlu1 %8421 }
0x15fe   :  { %v8606_v49 = vadd.f32 1e-05, %v8574_v23  ;;  %v8575_v15 = vsub.f32 %v8479_v50, %v8543_v18  ;;  %v8480_v24 = vmul.f32 0.03125, %v8422_v56  ;;  %v8511_v23 = vsub.f32 %v17452_v2, %v8319_v38 }
0x15ff   :  { %v8425_v16 = vpop.xlane.xlu0 %8424 }
0x1600   :  { %12359 = vrsqrt.f32 %v8606_v49  ;;  %v8607_v61 = vadd.f32 1e-05, %v8575_v15  ;;  %v8576_v22 = vsub.f32 %v8480_v24, %v8544_v46  ;;  %v8481_v14 = vmul.f32 0.03125, %v8425_v16 }
0x1601   :  { %v8274_v48 = vpop.xlane.xlu1 %8273 }
0x1602   :  { %12361 = vrsqrt.f32 %v8607_v61  ;;  %v8608_v26 = vadd.f32 1e-05, %v8576_v22  ;;  %v8577_v1 = vsub.f32 %v8481_v14, %v8545_v11  ;;  %v17589_v45 = vmul.f32 0.03125, %v8274_v48  ;;  %v17602_v61 = vld [vmem:[%s18394_s2 + $0xd] ss:$0 sm:$0xff] }
0x1603   :  { %v8277_v19 = vpop.xlane.xlu0 %8276 }
0x1604   :  { %12363 = vrsqrt.f32 %v8608_v26  ;;  %v8609_v60 = vadd.f32 1e-05, %v8577_v1  ;;  %v17594_v50 = vmul.f32 0.03125, %v8277_v19  ;;  %v8548_v22 = vmul.f32 %v17589_v45, %v17589_v45 }
0x1605   :  { %v8268_v54 = vpop.xlane.xlu1 %8267  ;;  %v8513_v1 = vsub.f32 %v17447_v0, %v17580_v44  ;;  %v17616_v0 = vld [vmem:[%s18394_s2 + $0xe] ss:$0 sm:$0xff] }
0x1606   :  { %12365 = vrsqrt.f32 %v8609_v60  ;;  %v17584_v62 = vmul.f32 0.03125, %v8268_v54  ;;  %v8549_v57 = vmul.f32 %v17594_v50, %v17594_v50 }
0x1607   :  { %v8271_v47 = vpop.xlane.xlu0 %8270 }
0x1608   :  { %v17586_v20 = vmul.f32 0.03125, %v8271_v47  ;;  %v8546_v5 = vmul.f32 %v17584_v62, %v17584_v62 }
0x1609   :  { %v8428_v29 = vpop.xlane.xlu1 %8427 }
0x160a   :  { %v12360_v12 = vpop.eup %12359  ;;  %v8482_v18 = vmul.f32 0.03125, %v8428_v29  ;;  %v8547_v15 = vmul.f32 %v17586_v20, %v17586_v20 }
0x160b   :  { %v8431_v56 = vpop.xlane.xlu0 %8430  ;;  %v8670_v46 = vmul.f32 %v12360_v12, %v8510_v17 }
0x160c   :  { %v12362_v49 = vpop.eup %12361  ;;  %v8578_v24 = vsub.f32 %v8482_v18, %v8546_v5  ;;  %v8483_v21 = vmul.f32 0.03125, %v8431_v56 }
0x160d   :  { %v8434_v11 = vpop.xlane.xlu1 %8433  ;;  %v8671_v16 = vmul.f32 %v12362_v49, %v8511_v23  ;;  %v8706_v2 = vmul.f32 %v17602_v61, %v8670_v46 }
0x160e   :  { %v12364_v38 = vpop.eup %12363  ;;  %v8610_v14 = vadd.f32 1e-05, %v8578_v24  ;;  %v8579_v48 = vsub.f32 %v8483_v21, %v8547_v15  ;;  %v8484_v26 = vmul.f32 0.03125, %v8434_v11 }
0x160f   :  { %v8672_v9 = vmul.f32 %v12364_v38, %v8512_v32  ;;  %v8437_v19 = vpop.xlane.xlu0 %8436  ;;  %v8707_v60 = vmul.f32 %v17602_v61, %v8671_v16  ;;  %v8742_v44 = vadd.f32 %v17616_v0, %v8706_v2 }
0x1610   :  { %v12366_v54 = vpop.eup %12365  ;;  %12367 = vrsqrt.f32 %v8610_v14  ;;  %v8611_v47 = vadd.f32 1e-05, %v8579_v48  ;;  %v8580_v17 = vsub.f32 %v8484_v26, %v8548_v22  ;;  %v8485_v29 = vmul.f32 0.03125, %v8437_v19 }
0x1611   :  { %v8708_v12 = vmul.f32 %v17602_v61, %v8672_v9  ;;  %v8673_v5 = vmul.f32 %v12366_v54, %v8513_v1  ;;  %v8286_v18 = vpop.xlane.xlu1 %8285  ;;  %v8743_v23 = vadd.f32 %v17616_v0, %v8707_v60  ;;  %v8514_v48 = vsub.f32 %v17480_v53, %v17584_v62 }
0x1612   :  { %12369 = vrsqrt.f32 %v8611_v47  ;;  %v8612_v56 = vadd.f32 1e-05, %v8580_v17  ;;  %v8581_v46 = vsub.f32 %v8485_v29, %v8549_v57  ;;  %v17631_v9 = vmul.f32 0.03125, %v8286_v18 }
0x1613   :  { %v8709_v49 = vmul.f32 %v17602_v61, %v8673_v5  ;;  %v8289_v15 = vpop.xlane.xlu0 %8288  ;;  %v8770_v24 = vpack.c.bf16 %v8743_v23, %v8742_v44  ;;  %v8744_v32 = vadd.f32 %v17616_v0, %v8708_v12  ;;  %v8515_v60 = vsub.f32 %v17488_v34, %v17586_v20 }
0x1614   :  { %12371 = vrsqrt.f32 %v8612_v56  ;;  %v8613_v21 = vadd.f32 1e-05, %v8581_v46  ;;  %v17637_v54 = vmul.f32 0.03125, %v8289_v15  ;;  %v8516_v5 = vsub.f32 %v17474_v59, %v17589_v45 }
0x1615   :  { %v8745_v11 = vadd.f32 %v17616_v0, %v8709_v49  ;;  %v8280_v16 = vpop.xlane.xlu1 %8279  ;;  %11501 = vmatprep.mubr.msk.bf16.mxu1 %vm2363_vm3, %v8770_v24  ;;  %v8552_v34 = vmul.f32 %v17631_v9, %v17631_v9  ;;  %v8517_v15 = vsub.f32 %v17483_v7, %v17594_v50 }
0x1616   :  { %12373 = vrsqrt.f32 %v8613_v21  ;;  %v17624_v2 = vmul.f32 0.03125, %v8280_v16  ;;  %v8553_v21 = vmul.f32 %v17637_v54, %v17637_v54 }
0x1617   :  { %v8771_v38 = vpack.c.bf16 %v8745_v11, %v8744_v32  ;;  %v8283_v22 = vpop.xlane.xlu0 %8282 }
0x1618   :  { %v17626_v14 = vmul.f32 0.03125, %v8283_v22  ;;  %v8550_v57 = vmul.f32 %v17624_v2, %v17624_v2 }
0x1619   :  { %v8440_v26 = vpop.xlane.xlu1 %8439  ;;  %11502 = vmatmul.mubr.msk.bf16.gmra.mrb[16].mxu1 %vm2363_vm3, %v8771_v38 }
0x161a   :  { %v12368_v1 = vpop.eup %12367  ;;  %v8486_v19 = vmul.f32 0.03125, %v8440_v26  ;;  %v8551_v53 = vmul.f32 %v17626_v14, %v17626_v14 }
0x161b   :  { %v8443_v47 = vpop.xlane.xlu0 %8442  ;;  %v8674_v17 = vmul.f32 %v12368_v1, %v8514_v48 }
0x161c   :  { %v12370_v29 = vpop.eup %12369  ;;  %v8582_v62 = vsub.f32 %v8486_v19, %v8550_v57  ;;  %v8487_v12 = vmul.f32 0.03125, %v8443_v47 }
0x161d   :  { %v8446_v18 = vpop.xlane.xlu1 %8445  ;;  %v8675_v44 = vmul.f32 %v12370_v29, %v8515_v60  ;;  %v8710_v23 = vmul.f32 %v17602_v61, %v8674_v17 }
0x161e   :  { %v12372_v56 = vpop.eup %12371  ;;  %v8614_v20 = vadd.f32 1e-05, %v8582_v62  ;;  %v8583_v46 = vsub.f32 %v8487_v12, %v8551_v53  ;;  %v8488_v49 = vmul.f32 0.03125, %v8446_v18 }
0x161f   :  { %v8676_v24 = vmul.f32 %v12372_v56, %v8516_v5  ;;  %v8449_v32 = vpop.xlane.xlu0 %8448  ;;  %v8711_v59 = vmul.f32 %v17602_v61, %v8675_v44  ;;  %v8746_v1 = vadd.f32 %v17616_v0, %v8710_v23  ;;  %v8518_v23 = vsub.f32 %v17516_v36, %v17624_v2 }
0x1620   :  { %v12374_v45 = vpop.eup %12373  ;;  %12375 = vrsqrt.f32 %v8614_v20  ;;  %v8615_v11 = vadd.f32 1e-05, %v8583_v46  ;;  %v8584_v16 = vsub.f32 %v8488_v49, %v8552_v34  ;;  %v8489_v38 = vmul.f32 0.03125, %v8449_v32 }
0x1621   :  { %v8712_v22 = vmul.f32 %v17602_v61, %v8676_v24  ;;  %v8677_v48 = vmul.f32 %v12374_v45, %v8517_v15  ;;  %v8298_v26 = vpop.xlane.xlu1 %8297  ;;  %v8747_v7 = vadd.f32 %v17616_v0, %v8711_v59  ;;  %v8519_v15 = vsub.f32 %v17524_v42, %v17626_v14 }
0x1622   :  { %12377 = vrsqrt.f32 %v8615_v11  ;;  %v8616_v50 = vadd.f32 1e-05, %v8584_v16  ;;  %v8585_v57 = vsub.f32 %v8489_v38, %v8553_v21  ;;  %v8332_v20 = vmul.f32 0.03125, %v8298_v26 }
0x1623   :  { %v8713_v19 = vmul.f32 %v17602_v61, %v8677_v48  ;;  %v8301_v60 = vpop.xlane.xlu0 %8300  ;;  %v8772_v47 = vpack.c.bf16 %v8747_v7, %v8746_v1  ;;  %v8748_v29 = vadd.f32 %v17616_v0, %v8712_v22  ;;  %v8520_v36 = vsub.f32 %v17510_v6, %v17631_v9 }
0x1624   :  { %12379 = vrsqrt.f32 %v8616_v50  ;;  %v8617_v17 = vadd.f32 1e-05, %v8585_v57  ;;  %v8333_v24 = vmul.f32 0.03125, %v8301_v60  ;;  %v8556_v26 = vmul.f32 %v8332_v20, %v8332_v20 }
0x1625   :  { %v8749_v53 = vadd.f32 %v17616_v0, %v8713_v19  ;;  %v8292_v62 = vpop.xlane.xlu1 %8291  ;;  %11505 = vmatprep.mubr.msk.bf16.mxu1 %vm2363_vm3, %v8772_v47  ;;  %v8521_v42 = vsub.f32 %v17519_v51, %v17637_v54 }
0x1626   :  { %12381 = vrsqrt.f32 %v8617_v17  ;;  %v8330_v12 = vmul.f32 0.03125, %v8292_v62  ;;  %v8557_v57 = vmul.f32 %v8333_v24, %v8333_v24 }
0x1627   :  { %v8773_v5 = vpack.c.bf16 %v8749_v53, %v8748_v29  ;;  %v8295_v18 = vpop.xlane.xlu0 %8294 }
0x1628   :  { %v8331_v44 = vmul.f32 0.03125, %v8295_v18  ;;  %v8554_v46 = vmul.f32 %v8330_v12, %v8330_v12 }
0x1629   :  { %v8452_v56 = vpop.xlane.xlu1 %8451  ;;  %11506 = vmatmul.mubr.msk.bf16.gmra.mrb[20].mxu1 %vm2363_vm3, %v8773_v5 }
0x162a   :  { %v12376_v34 = vpop.eup %12375  ;;  %v8490_v49 = vmul.f32 0.03125, %v8452_v56  ;;  %v8555_v45 = vmul.f32 %v8331_v44, %v8331_v44 }
0x162b   :  { %v8455_v21 = vpop.xlane.xlu0 %8454  ;;  %v8678_v32 = vmul.f32 %v12376_v34, %v8518_v23 }
0x162c   :  { %v12378_v59 = vpop.eup %12377  ;;  %v8586_v11 = vsub.f32 %v8490_v49, %v8554_v46  ;;  %v8491_v16 = vmul.f32 0.03125, %v8455_v21 }
0x162d   :  { %v8458_v2 = vpop.xlane.xlu1 %8457  ;;  %v8679_v38 = vmul.f32 %v12378_v59, %v8519_v15  ;;  %v8714_v22 = vmul.f32 %v17602_v61, %v8678_v32  ;;  %v8522_v15 = vsub.f32 %v17552_v55, %v8330_v12  ;;  %v8523_v32 = vsub.f32 %v17560_v3, %v8331_v44 }
0x162e   :  { %v12380_v48 = vpop.eup %12379  ;;  %v8618_v1 = vadd.f32 1e-05, %v8586_v11  ;;  %v8587_v7 = vsub.f32 %v8491_v16, %v8555_v45  ;;  %v8492_v50 = vmul.f32 0.03125, %v8458_v2  ;;  %v8524_v11 = vsub.f32 %v17546_v27, %v8332_v20 }
0x162f   :  { %v8680_v14 = vmul.f32 %v12380_v48, %v8520_v36  ;;  %v8461_v19 = vpop.xlane.xlu0 %8460  ;;  %v8715_v60 = vmul.f32 %v17602_v61, %v8679_v38  ;;  %v8750_v62 = vadd.f32 %v17616_v0, %v8714_v22  ;;  %v8525_v38 = vsub.f32 %v17555_v13, %v8333_v24 }
0x1630   :  { %v12382_v47 = vpop.eup %12381  ;;  %12383 = vrsqrt.f32 %v8618_v1  ;;  %v8619_v6 = vadd.f32 1e-05, %v8587_v7  ;;  %v8588_v9 = vsub.f32 %v8492_v50, %v8556_v26  ;;  %v8493_v17 = vmul.f32 0.03125, %v8461_v19 }
0x1631   :  { %v8716_v29 = vmul.f32 %v17602_v61, %v8680_v14  ;;  %v8681_v53 = vmul.f32 %v12382_v47, %v8521_v42  ;;  %v8751_v5 = vadd.f32 %v17616_v0, %v8715_v60 }
0x1632   :  { %12385 = vrsqrt.f32 %v8619_v6  ;;  %v8620_v18 = vadd.f32 1e-05, %v8588_v9  ;;  %v8589_v51 = vsub.f32 %v8493_v17, %v8557_v57 }
0x1633   :  { %v8717_v54 = vmul.f32 %v17602_v61, %v8681_v53  ;;  %v8774_v23 = vpack.c.bf16 %v8751_v5, %v8750_v62  ;;  %v8752_v34 = vadd.f32 %v17616_v0, %v8716_v29 }
0x1634   :  { %12387 = vrsqrt.f32 %v8620_v18  ;;  %v8621_v56 = vadd.f32 1e-05, %v8589_v51 }
0x1635   :  { %v8753_v46 = vadd.f32 %v17616_v0, %v8717_v54  ;;  %11509 = vmatprep.mubr.msk.bf16.mxu1 %vm2363_vm3, %v8774_v23 }
0x1636   :  { %12389 = vrsqrt.f32 %v8621_v56 }
0x1637   :  { %v8775_v49 = vpack.c.bf16 %v8753_v46, %v8752_v34 }
0x1639   :  { %11510 = vmatmul.mubr.msk.bf16.gmra.mrb[24].mxu1 %vm2363_vm3, %v8775_v49 }
0x163a   :  { %v12384_v21 = vpop.eup %12383 }
0x163b   :  { %v8682_v59 = vmul.f32 %v12384_v21, %v8522_v15 }
0x163c   :  { %v12386_v45 = vpop.eup %12385 }
0x163d   :  { %v8683_v16 = vmul.f32 %v12386_v45, %v8523_v32  ;;  %v8718_v36 = vmul.f32 %v17602_v61, %v8682_v59 }
0x163e   :  { %v12388_v2 = vpop.eup %12387 }
0x163f   :  { %v8684_v22 = vmul.f32 %v12388_v2, %v8524_v11  ;;  %v8719_v48 = vmul.f32 %v17602_v61, %v8683_v16  ;;  %v8754_v1 = vadd.f32 %v17616_v0, %v8718_v36 }
0x1640   :  { %v12390_v26 = vpop.eup %12389 }
0x1641   :  { %v8720_v55 = vmul.f32 %v17602_v61, %v8684_v22  ;;  %v8685_v12 = vmul.f32 %v12390_v26, %v8525_v38  ;;  %v8755_v3 = vadd.f32 %v17616_v0, %v8719_v48 }
0x1643   :  { %v8721_v44 = vmul.f32 %v17602_v61, %v8685_v12  ;;  %v8776_v27 = vpack.c.bf16 %v8755_v3, %v8754_v1  ;;  %v8756_v20 = vadd.f32 %v17616_v0, %v8720_v55  ;;  %v12412_v1 = vld [vmem:[%s18395_s3 + $0x10] sm:$0xff] }
0x1645   :  { %v8757_v7 = vadd.f32 %v17616_v0, %v8721_v44  ;;  %11513 = vmatprep.mubr.msk.bf16.mxu1 %vm2363_vm3, %v8776_v27 }
0x1647   :  { %v8777_v13 = vpack.c.bf16 %v8757_v7, %v8756_v20  ;;  %v12413_v7 = vld [vmem:[%s18395_s3 + $0x18] sm:$0xff] }
0x1649   :  { %11514 = vmatmul.mubr.msk.bf16.gmra.mrb[28].mxu1 %vm2363_vm3, %v8777_v13 }
0x16ec   :  { %v11503_v24 = vpop.f32.mrb[16].mxu1 }
0x16ed   :  { %v17692_v50 = vadd.f32 %v11503_v24, %v17309_v43  ;;  %v8941_v42 = vpop.f32.mrb[17].mxu1 }
0x16ee   :  { %v17695_v14 = vadd.f32 %v17309_v43, %v8941_v42  ;;  %v11504_v57 = vpop.f32.mrb[18].mxu1 }
0x16ef   :  { %9022 = vst [vmem:[%s18395_s3 + $0x90] sm:$0xff] %v17692_v50  ;;  %v17702_v61 = vadd.f32 %v11504_v57, %v17309_v43  ;;  %v8944_v0 = vpop.f32.mrb[19].mxu1 }
0x16f0   :  { %9020 = vst [vmem:[%s18395_s3 + $0x80] sm:$0xff] %v17695_v14  ;;  %v17709_v19 = vadd.f32 %v17309_v43, %v8944_v0  ;;  %9068 = vmax.xlane.f32.xlu1 %v17695_v14 }
0x16f1   :  { %9023 = vst [vmem:[%s18395_s3 + $0x98] sm:$0xff] %v17702_v61 }
0x16f2   :  { %9021 = vst [vmem:[%s18395_s3 + $0x88] sm:$0xff] %v17709_v19  ;;  %9070 = vmax.xlane.f32.xlu0 %v17709_v19 }
0x16f4   :  { %9036 = vmax.xlane.f32.xlu1 %v17315_v41 }
0x16f6   :  { %9038 = vmax.xlane.f32.xlu0 %v17331_v35 }
0x16f8   :  { %9072 = vmax.xlane.f32.xlu1 %v17692_v50 }
0x16fa   :  { %9074 = vmax.xlane.f32.xlu0 %v17702_v61 }
0x16fc   :  { %9040 = vmax.xlane.f32.xlu1 %v17312_v4  ;;  %v11507_v60 = vpop.f32.mrb[20].mxu1 }
0x16fd   :  { %v17727_v47 = vadd.f32 %v11507_v60, %v17309_v43  ;;  %v8957_v6 = vpop.f32.mrb[21].mxu1 }
0x16fe   :  { %v17730_v9 = vadd.f32 %v17309_v43, %v8957_v6  ;;  %9042 = vmax.xlane.f32.xlu0 %v17323_v39  ;;  %v11508_v17 = vpop.f32.mrb[22].mxu1 }
0x16ff   :  { %9026 = vst [vmem:[%s18395_s3 + $0xb0] sm:$0xff] %v17727_v47  ;;  %v17738_v29 = vadd.f32 %v11508_v17, %v17309_v43  ;;  %v8960_v4 = vpop.f32.mrb[23].mxu1  ;;  %v12414_v17 = vld [vmem:[%s18395_s3 + $0x20] sm:$0xff] }
0x1700   :  { %9024 = vst [vmem:[%s18395_s3 + $0xa0] sm:$0xff] %v17730_v9  ;;  %v17745_v53 = vadd.f32 %v17309_v43, %v8960_v4  ;;  %9076 = vmax.xlane.f32.xlu1 %v17730_v9 }
0x1701   :  { %9027 = vst [vmem:[%s18395_s3 + $0xb8] sm:$0xff] %v17738_v29 }
0x1702   :  { %9025 = vst [vmem:[%s18395_s3 + $0xa8] sm:$0xff] %v17745_v53  ;;  %9078 = vmax.xlane.f32.xlu0 %v17745_v53 }
0x1704   :  { %9044 = vmax.xlane.f32.xlu1 %v17349_v30 }
0x1706   :  { %9046 = vmax.xlane.f32.xlu0 %v17365_v8 }
0x1708   :  { %9080 = vmax.xlane.f32.xlu1 %v17727_v47 }
0x170a   :  { %9082 = vmax.xlane.f32.xlu0 %v17738_v29 }
0x170c   :  { %9048 = vmax.xlane.f32.xlu1 %v17346_v10  ;;  %v11511_v39 = vpop.f32.mrb[24].mxu1 }
0x170d   :  { %v17763_v62 = vadd.f32 %v11511_v39, %v17309_v43  ;;  %v8973_v5 = vpop.f32.mrb[25].mxu1 }
0x170e   :  { %v17766_v18 = vadd.f32 %v17309_v43, %v8973_v5  ;;  %9050 = vmax.xlane.f32.xlu0 %v17357_v58  ;;  %v11512_v51 = vpop.f32.mrb[26].mxu1 }
0x170f   :  { %9030 = vst [vmem:[%s18395_s3 + $0xd0] sm:$0xff] %v17763_v62  ;;  %v17774_v30 = vadd.f32 %v11512_v51, %v17309_v43  ;;  %v8976_v10 = vpop.f32.mrb[27].mxu1  ;;  %v12415_v51 = vld [vmem:[%s18395_s3 + $0x28] sm:$0xff] }
0x1710   :  { %9028 = vst [vmem:[%s18395_s3 + $0xc0] sm:$0xff] %v17766_v18  ;;  %v17781_v8 = vadd.f32 %v17309_v43, %v8976_v10  ;;  %9084 = vmax.xlane.f32.xlu1 %v17766_v18 }
0x1711   :  { %9031 = vst [vmem:[%s18395_s3 + $0xd8] sm:$0xff] %v17774_v30 }
0x1712   :  { %9029 = vst [vmem:[%s18395_s3 + $0xc8] sm:$0xff] %v17781_v8  ;;  %9086 = vmax.xlane.f32.xlu0 %v17781_v8 }
0x1714   :  { %9052 = vmax.xlane.f32.xlu1 %v17379_v28 }
0x1716   :  { %9054 = vmax.xlane.f32.xlu0 %v17393_v52 }
0x1718   :  { %9088 = vmax.xlane.f32.xlu1 %v17763_v62 }
0x171a   :  { %9090 = vmax.xlane.f32.xlu0 %v17774_v30 }
0x171c   :  { %9056 = vmax.xlane.f32.xlu1 %v17376_v63  ;;  %v11515_v58 = vpop.f32.mrb[28].mxu1 }
0x171d   :  { %v17799_v54 = vadd.f32 %v11515_v58, %v17309_v43  ;;  %v8989_v23 = vpop.f32.mrb[29].mxu1 }
0x171e   :  { %v17802_v56 = vadd.f32 %v17309_v43, %v8989_v23  ;;  %9058 = vmax.xlane.f32.xlu0 %v17386_v40  ;;  %v11516_v34 = vpop.f32.mrb[30].mxu1 }
0x171f   :  { %9034 = vst [vmem:[%s18395_s3 + $0xf0] sm:$0xff] %v17799_v54  ;;  %v17810_v28 = vadd.f32 %v11516_v34, %v17309_v43  ;;  %v8992_v63 = vpop.f32.mrb[31].mxu1 }
0x1720   :  { %9032 = vst [vmem:[%s18395_s3 + $0xe0] sm:$0xff] %v17802_v56  ;;  %v17817_v52 = vadd.f32 %v17309_v43, %v8992_v63  ;;  %9092 = vmax.xlane.f32.xlu1 %v17802_v56  ;;  %v9100_v43 = vlaneseq }
0x1721   :  { %9035 = vst [vmem:[%s18395_s3 + $0xf8] sm:$0xff] %v17810_v28 }
0x1722   :  { %9033 = vst [vmem:[%s18395_s3 + $0xe8] sm:$0xff] %v17817_v52  ;;  %9094 = vmax.xlane.f32.xlu0 %v17817_v52  ;;  %v17835_v40 = vand.u32 127, %v9100_v43 }
0x1724   :  { %9060 = vmax.xlane.f32.xlu1 %v17407_v37  ;;  %18725 = vst [vmem:[#allocation55_spill] sm:$0xff] %v17835_v40 }
0x1726   :  { %9062 = vmax.xlane.f32.xlu0 %v17421_v25 }
0x1728   :  { %9096 = vmax.xlane.f32.xlu1 %v17799_v54 }
0x172a   :  { %9098 = vmax.xlane.f32.xlu0 %v17810_v28 }
0x172c   :  { %9064 = vmax.xlane.f32.xlu1 %v17404_v31 }
0x172e   :  { %9066 = vmax.xlane.f32.xlu0 %v17414_v33 }
0x177d   :  { %v9069_v46 = vpop.xlane.xlu1 %9068 }
0x177e   :  { %vm9118_vm5 = vcmp.eq.f32.partialorder %v17695_v14, %v9069_v46 }
0x177f   :  { %v17839_v49 = vsel %vm9118_vm5, %v17835_v40, 256  ;;  %v9071_v37 = vpop.xlane.xlu0 %9070 }
0x1780   :  { %18726 = vst [vmem:[#allocation58_spill] sm:$0xff] %v17839_v49  ;;  %v9391_v25 = vshra.s32 %v17839_v49, 16  ;;  %vm9119_vm6 = vcmp.eq.f32.partialorder %v17709_v19, %v9071_v37 }
0x1781   :  { %v17844_v15 = vsel %vm9119_vm6, %v17835_v40, 256  ;;  %v9037_v31 = vpop.xlane.xlu1 %9036 }
0x1782   :  { %18727 = vst [vmem:[#allocation62_spill] sm:$0xff] %v17844_v15  ;;  %v9405_v33 = vshra.s32 %v17844_v15, 16  ;;  %vm9102_vm7 = vcmp.eq.f32.partialorder %v17315_v41, %v9037_v31  ;;  %v17848_v21 = vcvt.s32.f32 %v9391_v25 }
0x1783   :  { %v17851_v32 = vsel %vm9102_vm7, %v17835_v40, 256  ;;  %v9039_v59 = vpop.xlane.xlu0 %9038 }
0x1784   :  { %18728 = vst [vmem:[#allocation54_spill] sm:$0xff] %v17851_v32  ;;  %v9167_v45 = vshra.s32 %v17851_v32, 16  ;;  %vm9103_vm8 = vcmp.eq.f32.partialorder %v17331_v35, %v9039_v59  ;;  %9394 = vmin.xlane.f32.xlu1 %v17848_v21  ;;  %v17856_v11 = vcvt.s32.f32 %v9405_v33  ;;  %v12416_v59 = vld [vmem:[%s18395_s3 + $0x30] sm:$0xff] }
0x1785   :  { %v17859_v16 = vsel %vm9103_vm8, %v17835_v40, 256  ;;  %v9073_v36 = vpop.xlane.xlu1 %9072 }
0x1786   :  { %v9181_v41 = vshra.s32 %v17859_v16, 16  ;;  %vm9120_vm9 = vcmp.eq.f32.partialorder %v17692_v50, %v9073_v36  ;;  %9408 = vmin.xlane.f32.xlu0 %v17856_v11  ;;  %v17864_v2 = vcvt.s32.f32 %v9167_v45 }
0x1787   :  { %v17867_v38 = vsel %vm9120_vm9, %v17835_v40, 256  ;;  %v9075_v35 = vpop.xlane.xlu0 %9074 }
0x1788   :  { %v9419_v22 = vshra.s32 %v17867_v38, 16  ;;  %vm9121_vm10 = vcmp.eq.f32.partialorder %v17702_v61, %v9075_v35  ;;  %9170 = vmin.xlane.f32.xlu1 %v17864_v2  ;;  %v17872_v48 = vcvt.s32.f32 %v9181_v41  ;;  %v12417_v35 = vld [vmem:[%s18395_s3 + $0x38] sm:$0xff] }
0x1789   :  { %v17875_v26 = vsel %vm9121_vm10, %v17835_v40, 256  ;;  %v9041_v55 = vpop.xlane.xlu1 %9040 }
0x178a   :  { %v9433_v12 = vshra.s32 %v17875_v26, 16  ;;  %vm9104_vm11 = vcmp.eq.f32.partialorder %v12412_v1, %v9041_v55  ;;  %9184 = vmin.xlane.f32.xlu0 %v17872_v48  ;;  %v17882_v3 = vcvt.s32.f32 %v9419_v22 }
0x178b   :  { %v17885_v44 = vsel %vm9104_vm11, %v17835_v40, 256  ;;  %v9043_v27 = vpop.xlane.xlu0 %9042 }
0x178c   :  { %v9195_v20 = vshra.s32 %v17885_v44, 16  ;;  %vm9105_vm12 = vcmp.eq.f32.partialorder %v12413_v7, %v9043_v27  ;;  %9422 = vmin.xlane.f32.xlu1 %v17882_v3  ;;  %v17892_v13 = vcvt.s32.f32 %v9433_v12 }
0x178d   :  { %v17895_v24 = vsel %vm9105_vm12, %v17835_v40, 256  ;;  %v9077_v50 = vpop.xlane.xlu1 %9076 }
0x178e   :  { %v9209_v42 = vshra.s32 %v17895_v24, 16  ;;  %vm9122_vm13 = vcmp.eq.f32.partialorder %v17730_v9, %v9077_v50  ;;  %9436 = vmin.xlane.f32.xlu0 %v17892_v13  ;;  %v17900_v14 = vcvt.s32.f32 %v9195_v20 }
0x178f   :  { %v17903_v57 = vsel %vm9122_vm13, %v17835_v40, 256  ;;  %v9079_v61 = vpop.xlane.xlu0 %9078 }
0x1790   :  { %v9447_v0 = vshra.s32 %v17903_v57, 16  ;;  %vm9123_vm14 = vcmp.eq.f32.partialorder %v17745_v53, %v9079_v61  ;;  %9198 = vmin.xlane.f32.xlu1 %v17900_v14  ;;  %v17908_v19 = vcvt.s32.f32 %v9209_v42 }
0x1791   :  { %v17911_v60 = vsel %vm9123_vm14, %v17835_v40, 256  ;;  %v9045_v6 = vpop.xlane.xlu1 %9044 }
0x1792   :  { %v9461_v9 = vshra.s32 %v17911_v60, 16  ;;  %vm9106_vm15 = vcmp.eq.f32.partialorder %v12414_v17, %v9045_v6  ;;  %9212 = vmin.xlane.f32.xlu0 %v17908_v19  ;;  %v17918_v4 = vcvt.s32.f32 %v9447_v0  ;;  %v12418_v6 = vld [vmem:[%s18395_s3 + $0x40] sm:$0xff] }
0x1793   :  { %v17921_v53 = vsel %vm9106_vm15, %v17835_v40, 256  ;;  %v9047_v39 = vpop.xlane.xlu0 %9046 }
0x1794   :  { %v9223_v5 = vshra.s32 %v17921_v53, 16  ;;  %vm9107_vm0 = vcmp.eq.f32.partialorder %v12415_v51, %v9047_v39  ;;  %9450 = vmin.xlane.f32.xlu1 %v17918_v4  ;;  %v17928_v10 = vcvt.s32.f32 %v9461_v9 }
0x1795   :  { %v17931_v58 = vsel %vm9107_vm0, %v17835_v40, 256  ;;  %v9081_v23 = vpop.xlane.xlu1 %9080 }
0x1796   :  { %v9237_v34 = vshra.s32 %v17931_v58, 16  ;;  %vm9124_vm1 = vcmp.eq.f32.partialorder %v17727_v47, %v9081_v23  ;;  %9464 = vmin.xlane.f32.xlu0 %v17928_v10  ;;  %v17936_v63 = vcvt.s32.f32 %v9223_v5  ;;  %v12419_v5 = vld [vmem:[%s18395_s3 + $0x48] sm:$0xff] }
0x1797   :  { %v17939_v43 = vsel %vm9124_vm1, %v17835_v40, 256  ;;  %v9083_v46 = vpop.xlane.xlu0 %9082 }
0x1798   :  { %v9475_v37 = vshra.s32 %v17939_v43, 16  ;;  %vm9125_vm2 = vcmp.eq.f32.partialorder %v17738_v29, %v9083_v46  ;;  %9226 = vmin.xlane.f32.xlu1 %v17936_v63  ;;  %v17944_v25 = vcvt.s32.f32 %v9237_v34 }
0x1799   :  { %v17947_v31 = vsel %vm9125_vm2, %v17835_v40, 256  ;;  %v9049_v47 = vpop.xlane.xlu1 %9048 }
0x179a   :  { %v9489_v33 = vshra.s32 %v17947_v31, 16  ;;  %vm9108_vm3 = vcmp.eq.f32.partialorder %v12416_v59, %v9049_v47  ;;  %9240 = vmin.xlane.f32.xlu0 %v17944_v25  ;;  %v17954_v45 = vcvt.s32.f32 %v9475_v37 }
0x179b   :  { %v17957_v29 = vsel %vm9108_vm3, %v17835_v40, 256  ;;  %v9051_v36 = vpop.xlane.xlu0 %9050 }
0x179c   :  { %v9251_v41 = vshra.s32 %v17957_v29, 16  ;;  %vm9109_vm4 = vcmp.eq.f32.partialorder %v12417_v35, %v9051_v36  ;;  %9478 = vmin.xlane.f32.xlu1 %v17954_v45  ;;  %v17964_v22 = vcvt.s32.f32 %v9489_v33 }
0x179d   :  { %v17967_v55 = vsel %vm9109_vm4, %v17835_v40, 256  ;;  %v9085_v12 = vpop.xlane.xlu1 %9084 }
0x179e   :  { %v9265_v1 = vshra.s32 %v17967_v55, 16  ;;  %vm9126_vm5 = vcmp.eq.f32.partialorder %v17766_v18, %v9085_v12  ;;  %9492 = vmin.xlane.f32.xlu0 %v17964_v22  ;;  %v17972_v27 = vcvt.s32.f32 %v9251_v41  ;;  %v12420_v12 = vld [vmem:[%s18395_s3 + $0x50] sm:$0xff] }
0x179f   :  { %v17975_v20 = vsel %vm9126_vm5, %v17835_v40, 256  ;;  %v9087_v7 = vpop.xlane.xlu0 %9086 }
0x17a0   :  { %v9503_v50 = vshra.s32 %v17975_v20, 16  ;;  %vm9127_vm6 = vcmp.eq.f32.partialorder %v17781_v8, %v9087_v7  ;;  %9254 = vmin.xlane.f32.xlu1 %v17972_v27  ;;  %v17980_v42 = vcvt.s32.f32 %v9265_v1 }
0x17a1   :  { %v17983_v61 = vsel %vm9127_vm6, %v17835_v40, 256  ;;  %v9053_v18 = vpop.xlane.xlu1 %9052 }
0x17a2   :  { %v9517_v0 = vshra.s32 %v17983_v61, 16  ;;  %vm9110_vm7 = vcmp.eq.f32.partialorder %v12418_v6, %v9053_v18  ;;  %9268 = vmin.xlane.f32.xlu0 %v17980_v42  ;;  %v17990_v9 = vcvt.s32.f32 %v9503_v50  ;;  %v12421_v18 = vld [vmem:[%s18395_s3 + $0x58] sm:$0xff] }
0x17a3   :  { %v17993_v8 = vsel %vm9110_vm7, %v17835_v40, 256  ;;  %v9055_v17 = vpop.xlane.xlu0 %9054 }
0x17a4   :  { %v9279_v39 = vshra.s32 %v17993_v8, 16  ;;  %vm9111_vm8 = vcmp.eq.f32.partialorder %v12419_v5, %v9055_v17  ;;  %9506 = vmin.xlane.f32.xlu1 %v17990_v9  ;;  %v18000_v51 = vcvt.s32.f32 %v9517_v0 }
0x17a5   :  { %v18003_v23 = vsel %vm9111_vm8, %v17835_v40, 256  ;;  %v9089_v34 = vpop.xlane.xlu1 %9088 }
0x17a6   :  { %v9293_v46 = vshra.s32 %v18003_v23, 16  ;;  %vm9128_vm9 = vcmp.eq.f32.partialorder %v17763_v62, %v9089_v34  ;;  %9520 = vmin.xlane.f32.xlu0 %v18000_v51  ;;  %v18008_v37 = vcvt.s32.f32 %v9279_v39 }
0x17a7   :  { %v18011_v47 = vsel %vm9128_vm9, %v17835_v40, 256  ;;  %v9091_v33 = vpop.xlane.xlu0 %9090 }
0x17a8   :  { %v9531_v59 = vshra.s32 %v18011_v47, 16  ;;  %vm9129_vm10 = vcmp.eq.f32.partialorder %v17774_v30, %v9091_v33  ;;  %9282 = vmin.xlane.f32.xlu1 %v18008_v37  ;;  %v18016_v36 = vcvt.s32.f32 %v9293_v46 }
0x17a9   :  { %v18019_v41 = vsel %vm9129_vm10, %v17835_v40, 256  ;;  %v9057_v62 = vpop.xlane.xlu1 %9056 }
0x17aa   :  { %v9545_v35 = vshra.s32 %v18019_v41, 16  ;;  %vm9112_vm11 = vcmp.eq.f32.partialorder %v12420_v12, %v9057_v62  ;;  %9296 = vmin.xlane.f32.xlu0 %v18016_v36  ;;  %v18026_v1 = vcvt.s32.f32 %v9531_v59  ;;  %v12422_v12 = vld [vmem:[%s18395_s3 + $0x60] sm:$0xff] }
0x17ab   :  { %v18029_v30 = vsel %vm9112_vm11, %v17835_v40, 256  ;;  %v9059_v7 = vpop.xlane.xlu0 %9058 }
0x17ac   :  { %18729 = vst [vmem:[#allocation56_spill] sm:$0xff] %v18029_v30  ;;  %v9307_v50 = vshra.s32 %v18029_v30, 16  ;;  %vm9113_vm12 = vcmp.eq.f32.partialorder %v12421_v18, %v9059_v7  ;;  %9534 = vmin.xlane.f32.xlu1 %v18026_v1  ;;  %v18036_v0 = vcvt.s32.f32 %v9545_v35 }
0x17ad   :  { %v18039_v6 = vsel %vm9113_vm12, %v17835_v40, 256  ;;  %v9093_v17 = vpop.xlane.xlu1 %9092 }
0x17ae   :  { %18730 = vst [vmem:[#allocation64_spill] sm:$0xff] %v18039_v6  ;;  %v9321_v39 = vshra.s32 %v18039_v6, 16  ;;  %vm9130_vm13 = vcmp.eq.f32.partialorder %v17802_v56, %v9093_v17  ;;  %9548 = vmin.xlane.f32.xlu0 %v18036_v0  ;;  %v18044_v5 = vcvt.s32.f32 %v9307_v50  ;;  %v12423_v17 = vld [vmem:[%s18395_s3 + $0x68] sm:$0xff] }
0x17af   :  { %v18047_v34 = vsel %vm9130_vm13, %v17835_v40, 256  ;;  %v9095_v46 = vpop.xlane.xlu0 %9094 }
0x17b0   :  { %18731 = vst [vmem:[#allocation67_spill] sm:$0xff] %v18047_v34  ;;  %v9559_v33 = vshra.s32 %v18047_v34, 16  ;;  %vm9131_vm14 = vcmp.eq.f32.partialorder %v17817_v52, %v9095_v46  ;;  %9310 = vmin.xlane.f32.xlu1 %v18044_v5  ;;  %v18052_v59 = vcvt.s32.f32 %v9321_v39 }
0x17b1   :  { %v18055_v62 = vsel %vm9131_vm14, %v17835_v40, 256  ;;  %v9061_v56 = vpop.xlane.xlu1 %9060 }
0x17b2   :  { %18732 = vst [vmem:[#allocation63_spill] sm:$0xff] %v18055_v62  ;;  %v9573_v35 = vshra.s32 %v18055_v62, 16  ;;  %vm9114_vm15 = vcmp.eq.f32.partialorder %v12422_v12, %v9061_v56  ;;  %9324 = vmin.xlane.f32.xlu0 %v18052_v59  ;;  %v18062_v7 = vcvt.s32.f32 %v9559_v33 }
0x17b3   :  { %v18065_v52 = vsel %vm9114_vm15, %v17835_v40, 256  ;;  %v9063_v50 = vpop.xlane.xlu0 %9062 }
0x17b4   :  { %18733 = vst [vmem:[#allocation65_spill] sm:$0xff] %v18065_v52  ;;  %v9335_v18 = vshra.s32 %v18065_v52, 16  ;;  %vm9115_vm0 = vcmp.eq.f32.partialorder %v12423_v17, %v9063_v50  ;;  %9562 = vmin.xlane.f32.xlu1 %v18062_v7  ;;  %v18072_v39 = vcvt.s32.f32 %v9573_v35 }
0x17b5   :  { %v18075_v46 = vsel %vm9115_vm0, %v17835_v40, 256  ;;  %v9097_v33 = vpop.xlane.xlu1 %9096 }
0x17b6   :  { %18734 = vst [vmem:[#allocation71_spill] sm:$0xff] %v18075_v46  ;;  %v9349_v56 = vshra.s32 %v18075_v46, 16  ;;  %vm9132_vm1 = vcmp.eq.f32.partialorder %v17799_v54, %v9097_v33  ;;  %9576 = vmin.xlane.f32.xlu0 %v18072_v39  ;;  %v18080_v12 = vcvt.s32.f32 %v9335_v18  ;;  %v12424_v18 = vld [vmem:[%s18395_s3 + $0x70] sm:$0xff] }
0x17b7   :  { %v18083_v52 = vsel %vm9132_vm1, %v17835_v40, 256  ;;  %v9099_v50 = vpop.xlane.xlu0 %9098 }
0x17b8   :  { %18735 = vst [vmem:[#allocation69_spill] sm:$0xff] %v18080_v12  ;;  %18736 = vst [vmem:[#allocation70_spill] sm:$0xff] %v18083_v52  ;;  %v9587_v17 = vshra.s32 %v18083_v52, 16  ;;  %vm9133_vm2 = vcmp.eq.f32.partialorder %v17810_v28, %v9099_v50  ;;  %9338 = vmin.xlane.f32.xlu1 %v18080_v12  ;;  %v18088_v35 = vcvt.s32.f32 %v9349_v56  ;;  %v12425_v12 = vld [vmem:[%s18395_s3 + $0x78] sm:$0xff]  ;;  %s12455_s3 = smov [#allocation2]  }
0x17b9   :  { %v18091_v46 = vsel %vm9133_vm2, %v17835_v40, 256  ;;  %v9065_v54 = vpop.xlane.xlu1 %9064  ;;  %s9823_s14 = sshll.u32 %s12455_s3, 4  ;;  %s9824_s14 = int_to_ptr.vmem [resolvable:$true] %s9823_s14 }
0x17ba   :  { %18737 = vst [vmem:[#allocation72_spill] sm:$0xff] %v18091_v46  ;;  %v9601_v33 = vshra.s32 %v18091_v46, 16  ;;  %vm9116_vm3 = vcmp.eq.f32.partialorder %v12424_v18, %v9065_v54  ;;  %9352 = vmin.xlane.f32.xlu0 %v18088_v35  ;;  %v18098_v52 = vcvt.s32.f32 %v9587_v17  ;;  %s12426_s15 = scalar_lea.vmem %s9824_s14, 32  ;;  %p12431_p1 = scmp.lt.s32.totalorder %s9824_s14, %s9824_s14 }
0x17bb   :  { %v18101_v28 = vsel %vm9116_vm3, %v17835_v40, 256  ;;  %v9067_v56 = vpop.xlane.xlu0 %9066  ;;  %p12427_p0 = scmp.ne.s32.totalorder %s9824_s14, %s12426_s15  ;;  %p12432_p2 = scmp.lt.s32.totalorder %s12426_s15, %s12426_s15 }
0x17bc   :  { %18738 = vst [vmem:[#allocation24_spill] sm:$0xff] %v18098_v52  ;;  %18739 = vst [vmem:[#allocation30_spill] sm:$0xff] %v18101_v28  ;;  %v9363_v50 = vshra.s32 %v18101_v28, 16  ;;  %vm9117_vm4 = vcmp.eq.f32.partialorder %v12425_v12, %v9067_v56  ;;  %9590 = vmin.xlane.f32.xlu1 %v18098_v52  ;;  %v18108_v46 = vcvt.s32.f32 %v9601_v33  ;;  %v9390_v12 = vand.u32 65535, %v17839_v49 }
0x17bd   :  { %v18111_v54 = vsel %vm9117_vm4, %v17835_v40, 256  ;;  %v9404_v33 = vand.u32 65535, %v17844_v15  ;;  %v9166_v56 = vand.u32 65535, %v17851_v32  ;;  %v9418_v15 = vand.u32 65535, %v17867_v38  ;;  %p12433_p3 = por %p12432_p2, %p12431_p1 }
0x17be   :  { %18740 = vst [vmem:[#allocation28_spill] sm:$0xff] %v18108_v46  ;;  %18741 = vst [vmem:[#allocation29_spill] sm:$0xff] %v18111_v54  ;;  %v9377_v17 = vshra.s32 %v18111_v54, 16  ;;  %9604 = vmin.xlane.f32.xlu0 %v18108_v46  ;;  %v18115_v18 = vcvt.s32.f32 %v9363_v50  ;;  %v9392_v52 = vcvt.s32.f32 %v9390_v12  ;;  %v9180_v50 = vand.u32 65535, %v17859_v16 }
0x17bf   :  { %p12434_p4 = pnand %p12433_p3, %p12427_p0 }
0x17c0   :  { %18742 = vst [vmem:[#allocation27_spill] sm:$0xff] %v18115_v18  ;;  %9366 = vmin.xlane.f32.xlu1 %v18115_v18  ;;  %v18118_v28 = vcvt.s32.f32 %v9377_v17  ;;  %v9406_v18 = vcvt.s32.f32 %v9404_v33  ;;  %v9182_v33 = vcvt.s32.f32 %v9180_v50 }
0x17c2   :  { %18743 = vst [vmem:[#allocation34_spill] sm:$0xff] %v18118_v28  ;;  %9380 = vmin.xlane.f32.xlu0 %v18118_v28  ;;  %v9168_v28 = vcvt.s32.f32 %v9166_v56  ;;  %v9420_v56 = vcvt.s32.f32 %v9418_v15 }
0x1811   :  { %v18124_v40 = vpop.xlane.xlu1 %9394 }
0x1812   :  { %vm9396_vm5 = vcmp.eq.f32.partialorder %v17848_v21, %v18124_v40  ;;  %v9432_v21 = vand.u32 65535, %v17875_v26 }
0x1813   :  { %v18129_v46 = vpop.xlane.xlu0 %9408  ;;  %v9397_v17 = vsel %vm9396_vm5, %v9392_v52, inf }
0x1814   :  { %vm9410_vm6 = vcmp.eq.f32.partialorder %v17856_v11, %v18129_v46  ;;  %9398 = vmin.xlane.f32.xlu1 %v9397_v17  ;;  %v9194_v11 = vand.u32 65535, %v17885_v44  ;;  %v9434_v50 = vcvt.s32.f32 %v9432_v21 }
0x1815   :  { %v18134_v49 = vpop.xlane.xlu1 %9170  ;;  %v9411_v32 = vsel %vm9410_vm6, %v9406_v18, inf }
0x1816   :  { %vm9172_vm7 = vcmp.eq.f32.partialorder %v17864_v2, %v18134_v49  ;;  %9412 = vmin.xlane.f32.xlu0 %v9411_v32  ;;  %v9208_v32 = vand.u32 65535, %v17895_v24  ;;  %v9196_v15 = vcvt.s32.f32 %v9194_v11 }
0x1817   :  { %v18139_v12 = vpop.xlane.xlu0 %9184  ;;  %v9173_v52 = vsel %vm9172_vm7, %v9168_v28, inf }
0x1818   :  { %vm9186_vm8 = vcmp.eq.f32.partialorder %v17872_v48, %v18139_v12  ;;  %9174 = vmin.xlane.f32.xlu1 %v9173_v52  ;;  %v9446_v48 = vand.u32 65535, %v17903_v57  ;;  %v9210_v21 = vcvt.s32.f32 %v9208_v32 }
0x1819   :  { %v18144_v17 = vpop.xlane.xlu1 %9422  ;;  %v9187_v18 = vsel %vm9186_vm8, %v9182_v33, inf }
0x181a   :  { %vm9424_vm9 = vcmp.eq.f32.partialorder %v17882_v3, %v18144_v17  ;;  %9188 = vmin.xlane.f32.xlu0 %v9187_v18  ;;  %v9460_v3 = vand.u32 65535, %v17911_v60  ;;  %v9448_v11 = vcvt.s32.f32 %v9446_v48 }
0x181b   :  { %v18149_v2 = vpop.xlane.xlu0 %9436  ;;  %v9425_v28 = vsel %vm9424_vm9, %v9420_v56, inf }
0x181c   :  { %vm9438_vm10 = vcmp.eq.f32.partialorder %v17892_v13, %v18149_v2  ;;  %9426 = vmin.xlane.f32.xlu1 %v9425_v28  ;;  %v9222_v13 = vand.u32 65535, %v17921_v53  ;;  %v9462_v32 = vcvt.s32.f32 %v9460_v3 }
0x181d   :  { %v18154_v52 = vpop.xlane.xlu1 %9198  ;;  %v9439_v33 = vsel %vm9438_vm10, %v9434_v50, inf }
0x181e   :  { %vm9200_vm11 = vcmp.eq.f32.partialorder %v17900_v14, %v18154_v52  ;;  %9440 = vmin.xlane.f32.xlu0 %v9439_v33  ;;  %v9236_v14 = vand.u32 65535, %v17931_v58  ;;  %v9224_v48 = vcvt.s32.f32 %v9222_v13 }
0x181f   :  { %v18159_v18 = vpop.xlane.xlu0 %9212  ;;  %v9201_v56 = vsel %vm9200_vm11, %v9196_v15, inf }
0x1820   :  { %vm9214_vm12 = vcmp.eq.f32.partialorder %v17908_v19, %v18159_v18  ;;  %9202 = vmin.xlane.f32.xlu1 %v9201_v56  ;;  %v9474_v19 = vand.u32 65535, %v17939_v43  ;;  %v9238_v3 = vcvt.s32.f32 %v9236_v14 }
0x1821   :  { %v18164_v28 = vpop.xlane.xlu1 %9450  ;;  %v9215_v50 = vsel %vm9214_vm12, %v9210_v21, inf }
0x1822   :  { %vm9452_vm13 = vcmp.eq.f32.partialorder %v17918_v4, %v18164_v28  ;;  %9216 = vmin.xlane.f32.xlu0 %v9215_v50  ;;  %v9488_v4 = vand.u32 65535, %v17947_v31  ;;  %v9476_v13 = vcvt.s32.f32 %v9474_v19 }
0x1823   :  { %v18169_v33 = vpop.xlane.xlu0 %9464  ;;  %v9453_v15 = vsel %vm9452_vm13, %v9448_v11, inf }
0x1824   :  { %vm9466_vm14 = vcmp.eq.f32.partialorder %v17928_v10, %v18169_v33  ;;  %9454 = vmin.xlane.f32.xlu1 %v9453_v15  ;;  %v9250_v10 = vand.u32 65535, %v17957_v29  ;;  %v9490_v14 = vcvt.s32.f32 %v9488_v4 }
0x1825   :  { %v18174_v56 = vpop.xlane.xlu1 %9226  ;;  %v9467_v21 = vsel %vm9466_vm14, %v9462_v32, inf }
0x1826   :  { %vm9228_vm15 = vcmp.eq.f32.partialorder %v17936_v63, %v18174_v56  ;;  %9468 = vmin.xlane.f32.xlu0 %v9467_v21  ;;  %v9264_v63 = vand.u32 65535, %v17967_v55  ;;  %v9252_v19 = vcvt.s32.f32 %v9250_v10  ;;  %v9278_v10 = vand.u32 65535, %v17993_v8 }
0x1827   :  { %v18179_v50 = vpop.xlane.xlu0 %9240  ;;  %v9229_v11 = vsel %vm9228_vm15, %v9224_v48, inf }
0x1828   :  { %vm9242_vm0 = vcmp.eq.f32.partialorder %v17944_v25, %v18179_v50  ;;  %9230 = vmin.xlane.f32.xlu1 %v9229_v11  ;;  %v9502_v25 = vand.u32 65535, %v17975_v20 }
0x1829   :  { %v18184_v15 = vpop.xlane.xlu1 %9478  ;;  %v9243_v32 = vsel %vm9242_vm0, %v9238_v3, inf }
0x182a   :  { %vm9480_vm1 = vcmp.eq.f32.partialorder %v17954_v45, %v18184_v15  ;;  %9244 = vmin.xlane.f32.xlu0 %v9243_v32  ;;  %v18499_v45 = vmov 0.0   ;;  %v9516_v32 = vand.u32 65535, %v17983_v61 }
0x182b   :  { %v18189_v21 = vpop.xlane.xlu0 %9492  ;;  %v9481_v48 = vsel %vm9480_vm1, %v9476_v13, inf  ;;  %11537 = vmatprep.subr.bf16.mxu1 %v18499_v45  ;;  %11517 = vmatprep.subr.bf16.mxu0 %v18499_v45 }
0x182c   :  { %vm9494_vm2 = vcmp.eq.f32.partialorder %v17964_v22, %v18189_v21  ;;  %9482 = vmin.xlane.f32.xlu1 %v9481_v48  ;;  %v9266_v22 = vcvt.s32.f32 %v9264_v63  ;;  %v9518_v45 = vcvt.s32.f32 %v9516_v32 }
0x182d   :  { %v18194_v11 = vpop.xlane.xlu1 %9254  ;;  %v9495_v3 = vsel %vm9494_vm2, %v9490_v14, inf  ;;  %v9504_v14 = vcvt.s32.f32 %v9502_v25  ;;  %v9280_v25 = vcvt.s32.f32 %v9278_v10 }
0x182e   :  { %vm9256_vm3 = vcmp.eq.f32.partialorder %v17972_v27, %v18194_v11  ;;  %9496 = vmin.xlane.f32.xlu0 %v9495_v3  ;;  %v9292_v3 = vand.u32 65535, %v18003_v23 }
0x182f   :  { %v18200_v4 = vpop.xlane.xlu0 %9268  ;;  %v9257_v13 = vsel %vm9256_vm3, %v9252_v19, inf }
0x1830   :  { %vm9270_vm4 = vcmp.eq.f32.partialorder %v17980_v42, %v18200_v4  ;;  %9258 = vmin.xlane.f32.xlu1 %v9257_v13  ;;  %v9530_v42 = vand.u32 65535, %v18011_v47  ;;  %v9294_v32 = vcvt.s32.f32 %v9292_v3 }
0x1831   :  { %v18206_v48 = vpop.xlane.xlu1 %9506  ;;  %v9271_v27 = vsel %vm9270_vm4, %v9266_v22, inf }
0x1832   :  { %vm9508_vm5 = vcmp.eq.f32.partialorder %v17990_v9, %v18206_v48  ;;  %9272 = vmin.xlane.f32.xlu0 %v9271_v27  ;;  %v9544_v9 = vand.u32 65535, %v18019_v41  ;;  %v9532_v10 = vcvt.s32.f32 %v9530_v42 }
0x1833   :  { %v18211_v19 = vpop.xlane.xlu0 %9520  ;;  %v9509_v63 = vsel %vm9508_vm5, %v9504_v14, inf  ;;  %vm12453_vm5 = vmmov 0  }
0x1834   :  { %vm9522_vm6 = vcmp.eq.f32.partialorder %v18000_v51, %v18211_v19  ;;  %9510 = vmin.xlane.f32.xlu1 %v9509_v63  ;;  %v9306_v51 = vand.u32 65535, %v18029_v30  ;;  %v9546_v3 = vcvt.s32.f32 %v9544_v9  ;;  %v18752_v30 = vld [vmem:[#allocation24_spill] sm:$0xff] }
0x1835   :  { %v18216_v13 = vpop.xlane.xlu1 %9282  ;;  %v9523_v22 = vsel %vm9522_vm6, %v9518_v45, inf }
0x1836   :  { %vm9284_vm7 = vcmp.eq.f32.partialorder %v18008_v37, %v18216_v13  ;;  %9524 = vmin.xlane.f32.xlu0 %v9523_v22  ;;  %v9320_v37 = vand.u32 65535, %v18039_v6  ;;  %v9308_v42 = vcvt.s32.f32 %v9306_v51  ;;  %v18747_v6 = vld [vmem:[#allocation69_spill] sm:$0xff] }
0x1837   :  { %v18221_v27 = vpop.xlane.xlu0 %9296  ;;  %v9285_v14 = vsel %vm9284_vm7, %v9280_v25, inf }
0x1838   :  { %vm9298_vm8 = vcmp.eq.f32.partialorder %v18016_v36, %v18221_v27  ;;  %9286 = vmin.xlane.f32.xlu1 %v9285_v14  ;;  %v9558_v36 = vand.u32 65535, %v18047_v34  ;;  %v9322_v9 = vcvt.s32.f32 %v9320_v37 }
0x1839   :  { %v18226_v63 = vpop.xlane.xlu1 %9534  ;;  %v9299_v45 = vsel %vm9298_vm8, %v9294_v32, inf }
0x183a   :  { %vm9536_vm9 = vcmp.eq.f32.partialorder %v18026_v1, %v18226_v63  ;;  %9300 = vmin.xlane.f32.xlu0 %v9299_v45  ;;  %v9572_v1 = vand.u32 65535, %v18055_v62  ;;  %v9560_v51 = vcvt.s32.f32 %v9558_v36 }
0x183b   :  { %v18231_v22 = vpop.xlane.xlu0 %9548  ;;  %v9537_v25 = vsel %vm9536_vm9, %v9532_v10, inf }
0x183c   :  { %vm9550_vm10 = vcmp.eq.f32.partialorder %v18036_v0, %v18231_v22  ;;  %9538 = vmin.xlane.f32.xlu1 %v9537_v25  ;;  %v18744_v0 = vld [vmem:[#allocation65_spill] sm:$0xff]  ;;  %v9574_v37 = vcvt.s32.f32 %v9572_v1 }
0x183d   :  { %v18236_v14 = vpop.xlane.xlu1 %9310  ;;  %v9551_v32 = vsel %vm9550_vm10, %v9546_v3, inf  ;;  %v9334_v25 = vand.u32 65535, %v18744_v0 }
0x183e   :  { %vm9312_vm11 = vcmp.eq.f32.partialorder %v18044_v5, %v18236_v14  ;;  %9552 = vmin.xlane.f32.xlu0 %v9551_v32  ;;  %v18745_v5 = vld [vmem:[#allocation71_spill] sm:$0xff] }
0x183f   :  { %v18241_v45 = vpop.xlane.xlu0 %9324  ;;  %v9313_v10 = vsel %vm9312_vm11, %v9308_v42, inf  ;;  %v9348_v32 = vand.u32 65535, %v18745_v5  ;;  %v9336_v36 = vcvt.s32.f32 %v9334_v25 }
0x1840   :  { %vm9326_vm12 = vcmp.eq.f32.partialorder %v18052_v59, %v18241_v45  ;;  %9314 = vmin.xlane.f32.xlu1 %v9313_v10  ;;  %v18746_v59 = vld [vmem:[#allocation70_spill] sm:$0xff] }
0x1841   :  { %v18246_v34 = vpop.xlane.xlu1 %9562  ;;  %v9327_v3 = vsel %vm9326_vm12, %v9322_v9, inf  ;;  %v9586_v10 = vand.u32 65535, %v18746_v59  ;;  %v9350_v1 = vcvt.s32.f32 %v9348_v32 }
0x1842   :  { %vm9564_vm13 = vcmp.eq.f32.partialorder %v18062_v7, %v18246_v34  ;;  %9328 = vmin.xlane.f32.xlu0 %v9327_v3  ;;  %v18748_v7 = vld [vmem:[#allocation72_spill] sm:$0xff] }
0x1843   :  { %v18251_v62 = vpop.xlane.xlu0 %9576  ;;  %v9565_v42 = vsel %vm9564_vm13, %v9560_v51, inf  ;;  %v9600_v3 = vand.u32 65535, %v18748_v7  ;;  %v9588_v25 = vcvt.s32.f32 %v9586_v10  ;;  %v18754_v7 = vld [vmem:[#allocation28_spill] sm:$0xff]  ;;  %v18756_v10 = vld [vmem:[#allocation27_spill] sm:$0xff] }
0x1844   :  { %vm9578_vm14 = vcmp.eq.f32.partialorder %v18072_v39, %v18251_v62  ;;  %9566 = vmin.xlane.f32.xlu1 %v9565_v42  ;;  %v18750_v39 = vld [vmem:[#allocation30_spill] sm:$0xff] }
0x1845   :  { %v18256_v0 = vpop.xlane.xlu1 %9338  ;;  %v9579_v9 = vsel %vm9578_vm14, %v9574_v37, inf  ;;  %v9362_v42 = vand.u32 65535, %v18750_v39  ;;  %v9602_v32 = vcvt.s32.f32 %v9600_v3 }
0x1846   :  { %vm9340_vm15 = vcmp.eq.f32.partialorder %v18747_v6, %v18256_v0  ;;  %9580 = vmin.xlane.f32.xlu0 %v9579_v9  ;;  %v9376_v6 = vand.u32 65535, %v18111_v54  ;;  %v18758_v54 = vld [vmem:[#allocation34_spill] sm:$0xff] }
0x1847   :  { %v18261_v5 = vpop.xlane.xlu0 %9352  ;;  %v9341_v51 = vsel %vm9340_vm15, %v9336_v36, inf  ;;  %v9364_v39 = vcvt.s32.f32 %v9362_v42  ;;  %v9401_v42 = vcvt.f32.s32 %v18124_v40 }
0x1848   :  { %18749 = vst [vmem:[#allocation32_spill] sm:$0xff] %v18261_v5  ;;  %vm9354_vm0 = vcmp.eq.f32.partialorder %v18088_v35, %v18261_v5  ;;  %9342 = vmin.xlane.f32.xlu1 %v9341_v51 }
0x1849   :  { %v18266_v59 = vpop.xlane.xlu1 %9590  ;;  %v9355_v37 = vsel %vm9354_vm0, %v9350_v1, inf }
0x184a   :  { %18751 = vst [vmem:[#allocation33_spill] sm:$0xff] %v18266_v59  ;;  %vm9592_vm1 = vcmp.eq.f32.partialorder %v18752_v30, %v18266_v59  ;;  %9356 = vmin.xlane.f32.xlu0 %v9355_v37  ;;  %v9378_v37 = vcvt.s32.f32 %v9376_v6 }
0x184b   :  { %v18271_v9 = vpop.xlane.xlu0 %9604  ;;  %v9593_v36 = vsel %vm9592_vm1, %v9588_v25, inf  ;;  %v9415_v25 = vcvt.f32.s32 %v18129_v46  ;;  %v9443_v46 = vcvt.f32.s32 %v18149_v2  ;;  %v9219_v2 = vcvt.f32.s32 %v18159_v18 }
0x184c   :  { %18753 = vst [vmem:[#allocation31_spill] sm:$0xff] %v18271_v9  ;;  %vm9606_vm2 = vcmp.eq.f32.partialorder %v18754_v7, %v18271_v9  ;;  %9594 = vmin.xlane.f32.xlu1 %v9593_v36  ;;  %v18759_v7 = vmov 0.0   ;;  %v9471_v18 = vcvt.f32.s32 %v18169_v33  ;;  %v9247_v33 = vcvt.f32.s32 %v18179_v50 }
0x184d   :  { %v18275_v35 = vpop.xlane.xlu1 %9366  ;;  %v9607_v51 = vsel %vm9606_vm2, %v9602_v32, inf  ;;  %11553 = vmatprep.mubr.msk.bf16.mxu1 %vm12453_vm5, %v18759_v7  ;;  %11533 = vmatprep.mubr.msk.bf16.mxu0 %vm12453_vm5, %v18759_v7  ;;  %v9402_v32 = vshll.u32 %v9401_v42, 16  ;;  %v18760_v42 = vld [vmem:[#allocation58_spill] sm:$0xff]  ;;  %v9499_v50 = vcvt.f32.s32 %v18189_v21  ;;  %v9275_v21 = vcvt.f32.s32 %v18200_v4 }
0x184e   :  { %18755 = vst [vmem:[#allocation38_spill] sm:$0xff] %v18275_v35  ;;  %vm9368_vm3 = vcmp.eq.f32.partialorder %v18756_v10, %v18275_v35  ;;  %9608 = vmin.xlane.f32.xlu0 %v9607_v51  ;;  %v9191_v51 = vcvt.f32.s32 %v18139_v12  ;;  %v9416_v10 = vshll.u32 %v9415_v25, 16  ;;  %v9429_v35 = vcvt.f32.s32 %v18144_v17 }
0x184f   :  { %v18279_v30 = vpop.xlane.xlu0 %9380  ;;  %v9369_v1 = vsel %vm9368_vm3, %v9364_v39, inf  ;;  %v9177_v39 = vcvt.f32.s32 %v18134_v49  ;;  %v18761_v49 = vld [vmem:[#allocation62_spill] sm:$0xff]  ;;  %v12454_v17 = vmov 1.0|1.0   ;;  %v9527_v4 = vcvt.f32.s32 %v18211_v19 }
0x1850   :  { %18757 = vst [vmem:[#allocation36_spill] sm:$0xff] %v18279_v30  ;;  %vm9382_vm4 = vcmp.eq.f32.partialorder %v18758_v54, %v18279_v30  ;;  %9370 = vmin.xlane.f32.xlu1 %v9369_v1  ;;  %v9192_v40 = vshll.u32 %v9191_v51, 16  ;;  %v9444_v51 = vshll.u32 %v9443_v46, 16  ;;  %v9303_v19 = vcvt.f32.s32 %v18221_v27 }
0x1851   :  { %v9383_v3 = vsel %vm9382_vm4, %v9378_v37, inf  ;;  %v9178_v30 = vshll.u32 %v9177_v39, 16  ;;  %v9555_v27 = vcvt.f32.s32 %v18231_v22  ;;  %v9331_v22 = vcvt.f32.s32 %v18241_v45 }
0x1852   :  { %9384 = vmin.xlane.f32.xlu0 %v9383_v3  ;;  %v9583_v45 = vcvt.f32.s32 %v18251_v62  ;;  %v18763_v62 = vld [vmem:[#allocation32_spill] sm:$0xff] }
0x18a1   :  { %v9399_v36 = vpop.xlane.xlu1 %9398 }
0x18a2   :  { %v9400_v6 = vcvt.f32.s32 %v9399_v36 }
0x18a3   :  { %v9413_v54 = vpop.xlane.xlu0 %9412 }
0x18a4   :  { %v9403_v1 = vadd.s32 %v9402_v32, %v9400_v6  ;;  %v9414_v37 = vcvt.f32.s32 %v9413_v54  ;;  %v9430_v32 = vshll.u32 %v9429_v35, 16  ;;  %v9205_v6 = vcvt.f32.s32 %v18154_v52 }
0x18a5   :  { %v9175_v3 = vpop.xlane.xlu1 %9174  ;;  %v9457_v35 = vcvt.f32.s32 %v18164_v28  ;;  %v9233_v28 = vcvt.f32.s32 %v18174_v56  ;;  %v9485_v56 = vcvt.f32.s32 %v18184_v15  ;;  %v9261_v15 = vcvt.f32.s32 %v18194_v11 }
0x18a6   :  { %v9417_v9 = vadd.s32 %v9416_v10, %v9414_v37  ;;  %v9176_v59 = vcvt.f32.s32 %v9175_v3  ;;  %vm9630_vm6 = vcmp.eq.s32.totalorder %v18760_v42, %v9403_v1  ;;  %v18762_v1 = vld [vmem:[#allocation54_spill] sm:$0xff]  ;;  %v9206_v52 = vshll.u32 %v9205_v6, 16 }
0x18a7   :  { %v9189_v5 = vpop.xlane.xlu0 %9188  ;;  %v9220_v3 = vshll.u32 %v9219_v2, 16  ;;  %v9248_v2 = vshll.u32 %v9247_v33, 16  ;;  %v9513_v11 = vcvt.f32.s32 %v18206_v48  ;;  %v9289_v48 = vcvt.f32.s32 %v18216_v13 }
0x18a8   :  { %vm9631_vm7 = vcmp.eq.s32.totalorder %v18761_v49, %v9417_v9  ;;  %v9179_v36 = vadd.s32 %v9178_v30, %v9176_v59  ;;  %v9190_v12 = vcvt.f32.s32 %v9189_v5  ;;  %v9458_v49 = vshll.u32 %v9457_v35, 16 }
0x18a9   :  { %vm10205_vm8 = vmpackc.low %vm9631_vm7, %vm9630_vm6  ;;  %v9427_v25 = vpop.xlane.xlu1 %9426  ;;  %v9290_v33 = vshll.u32 %v9289_v48, 16  ;;  %v9541_v13 = vcvt.f32.s32 %v18226_v63  ;;  %v9317_v63 = vcvt.f32.s32 %v18236_v14  ;;  %v9569_v14 = vcvt.f32.s32 %v18246_v34  ;;  %v18769_v48 = vld [vmem:[#allocation63_spill] sm:$0xff] }
0x18aa   :  { %v9193_v39 = vadd.s32 %v9192_v40, %v9190_v12  ;;  %v9428_v54 = vcvt.f32.s32 %v9427_v25  ;;  %11538 = vmatpush3.bf16.xpose.msk.msra.mxu1 %vm10205_vm8, %v12454_v17  ;;  %vm9614_vm9 = vcmp.eq.s32.totalorder %v18762_v1, %v9179_v36  ;;  %v9472_v25 = vshll.u32 %v9471_v18, 16 }
0x18ab   :  { %v9441_v10 = vpop.xlane.xlu0 %9440  ;;  %11539 = vmatprep.subr.bf16.mxu1 %v18759_v7  ;;  %v9345_v34 = vcvt.f32.s32 %v18256_v0  ;;  %v18766_v0 = vld [vmem:[#allocation33_spill] sm:$0xff] }
0x18ac   :  { %vm9615_vm10 = vcmp.eq.s32.totalorder %v17859_v16, %v9193_v39  ;;  %v9431_v5 = vadd.s32 %v9430_v32, %v9428_v54  ;;  %v9442_v59 = vcvt.f32.s32 %v9441_v10  ;;  %v9234_v39 = vshll.u32 %v9233_v28, 16 }
0x18ad   :  { %vm10189_vm11 = vmpackc.low %vm9615_vm10, %vm9614_vm9  ;;  %v9203_v9 = vpop.xlane.xlu1 %9202 }
0x18ae   :  { %v9445_v30 = vadd.s32 %v9444_v51, %v9442_v59  ;;  %v9204_v37 = vcvt.f32.s32 %v9203_v9  ;;  %11518 = vmatpush3.bf16.xpose.msk.msra.mxu0 %vm10189_vm11, %v12454_v17  ;;  %vm9632_vm12 = vcmp.eq.s32.totalorder %v17867_v38, %v9431_v5  ;;  %v9486_v5 = vshll.u32 %v9485_v56, 16 }
0x18af   :  { %v9217_v40 = vpop.xlane.xlu0 %9216  ;;  %11519 = vmatprep.subr.bf16.mxu0 %v18759_v7  ;;  %v9542_v56 = vshll.u32 %v9541_v13, 16  ;;  %v18771_v13 = vld [vmem:[#allocation36_spill] sm:$0xff] }
0x18b0   :  { %vm9633_vm13 = vcmp.eq.s32.totalorder %v17875_v26, %v9445_v30  ;;  %v9207_v16 = vadd.s32 %v9206_v52, %v9204_v37  ;;  %v9218_v46 = vcvt.f32.s32 %v9217_v40  ;;  %v9500_v52 = vshll.u32 %v9499_v50, 16 }
0x18b1   :  { %vm10207_vm14 = vmpackc.low %vm9633_vm13, %vm9632_vm12  ;;  %v9455_v42 = vpop.xlane.xlu1 %9454  ;;  %v9262_v37 = vshll.u32 %v9261_v15, 16  ;;  %v9276_v40 = vshll.u32 %v9275_v21, 16 }
0x18b2   :  { %v9221_v36 = vadd.s32 %v9220_v3, %v9218_v46  ;;  %v9456_v12 = vcvt.f32.s32 %v9455_v42  ;;  %11540 = vmatpush3.bf16.xpose.msk.msra.mxu1 %vm10207_vm14, %v12454_v17  ;;  %vm9616_vm15 = vcmp.eq.s32.totalorder %v17885_v44, %v9207_v16  ;;  %v9514_v42 = vshll.u32 %v9513_v11, 16 }
0x18b3   :  { %v9469_v32 = vpop.xlane.xlu0 %9468  ;;  %11541 = vmatprep.subr.bf16.mxu1 %v18759_v7 }
0x18b4   :  { %vm9617_vm0 = vcmp.eq.s32.totalorder %v17895_v24, %v9221_v36  ;;  %v9459_v38 = vadd.s32 %v9458_v49, %v9456_v12  ;;  %v9470_v26 = vcvt.f32.s32 %v9469_v32  ;;  %v9528_v36 = vshll.u32 %v9527_v4, 16 }
0x18b5   :  { %vm10191_vm1 = vmpackc.low %vm9617_vm0, %vm9616_vm15  ;;  %v9231_v6 = vpop.xlane.xlu1 %9230 }
0x18b6   :  { %v9473_v54 = vadd.s32 %v9472_v25, %v9470_v26  ;;  %v9232_v51 = vcvt.f32.s32 %v9231_v6  ;;  %11520 = vmatpush3.bf16.xpose.msk.msra.mxu0 %vm10191_vm1, %v12454_v17  ;;  %vm9634_vm2 = vcmp.eq.s32.totalorder %v17903_v57, %v9459_v38  ;;  %v9304_v26 = vshll.u32 %v9303_v19, 16 }
0x18b7   :  { %v9245_v10 = vpop.xlane.xlu0 %9244  ;;  %11521 = vmatprep.subr.bf16.mxu0 %v18759_v7 }
0x18b8   :  { %vm9635_vm3 = vcmp.eq.s32.totalorder %v17911_v60, %v9473_v54  ;;  %v9235_v44 = vadd.s32 %v9234_v39, %v9232_v51  ;;  %v9246_v24 = vcvt.f32.s32 %v9245_v10 }
0x18b9   :  { %vm10209_vm4 = vmpackc.low %vm9635_vm3, %vm9634_vm2  ;;  %v9483_v1 = vpop.xlane.xlu1 %9482 }
0x18ba   :  { %v9249_v59 = vadd.s32 %v9248_v2, %v9246_v24  ;;  %v9484_v9 = vcvt.f32.s32 %v9483_v1  ;;  %11542 = vmatpush3.bf16.xpose.msk.msra.mxu1 %vm10209_vm4, %v12454_v17  ;;  %vm9618_vm5 = vcmp.eq.s32.totalorder %v17921_v53, %v9235_v44  ;;  %v9556_v2 = vshll.u32 %v9555_v27, 16  ;;  %v18773_v27 = vld [vmem:[#allocation71_spill] sm:$0xff] }
0x18bb   :  { %v9497_v35 = vpop.xlane.xlu0 %9496  ;;  %11543 = vmatprep.subr.bf16.mxu1 %v18759_v7  ;;  %v9318_v44 = vshll.u32 %v9317_v63, 16 }
0x18bc   :  { %vm9619_vm6 = vcmp.eq.s32.totalorder %v17931_v58, %v9249_v59  ;;  %v9487_v57 = vadd.s32 %v9486_v5, %v9484_v9  ;;  %v9498_v60 = vcvt.f32.s32 %v9497_v35  ;;  %v9332_v5 = vshll.u32 %v9331_v22, 16  ;;  %v18775_v22 = vld [vmem:[#allocation72_spill] sm:$0xff] }
0x18bd   :  { %vm10193_vm7 = vmpackc.low %vm9619_vm6, %vm9618_vm5  ;;  %v9259_v30 = vpop.xlane.xlu1 %9258  ;;  %v9570_v9 = vshll.u32 %v9569_v14, 16  ;;  %v9584_v35 = vshll.u32 %v9583_v45, 16  ;;  %v18777_v14 = vld [vmem:[#allocation30_spill] sm:$0xff] }
0x18be   :  { %v9501_v3 = vadd.s32 %v9500_v52, %v9498_v60  ;;  %v9260_v18 = vcvt.f32.s32 %v9259_v30  ;;  %11522 = vmatpush3.bf16.xpose.msk.msra.mxu0 %vm10193_vm7, %v12454_v17  ;;  %vm9636_vm8 = vcmp.eq.s32.totalorder %v17939_v43, %v9487_v57  ;;  %v9359_v57 = vcvt.f32.s32 %v18763_v62 }
0x18bf   :  { %v9273_v16 = vpop.xlane.xlu0 %9272  ;;  %11523 = vmatprep.subr.bf16.mxu0 %v18759_v7 }
0x18c0   :  { %vm9637_vm9 = vcmp.eq.s32.totalorder %v17947_v31, %v9501_v3  ;;  %v9263_v53 = vadd.s32 %v9262_v37, %v9260_v18  ;;  %v9274_v58 = vcvt.f32.s32 %v9273_v16  ;;  %v9346_v3 = vshll.u32 %v9345_v34, 16 }
0x18c1   :  { %vm10211_vm10 = vmpackc.low %vm9637_vm9, %vm9636_vm8  ;;  %v9511_v46 = vpop.xlane.xlu1 %9510  ;;  %v9597_v18 = vcvt.f32.s32 %v18766_v0  ;;  %v9360_v16 = vshll.u32 %v9359_v57, 16 }
0x18c2   :  { %v9277_v49 = vadd.s32 %v9276_v40, %v9274_v58  ;;  %v9512_v28 = vcvt.f32.s32 %v9511_v46  ;;  %11544 = vmatpush3.bf16.xpose.msk.msra.mxu1 %vm10211_vm10, %v12454_v17  ;;  %vm9620_vm11 = vcmp.eq.s32.totalorder %v17957_v29, %v9263_v53  ;;  %v18767_v53 = vld [vmem:[#allocation31_spill] sm:$0xff] }
0x18c3   :  { %v9525_v12 = vpop.xlane.xlu0 %9524  ;;  %11545 = vmatprep.subr.bf16.mxu1 %v18759_v7  ;;  %v9611_v58 = vcvt.f32.s32 %v18767_v53  ;;  %v9598_v19 = vshll.u32 %v9597_v18, 16 }
0x18c4   :  { %vm9621_vm12 = vcmp.eq.s32.totalorder %v17967_v55, %v9277_v49  ;;  %v9515_v43 = vadd.s32 %v9514_v42, %v9512_v28  ;;  %v9526_v31 = vcvt.f32.s32 %v9525_v12  ;;  %v18768_v42 = vld [vmem:[#allocation67_spill] sm:$0xff]  ;;  %v18770_v12 = vld [vmem:[#allocation38_spill] sm:$0xff] }
0x18c5   :  { %vm10195_vm13 = vmpackc.low %vm9621_vm12, %vm9620_vm11  ;;  %v9287_v25 = vpop.xlane.xlu1 %9286 }
0x18c6   :  { %v9529_v32 = vadd.s32 %v9528_v36, %v9526_v31  ;;  %v9288_v38 = vcvt.f32.s32 %v9287_v25  ;;  %11524 = vmatpush3.bf16.xpose.msk.msra.mxu0 %vm10195_vm13, %v12454_v17  ;;  %vm9638_vm14 = vcmp.eq.s32.totalorder %v17975_v20, %v9515_v43  ;;  %v9373_v43 = vcvt.f32.s32 %v18770_v12 }
0x18c7   :  { %v9301_v6 = vpop.xlane.xlu0 %9300  ;;  %11525 = vmatprep.subr.bf16.mxu0 %v18759_v7 }
0x18c8   :  { %vm9639_vm15 = vcmp.eq.s32.totalorder %v17983_v61, %v9529_v32  ;;  %v9291_v29 = vadd.s32 %v9290_v33, %v9288_v38  ;;  %v9302_v55 = vcvt.f32.s32 %v9301_v6  ;;  %v9612_v33 = vshll.u32 %v9611_v58, 16 }
0x18c9   :  { %vm10213_vm0 = vmpackc.low %vm9639_vm15, %vm9638_vm14  ;;  %v9539_v39 = vpop.xlane.xlu1 %9538  ;;  %v9387_v32 = vcvt.f32.s32 %v18771_v13 }
0x18ca   :  { %v9305_v54 = vadd.s32 %v9304_v26, %v9302_v55  ;;  %v9540_v51 = vcvt.f32.s32 %v9539_v39  ;;  %11546 = vmatpush3.bf16.xpose.msk.msra.mxu1 %vm10213_vm0, %v12454_v17  ;;  %vm9622_vm1 = vcmp.eq.s32.totalorder %v17993_v8, %v9291_v29  ;;  %v18772_v26 = vld [vmem:[#allocation65_spill] sm:$0xff]  ;;  %v9374_v39 = vshll.u32 %v9373_v43, 16 }
0x18cb   :  { %v9553_v50 = vpop.xlane.xlu0 %9552  ;;  %11547 = vmatprep.subr.bf16.mxu1 %v18759_v7 }
0x18cc   :  { %vm9623_vm2 = vcmp.eq.s32.totalorder %v18003_v23, %v9305_v54  ;;  %v9543_v20 = vadd.s32 %v9542_v56, %v9540_v51  ;;  %v9554_v61 = vcvt.f32.s32 %v9553_v50  ;;  %v9388_v54 = vshll.u32 %v9387_v32, 16 }
0x18cd   :  { %vm10197_vm3 = vmpackc.low %vm9623_vm2, %vm9622_vm1  ;;  %v9315_v10 = vpop.xlane.xlu1 %9314 }
0x18ce   :  { %v9557_v24 = vadd.s32 %v9556_v2, %v9554_v61  ;;  %v9316_v1 = vcvt.f32.s32 %v9315_v10  ;;  %11526 = vmatpush3.bf16.xpose.msk.msra.mxu0 %vm10197_vm3, %v12454_v17  ;;  %vm9640_vm4 = vcmp.eq.s32.totalorder %v18011_v47, %v9543_v20  ;;  %v18764_v47 = vld [vmem:[#allocation56_spill] sm:$0xff]  ;;  %v18774_v2 = vld [vmem:[#allocation70_spill] sm:$0xff]  ;;  %v18776_v61 = vld [vmem:[#allocation55_spill] sm:$0xff] }
0x18cf   :  { %v9329_v15 = vpop.xlane.xlu0 %9328  ;;  %11527 = vmatprep.subr.bf16.mxu0 %v18759_v7  ;;  %v9710_v10 = vcvt.s32.f32 %v18776_v61 }
0x18d0   :  { %vm9641_vm5 = vcmp.eq.s32.totalorder %v18019_v41, %v9557_v24  ;;  %v9319_v8 = vadd.s32 %v9318_v44, %v9316_v1  ;;  %v9330_v23 = vcvt.f32.s32 %v9329_v15  ;;  %v18765_v41 = vld [vmem:[#allocation64_spill] sm:$0xff]  ;;  %v18778_v24 = vld [vmem:[#allocation29_spill] sm:$0xff] }
0x18d1   :  { %vm10215_vm6 = vmpackc.low %vm9641_vm5, %vm9640_vm4  ;;  %v9567_v59 = vpop.xlane.xlu1 %9566  ;;  %v9711_v1 = vpack.c.bf16 %v9710_v10, %v9710_v10 }
0x18d2   :  { %v9333_v52 = vadd.s32 %v9332_v5, %v9330_v23  ;;  %v9568_v21 = vcvt.f32.s32 %v9567_v59  ;;  %11548 = vmatpush3.bf16.xpose.msk.msra.mxu1 %vm10215_vm6, %v12454_v17  ;;  %vm9624_vm7 = vcmp.eq.s32.totalorder %v18764_v47, %v9319_v8  ;;  %vm9811_vm6 = vcmask 1040384  }
0x18d3   :  { %v9581_v60 = vpop.xlane.xlu0 %9580  ;;  %11549 = vmatprep.subr.bf16.mxu1 %v18759_v7 }
0x18d4   :  { %vm9625_vm8 = vcmp.eq.s32.totalorder %v18765_v41, %v9333_v52  ;;  %v9571_v30 = vadd.s32 %v9570_v9, %v9568_v21  ;;  %v9582_v37 = vcvt.f32.s32 %v9581_v60 }
0x18d5   :  { %vm10199_vm9 = vmpackc.low %vm9625_vm8, %vm9624_vm7  ;;  %v9343_v11 = vpop.xlane.xlu1 %9342 }
0x18d6   :  { %v9585_v40 = vadd.s32 %v9584_v35, %v9582_v37  ;;  %v9344_v4 = vcvt.f32.s32 %v9343_v11  ;;  %11528 = vmatpush3.bf16.xpose.msk.msra.mxu0 %vm10199_vm9, %v12454_v17  ;;  %vm9642_vm10 = vcmp.eq.s32.totalorder %v18768_v42, %v9571_v30 }
0x18d7   :  { %v9357_v46 = vpop.xlane.xlu0 %9356  ;;  %11529 = vmatprep.subr.bf16.mxu0 %v18759_v7 }
0x18d8   :  { %vm9643_vm11 = vcmp.eq.s32.totalorder %v18769_v48, %v9585_v40  ;;  %v9347_v49 = vadd.s32 %v9346_v3, %v9344_v4  ;;  %v9358_v28 = vcvt.f32.s32 %v9357_v46 }
0x18d9   :  { %vm10217_vm12 = vmpackc.low %vm9643_vm11, %vm9642_vm10  ;;  %v9595_v36 = vpop.xlane.xlu1 %9594 }
0x18da   :  { %v9361_v31 = vadd.s32 %v9360_v16, %v9358_v28  ;;  %v9596_v25 = vcvt.f32.s32 %v9595_v36  ;;  %11550 = vmatpush3.bf16.xpose.msk.msra.mxu1 %vm10217_vm12, %v12454_v17  ;;  %vm9626_vm13 = vcmp.eq.s32.totalorder %v18772_v26, %v9347_v49 }
0x18db   :  { %v9609_v38 = vpop.xlane.xlu0 %9608  ;;  %11551 = vmatprep.subr.bf16.mxu1 %v18759_v7 }
0x18dc   :  { %vm9627_vm14 = vcmp.eq.s32.totalorder %v18773_v27, %v9361_v31  ;;  %v9599_v6 = vadd.s32 %v9598_v19, %v9596_v25  ;;  %v9610_v29 = vcvt.f32.s32 %v9609_v38 }
0x18dd   :  { %vm10201_vm15 = vmpackc.low %vm9627_vm14, %vm9626_vm13  ;;  %v9371_v55 = vpop.xlane.xlu1 %9370 }
0x18de   :  { %v9613_v56 = vadd.s32 %v9612_v33, %v9610_v29  ;;  %v9372_v63 = vcvt.f32.s32 %v9371_v55  ;;  %11530 = vmatpush3.bf16.xpose.msk.msra.mxu0 %vm10201_vm15, %v12454_v17  ;;  %vm9644_vm0 = vcmp.eq.s32.totalorder %v18774_v2, %v9599_v6 }
0x18df   :  { %v9385_v51 = vpop.xlane.xlu0 %9384  ;;  %11531 = vmatprep.subr.bf16.mxu0 %v18759_v7 }
0x18e0   :  { %vm9645_vm1 = vcmp.eq.s32.totalorder %v18775_v22, %v9613_v56  ;;  %v9375_v50 = vadd.s32 %v9374_v39, %v9372_v63  ;;  %v9386_v20 = vcvt.f32.s32 %v9385_v51 }
0x18e1   :  { %vm10219_vm2 = vmpackc.low %vm9645_vm1, %vm9644_vm0 }
0x18e2   :  { %v9389_v44 = vadd.s32 %v9388_v54, %v9386_v20  ;;  %11552 = vmatpush3.bf16.xpose.msk.msra.mxu1 %vm10219_vm2, %v12454_v17  ;;  %vm9628_vm3 = vcmp.eq.s32.totalorder %v18777_v14, %v9375_v50 }
0x18e4   :  { %vm9629_vm4 = vcmp.eq.s32.totalorder %v18778_v24, %v9389_v44 }
0x18e5   :  { %vm10203_vm5 = vmpackc.low %vm9629_vm4, %vm9628_vm3 }
0x18e6   :  { %11532 = vmatpush3.bf16.xpose.msk.msra.mxu0 %vm10203_vm5, %v12454_v17 }
0x18e9   :  { %11554 = vmatmul.mubr.bf16.vlgmr.msra.gmra.mrb[32].mxu1 %v9711_v1 }
0x18ed   :  { %11534 = vmatmul.mubr.bf16.vlgmr.msra.gmra.mrb[32].mxu0 %v9711_v1 }
0x19bc   :  { %v9802_v7 = vpop.f32.mrb[32].mxu1 }
0x19bd   :  { %v9809_v5 = vrot.slane %v9802_v7, 7  ;;  %v11555_v45 = vpop.f32.mrb[33].mxu1 }
0x19be   :  { %v9805_v15 = vpop.f32.mrb[34].mxu1 }
0x19bf   :  { %v11556_v8 = vpop.f32.mrb[35].mxu1 }
0x19c0   :  { %v9754_v23 = vpop.f32.mrb[32].mxu0 }
0x19c1   :  { %v9812_v59 = vsel %vm9811_vm6, %v9754_v23, %v9809_v5  ;;  %v11535_v9 = vpop.f32.mrb[33].mxu0 }
0x19c2   :  { %v11655_v34 = vtrunc.f32 %v9812_v59  ;;  %v9757_v52 = vpop.f32.mrb[34].mxu0 }
0x19c3   :  { %v11536_v21 = vpop.f32.mrb[35].mxu0 }
0x19c4   :  { %v11656_v35 = vcvt.f32.s32 %v11655_v34 }
0x19c6   :  { %9814 = vst [vmem:[#allocation2] sm:$0x3] %v11656_v35 }
0x19c7   :  { %12437 = shalt.err (!%p12434_p4)
}
0x19c8   :  { %s12438_s18 = scalar_lea.hbm %s18396_s4, 32 }
0x19c9   :  { %p12439_p5 = scmp.ne.s32.totalorder %s18396_s4, %s12438_s18  ;;  %p12442_p6 = scmp.lt.u32.totalorder %s12438_s18, %s18396_s4 }
0x19cb   :  { %p12444_p7 = pnand %p12442_p6, %p12439_p5 }
0x19cd   :  { %12447 = shalt.err (!%p12444_p7)
}
0x19ce   :  { %9826 = dma.vmem_to_hbm [thread:$0]  %s9824_s14, 32, %s18396_s4, [#allocation3]  }
0x19cf   :  { %12448 = dma.done.wait [#allocation3], 32  }
0x19d0   :  { %12449 = vsyncadd [#allocation3], 4294967264 }
0x19d1   :  { %9832 = vsyncpa [#allocation3], 1 }

</bundles_post_ra>
